<compile_context>
chip_gen: v5e
topology: v5e:2x2
jax: 0.10.0
libtpu: 0.0.40
codegen_flags: <defaults>
</compile_context>

<pallas_src>
import functools

import jax
import jax.numpy as jnp
from jax.experimental import pallas as pl
from jax.experimental.pallas import tpu as pltpu

EPS = 1e-5            # nn.InstanceNorm3d default eps
NEG_SLOPE = 0.1       # MONAI BasicUNet default LeakyReLU slope
_VMEM_LIMIT = 48 * 1024 * 1024   # scoped VMEM limit; tiles are sized well below this


# ----------------------------------------------------------------------------
# small static helpers
# ----------------------------------------------------------------------------
def _round_up(x, m):
    return -(-x // m) * m


def _pad_to(a, axis, size):
    pad = size - a.shape[axis]
    if pad <= 0:
        return a
    width = [(0, 0)] * a.ndim
    width[axis] = (0, pad)
    return jnp.pad(a, width)


def _row_tile(m, target=4096):
    """Largest row tile <= target that is a multiple of 8 and divides m (else m)."""
    if m <= target:
        return m
    t = (target // 8) * 8
    while t >= 8:
        if m % t == 0:
            return t
        t -= 8
    return m


def _pick_d_tile(D, H, W, co, d_tile=None):
    """Depth-tile so each grid step handles ~512-2048 output rows and the f32
    accumulator + double-buffered output tile stay far below v7x's 64 MiB VMEM."""
    if d_tile is None:
        rows_target = 2048
        vmem_target = 16 * 1024 * 1024
        by_rows = max(1, rows_target // max(H * W, 1))
        by_vmem = max(1, vmem_target // max(H * W * co * 4 * 3, 1))
        d_tile = min(D, by_rows, by_vmem)
    d_tile = max(1, min(int(d_tile), D))
    while D % d_tile:
        d_tile -= 1
    return d_tile


# ----------------------------------------------------------------------------
# Pallas kernels
# ----------------------------------------------------------------------------
def _deconv_rows_kernel(x_ref, w_ref, b_ref, o_ref):
    # ConvTranspose3d(k=2, s=2) as a row matmul: (rows, Cin) @ (Cin, 8*Cup) + bias.
    y = jnp.dot(x_ref[...], w_ref[...], preferred_element_type=jnp.float32)
    o_ref[...] = (y + b_ref[...]).astype(o_ref.dtype)


def _conv3d_moments_kernel(x_ref, w_ref, b_ref, y_ref, m_ref, *, d_tile, H, W):
    """3x3x3 conv (+bias) for one (batch, depth-tile).

    The conv is 27 shifted bf16 matmuls accumulated in f32 (no im2col, no HBM
    expansion); the weight block (27, Ci, Co) stays resident across the grid.
    Also emits per-tile per-channel sum / sum-of-squares for the two-pass
    InstanceNorm (reduced across tiles in JAX)."""
    ci = x_ref.shape[-1]
    co = w_ref.shape[-1]
    rows = d_tile * H * W
    d0 = pl.program_id(1) * d_tile               # first output depth of this tile

    acc = jnp.zeros((rows, co), jnp.float32)
    for kd in range(3):
        # depth-shifted slab read from the per-batch padded block resident in VMEM
        xd = x_ref[0, pl.ds(d0 + kd, d_tile), :, :, :]        # (d_tile, H+2, W+2, ci)
        for kh in range(3):
            for kw in range(3):
                xs = xd[:, kh:kh + H, kw:kw + W, :].reshape(rows, ci)
                acc = acc + jnp.dot(xs, w_ref[kd * 9 + kh * 3 + kw],
                                    preferred_element_type=jnp.float32)
    acc = acc + b_ref[...]                                     # (1, co) broadcast

    y_ref[...] = acc.reshape(1, d_tile, H * W, co)             # lane-dense (co = 128k)
    m_ref[...] = jnp.stack(
        [jnp.sum(acc, axis=0), jnp.sum(acc * acc, axis=0)], axis=0)[None, None]


def _norm_act_kernel(y_ref, s_ref, t_ref, p_ref, o_ref):
    # Fused InstanceNorm apply (scale/shift pre-folded in JAX) + LeakyReLU + temb add.
    # All elementwise math in f32 (no bf16 VPU on v5e); cast only at the store.
    z = y_ref[...] * s_ref[...] + t_ref[...]
    z = jnp.where(z > 0, z, NEG_SLOPE * z)
    z = z + p_ref[...]
    o_ref[...] = z.astype(o_ref.dtype)


# ----------------------------------------------------------------------------
# pallas_call wrappers
# ----------------------------------------------------------------------------
def deconv_rows(x_rows, w, b):
    M, Cin = x_rows.shape
    Cout = w.shape[1]
    tr = _row_tile(M)
    return pl.pallas_call(
        _deconv_rows_kernel,
        grid=(M // tr,),
        in_specs=[
            pl.BlockSpec((tr, Cin), lambda i: (i, 0)),
            pl.BlockSpec((Cin, Cout), lambda i: (0, 0)),
            pl.BlockSpec((1, Cout), lambda i: (0, 0)),
        ],
        out_specs=pl.BlockSpec((tr, Cout), lambda i: (i, 0)),
        out_shape=jax.ShapeDtypeStruct((M, Cout), jnp.bfloat16),
        compiler_params=pltpu.CompilerParams(
            dimension_semantics=("parallel",),
            vmem_limit_bytes=_VMEM_LIMIT,
        ),
    )(x_rows, w, b.reshape(1, Cout))


def conv3d_moments(x_pad, w, b, d_tile):
    # x_pad: (N, D+2, H+2, W+2, Ci) bf16, w: (27, Ci, Co) bf16, b: (Co,) f32
    N, Dp, Hp, Wp, Ci = x_pad.shape
    D, H, W = Dp - 2, Hp - 2, Wp - 2
    Co = w.shape[-1]
    n_dt = D // d_tile
    kernel = functools.partial(_conv3d_moments_kernel, d_tile=d_tile, H=H, W=W)
    return pl.pallas_call(
        kernel,
        grid=(N, n_dt),
        in_specs=[
            # Full padded image per batch; constant index along the depth-tile axis so
            # the block is DMA'd once per batch and reused across tiles.
            pl.BlockSpec((1, Dp, Hp, Wp, Ci), lambda n, t: (n, 0, 0, 0, 0)),
            pl.BlockSpec((27, Ci, Co), lambda n, t: (0, 0, 0)),
            pl.BlockSpec((1, Co), lambda n, t: (0, 0)),
        ],
        out_specs=[
            pl.BlockSpec((1, d_tile, H * W, Co), lambda n, t: (n, t, 0, 0)),
            pl.BlockSpec((1, 1, 2, Co), lambda n, t: (n, t, 0, 0)),
        ],
        out_shape=[
            jax.ShapeDtypeStruct((N, D, H * W, Co), jnp.float32),
            jax.ShapeDtypeStruct((N, n_dt, 2, Co), jnp.float32),
        ],
        compiler_params=pltpu.CompilerParams(
            # Batch axis parallel (v7x megacore); depth tiles sequential per batch so
            # the resident input block is fetched once per batch.
            dimension_semantics=("parallel", "arbitrary"),
            vmem_limit_bytes=_VMEM_LIMIT,
        ),
    )(x_pad, w, b.reshape(1, Co))


def norm_act(y, scale, shift, tp, d_tile, out_dtype):
    N, D, HW, Co = y.shape
    n_dt = D // d_tile
    vec = lambda a: a.reshape(N, 1, Co)
    bspec_vec = pl.BlockSpec((1, 1, Co), lambda n, t: (n, 0, 0))
    bspec_y = pl.BlockSpec((1, d_tile, HW, Co), lambda n, t: (n, t, 0, 0))
    return pl.pallas_call(
        _norm_act_kernel,
        grid=(N, n_dt),
        in_specs=[bspec_y, bspec_vec, bspec_vec, bspec_vec],
        out_specs=bspec_y,
        out_shape=jax.ShapeDtypeStruct((N, D, HW, Co), out_dtype),
        compiler_params=pltpu.CompilerParams(
            dimension_semantics=("parallel", "parallel"),
            vmem_limit_bytes=_VMEM_LIMIT,
        ),
    )(y, vec(scale), vec(shift), vec(tp))


# ----------------------------------------------------------------------------
# pure-JAX references for the three kernels (correctness cross-check)
# ----------------------------------------------------------------------------
def deconv_rows_ref(x_rows, w, b):
    y = jnp.dot(x_rows.astype(jnp.float32), w.astype(jnp.float32)) + b.reshape(1, -1)
    return y.astype(jnp.bfloat16)


def conv3d_moments_ref(x_pad, w, b, d_tile):
    N, Dp, Hp, Wp, _ = x_pad.shape
    D, H, W = Dp - 2, Hp - 2, Wp - 2
    Co = w.shape[-1]
    xf = x_pad.astype(jnp.float32)
    wf = w.astype(jnp.float32)
    acc = jnp.zeros((N, D, H, W, Co), jnp.float32)
    for kd in range(3):
        for kh in range(3):
            for kw in range(3):
                xs = xf[:, kd:kd + D, kh:kh + H, kw:kw + W, :]
                acc = acc + jnp.einsum("ndhwc,co->ndhwo", xs, wf[kd * 9 + kh * 3 + kw])
    acc = acc + b
    y = acc.reshape(N, D, H * W, Co)
    a = acc.reshape(N, D // d_tile, d_tile * H * W, Co)
    mom = jnp.stack([jnp.sum(a, axis=2), jnp.sum(a * a, axis=2)], axis=2)
    return y, mom


def norm_act_ref(y, scale, shift, tp, d_tile, out_dtype):
    del d_tile
    z = y * scale[:, None, None, :] + shift[:, None, None, :]
    z = jnp.where(z > 0, z, NEG_SLOPE * z)
    z = z + tp[:, None, None, :]
    return z.astype(out_dtype)


# ----------------------------------------------------------------------------
# glue: conv block (two-pass InstanceNorm), parameter setup, full forward
# ----------------------------------------------------------------------------
def _conv_norm_act(conv_fn, nact_fn, x, w, b, gamma, beta, tp, d_tile, out_dtype):
    """Conv3d(3, pad=1) + bias -> InstanceNorm(affine) -> LeakyReLU [-> +temb]."""
    N, D, H, W, _ = x.shape
    xp = jnp.pad(x, ((0, 0), (1, 1), (1, 1), (1, 1), (0, 0)))   # zero pad for 3x3x3
    y_raw, mom = conv_fn(xp, w, b, d_tile)                      # (N,D,H*W,Co), (N,T,2,Co)
    cnt = float(D * H * W)
    mean = jnp.sum(mom[:, :, 0, :], axis=1) / cnt               # (N, Co)
    # E[x^2]-E[x]^2 in f32, clamped at 0 (cancellation guard for large S).
    var = jnp.maximum(jnp.sum(mom[:, :, 1, :], axis=1) / cnt - mean * mean, 0.0)
    scale = gamma * jax.lax.rsqrt(var + EPS)                    # fold affine into scale
    shift = beta - mean * scale
    h = nact_fn(y_raw, scale, shift, tp, d_tile, out_dtype)
    return h.reshape(N, D, H, W, -1)


def init_params(key, in_chns, cat_chns, out_chns):
    """Deterministic synthetic parameters in PyTorch layouts, converted to padded,
    matmul-ready layouts for the Pallas kernels (bf16 weights, f32 bias/affine)."""
    up_chns = in_chns // 2                       # halves=True, deconv mode
    cup = _round_up(up_chns, 16)                 # 8*cup is a multiple of 128 lanes
    co = _round_up(out_chns, 128)                # lane-dense conv output channels
    cin0 = cat_chns + cup
    ks = jax.random.split(key, 12)
    nrm = lambda k, shape, s: s * jax.random.normal(k, shape, jnp.float32)

    # UpSample("deconv"): ConvTranspose3d(in_chns, up_chns, kernel=2, stride=2)
    up_w = nrm(ks[0], (in_chns, up_chns, 2, 2, 2), 0.2)
    up_b = nrm(ks[1], (up_chns,), 0.05)
    # TwoConv.conv_0 / conv_1: Conv3d(.,.,3,pad=1) + InstanceNorm(affine) + LeakyReLU
    w0 = nrm(ks[2], (out_chns, cat_chns + up_chns, 3, 3, 3), 0.1)
    b0 = nrm(ks[3], (out_chns,), 0.05)
    g0 = 1.0 + nrm(ks[4], (out_chns,), 0.05)
    be0 = nrm(ks[5], (out_chns,), 0.05)
    w1 = nrm(ks[6], (out_chns, out_chns, 3, 3, 3), 0.1)
    b1 = nrm(ks[7], (out_chns,), 0.05)
    g1 = 1.0 + nrm(ks[8], (out_chns,), 0.05)
    be1 = nrm(ks[9], (out_chns,), 0.05)
    # TwoConv.temb_proj: Linear(512, out_chns)
    tw = nrm(ks[10], (out_chns, 512), 0.05)
    tb = nrm(ks[11], (out_chns,), 0.05)

    # deconv: (Cin, Cup, 2,2,2) -> (Cin, 8*cup), columns ordered (kd, kh, kw, cup_pad)
    up_wm = _pad_to(jnp.transpose(up_w, (0, 2, 3, 4, 1)), 4, cup).reshape(in_chns, 8 * cup)
    up_brow = jnp.tile(_pad_to(up_b, 0, cup), 8)

    # conv weights: (Co, Ci, 3,3,3) -> (27, Ci_pad, Co_pad), taps ordered (kd, kh, kw).
    # Zero rows/columns for padded channels keep the pad lanes exactly zero end-to-end
    # (together with zero-padded gamma/beta/bias/temb below).
    def conv_w(w, ci_pad):
        w = jnp.transpose(w, (2, 3, 4, 1, 0))                  # (3,3,3, ci, co)
        w = _pad_to(_pad_to(w, 3, ci_pad), 4, co)
        return w.reshape(27, ci_pad, co).astype(jnp.bfloat16)

    return {
        "up_wm": up_wm.astype(jnp.bfloat16), "up_b": up_brow,
        "w0": conv_w(w0, cin0), "b0": _pad_to(b0, 0, co),
        "g0": _pad_to(g0, 0, co), "be0": _pad_to(be0, 0, co),
        "w1": conv_w(w1, co), "b1": _pad_to(b1, 0, co),
        "g1": _pad_to(g1, 0, co), "be1": _pad_to(be1, 0, co),
        "tw": _pad_to(tw.T, 1, co), "tb": _pad_to(tb, 0, co),
    }


def upcat_forward(params, x_ncdhw, xe_ncdhw, temb, *, out_chns,
                  use_pallas=True, d_tile=None):
    deconv_fn = deconv_rows if use_pallas else deconv_rows_ref
    conv_fn = conv3d_moments if use_pallas else conv3d_moments_ref
    nact_fn = norm_act if use_pallas else norm_act_ref

    # NCDHW -> NDHWC, bf16 activations for the MXU (f32 accumulation in-kernel).
    x = jnp.transpose(x_ncdhw, (0, 2, 3, 4, 1)).astype(jnp.bfloat16)
    N, D, H, W, Cin = x.shape
    cup = params["up_wm"].shape[1] // 8

    # --- UpSample("deconv"): ConvTranspose3d(k=2, s=2); batch folded into the M dim ---
    y_rows = deconv_fn(x.reshape(N * D * H * W, Cin), params["up_wm"], params["up_b"])
    # TODO(synk): the (2,2,2) pixel scatter is left to an XLA transpose; it could be
    #             fused into the deconv kernel's output BlockSpec write.
    y = (y_rows.reshape(N, D, H, W, 2, 2, 2, cup)
               .transpose(0, 1, 4, 2, 5, 3, 6, 7)
               .reshape(N, 2 * D, 2 * H, 2 * W, cup))

    # --- replicate-pad (if spatial mismatch) + concat with encoder features ---
    if xe_ncdhw is not None:
        xe = jnp.transpose(xe_ncdhw, (0, 2, 3, 4, 1)).astype(jnp.bfloat16)
        pads = [(0, 0)] + [(0, xe.shape[a] - y.shape[a]) for a in (1, 2, 3)] + [(0, 0)]
        if any(p[1] != 0 for p in pads):
            y = jnp.pad(y, pads, mode="edge")                  # torch replicate pad
        y = jnp.concatenate([xe, y], axis=-1)

    _, D2, H2, W2, _ = y.shape
    co_pad = params["b0"].shape[0]
    dt = _pick_d_tile(D2, H2, W2, co_pad, d_tile)

    # --- temb path hoisted out of the conv kernels: SiLU(temb) @ W_t + b_t, per batch ---
    t = temb.astype(jnp.float32)
    tp = jnp.dot(t * jax.nn.sigmoid(t), params["tw"]) + params["tb"]     # (N, co_pad)

    # --- TwoConv: conv_0 (+temb injection), then conv_1 ---
    h = _conv_norm_act(conv_fn, nact_fn, y, params["w0"], params["b0"],
                       params["g0"], params["be0"], tp, dt, jnp.bfloat16)
    h = _conv_norm_act(conv_fn, nact_fn, h, params["w1"], params["b1"],
                       params["g1"], params["be1"], jnp.zeros_like(tp), dt, jnp.float32)

    # un-pad channels, NDHWC -> NCDHW
    return jnp.transpose(h[..., :out_chns], (0, 4, 1, 2, 3))


# ----------------------------------------------------------------------------
if __name__ == "__main__":
    key = jax.random.PRNGKey(0)
    k_x, k_e, k_t, k_p = jax.random.split(key, 4)

    # Small shapes: spatial_dims=3, in_chns=8, cat_chns=8, out_chns=16, halves=True.
    N, in_chns, cat_chns, out_chns = 2, 8, 8, 16
    d = 4                                                   # decoder spatial size
    x = jax.random.normal(k_x, (N, in_chns, d, d, d), jnp.float32)       # to upsample
    x_e = jax.random.normal(k_e, (N, cat_chns, 2 * d, 2 * d, 2 * d), jnp.float32)
    temb = jax.random.normal(k_t, (N, 512), jnp.float32)

    params = init_params(k_p, in_chns, cat_chns, out_chns)

    # Forced small depth tile (4 tiles / batch) exercises the cross-tile moment reduction.
    fwd = jax.jit(functools.partial(upcat_forward, out_chns=out_chns,
                                    use_pallas=True, d_tile=2))
    out = jax.block_until_ready(fwd(params, x, x_e, temb))
    assert out.shape == (N, out_chns, 2 * d, 2 * d, 2 * d), out.shape
    assert bool(jnp.all(jnp.isfinite(out)))

    # Pure-jnp reference of the same math (same bf16 casts / padded params).
    ref = jax.block_until_ready(
        upcat_forward(params, x, x_e, temb, out_chns=out_chns,
                      use_pallas=False, d_tile=2))
    assert bool(jnp.allclose(out, ref, rtol=2e-3, atol=2e-2)), float(
        jnp.max(jnp.abs(out - ref)))

    # Auto-sized depth tile (single tile per batch at these small shapes).
    fwd_auto = jax.jit(functools.partial(upcat_forward, out_chns=out_chns,
                                         use_pallas=True))
    out2 = jax.block_until_ready(fwd_auto(params, x, x_e, temb))
    assert bool(jnp.allclose(out2, ref, rtol=2e-3, atol=2e-2)), float(
        jnp.max(jnp.abs(out2 - ref)))

    print("KERNEL_OK")
</pallas_src>

<mosaic_0001>
module attributes {stable_mosaic.version = 11 : i64} {
  func.func @_deconv_rows_kernel(%arg0: i32, %arg1: memref<128x8xbf16, #tpu.memory_space<vmem>>, %arg2: memref<8x128xbf16, #tpu.memory_space<vmem>>, %arg3: memref<1x128xf32, #tpu.memory_space<vmem>>, %arg4: memref<128x128xbf16, #tpu.memory_space<vmem>>) attributes {dimension_semantics = [#tpu.dimension_semantics<parallel>], iteration_bounds = array<i64: 1>, scalar_prefetch = 0 : i64, scratch_operands = 0 : i64, tpu.core_type = #tpu.core_type<tc>, window_params = [{transform_indices = @transform_0, window_bounds = array<i64: 128, 8>}, {pipeline_mode = #tpu.pipeline_mode<synchronous>, transform_indices = @transform_1, window_bounds = array<i64: 8, 128>}, {pipeline_mode = #tpu.pipeline_mode<synchronous>, transform_indices = @transform_2, window_bounds = array<i64: 1, 128>}, {transform_indices = @transform_3, window_bounds = array<i64: 128, 128>}]} {
    %c0 = arith.constant 0 : index
    %c0_0 = arith.constant 0 : index
    %0 = vector.load %arg1[%c0, %c0_0] : memref<128x8xbf16, #tpu.memory_space<vmem>>, vector<128x8xbf16>
    %c0_1 = arith.constant 0 : index
    %c0_2 = arith.constant 0 : index
    %1 = vector.load %arg2[%c0_1, %c0_2] : memref<8x128xbf16, #tpu.memory_space<vmem>>, vector<8x128xbf16>
    %cst = arith.constant dense<0.000000e+00> : vector<128x128xf32>
    %2 = tpu.matmul %0, %1, %cst {dimension_numbers = #tpu.dot_dimension_numbers<[1], [0], [0], [1], [0, 0, 1, 1], [], []>} : vector<128x8xbf16>, vector<8x128xbf16>, vector<128x128xf32> -> vector<128x128xf32>
    %c0_3 = arith.constant 0 : index
    %c0_4 = arith.constant 0 : index
    %3 = vector.load %arg3[%c0_3, %c0_4] : memref<1x128xf32, #tpu.memory_space<vmem>>, vector<1x128xf32>
    %4 = vector.broadcast %3 : vector<1x128xf32> to vector<128x128xf32>
    %5 = arith.addf %2, %4 : vector<128x128xf32>
    %6 = arith.truncf %5 : vector<128x128xf32> to vector<128x128xbf16>
    %c0_5 = arith.constant 0 : index
    %c0_6 = arith.constant 0 : index
    %7 = vector.load %arg4[%c0_5, %c0_6] : memref<128x128xbf16, #tpu.memory_space<vmem>>, vector<128x128xbf16>
    tpu.vector_store %arg4[%c0_5, %c0_6], %6 {strides = array<i32>} : memref<128x128xbf16, #tpu.memory_space<vmem>>, vector<128x128xbf16>,
    return
  }
  func.func @transform_0(%arg0: i32) -> (i32, i32) {
    %c0_i32 = arith.constant 0 : i32
    %c0_i32_0 = arith.constant 0 : i32
    return %arg0, %c0_i32 : i32, i32
  }
  func.func @transform_1(%arg0: i32) -> (i32, i32) {
    %c0_i32 = arith.constant 0 : i32
    %c0_i32_0 = arith.constant 0 : i32
    %c0_i32_1 = arith.constant 0 : i32
    return %c0_i32, %c0_i32_0 : i32, i32
  }
  func.func @transform_2(%arg0: i32) -> (i32, i32) {
    %c0_i32 = arith.constant 0 : i32
    %c0_i32_0 = arith.constant 0 : i32
    %c0_i32_1 = arith.constant 0 : i32
    return %c0_i32, %c0_i32_0 : i32, i32
  }
  func.func @transform_3(%arg0: i32) -> (i32, i32) {
    %c0_i32 = arith.constant 0 : i32
    %c0_i32_0 = arith.constant 0 : i32
    return %arg0, %c0_i32 : i32, i32
  }
}

module attributes {stable_mosaic.version = 11 : i64} {
  func.func @_conv3d_moments_kernel(%arg0: i32, %arg1: i32, %arg2: memref<1x10x10x10x24xbf16, #tpu.memory_space<vmem>>, %arg3: memref<27x24x128xbf16, #tpu.memory_space<vmem>>, %arg4: memref<1x128xf32, #tpu.memory_space<vmem>>, %arg5: memref<1x2x64x128xf32, #tpu.memory_space<vmem>>, %arg6: memref<1x1x2x128xf32, #tpu.memory_space<vmem>>) attributes {dimension_semantics = [#tpu.dimension_semantics<parallel>, #tpu.dimension_semantics<arbitrary>], iteration_bounds = array<i64: 2, 4>, scalar_prefetch = 0 : i64, scratch_operands = 0 : i64, tpu.core_type = #tpu.core_type<tc>, window_params = [{transform_indices = @transform_0, window_bounds = array<i64: 1, 10, 10, 10, 24>}, {pipeline_mode = #tpu.pipeline_mode<synchronous>, transform_indices = @transform_1, window_bounds = array<i64: 27, 24, 128>}, {pipeline_mode = #tpu.pipeline_mode<synchronous>, transform_indices = @transform_2, window_bounds = array<i64: 1, 128>}, {transform_indices = @transform_3, window_bounds = array<i64: 1, 2, 64, 128>}, {transform_indices = @transform_4, window_bounds = array<i64: 1, 1, 2, 128>}]} {
    %c2_i32 = arith.constant 2 : i32
    %0 = arith.muli %arg1, %c2_i32 : i32
    %cst = arith.constant 0.000000e+00 : f32
    %1 = vector.broadcast %cst : f32 to vector<128x128xf32>
    %c0_i32 = arith.constant 0 : i32
    %2 = arith.addi %0, %c0_i32 : i32
    %c0 = arith.constant 0 : index
    %3 = arith.index_cast %2 : i32 to index
    %c0_0 = arith.constant 0 : index
    %c0_1 = arith.constant 0 : index
    %c0_2 = arith.constant 0 : index
    %4 = vector.load %arg2[%c0, %3, %c0_0, %c0_1, %c0_2] : memref<1x10x10x10x24xbf16, #tpu.memory_space<vmem>>, vector<1x2x10x10x24xbf16>
    %5 = vector.shape_cast %4 : vector<1x2x10x10x24xbf16> to vector<2x10x10x24xbf16>
    %6 = vector.extract_strided_slice %5 {offsets = [0, 0, 0, 0], sizes = [2, 8, 8, 24], strides = [1, 1, 1, 1]} : vector<2x10x10x24xbf16> to vector<2x8x8x24xbf16>
    %7 = vector.shape_cast %6 : vector<2x8x8x24xbf16> to vector<128x24xbf16>
    %c0_3 = arith.constant 0 : index
    %c0_4 = arith.constant 0 : index
    %c0_5 = arith.constant 0 : index
    %8 = vector.load %arg3[%c0_3, %c0_4, %c0_5] : memref<27x24x128xbf16, #tpu.memory_space<vmem>>, vector<1x24x128xbf16>
    %9 = vector.shape_cast %8 : vector<1x24x128xbf16> to vector<24x128xbf16>
    %cst_6 = arith.constant dense<0.000000e+00> : vector<128x128xf32>
    %10 = tpu.matmul %7, %9, %cst_6 {dimension_numbers = #tpu.dot_dimension_numbers<[1], [0], [0], [1], [0, 0, 1, 1], [], []>} : vector<128x24xbf16>, vector<24x128xbf16>, vector<128x128xf32> -> vector<128x128xf32>
    %11 = arith.addf %1, %10 : vector<128x128xf32>
    %12 = vector.extract_strided_slice %5 {offsets = [0, 0, 1, 0], sizes = [2, 8, 8, 24], strides = [1, 1, 1, 1]} : vector<2x10x10x24xbf16> to vector<2x8x8x24xbf16>
    %13 = vector.shape_cast %12 : vector<2x8x8x24xbf16> to vector<128x24xbf16>
    %c1 = arith.constant 1 : index
    %c0_7 = arith.constant 0 : index
    %c0_8 = arith.constant 0 : index
    %14 = vector.load %arg3[%c1, %c0_7, %c0_8] : memref<27x24x128xbf16, #tpu.memory_space<vmem>>, vector<1x24x128xbf16>
    %15 = vector.shape_cast %14 : vector<1x24x128xbf16> to vector<24x128xbf16>
    %cst_9 = arith.constant dense<0.000000e+00> : vector<128x128xf32>
    %16 = tpu.matmul %13, %15, %cst_9 {dimension_numbers = #tpu.dot_dimension_numbers<[1], [0], [0], [1], [0, 0, 1, 1], [], []>} : vector<128x24xbf16>, vector<24x128xbf16>, vector<128x128xf32> -> vector<128x128xf32>
    %17 = arith.addf %11, %16 : vector<128x128xf32>
    %18 = vector.extract_strided_slice %5 {offsets = [0, 0, 2, 0], sizes = [2, 8, 8, 24], strides = [1, 1, 1, 1]} : vector<2x10x10x24xbf16> to vector<2x8x8x24xbf16>
    %19 = vector.shape_cast %18 : vector<2x8x8x24xbf16> to vector<128x24xbf16>
    %c2 = arith.constant 2 : index
    %c0_10 = arith.constant 0 : index
    %c0_11 = arith.constant 0 : index
    %20 = vector.load %arg3[%c2, %c0_10, %c0_11] : memref<27x24x128xbf16, #tpu.memory_space<vmem>>, vector<1x24x128xbf16>
    %21 = vector.shape_cast %20 : vector<1x24x128xbf16> to vector<24x128xbf16>
    %cst_12 = arith.constant dense<0.000000e+00> : vector<128x128xf32>
    %22 = tpu.matmul %19, %21, %cst_12 {dimension_numbers = #tpu.dot_dimension_numbers<[1], [0], [0], [1], [0, 0, 1, 1], [], []>} : vector<128x24xbf16>, vector<24x128xbf16>, vector<128x128xf32> -> vector<128x128xf32>
    %23 = arith.addf %17, %22 : vector<128x128xf32>
    %24 = vector.extract_strided_slice %5 {offsets = [0, 1, 0, 0], sizes = [2, 8, 8, 24], strides = [1, 1, 1, 1]} : vector<2x10x10x24xbf16> to vector<2x8x8x24xbf16>
    %25 = vector.shape_cast %24 : vector<2x8x8x24xbf16> to vector<128x24xbf16>
    %c3 = arith.constant 3 : index
    %c0_13 = arith.constant 0 : index
    %c0_14 = arith.constant 0 : index
    %26 = vector.load %arg3[%c3, %c0_13, %c0_14] : memref<27x24x128xbf16, #tpu.memory_space<vmem>>, vector<1x24x128xbf16>
    %27 = vector.shape_cast %26 : vector<1x24x128xbf16> to vector<24x128xbf16>
    %cst_15 = arith.constant dense<0.000000e+00> : vector<128x128xf32>
    %28 = tpu.matmul %25, %27, %cst_15 {dimension_numbers = #tpu.dot_dimension_numbers<[1], [0], [0], [1], [0, 0, 1, 1], [], []>} : vector<128x24xbf16>, vector<24x128xbf16>, vector<128x128xf32> -> vector<128x128xf32>
    %29 = arith.addf %23, %28 : vector<128x128xf32>
    %30 = vector.extract_strided_slice %5 {offsets = [0, 1, 1, 0], sizes = [2, 8, 8, 24], strides = [1, 1, 1, 1]} : vector<2x10x10x24xbf16> to vector<2x8x8x24xbf16>
    %31 = vector.shape_cast %30 : vector<2x8x8x24xbf16> to vector<128x24xbf16>
    %c4 = arith.constant 4 : index
    %c0_16 = arith.constant 0 : index
    %c0_17 = arith.constant 0 : index
    %32 = vector.load %arg3[%c4, %c0_16, %c0_17] : memref<27x24x128xbf16, #tpu.memory_space<vmem>>, vector<1x24x128xbf16>
    %33 = vector.shape_cast %32 : vector<1x24x128xbf16> to vector<24x128xbf16>
    %cst_18 = arith.constant dense<0.000000e+00> : vector<128x128xf32>
    %34 = tpu.matmul %31, %33, %cst_18 {dimension_numbers = #tpu.dot_dimension_numbers<[1], [0], [0], [1], [0, 0, 1, 1], [], []>} : vector<128x24xbf16>, vector<24x128xbf16>, vector<128x128xf32> -> vector<128x128xf32>
    %35 = arith.addf %29, %34 : vector<128x128xf32>
    %36 = vector.extract_strided_slice %5 {offsets = [0, 1, 2, 0], sizes = [2, 8, 8, 24], strides = [1, 1, 1, 1]} : vector<2x10x10x24xbf16> to vector<2x8x8x24xbf16>
    %37 = vector.shape_cast %36 : vector<2x8x8x24xbf16> to vector<128x24xbf16>
    %c5 = arith.constant 5 : index
    %c0_19 = arith.constant 0 : index
    %c0_20 = arith.constant 0 : index
    %38 = vector.load %arg3[%c5, %c0_19, %c0_20] : memref<27x24x128xbf16, #tpu.memory_space<vmem>>, vector<1x24x128xbf16>
    %39 = vector.shape_cast %38 : vector<1x24x128xbf16> to vector<24x128xbf16>
    %cst_21 = arith.constant dense<0.000000e+00> : vector<128x128xf32>
    %40 = tpu.matmul %37, %39, %cst_21 {dimension_numbers = #tpu.dot_dimension_numbers<[1], [0], [0], [1], [0, 0, 1, 1], [], []>} : vector<128x24xbf16>, vector<24x128xbf16>, vector<128x128xf32> -> vector<128x128xf32>
    %41 = arith.addf %35, %40 : vector<128x128xf32>
    %42 = vector.extract_strided_slice %5 {offsets = [0, 2, 0, 0], sizes = [2, 8, 8, 24], strides = [1, 1, 1, 1]} : vector<2x10x10x24xbf16> to vector<2x8x8x24xbf16>
    %43 = vector.shape_cast %42 : vector<2x8x8x24xbf16> to vector<128x24xbf16>
    %c6 = arith.constant 6 : index
    %c0_22 = arith.constant 0 : index
    %c0_23 = arith.constant 0 : index
    %44 = vector.load %arg3[%c6, %c0_22, %c0_23] : memref<27x24x128xbf16, #tpu.memory_space<vmem>>, vector<1x24x128xbf16>
    %45 = vector.shape_cast %44 : vector<1x24x128xbf16> to vector<24x128xbf16>
    %cst_24 = arith.constant dense<0.000000e+00> : vector<128x128xf32>
    %46 = tpu.matmul %43, %45, %cst_24 {dimension_numbers = #tpu.dot_dimension_numbers<[1], [0], [0], [1], [0, 0, 1, 1], [], []>} : vector<128x24xbf16>, vector<24x128xbf16>, vector<128x128xf32> -> vector<128x128xf32>
    %47 = arith.addf %41, %46 : vector<128x128xf32>
    %48 = vector.extract_strided_slice %5 {offsets = [0, 2, 1, 0], sizes = [2, 8, 8, 24], strides = [1, 1, 1, 1]} : vector<2x10x10x24xbf16> to vector<2x8x8x24xbf16>
    %49 = vector.shape_cast %48 : vector<2x8x8x24xbf16> to vector<128x24xbf16>
    %c7 = arith.constant 7 : index
    %c0_25 = arith.constant 0 : index
    %c0_26 = arith.constant 0 : index
    %50 = vector.load %arg3[%c7, %c0_25, %c0_26] : memref<27x24x128xbf16, #tpu.memory_space<vmem>>, vector<1x24x128xbf16>
    %51 = vector.shape_cast %50 : vector<1x24x128xbf16> to vector<24x128xbf16>
    %cst_27 = arith.constant dense<0.000000e+00> : vector<128x128xf32>
    %52 = tpu.matmul %49, %51, %cst_27 {dimension_numbers = #tpu.dot_dimension_numbers<[1], [0], [0], [1], [0, 0, 1, 1], [], []>} : vector<128x24xbf16>, vector<24x128xbf16>, vector<128x128xf32> -> vector<128x128xf32>
    %53 = arith.addf %47, %52 : vector<128x128xf32>
    %54 = vector.extract_strided_slice %5 {offsets = [0, 2, 2, 0], sizes = [2, 8, 8, 24], strides = [1, 1, 1, 1]} : vector<2x10x10x24xbf16> to vector<2x8x8x24xbf16>
    %55 = vector.shape_cast %54 : vector<2x8x8x24xbf16> to vector<128x24xbf16>
    %c8 = arith.constant 8 : index
    %c0_28 = arith.constant 0 : index
    %c0_29 = arith.constant 0 : index
    %56 = vector.load %arg3[%c8, %c0_28, %c0_29] : memref<27x24x128xbf16, #tpu.memory_space<vmem>>, vector<1x24x128xbf16>
    %57 = vector.shape_cast %56 : vector<1x24x128xbf16> to vector<24x128xbf16>
    %cst_30 = arith.constant dense<0.000000e+00> : vector<128x128xf32>
    %58 = tpu.matmul %55, %57, %cst_30 {dimension_numbers = #tpu.dot_dimension_numbers<[1], [0], [0], [1], [0, 0, 1, 1], [], []>} : vector<128x24xbf16>, vector<24x128xbf16>, vector<128x128xf32> -> vector<128x128xf32>
    %59 = arith.addf %53, %58 : vector<128x128xf32>
    %c1_i32 = arith.constant 1 : i32
    %60 = arith.addi %0, %c1_i32 : i32
    %c0_31 = arith.constant 0 : index
    %61 = arith.index_cast %60 : i32 to index
    %c0_32 = arith.constant 0 : index
    %c0_33 = arith.constant 0 : index
    %c0_34 = arith.constant 0 : index
    %62 = vector.load %arg2[%c0_31, %61, %c0_32, %c0_33, %c0_34] : memref<1x10x10x10x24xbf16, #tpu.memory_space<vmem>>, vector<1x2x10x10x24xbf16>
    %63 = vector.shape_cast %62 : vector<1x2x10x10x24xbf16> to vector<2x10x10x24xbf16>
    %64 = vector.extract_strided_slice %63 {offsets = [0, 0, 0, 0], sizes = [2, 8, 8, 24], strides = [1, 1, 1, 1]} : vector<2x10x10x24xbf16> to vector<2x8x8x24xbf16>
    %65 = vector.shape_cast %64 : vector<2x8x8x24xbf16> to vector<128x24xbf16>
    %c9 = arith.constant 9 : index
    %c0_35 = arith.constant 0 : index
    %c0_36 = arith.constant 0 : index
    %66 = vector.load %arg3[%c9, %c0_35, %c0_36] : memref<27x24x128xbf16, #tpu.memory_space<vmem>>, vector<1x24x128xbf16>
    %67 = vector.shape_cast %66 : vector<1x24x128xbf16> to vector<24x128xbf16>
    %cst_37 = arith.constant dense<0.000000e+00> : vector<128x128xf32>
    %68 = tpu.matmul %65, %67, %cst_37 {dimension_numbers = #tpu.dot_dimension_numbers<[1], [0], [0], [1], [0, 0, 1, 1], [], []>} : vector<128x24xbf16>, vector<24x128xbf16>, vector<128x128xf32> -> vector<128x128xf32>
    %69 = arith.addf %59, %68 : vector<128x128xf32>
    %70 = vector.extract_strided_slice %63 {offsets = [0, 0, 1, 0], sizes = [2, 8, 8, 24], strides = [1, 1, 1, 1]} : vector<2x10x10x24xbf16> to vector<2x8x8x24xbf16>
    %71 = vector.shape_cast %70 : vector<2x8x8x24xbf16> to vector<128x24xbf16>
    %c10 = arith.constant 10 : index
    %c0_38 = arith.constant 0 : index
    %c0_39 = arith.constant 0 : index
    %72 = vector.load %arg3[%c10, %c0_38, %c0_39] : memref<27x24x128xbf16, #tpu.memory_space<vmem>>, vector<1x24x128xbf16>
    %73 = vector.shape_cast %72 : vector<1x24x128xbf16> to vector<24x128xbf16>
    %cst_40 = arith.constant dense<0.000000e+00> : vector<128x128xf32>
    %74 = tpu.matmul %71, %73, %cst_40 {dimension_numbers = #tpu.dot_dimension_numbers<[1], [0], [0], [1], [0, 0, 1, 1], [], []>} : vector<128x24xbf16>, vector<24x128xbf16>, vector<128x128xf32> -> vector<128x128xf32>
    %75 = arith.addf %69, %74 : vector<128x128xf32>
    %76 = vector.extract_strided_slice %63 {offsets = [0, 0, 2, 0], sizes = [2, 8, 8, 24], strides = [1, 1, 1, 1]} : vector<2x10x10x24xbf16> to vector<2x8x8x24xbf16>
    %77 = vector.shape_cast %76 : vector<2x8x8x24xbf16> to vector<128x24xbf16>
    %c11 = arith.constant 11 : index
    %c0_41 = arith.constant 0 : index
    %c0_42 = arith.constant 0 : index
    %78 = vector.load %arg3[%c11, %c0_41, %c0_42] : memref<27x24x128xbf16, #tpu.memory_space<vmem>>, vector<1x24x128xbf16>
    %79 = vector.shape_cast %78 : vector<1x24x128xbf16> to vector<24x128xbf16>
    %cst_43 = arith.constant dense<0.000000e+00> : vector<128x128xf32>
    %80 = tpu.matmul %77, %79, %cst_43 {dimension_numbers = #tpu.dot_dimension_numbers<[1], [0], [0], [1], [0, 0, 1, 1], [], []>} : vector<128x24xbf16>, vector<24x128xbf16>, vector<128x128xf32> -> vector<128x128xf32>
    %81 = arith.addf %75, %80 : vector<128x128xf32>
    %82 = vector.extract_strided_slice %63 {offsets = [0, 1, 0, 0], sizes = [2, 8, 8, 24], strides = [1, 1, 1, 1]} : vector<2x10x10x24xbf16> to vector<2x8x8x24xbf16>
    %83 = vector.shape_cast %82 : vector<2x8x8x24xbf16> to vector<128x24xbf16>
    %c12 = arith.constant 12 : index
    %c0_44 = arith.constant 0 : index
    %c0_45 = arith.constant 0 : index
    %84 = vector.load %arg3[%c12, %c0_44, %c0_45] : memref<27x24x128xbf16, #tpu.memory_space<vmem>>, vector<1x24x128xbf16>
    %85 = vector.shape_cast %84 : vector<1x24x128xbf16> to vector<24x128xbf16>
    %cst_46 = arith.constant dense<0.000000e+00> : vector<128x128xf32>
    %86 = tpu.matmul %83, %85, %cst_46 {dimension_numbers = #tpu.dot_dimension_numbers<[1], [0], [0], [1], [0, 0, 1, 1], [], []>} : vector<128x24xbf16>, vector<24x128xbf16>, vector<128x128xf32> -> vector<128x128xf32>
    %87 = arith.addf %81, %86 : vector<128x128xf32>
    %88 = vector.extract_strided_slice %63 {offsets = [0, 1, 1, 0], sizes = [2, 8, 8, 24], strides = [1, 1, 1, 1]} : vector<2x10x10x24xbf16> to vector<2x8x8x24xbf16>
    %89 = vector.shape_cast %88 : vector<2x8x8x24xbf16> to vector<128x24xbf16>
    %c13 = arith.constant 13 : index
    %c0_47 = arith.constant 0 : index
    %c0_48 = arith.constant 0 : index
    %90 = vector.load %arg3[%c13, %c0_47, %c0_48] : memref<27x24x128xbf16, #tpu.memory_space<vmem>>, vector<1x24x128xbf16>
    %91 = vector.shape_cast %90 : vector<1x24x128xbf16> to vector<24x128xbf16>
    %cst_49 = arith.constant dense<0.000000e+00> : vector<128x128xf32>
    %92 = tpu.matmul %89, %91, %cst_49 {dimension_numbers = #tpu.dot_dimension_numbers<[1], [0], [0], [1], [0, 0, 1, 1], [], []>} : vector<128x24xbf16>, vector<24x128xbf16>, vector<128x128xf32> -> vector<128x128xf32>
    %93 = arith.addf %87, %92 : vector<128x128xf32>
    %94 = vector.extract_strided_slice %63 {offsets = [0, 1, 2, 0], sizes = [2, 8, 8, 24], strides = [1, 1, 1, 1]} : vector<2x10x10x24xbf16> to vector<2x8x8x24xbf16>
    %95 = vector.shape_cast %94 : vector<2x8x8x24xbf16> to vector<128x24xbf16>
    %c14 = arith.constant 14 : index
    %c0_50 = arith.constant 0 : index
    %c0_51 = arith.constant 0 : index
    %96 = vector.load %arg3[%c14, %c0_50, %c0_51] : memref<27x24x128xbf16, #tpu.memory_space<vmem>>, vector<1x24x128xbf16>
    %97 = vector.shape_cast %96 : vector<1x24x128xbf16> to vector<24x128xbf16>
    %cst_52 = arith.constant dense<0.000000e+00> : vector<128x128xf32>
    %98 = tpu.matmul %95, %97, %cst_52 {dimension_numbers = #tpu.dot_dimension_numbers<[1], [0], [0], [1], [0, 0, 1, 1], [], []>} : vector<128x24xbf16>, vector<24x128xbf16>, vector<128x128xf32> -> vector<128x128xf32>
    %99 = arith.addf %93, %98 : vector<128x128xf32>
    %100 = vector.extract_strided_slice %63 {offsets = [0, 2, 0, 0], sizes = [2, 8, 8, 24], strides = [1, 1, 1, 1]} : vector<2x10x10x24xbf16> to vector<2x8x8x24xbf16>
    %101 = vector.shape_cast %100 : vector<2x8x8x24xbf16> to vector<128x24xbf16>
    %c15 = arith.constant 15 : index
    %c0_53 = arith.constant 0 : index
    %c0_54 = arith.constant 0 : index
    %102 = vector.load %arg3[%c15, %c0_53, %c0_54] : memref<27x24x128xbf16, #tpu.memory_space<vmem>>, vector<1x24x128xbf16>
    %103 = vector.shape_cast %102 : vector<1x24x128xbf16> to vector<24x128xbf16>
    %cst_55 = arith.constant dense<0.000000e+00> : vector<128x128xf32>
    %104 = tpu.matmul %101, %103, %cst_55 {dimension_numbers = #tpu.dot_dimension_numbers<[1], [0], [0], [1], [0, 0, 1, 1], [], []>} : vector<128x24xbf16>, vector<24x128xbf16>, vector<128x128xf32> -> vector<128x128xf32>
    %105 = arith.addf %99, %104 : vector<128x128xf32>
    %106 = vector.extract_strided_slice %63 {offsets = [0, 2, 1, 0], sizes = [2, 8, 8, 24], strides = [1, 1, 1, 1]} : vector<2x10x10x24xbf16> to vector<2x8x8x24xbf16>
    %107 = vector.shape_cast %106 : vector<2x8x8x24xbf16> to vector<128x24xbf16>
    %c16 = arith.constant 16 : index
    %c0_56 = arith.constant 0 : index
    %c0_57 = arith.constant 0 : index
    %108 = vector.load %arg3[%c16, %c0_56, %c0_57] : memref<27x24x128xbf16, #tpu.memory_space<vmem>>, vector<1x24x128xbf16>
    %109 = vector.shape_cast %108 : vector<1x24x128xbf16> to vector<24x128xbf16>
    %cst_58 = arith.constant dense<0.000000e+00> : vector<128x128xf32>
    %110 = tpu.matmul %107, %109, %cst_58 {dimension_numbers = #tpu.dot_dimension_numbers<[1], [0], [0], [1], [0, 0, 1, 1], [], []>} : vector<128x24xbf16>, vector<24x128xbf16>, vector<128x128xf32> -> vector<128x128xf32>
    %111 = arith.addf %105, %110 : vector<128x128xf32>
    %112 = vector.extract_strided_slice %63 {offsets = [0, 2, 2, 0], sizes = [2, 8, 8, 24], strides = [1, 1, 1, 1]} : vector<2x10x10x24xbf16> to vector<2x8x8x24xbf16>
    %113 = vector.shape_cast %112 : vector<2x8x8x24xbf16> to vector<128x24xbf16>
    %c17 = arith.constant 17 : index
    %c0_59 = arith.constant 0 : index
    %c0_60 = arith.constant 0 : index
    %114 = vector.load %arg3[%c17, %c0_59, %c0_60] : memref<27x24x128xbf16, #tpu.memory_space<vmem>>, vector<1x24x128xbf16>
    %115 = vector.shape_cast %114 : vector<1x24x128xbf16> to vector<24x128xbf16>
    %cst_61 = arith.constant dense<0.000000e+00> : vector<128x128xf32>
    %116 = tpu.matmul %113, %115, %cst_61 {dimension_numbers = #tpu.dot_dimension_numbers<[1], [0], [0], [1], [0, 0, 1, 1], [], []>} : vector<128x24xbf16>, vector<24x128xbf16>, vector<128x128xf32> -> vector<128x128xf32>
    %117 = arith.addf %111, %116 : vector<128x128xf32>
    %c2_i32_62 = arith.constant 2 : i32
    %118 = arith.addi %0, %c2_i32_62 : i32
    %c0_63 = arith.constant 0 : index
    %119 = arith.index_cast %118 : i32 to index
    %c0_64 = arith.constant 0 : index
    %c0_65 = arith.constant 0 : index
    %c0_66 = arith.constant 0 : index
    %120 = vector.load %arg2[%c0_63, %119, %c0_64, %c0_65, %c0_66] : memref<1x10x10x10x24xbf16, #tpu.memory_space<vmem>>, vector<1x2x10x10x24xbf16>
    %121 = vector.shape_cast %120 : vector<1x2x10x10x24xbf16> to vector<2x10x10x24xbf16>
    %122 = vector.extract_strided_slice %121 {offsets = [0, 0, 0, 0], sizes = [2, 8, 8, 24], strides = [1, 1, 1, 1]} : vector<2x10x10x24xbf16> to vector<2x8x8x24xbf16>
    %123 = vector.shape_cast %122 : vector<2x8x8x24xbf16> to vector<128x24xbf16>
    %c18 = arith.constant 18 : index
    %c0_67 = arith.constant 0 : index
    %c0_68 = arith.constant 0 : index
    %124 = vector.load %arg3[%c18, %c0_67, %c0_68] : memref<27x24x128xbf16, #tpu.memory_space<vmem>>, vector<1x24x128xbf16>
    %125 = vector.shape_cast %124 : vector<1x24x128xbf16> to vector<24x128xbf16>
    %cst_69 = arith.constant dense<0.000000e+00> : vector<128x128xf32>
    %126 = tpu.matmul %123, %125, %cst_69 {dimension_numbers = #tpu.dot_dimension_numbers<[1], [0], [0], [1], [0, 0, 1, 1], [], []>} : vector<128x24xbf16>, vector<24x128xbf16>, vector<128x128xf32> -> vector<128x128xf32>
    %127 = arith.addf %117, %126 : vector<128x128xf32>
    %128 = vector.extract_strided_slice %121 {offsets = [0, 0, 1, 0], sizes = [2, 8, 8, 24], strides = [1, 1, 1, 1]} : vector<2x10x10x24xbf16> to vector<2x8x8x24xbf16>
    %129 = vector.shape_cast %128 : vector<2x8x8x24xbf16> to vector<128x24xbf16>
    %c19 = arith.constant 19 : index
    %c0_70 = arith.constant 0 : index
    %c0_71 = arith.constant 0 : index
    %130 = vector.load %arg3[%c19, %c0_70, %c0_71] : memref<27x24x128xbf16, #tpu.memory_space<vmem>>, vector<1x24x128xbf16>
    %131 = vector.shape_cast %130 : vector<1x24x128xbf16> to vector<24x128xbf16>
    %cst_72 = arith.constant dense<0.000000e+00> : vector<128x128xf32>
    %132 = tpu.matmul %129, %131, %cst_72 {dimension_numbers = #tpu.dot_dimension_numbers<[1], [0], [0], [1], [0, 0, 1, 1], [], []>} : vector<128x24xbf16>, vector<24x128xbf16>, vector<128x128xf32> -> vector<128x128xf32>
    %133 = arith.addf %127, %132 : vector<128x128xf32>
    %134 = vector.extract_strided_slice %121 {offsets = [0, 0, 2, 0], sizes = [2, 8, 8, 24], strides = [1, 1, 1, 1]} : vector<2x10x10x24xbf16> to vector<2x8x8x24xbf16>
    %135 = vector.shape_cast %134 : vector<2x8x8x24xbf16> to vector<128x24xbf16>
    %c20 = arith.constant 20 : index
    %c0_73 = arith.constant 0 : index
    %c0_74 = arith.constant 0 : index
    %136 = vector.load %arg3[%c20, %c0_73, %c0_74] : memref<27x24x128xbf16, #tpu.memory_space<vmem>>, vector<1x24x128xbf16>
    %137 = vector.shape_cast %136 : vector<1x24x128xbf16> to vector<24x128xbf16>
    %cst_75 = arith.constant dense<0.000000e+00> : vector<128x128xf32>
    %138 = tpu.matmul %135, %137, %cst_75 {dimension_numbers = #tpu.dot_dimension_numbers<[1], [0], [0], [1], [0, 0, 1, 1], [], []>} : vector<128x24xbf16>, vector<24x128xbf16>, vector<128x128xf32> -> vector<128x128xf32>
    %139 = arith.addf %133, %138 : vector<128x128xf32>
    %140 = vector.extract_strided_slice %121 {offsets = [0, 1, 0, 0], sizes = [2, 8, 8, 24], strides = [1, 1, 1, 1]} : vector<2x10x10x24xbf16> to vector<2x8x8x24xbf16>
    %141 = vector.shape_cast %140 : vector<2x8x8x24xbf16> to vector<128x24xbf16>
    %c21 = arith.constant 21 : index
    %c0_76 = arith.constant 0 : index
    %c0_77 = arith.constant 0 : index
    %142 = vector.load %arg3[%c21, %c0_76, %c0_77] : memref<27x24x128xbf16, #tpu.memory_space<vmem>>, vector<1x24x128xbf16>
    %143 = vector.shape_cast %142 : vector<1x24x128xbf16> to vector<24x128xbf16>
    %cst_78 = arith.constant dense<0.000000e+00> : vector<128x128xf32>
    %144 = tpu.matmul %141, %143, %cst_78 {dimension_numbers = #tpu.dot_dimension_numbers<[1], [0], [0], [1], [0, 0, 1, 1], [], []>} : vector<128x24xbf16>, vector<24x128xbf16>, vector<128x128xf32> -> vector<128x128xf32>
    %145 = arith.addf %139, %144 : vector<128x128xf32>
    %146 = vector.extract_strided_slice %121 {offsets = [0, 1, 1, 0], sizes = [2, 8, 8, 24], strides = [1, 1, 1, 1]} : vector<2x10x10x24xbf16> to vector<2x8x8x24xbf16>
    %147 = vector.shape_cast %146 : vector<2x8x8x24xbf16> to vector<128x24xbf16>
    %c22 = arith.constant 22 : index
    %c0_79 = arith.constant 0 : index
    %c0_80 = arith.constant 0 : index
    %148 = vector.load %arg3[%c22, %c0_79, %c0_80] : memref<27x24x128xbf16, #tpu.memory_space<vmem>>, vector<1x24x128xbf16>
    %149 = vector.shape_cast %148 : vector<1x24x128xbf16> to vector<24x128xbf16>
    %cst_81 = arith.constant dense<0.000000e+00> : vector<128x128xf32>
    %150 = tpu.matmul %147, %149, %cst_81 {dimension_numbers = #tpu.dot_dimension_numbers<[1], [0], [0], [1], [0, 0, 1, 1], [], []>} : vector<128x24xbf16>, vector<24x128xbf16>, vector<128x128xf32> -> vector<128x128xf32>
    %151 = arith.addf %145, %150 : vector<128x128xf32>
    %152 = vector.extract_strided_slice %121 {offsets = [0, 1, 2, 0], sizes = [2, 8, 8, 24], strides = [1, 1, 1, 1]} : vector<2x10x10x24xbf16> to vector<2x8x8x24xbf16>
    %153 = vector.shape_cast %152 : vector<2x8x8x24xbf16> to vector<128x24xbf16>
    %c23 = arith.constant 23 : index
    %c0_82 = arith.constant 0 : index
    %c0_83 = arith.constant 0 : index
    %154 = vector.load %arg3[%c23, %c0_82, %c0_83] : memref<27x24x128xbf16, #tpu.memory_space<vmem>>, vector<1x24x128xbf16>
    %155 = vector.shape_cast %154 : vector<1x24x128xbf16> to vector<24x128xbf16>
    %cst_84 = arith.constant dense<0.000000e+00> : vector<128x128xf32>
    %156 = tpu.matmul %153, %155, %cst_84 {dimension_numbers = #tpu.dot_dimension_numbers<[1], [0], [0], [1], [0, 0, 1, 1], [], []>} : vector<128x24xbf16>, vector<24x128xbf16>, vector<128x128xf32> -> vector<128x128xf32>
    %157 = arith.addf %151, %156 : vector<128x128xf32>
    %158 = vector.extract_strided_slice %121 {offsets = [0, 2, 0, 0], sizes = [2, 8, 8, 24], strides = [1, 1, 1, 1]} : vector<2x10x10x24xbf16> to vector<2x8x8x24xbf16>
    %159 = vector.shape_cast %158 : vector<2x8x8x24xbf16> to vector<128x24xbf16>
    %c24 = arith.constant 24 : index
    %c0_85 = arith.constant 0 : index
    %c0_86 = arith.constant 0 : index
    %160 = vector.load %arg3[%c24, %c0_85, %c0_86] : memref<27x24x128xbf16, #tpu.memory_space<vmem>>, vector<1x24x128xbf16>
    %161 = vector.shape_cast %160 : vector<1x24x128xbf16> to vector<24x128xbf16>
    %cst_87 = arith.constant dense<0.000000e+00> : vector<128x128xf32>
    %162 = tpu.matmul %159, %161, %cst_87 {dimension_numbers = #tpu.dot_dimension_numbers<[1], [0], [0], [1], [0, 0, 1, 1], [], []>} : vector<128x24xbf16>, vector<24x128xbf16>, vector<128x128xf32> -> vector<128x128xf32>
    %163 = arith.addf %157, %162 : vector<128x128xf32>
    %164 = vector.extract_strided_slice %121 {offsets = [0, 2, 1, 0], sizes = [2, 8, 8, 24], strides = [1, 1, 1, 1]} : vector<2x10x10x24xbf16> to vector<2x8x8x24xbf16>
    %165 = vector.shape_cast %164 : vector<2x8x8x24xbf16> to vector<128x24xbf16>
    %c25 = arith.constant 25 : index
    %c0_88 = arith.constant 0 : index
    %c0_89 = arith.constant 0 : index
    %166 = vector.load %arg3[%c25, %c0_88, %c0_89] : memref<27x24x128xbf16, #tpu.memory_space<vmem>>, vector<1x24x128xbf16>
    %167 = vector.shape_cast %166 : vector<1x24x128xbf16> to vector<24x128xbf16>
    %cst_90 = arith.constant dense<0.000000e+00> : vector<128x128xf32>
    %168 = tpu.matmul %165, %167, %cst_90 {dimension_numbers = #tpu.dot_dimension_numbers<[1], [0], [0], [1], [0, 0, 1, 1], [], []>} : vector<128x24xbf16>, vector<24x128xbf16>, vector<128x128xf32> -> vector<128x128xf32>
    %169 = arith.addf %163, %168 : vector<128x128xf32>
    %170 = vector.extract_strided_slice %121 {offsets = [0, 2, 2, 0], sizes = [2, 8, 8, 24], strides = [1, 1, 1, 1]} : vector<2x10x10x24xbf16> to vector<2x8x8x24xbf16>
    %171 = vector.shape_cast %170 : vector<2x8x8x24xbf16> to vector<128x24xbf16>
    %c26 = arith.constant 26 : index
    %c0_91 = arith.constant 0 : index
    %c0_92 = arith.constant 0 : index
    %172 = vector.load %arg3[%c26, %c0_91, %c0_92] : memref<27x24x128xbf16, #tpu.memory_space<vmem>>, vector<1x24x128xbf16>
    %173 = vector.shape_cast %172 : vector<1x24x128xbf16> to vector<24x128xbf16>
    %cst_93 = arith.constant dense<0.000000e+00> : vector<128x128xf32>
    %174 = tpu.matmul %171, %173, %cst_93 {dimension_numbers = #tpu.dot_dimension_numbers<[1], [0], [0], [1], [0, 0, 1, 1], [], []>} : vector<128x24xbf16>, vector<24x128xbf16>, vector<128x128xf32> -> vector<128x128xf32>
    %175 = arith.addf %169, %174 : vector<128x128xf32>
    %c0_94 = arith.constant 0 : index
    %c0_95 = arith.constant 0 : index
    %176 = vector.load %arg4[%c0_94, %c0_95] : memref<1x128xf32, #tpu.memory_space<vmem>>, vector<1x128xf32>
    %177 = vector.broadcast %176 : vector<1x128xf32> to vector<128x128xf32>
    %178 = arith.addf %175, %177 : vector<128x128xf32>
    %179 = vector.shape_cast %178 : vector<128x128xf32> to vector<1x2x64x128xf32>
    %c0_96 = arith.constant 0 : index
    %c0_97 = arith.constant 0 : index
    %c0_98 = arith.constant 0 : index
    %c0_99 = arith.constant 0 : index
    %180 = vector.load %arg5[%c0_96, %c0_97, %c0_98, %c0_99] : memref<1x2x64x128xf32, #tpu.memory_space<vmem>>, vector<1x2x64x128xf32>
    tpu.vector_store %arg5[%c0_96, %c0_97, %c0_98, %c0_99], %179 {strides = array<i32>} : memref<1x2x64x128xf32, #tpu.memory_space<vmem>>, vector<1x2x64x128xf32>,
    %cst_100 = arith.constant dense<0.000000e+00> : vector<128xf32>
    %181 = vector.multi_reduction <add>, %178, %cst_100 [0] : vector<128x128xf32> to vector<128xf32>
    %182 = arith.mulf %178, %178 : vector<128x128xf32>
    %cst_101 = arith.constant dense<0.000000e+00> : vector<128xf32>
    %183 = vector.multi_reduction <add>, %182, %cst_101 [0] : vector<128x128xf32> to vector<128xf32>
    %184 = vector.shape_cast %181 : vector<128xf32> to vector<1x128xf32>
    %185 = vector.shape_cast %183 : vector<128xf32> to vector<1x128xf32>
    %186 = tpu.concatenate %184, %185 in 0 : vector<1x128xf32>, vector<1x128xf32> -> vector<2x128xf32>
    %187 = vector.shape_cast %186 : vector<2x128xf32> to vector<1x1x2x128xf32>
    %c0_102 = arith.constant 0 : index
    %c0_103 = arith.constant 0 : index
    %c0_104 = arith.constant 0 : index
    %c0_105 = arith.constant 0 : index
    %188 = vector.load %arg6[%c0_102, %c0_103, %c0_104, %c0_105] : memref<1x1x2x128xf32, #tpu.memory_space<vmem>>, vector<1x1x2x128xf32>
    tpu.vector_store %arg6[%c0_102, %c0_103, %c0_104, %c0_105], %187 {strides = array<i32>} : memref<1x1x2x128xf32, #tpu.memory_space<vmem>>, vector<1x1x2x128xf32>,
    return
  }
  func.func @transform_0(%arg0: i32, %arg1: i32) -> (i32, i32, i32, i32, i32) {
    %c0_i32 = arith.constant 0 : i32
    %c0_i32_0 = arith.constant 0 : i32
    %c0_i32_1 = arith.constant 0 : i32
    %c0_i32_2 = arith.constant 0 : i32
    %c0_i32_3 = arith.constant 0 : i32
    return %arg0, %c0_i32, %c0_i32_0, %c0_i32_1, %c0_i32_2 : i32, i32, i32, i32, i32
  }
  func.func @transform_1(%arg0: i32, %arg1: i32) -> (i32, i32, i32) {
    %c0_i32 = arith.constant 0 : i32
    %c0_i32_0 = arith.constant 0 : i32
    %c0_i32_1 = arith.constant 0 : i32
    %c0_i32_2 = arith.constant 0 : i32
    return %c0_i32, %c0_i32_0, %c0_i32_1 : i32, i32, i32
  }
  func.func @transform_2(%arg0: i32, %arg1: i32) -> (i32, i32) {
    %c0_i32 = arith.constant 0 : i32
    %c0_i32_0 = arith.constant 0 : i32
    %c0_i32_1 = arith.constant 0 : i32
    return %c0_i32, %c0_i32_0 : i32, i32
  }
  func.func @transform_3(%arg0: i32, %arg1: i32) -> (i32, i32, i32, i32) {
    %c0_i32 = arith.constant 0 : i32
    %c0_i32_0 = arith.constant 0 : i32
    %c0_i32_1 = arith.constant 0 : i32
    return %arg0, %arg1, %c0_i32, %c0_i32_0 : i32, i32, i32, i32
  }
  func.func @transform_4(%arg0: i32, %arg1: i32) -> (i32, i32, i32, i32) {
    %c0_i32 = arith.constant 0 : i32
    %c0_i32_0 = arith.constant 0 : i32
    %c0_i32_1 = arith.constant 0 : i32
    return %arg0, %arg1, %c0_i32, %c0_i32_0 : i32, i32, i32, i32
  }
}

module attributes {stable_mosaic.version = 11 : i64} {
  func.func @_norm_act_kernel(%arg0: i32, %arg1: i32, %arg2: memref<1x2x64x128xf32, #tpu.memory_space<vmem>>, %arg3: memref<1x1x128xf32, #tpu.memory_space<vmem>>, %arg4: memref<1x1x128xf32, #tpu.memory_space<vmem>>, %arg5: memref<1x1x128xf32, #tpu.memory_space<vmem>>, %arg6: memref<1x2x64x128xbf16, #tpu.memory_space<vmem>>) attributes {dimension_semantics = [#tpu.dimension_semantics<parallel>, #tpu.dimension_semantics<parallel>], iteration_bounds = array<i64: 2, 4>, scalar_prefetch = 0 : i64, scratch_operands = 0 : i64, tpu.core_type = #tpu.core_type<tc>, window_params = [{transform_indices = @transform_0, window_bounds = array<i64: 1, 2, 64, 128>}, {transform_indices = @transform_1, window_bounds = array<i64: 1, 1, 128>}, {transform_indices = @transform_2, window_bounds = array<i64: 1, 1, 128>}, {transform_indices = @transform_3, window_bounds = array<i64: 1, 1, 128>}, {transform_indices = @transform_4, window_bounds = array<i64: 1, 2, 64, 128>}]} {
    %c0 = arith.constant 0 : index
    %c0_0 = arith.constant 0 : index
    %c0_1 = arith.constant 0 : index
    %c0_2 = arith.constant 0 : index
    %0 = vector.load %arg2[%c0, %c0_0, %c0_1, %c0_2] : memref<1x2x64x128xf32, #tpu.memory_space<vmem>>, vector<1x2x64x128xf32>
    %c0_3 = arith.constant 0 : index
    %c0_4 = arith.constant 0 : index
    %c0_5 = arith.constant 0 : index
    %1 = vector.load %arg3[%c0_3, %c0_4, %c0_5] : memref<1x1x128xf32, #tpu.memory_space<vmem>>, vector<1x1x128xf32>
    %2 = vector.shape_cast %1 : vector<1x1x128xf32> to vector<1x1x1x128xf32>
    %3 = vector.broadcast %2 : vector<1x1x1x128xf32> to vector<1x2x64x128xf32>
    %4 = arith.mulf %0, %3 : vector<1x2x64x128xf32>
    %c0_6 = arith.constant 0 : index
    %c0_7 = arith.constant 0 : index
    %c0_8 = arith.constant 0 : index
    %5 = vector.load %arg4[%c0_6, %c0_7, %c0_8] : memref<1x1x128xf32, #tpu.memory_space<vmem>>, vector<1x1x128xf32>
    %6 = vector.shape_cast %5 : vector<1x1x128xf32> to vector<1x1x1x128xf32>
    %7 = vector.broadcast %6 : vector<1x1x1x128xf32> to vector<1x2x64x128xf32>
    %8 = arith.addf %4, %7 : vector<1x2x64x128xf32>
    %cst = arith.constant 0.000000e+00 : f32
    %9 = vector.broadcast %cst : f32 to vector<1x2x64x128xf32>
    %10 = arith.cmpf ogt, %8, %9 : vector<1x2x64x128xf32>
    %cst_9 = arith.constant 1.000000e-01 : f32
    %11 = vector.broadcast %cst_9 : f32 to vector<1x2x64x128xf32>
    %12 = arith.mulf %11, %8 : vector<1x2x64x128xf32>
    %13 = arith.select %10, %8, %12 : vector<1x2x64x128xi1>, vector<1x2x64x128xf32>
    %c0_10 = arith.constant 0 : index
    %c0_11 = arith.constant 0 : index
    %c0_12 = arith.constant 0 : index
    %14 = vector.load %arg5[%c0_10, %c0_11, %c0_12] : memref<1x1x128xf32, #tpu.memory_space<vmem>>, vector<1x1x128xf32>
    %15 = vector.shape_cast %14 : vector<1x1x128xf32> to vector<1x1x1x128xf32>
    %16 = vector.broadcast %15 : vector<1x1x1x128xf32> to vector<1x2x64x128xf32>
    %17 = arith.addf %13, %16 : vector<1x2x64x128xf32>
    %18 = arith.truncf %17 : vector<1x2x64x128xf32> to vector<1x2x64x128xbf16>
    %c0_13 = arith.constant 0 : index
    %c0_14 = arith.constant 0 : index
    %c0_15 = arith.constant 0 : index
    %c0_16 = arith.constant 0 : index
    %19 = vector.load %arg6[%c0_13, %c0_14, %c0_15, %c0_16] : memref<1x2x64x128xbf16, #tpu.memory_space<vmem>>, vector<1x2x64x128xbf16>
    tpu.vector_store %arg6[%c0_13, %c0_14, %c0_15, %c0_16], %18 {strides = array<i32>} : memref<1x2x64x128xbf16, #tpu.memory_space<vmem>>, vector<1x2x64x128xbf16>,
    return
  }
  func.func @transform_0(%arg0: i32, %arg1: i32) -> (i32, i32, i32, i32) {
    %c0_i32 = arith.constant 0 : i32
    %c0_i32_0 = arith.constant 0 : i32
    %c0_i32_1 = arith.constant 0 : i32
    return %arg0, %arg1, %c0_i32, %c0_i32_0 : i32, i32, i32, i32
  }
  func.func @transform_1(%arg0: i32, %arg1: i32) -> (i32, i32, i32) {
    %c0_i32 = arith.constant 0 : i32
    %c0_i32_0 = arith.constant 0 : i32
    %c0_i32_1 = arith.constant 0 : i32
    return %arg0, %c0_i32, %c0_i32_0 : i32, i32, i32
  }
  func.func @transform_2(%arg0: i32, %arg1: i32) -> (i32, i32, i32) {
    %c0_i32 = arith.constant 0 : i32
    %c0_i32_0 = arith.constant 0 : i32
    %c0_i32_1 = arith.constant 0 : i32
    return %arg0, %c0_i32, %c0_i32_0 : i32, i32, i32
  }
  func.func @transform_3(%arg0: i32, %arg1: i32) -> (i32, i32, i32) {
    %c0_i32 = arith.constant 0 : i32
    %c0_i32_0 = arith.constant 0 : i32
    %c0_i32_1 = arith.constant 0 : i32
    return %arg0, %c0_i32, %c0_i32_0 : i32, i32, i32
  }
  func.func @transform_4(%arg0: i32, %arg1: i32) -> (i32, i32, i32, i32) {
    %c0_i32 = arith.constant 0 : i32
    %c0_i32_0 = arith.constant 0 : i32
    %c0_i32_1 = arith.constant 0 : i32
    return %arg0, %arg1, %c0_i32, %c0_i32_0 : i32, i32, i32, i32
  }
}

module attributes {stable_mosaic.version = 11 : i64} {
  func.func @_conv3d_moments_kernel(%arg0: i32, %arg1: i32, %arg2: memref<1x10x10x10x128xbf16, #tpu.memory_space<vmem>>, %arg3: memref<27x128x128xbf16, #tpu.memory_space<vmem>>, %arg4: memref<1x128xf32, #tpu.memory_space<vmem>>, %arg5: memref<1x2x64x128xf32, #tpu.memory_space<vmem>>, %arg6: memref<1x1x2x128xf32, #tpu.memory_space<vmem>>) attributes {dimension_semantics = [#tpu.dimension_semantics<parallel>, #tpu.dimension_semantics<arbitrary>], iteration_bounds = array<i64: 2, 4>, scalar_prefetch = 0 : i64, scratch_operands = 0 : i64, tpu.core_type = #tpu.core_type<tc>, window_params = [{transform_indices = @transform_0, window_bounds = array<i64: 1, 10, 10, 10, 128>}, {pipeline_mode = #tpu.pipeline_mode<synchronous>, transform_indices = @transform_1, window_bounds = array<i64: 27, 128, 128>}, {pipeline_mode = #tpu.pipeline_mode<synchronous>, transform_indices = @transform_2, window_bounds = array<i64: 1, 128>}, {transform_indices = @transform_3, window_bounds = array<i64: 1, 2, 64, 128>}, {transform_indices = @transform_4, window_bounds = array<i64: 1, 1, 2, 128>}]} {
    %c2_i32 = arith.constant 2 : i32
    %0 = arith.muli %arg1, %c2_i32 : i32
    %cst = arith.constant 0.000000e+00 : f32
    %1 = vector.broadcast %cst : f32 to vector<128x128xf32>
    %c0_i32 = arith.constant 0 : i32
    %2 = arith.addi %0, %c0_i32 : i32
    %c0 = arith.constant 0 : index
    %3 = arith.index_cast %2 : i32 to index
    %c0_0 = arith.constant 0 : index
    %c0_1 = arith.constant 0 : index
    %c0_2 = arith.constant 0 : index
    %4 = vector.load %arg2[%c0, %3, %c0_0, %c0_1, %c0_2] : memref<1x10x10x10x128xbf16, #tpu.memory_space<vmem>>, vector<1x2x10x10x128xbf16>
    %5 = vector.shape_cast %4 : vector<1x2x10x10x128xbf16> to vector<2x10x10x128xbf16>
    %6 = vector.extract_strided_slice %5 {offsets = [0, 0, 0, 0], sizes = [2, 8, 8, 128], strides = [1, 1, 1, 1]} : vector<2x10x10x128xbf16> to vector<2x8x8x128xbf16>
    %7 = vector.shape_cast %6 : vector<2x8x8x128xbf16> to vector<128x128xbf16>
    %c0_3 = arith.constant 0 : index
    %c0_4 = arith.constant 0 : index
    %c0_5 = arith.constant 0 : index
    %8 = vector.load %arg3[%c0_3, %c0_4, %c0_5] : memref<27x128x128xbf16, #tpu.memory_space<vmem>>, vector<1x128x128xbf16>
    %9 = vector.shape_cast %8 : vector<1x128x128xbf16> to vector<128x128xbf16>
    %cst_6 = arith.constant dense<0.000000e+00> : vector<128x128xf32>
    %10 = tpu.matmul %7, %9, %cst_6 {dimension_numbers = #tpu.dot_dimension_numbers<[1], [0], [0], [1], [0, 0, 1, 1], [], []>} : vector<128x128xbf16>, vector<128x128xbf16>, vector<128x128xf32> -> vector<128x128xf32>
    %11 = arith.addf %1, %10 : vector<128x128xf32>
    %12 = vector.extract_strided_slice %5 {offsets = [0, 0, 1, 0], sizes = [2, 8, 8, 128], strides = [1, 1, 1, 1]} : vector<2x10x10x128xbf16> to vector<2x8x8x128xbf16>
    %13 = vector.shape_cast %12 : vector<2x8x8x128xbf16> to vector<128x128xbf16>
    %c1 = arith.constant 1 : index
    %c0_7 = arith.constant 0 : index
    %c0_8 = arith.constant 0 : index
    %14 = vector.load %arg3[%c1, %c0_7, %c0_8] : memref<27x128x128xbf16, #tpu.memory_space<vmem>>, vector<1x128x128xbf16>
    %15 = vector.shape_cast %14 : vector<1x128x128xbf16> to vector<128x128xbf16>
    %cst_9 = arith.constant dense<0.000000e+00> : vector<128x128xf32>
    %16 = tpu.matmul %13, %15, %cst_9 {dimension_numbers = #tpu.dot_dimension_numbers<[1], [0], [0], [1], [0, 0, 1, 1], [], []>} : vector<128x128xbf16>, vector<128x128xbf16>, vector<128x128xf32> -> vector<128x128xf32>
    %17 = arith.addf %11, %16 : vector<128x128xf32>
    %18 = vector.extract_strided_slice %5 {offsets = [0, 0, 2, 0], sizes = [2, 8, 8, 128], strides = [1, 1, 1, 1]} : vector<2x10x10x128xbf16> to vector<2x8x8x128xbf16>
    %19 = vector.shape_cast %18 : vector<2x8x8x128xbf16> to vector<128x128xbf16>
    %c2 = arith.constant 2 : index
    %c0_10 = arith.constant 0 : index
    %c0_11 = arith.constant 0 : index
    %20 = vector.load %arg3[%c2, %c0_10, %c0_11] : memref<27x128x128xbf16, #tpu.memory_space<vmem>>, vector<1x128x128xbf16>
    %21 = vector.shape_cast %20 : vector<1x128x128xbf16> to vector<128x128xbf16>
    %cst_12 = arith.constant dense<0.000000e+00> : vector<128x128xf32>
    %22 = tpu.matmul %19, %21, %cst_12 {dimension_numbers = #tpu.dot_dimension_numbers<[1], [0], [0], [1], [0, 0, 1, 1], [], []>} : vector<128x128xbf16>, vector<128x128xbf16>, vector<128x128xf32> -> vector<128x128xf32>
    %23 = arith.addf %17, %22 : vector<128x128xf32>
    %24 = vector.extract_strided_slice %5 {offsets = [0, 1, 0, 0], sizes = [2, 8, 8, 128], strides = [1, 1, 1, 1]} : vector<2x10x10x128xbf16> to vector<2x8x8x128xbf16>
    %25 = vector.shape_cast %24 : vector<2x8x8x128xbf16> to vector<128x128xbf16>
    %c3 = arith.constant 3 : index
    %c0_13 = arith.constant 0 : index
    %c0_14 = arith.constant 0 : index
    %26 = vector.load %arg3[%c3, %c0_13, %c0_14] : memref<27x128x128xbf16, #tpu.memory_space<vmem>>, vector<1x128x128xbf16>
    %27 = vector.shape_cast %26 : vector<1x128x128xbf16> to vector<128x128xbf16>
    %cst_15 = arith.constant dense<0.000000e+00> : vector<128x128xf32>
    %28 = tpu.matmul %25, %27, %cst_15 {dimension_numbers = #tpu.dot_dimension_numbers<[1], [0], [0], [1], [0, 0, 1, 1], [], []>} : vector<128x128xbf16>, vector<128x128xbf16>, vector<128x128xf32> -> vector<128x128xf32>
    %29 = arith.addf %23, %28 : vector<128x128xf32>
    %30 = vector.extract_strided_slice %5 {offsets = [0, 1, 1, 0], sizes = [2, 8, 8, 128], strides = [1, 1, 1, 1]} : vector<2x10x10x128xbf16> to vector<2x8x8x128xbf16>
    %31 = vector.shape_cast %30 : vector<2x8x8x128xbf16> to vector<128x128xbf16>
    %c4 = arith.constant 4 : index
    %c0_16 = arith.constant 0 : index
    %c0_17 = arith.constant 0 : index
    %32 = vector.load %arg3[%c4, %c0_16, %c0_17] : memref<27x128x128xbf16, #tpu.memory_space<vmem>>, vector<1x128x128xbf16>
    %33 = vector.shape_cast %32 : vector<1x128x128xbf16> to vector<128x128xbf16>
    %cst_18 = arith.constant dense<0.000000e+00> : vector<128x128xf32>
    %34 = tpu.matmul %31, %33, %cst_18 {dimension_numbers = #tpu.dot_dimension_numbers<[1], [0], [0], [1], [0, 0, 1, 1], [], []>} : vector<128x128xbf16>, vector<128x128xbf16>, vector<128x128xf32> -> vector<128x128xf32>
    %35 = arith.addf %29, %34 : vector<128x128xf32>
    %36 = vector.extract_strided_slice %5 {offsets = [0, 1, 2, 0], sizes = [2, 8, 8, 128], strides = [1, 1, 1, 1]} : vector<2x10x10x128xbf16> to vector<2x8x8x128xbf16>
    %37 = vector.shape_cast %36 : vector<2x8x8x128xbf16> to vector<128x128xbf16>
    %c5 = arith.constant 5 : index
    %c0_19 = arith.constant 0 : index
    %c0_20 = arith.constant 0 : index
    %38 = vector.load %arg3[%c5, %c0_19, %c0_20] : memref<27x128x128xbf16, #tpu.memory_space<vmem>>, vector<1x128x128xbf16>
    %39 = vector.shape_cast %38 : vector<1x128x128xbf16> to vector<128x128xbf16>
    %cst_21 = arith.constant dense<0.000000e+00> : vector<128x128xf32>
    %40 = tpu.matmul %37, %39, %cst_21 {dimension_numbers = #tpu.dot_dimension_numbers<[1], [0], [0], [1], [0, 0, 1, 1], [], []>} : vector<128x128xbf16>, vector<128x128xbf16>, vector<128x128xf32> -> vector<128x128xf32>
    %41 = arith.addf %35, %40 : vector<128x128xf32>
    %42 = vector.extract_strided_slice %5 {offsets = [0, 2, 0, 0], sizes = [2, 8, 8, 128], strides = [1, 1, 1, 1]} : vector<2x10x10x128xbf16> to vector<2x8x8x128xbf16>
    %43 = vector.shape_cast %42 : vector<2x8x8x128xbf16> to vector<128x128xbf16>
    %c6 = arith.constant 6 : index
    %c0_22 = arith.constant 0 : index
    %c0_23 = arith.constant 0 : index
    %44 = vector.load %arg3[%c6, %c0_22, %c0_23] : memref<27x128x128xbf16, #tpu.memory_space<vmem>>, vector<1x128x128xbf16>
    %45 = vector.shape_cast %44 : vector<1x128x128xbf16> to vector<128x128xbf16>
    %cst_24 = arith.constant dense<0.000000e+00> : vector<128x128xf32>
    %46 = tpu.matmul %43, %45, %cst_24 {dimension_numbers = #tpu.dot_dimension_numbers<[1], [0], [0], [1], [0, 0, 1, 1], [], []>} : vector<128x128xbf16>, vector<128x128xbf16>, vector<128x128xf32> -> vector<128x128xf32>
    %47 = arith.addf %41, %46 : vector<128x128xf32>
    %48 = vector.extract_strided_slice %5 {offsets = [0, 2, 1, 0], sizes = [2, 8, 8, 128], strides = [1, 1, 1, 1]} : vector<2x10x10x128xbf16> to vector<2x8x8x128xbf16>
    %49 = vector.shape_cast %48 : vector<2x8x8x128xbf16> to vector<128x128xbf16>
    %c7 = arith.constant 7 : index
    %c0_25 = arith.constant 0 : index
    %c0_26 = arith.constant 0 : index
    %50 = vector.load %arg3[%c7, %c0_25, %c0_26] : memref<27x128x128xbf16, #tpu.memory_space<vmem>>, vector<1x128x128xbf16>
    %51 = vector.shape_cast %50 : vector<1x128x128xbf16> to vector<128x128xbf16>
    %cst_27 = arith.constant dense<0.000000e+00> : vector<128x128xf32>
    %52 = tpu.matmul %49, %51, %cst_27 {dimension_numbers = #tpu.dot_dimension_numbers<[1], [0], [0], [1], [0, 0, 1, 1], [], []>} : vector<128x128xbf16>, vector<128x128xbf16>, vector<128x128xf32> -> vector<128x128xf32>
    %53 = arith.addf %47, %52 : vector<128x128xf32>
    %54 = vector.extract_strided_slice %5 {offsets = [0, 2, 2, 0], sizes = [2, 8, 8, 128], strides = [1, 1, 1, 1]} : vector<2x10x10x128xbf16> to vector<2x8x8x128xbf16>
    %55 = vector.shape_cast %54 : vector<2x8x8x128xbf16> to vector<128x128xbf16>
    %c8 = arith.constant 8 : index
    %c0_28 = arith.constant 0 : index
    %c0_29 = arith.constant 0 : index
    %56 = vector.load %arg3[%c8, %c0_28, %c0_29] : memref<27x128x128xbf16, #tpu.memory_space<vmem>>, vector<1x128x128xbf16>
    %57 = vector.shape_cast %56 : vector<1x128x128xbf16> to vector<128x128xbf16>
    %cst_30 = arith.constant dense<0.000000e+00> : vector<128x128xf32>
    %58 = tpu.matmul %55, %57, %cst_30 {dimension_numbers = #tpu.dot_dimension_numbers<[1], [0], [0], [1], [0, 0, 1, 1], [], []>} : vector<128x128xbf16>, vector<128x128xbf16>, vector<128x128xf32> -> vector<128x128xf32>
    %59 = arith.addf %53, %58 : vector<128x128xf32>
    %c1_i32 = arith.constant 1 : i32
    %60 = arith.addi %0, %c1_i32 : i32
    %c0_31 = arith.constant 0 : index
    %61 = arith.index_cast %60 : i32 to index
    %c0_32 = arith.constant 0 : index
    %c0_33 = arith.constant 0 : index
    %c0_34 = arith.constant 0 : index
    %62 = vector.load %arg2[%c0_31, %61, %c0_32, %c0_33, %c0_34] : memref<1x10x10x10x128xbf16, #tpu.memory_space<vmem>>, vector<1x2x10x10x128xbf16>
    %63 = vector.shape_cast %62 : vector<1x2x10x10x128xbf16> to vector<2x10x10x128xbf16>
    %64 = vector.extract_strided_slice %63 {offsets = [0, 0, 0, 0], sizes = [2, 8, 8, 128], strides = [1, 1, 1, 1]} : vector<2x10x10x128xbf16> to vector<2x8x8x128xbf16>
    %65 = vector.shape_cast %64 : vector<2x8x8x128xbf16> to vector<128x128xbf16>
    %c9 = arith.constant 9 : index
    %c0_35 = arith.constant 0 : index
    %c0_36 = arith.constant 0 : index
    %66 = vector.load %arg3[%c9, %c0_35, %c0_36] : memref<27x128x128xbf16, #tpu.memory_space<vmem>>, vector<1x128x128xbf16>
    %67 = vector.shape_cast %66 : vector<1x128x128xbf16> to vector<128x128xbf16>
    %cst_37 = arith.constant dense<0.000000e+00> : vector<128x128xf32>
    %68 = tpu.matmul %65, %67, %cst_37 {dimension_numbers = #tpu.dot_dimension_numbers<[1], [0], [0], [1], [0, 0, 1, 1], [], []>} : vector<128x128xbf16>, vector<128x128xbf16>, vector<128x128xf32> -> vector<128x128xf32>
    %69 = arith.addf %59, %68 : vector<128x128xf32>
    %70 = vector.extract_strided_slice %63 {offsets = [0, 0, 1, 0], sizes = [2, 8, 8, 128], strides = [1, 1, 1, 1]} : vector<2x10x10x128xbf16> to vector<2x8x8x128xbf16>
    %71 = vector.shape_cast %70 : vector<2x8x8x128xbf16> to vector<128x128xbf16>
    %c10 = arith.constant 10 : index
    %c0_38 = arith.constant 0 : index
    %c0_39 = arith.constant 0 : index
    %72 = vector.load %arg3[%c10, %c0_38, %c0_39] : memref<27x128x128xbf16, #tpu.memory_space<vmem>>, vector<1x128x128xbf16>
    %73 = vector.shape_cast %72 : vector<1x128x128xbf16> to vector<128x128xbf16>
    %cst_40 = arith.constant dense<0.000000e+00> : vector<128x128xf32>
    %74 = tpu.matmul %71, %73, %cst_40 {dimension_numbers = #tpu.dot_dimension_numbers<[1], [0], [0], [1], [0, 0, 1, 1], [], []>} : vector<128x128xbf16>, vector<128x128xbf16>, vector<128x128xf32> -> vector<128x128xf32>
    %75 = arith.addf %69, %74 : vector<128x128xf32>
    %76 = vector.extract_strided_slice %63 {offsets = [0, 0, 2, 0], sizes = [2, 8, 8, 128], strides = [1, 1, 1, 1]} : vector<2x10x10x128xbf16> to vector<2x8x8x128xbf16>
    %77 = vector.shape_cast %76 : vector<2x8x8x128xbf16> to vector<128x128xbf16>
    %c11 = arith.constant 11 : index
    %c0_41 = arith.constant 0 : index
    %c0_42 = arith.constant 0 : index
    %78 = vector.load %arg3[%c11, %c0_41, %c0_42] : memref<27x128x128xbf16, #tpu.memory_space<vmem>>, vector<1x128x128xbf16>
    %79 = vector.shape_cast %78 : vector<1x128x128xbf16> to vector<128x128xbf16>
    %cst_43 = arith.constant dense<0.000000e+00> : vector<128x128xf32>
    %80 = tpu.matmul %77, %79, %cst_43 {dimension_numbers = #tpu.dot_dimension_numbers<[1], [0], [0], [1], [0, 0, 1, 1], [], []>} : vector<128x128xbf16>, vector<128x128xbf16>, vector<128x128xf32> -> vector<128x128xf32>
    %81 = arith.addf %75, %80 : vector<128x128xf32>
    %82 = vector.extract_strided_slice %63 {offsets = [0, 1, 0, 0], sizes = [2, 8, 8, 128], strides = [1, 1, 1, 1]} : vector<2x10x10x128xbf16> to vector<2x8x8x128xbf16>
    %83 = vector.shape_cast %82 : vector<2x8x8x128xbf16> to vector<128x128xbf16>
    %c12 = arith.constant 12 : index
    %c0_44 = arith.constant 0 : index
    %c0_45 = arith.constant 0 : index
    %84 = vector.load %arg3[%c12, %c0_44, %c0_45] : memref<27x128x128xbf16, #tpu.memory_space<vmem>>, vector<1x128x128xbf16>
    %85 = vector.shape_cast %84 : vector<1x128x128xbf16> to vector<128x128xbf16>
    %cst_46 = arith.constant dense<0.000000e+00> : vector<128x128xf32>
    %86 = tpu.matmul %83, %85, %cst_46 {dimension_numbers = #tpu.dot_dimension_numbers<[1], [0], [0], [1], [0, 0, 1, 1], [], []>} : vector<128x128xbf16>, vector<128x128xbf16>, vector<128x128xf32> -> vector<128x128xf32>
    %87 = arith.addf %81, %86 : vector<128x128xf32>
    %88 = vector.extract_strided_slice %63 {offsets = [0, 1, 1, 0], sizes = [2, 8, 8, 128], strides = [1, 1, 1, 1]} : vector<2x10x10x128xbf16> to vector<2x8x8x128xbf16>
    %89 = vector.shape_cast %88 : vector<2x8x8x128xbf16> to vector<128x128xbf16>
    %c13 = arith.constant 13 : index
    %c0_47 = arith.constant 0 : index
    %c0_48 = arith.constant 0 : index
    %90 = vector.load %arg3[%c13, %c0_47, %c0_48] : memref<27x128x128xbf16, #tpu.memory_space<vmem>>, vector<1x128x128xbf16>
    %91 = vector.shape_cast %90 : vector<1x128x128xbf16> to vector<128x128xbf16>
    %cst_49 = arith.constant dense<0.000000e+00> : vector<128x128xf32>
    %92 = tpu.matmul %89, %91, %cst_49 {dimension_numbers = #tpu.dot_dimension_numbers<[1], [0], [0], [1], [0, 0, 1, 1], [], []>} : vector<128x128xbf16>, vector<128x128xbf16>, vector<128x128xf32> -> vector<128x128xf32>
    %93 = arith.addf %87, %92 : vector<128x128xf32>
    %94 = vector.extract_strided_slice %63 {offsets = [0, 1, 2, 0], sizes = [2, 8, 8, 128], strides = [1, 1, 1, 1]} : vector<2x10x10x128xbf16> to vector<2x8x8x128xbf16>
    %95 = vector.shape_cast %94 : vector<2x8x8x128xbf16> to vector<128x128xbf16>
    %c14 = arith.constant 14 : index
    %c0_50 = arith.constant 0 : index
    %c0_51 = arith.constant 0 : index
    %96 = vector.load %arg3[%c14, %c0_50, %c0_51] : memref<27x128x128xbf16, #tpu.memory_space<vmem>>, vector<1x128x128xbf16>
    %97 = vector.shape_cast %96 : vector<1x128x128xbf16> to vector<128x128xbf16>
    %cst_52 = arith.constant dense<0.000000e+00> : vector<128x128xf32>
    %98 = tpu.matmul %95, %97, %cst_52 {dimension_numbers = #tpu.dot_dimension_numbers<[1], [0], [0], [1], [0, 0, 1, 1], [], []>} : vector<128x128xbf16>, vector<128x128xbf16>, vector<128x128xf32> -> vector<128x128xf32>
    %99 = arith.addf %93, %98 : vector<128x128xf32>
    %100 = vector.extract_strided_slice %63 {offsets = [0, 2, 0, 0], sizes = [2, 8, 8, 128], strides = [1, 1, 1, 1]} : vector<2x10x10x128xbf16> to vector<2x8x8x128xbf16>
    %101 = vector.shape_cast %100 : vector<2x8x8x128xbf16> to vector<128x128xbf16>
    %c15 = arith.constant 15 : index
    %c0_53 = arith.constant 0 : index
    %c0_54 = arith.constant 0 : index
    %102 = vector.load %arg3[%c15, %c0_53, %c0_54] : memref<27x128x128xbf16, #tpu.memory_space<vmem>>, vector<1x128x128xbf16>
    %103 = vector.shape_cast %102 : vector<1x128x128xbf16> to vector<128x128xbf16>
    %cst_55 = arith.constant dense<0.000000e+00> : vector<128x128xf32>
    %104 = tpu.matmul %101, %103, %cst_55 {dimension_numbers = #tpu.dot_dimension_numbers<[1], [0], [0], [1], [0, 0, 1, 1], [], []>} : vector<128x128xbf16>, vector<128x128xbf16>, vector<128x128xf32> -> vector<128x128xf32>
    %105 = arith.addf %99, %104 : vector<128x128xf32>
    %106 = vector.extract_strided_slice %63 {offsets = [0, 2, 1, 0], sizes = [2, 8, 8, 128], strides = [1, 1, 1, 1]} : vector<2x10x10x128xbf16> to vector<2x8x8x128xbf16>
    %107 = vector.shape_cast %106 : vector<2x8x8x128xbf16> to vector<128x128xbf16>
    %c16 = arith.constant 16 : index
    %c0_56 = arith.constant 0 : index
    %c0_57 = arith.constant 0 : index
    %108 = vector.load %arg3[%c16, %c0_56, %c0_57] : memref<27x128x128xbf16, #tpu.memory_space<vmem>>, vector<1x128x128xbf16>
    %109 = vector.shape_cast %108 : vector<1x128x128xbf16> to vector<128x128xbf16>
    %cst_58 = arith.constant dense<0.000000e+00> : vector<128x128xf32>
    %110 = tpu.matmul %107, %109, %cst_58 {dimension_numbers = #tpu.dot_dimension_numbers<[1], [0], [0], [1], [0, 0, 1, 1], [], []>} : vector<128x128xbf16>, vector<128x128xbf16>, vector<128x128xf32> -> vector<128x128xf32>
    %111 = arith.addf %105, %110 : vector<128x128xf32>
    %112 = vector.extract_strided_slice %63 {offsets = [0, 2, 2, 0], sizes = [2, 8, 8, 128], strides = [1, 1, 1, 1]} : vector<2x10x10x128xbf16> to vector<2x8x8x128xbf16>
    %113 = vector.shape_cast %112 : vector<2x8x8x128xbf16> to vector<128x128xbf16>
    %c17 = arith.constant 17 : index
    %c0_59 = arith.constant 0 : index
    %c0_60 = arith.constant 0 : index
    %114 = vector.load %arg3[%c17, %c0_59, %c0_60] : memref<27x128x128xbf16, #tpu.memory_space<vmem>>, vector<1x128x128xbf16>
    %115 = vector.shape_cast %114 : vector<1x128x128xbf16> to vector<128x128xbf16>
    %cst_61 = arith.constant dense<0.000000e+00> : vector<128x128xf32>
    %116 = tpu.matmul %113, %115, %cst_61 {dimension_numbers = #tpu.dot_dimension_numbers<[1], [0], [0], [1], [0, 0, 1, 1], [], []>} : vector<128x128xbf16>, vector<128x128xbf16>, vector<128x128xf32> -> vector<128x128xf32>
    %117 = arith.addf %111, %116 : vector<128x128xf32>
    %c2_i32_62 = arith.constant 2 : i32
    %118 = arith.addi %0, %c2_i32_62 : i32
    %c0_63 = arith.constant 0 : index
    %119 = arith.index_cast %118 : i32 to index
    %c0_64 = arith.constant 0 : index
    %c0_65 = arith.constant 0 : index
    %c0_66 = arith.constant 0 : index
    %120 = vector.load %arg2[%c0_63, %119, %c0_64, %c0_65, %c0_66] : memref<1x10x10x10x128xbf16, #tpu.memory_space<vmem>>, vector<1x2x10x10x128xbf16>
    %121 = vector.shape_cast %120 : vector<1x2x10x10x128xbf16> to vector<2x10x10x128xbf16>
    %122 = vector.extract_strided_slice %121 {offsets = [0, 0, 0, 0], sizes = [2, 8, 8, 128], strides = [1, 1, 1, 1]} : vector<2x10x10x128xbf16> to vector<2x8x8x128xbf16>
    %123 = vector.shape_cast %122 : vector<2x8x8x128xbf16> to vector<128x128xbf16>
    %c18 = arith.constant 18 : index
    %c0_67 = arith.constant 0 : index
    %c0_68 = arith.constant 0 : index
    %124 = vector.load %arg3[%c18, %c0_67, %c0_68] : memref<27x128x128xbf16, #tpu.memory_space<vmem>>, vector<1x128x128xbf16>
    %125 = vector.shape_cast %124 : vector<1x128x128xbf16> to vector<128x128xbf16>
    %cst_69 = arith.constant dense<0.000000e+00> : vector<128x128xf32>
    %126 = tpu.matmul %123, %125, %cst_69 {dimension_numbers = #tpu.dot_dimension_numbers<[1], [0], [0], [1], [0, 0, 1, 1], [], []>} : vector<128x128xbf16>, vector<128x128xbf16>, vector<128x128xf32> -> vector<128x128xf32>
    %127 = arith.addf %117, %126 : vector<128x128xf32>
    %128 = vector.extract_strided_slice %121 {offsets = [0, 0, 1, 0], sizes = [2, 8, 8, 128], strides = [1, 1, 1, 1]} : vector<2x10x10x128xbf16> to vector<2x8x8x128xbf16>
    %129 = vector.shape_cast %128 : vector<2x8x8x128xbf16> to vector<128x128xbf16>
    %c19 = arith.constant 19 : index
    %c0_70 = arith.constant 0 : index
    %c0_71 = arith.constant 0 : index
    %130 = vector.load %arg3[%c19, %c0_70, %c0_71] : memref<27x128x128xbf16, #tpu.memory_space<vmem>>, vector<1x128x128xbf16>
    %131 = vector.shape_cast %130 : vector<1x128x128xbf16> to vector<128x128xbf16>
    %cst_72 = arith.constant dense<0.000000e+00> : vector<128x128xf32>
    %132 = tpu.matmul %129, %131, %cst_72 {dimension_numbers = #tpu.dot_dimension_numbers<[1], [0], [0], [1], [0, 0, 1, 1], [], []>} : vector<128x128xbf16>, vector<128x128xbf16>, vector<128x128xf32> -> vector<128x128xf32>
    %133 = arith.addf %127, %132 : vector<128x128xf32>
    %134 = vector.extract_strided_slice %121 {offsets = [0, 0, 2, 0], sizes = [2, 8, 8, 128], strides = [1, 1, 1, 1]} : vector<2x10x10x128xbf16> to vector<2x8x8x128xbf16>
    %135 = vector.shape_cast %134 : vector<2x8x8x128xbf16> to vector<128x128xbf16>
    %c20 = arith.constant 20 : index
    %c0_73 = arith.constant 0 : index
    %c0_74 = arith.constant 0 : index
    %136 = vector.load %arg3[%c20, %c0_73, %c0_74] : memref<27x128x128xbf16, #tpu.memory_space<vmem>>, vector<1x128x128xbf16>
    %137 = vector.shape_cast %136 : vector<1x128x128xbf16> to vector<128x128xbf16>
    %cst_75 = arith.constant dense<0.000000e+00> : vector<128x128xf32>
    %138 = tpu.matmul %135, %137, %cst_75 {dimension_numbers = #tpu.dot_dimension_numbers<[1], [0], [0], [1], [0, 0, 1, 1], [], []>} : vector<128x128xbf16>, vector<128x128xbf16>, vector<128x128xf32> -> vector<128x128xf32>
    %139 = arith.addf %133, %138 : vector<128x128xf32>
    %140 = vector.extract_strided_slice %121 {offsets = [0, 1, 0, 0], sizes = [2, 8, 8, 128], strides = [1, 1, 1, 1]} : vector<2x10x10x128xbf16> to vector<2x8x8x128xbf16>
    %141 = vector.shape_cast %140 : vector<2x8x8x128xbf16> to vector<128x128xbf16>
    %c21 = arith.constant 21 : index
    %c0_76 = arith.constant 0 : index
    %c0_77 = arith.constant 0 : index
    %142 = vector.load %arg3[%c21, %c0_76, %c0_77] : memref<27x128x128xbf16, #tpu.memory_space<vmem>>, vector<1x128x128xbf16>
    %143 = vector.shape_cast %142 : vector<1x128x128xbf16> to vector<128x128xbf16>
    %cst_78 = arith.constant dense<0.000000e+00> : vector<128x128xf32>
    %144 = tpu.matmul %141, %143, %cst_78 {dimension_numbers = #tpu.dot_dimension_numbers<[1], [0], [0], [1], [0, 0, 1, 1], [], []>} : vector<128x128xbf16>, vector<128x128xbf16>, vector<128x128xf32> -> vector<128x128xf32>
    %145 = arith.addf %139, %144 : vector<128x128xf32>
    %146 = vector.extract_strided_slice %121 {offsets = [0, 1, 1, 0], sizes = [2, 8, 8, 128], strides = [1, 1, 1, 1]} : vector<2x10x10x128xbf16> to vector<2x8x8x128xbf16>
    %147 = vector.shape_cast %146 : vector<2x8x8x128xbf16> to vector<128x128xbf16>
    %c22 = arith.constant 22 : index
    %c0_79 = arith.constant 0 : index
    %c0_80 = arith.constant 0 : index
    %148 = vector.load %arg3[%c22, %c0_79, %c0_80] : memref<27x128x128xbf16, #tpu.memory_space<vmem>>, vector<1x128x128xbf16>
    %149 = vector.shape_cast %148 : vector<1x128x128xbf16> to vector<128x128xbf16>
    %cst_81 = arith.constant dense<0.000000e+00> : vector<128x128xf32>
    %150 = tpu.matmul %147, %149, %cst_81 {dimension_numbers = #tpu.dot_dimension_numbers<[1], [0], [0], [1], [0, 0, 1, 1], [], []>} : vector<128x128xbf16>, vector<128x128xbf16>, vector<128x128xf32> -> vector<128x128xf32>
    %151 = arith.addf %145, %150 : vector<128x128xf32>
    %152 = vector.extract_strided_slice %121 {offsets = [0, 1, 2, 0], sizes = [2, 8, 8, 128], strides = [1, 1, 1, 1]} : vector<2x10x10x128xbf16> to vector<2x8x8x128xbf16>
    %153 = vector.shape_cast %152 : vector<2x8x8x128xbf16> to vector<128x128xbf16>
    %c23 = arith.constant 23 : index
    %c0_82 = arith.constant 0 : index
    %c0_83 = arith.constant 0 : index
    %154 = vector.load %arg3[%c23, %c0_82, %c0_83] : memref<27x128x128xbf16, #tpu.memory_space<vmem>>, vector<1x128x128xbf16>
    %155 = vector.shape_cast %154 : vector<1x128x128xbf16> to vector<128x128xbf16>
    %cst_84 = arith.constant dense<0.000000e+00> : vector<128x128xf32>
    %156 = tpu.matmul %153, %155, %cst_84 {dimension_numbers = #tpu.dot_dimension_numbers<[1], [0], [0], [1], [0, 0, 1, 1], [], []>} : vector<128x128xbf16>, vector<128x128xbf16>, vector<128x128xf32> -> vector<128x128xf32>
    %157 = arith.addf %151, %156 : vector<128x128xf32>
    %158 = vector.extract_strided_slice %121 {offsets = [0, 2, 0, 0], sizes = [2, 8, 8, 128], strides = [1, 1, 1, 1]} : vector<2x10x10x128xbf16> to vector<2x8x8x128xbf16>
    %159 = vector.shape_cast %158 : vector<2x8x8x128xbf16> to vector<128x128xbf16>
    %c24 = arith.constant 24 : index
    %c0_85 = arith.constant 0 : index
    %c0_86 = arith.constant 0 : index
    %160 = vector.load %arg3[%c24, %c0_85, %c0_86] : memref<27x128x128xbf16, #tpu.memory_space<vmem>>, vector<1x128x128xbf16>
    %161 = vector.shape_cast %160 : vector<1x128x128xbf16> to vector<128x128xbf16>
    %cst_87 = arith.constant dense<0.000000e+00> : vector<128x128xf32>
    %162 = tpu.matmul %159, %161, %cst_87 {dimension_numbers = #tpu.dot_dimension_numbers<[1], [0], [0], [1], [0, 0, 1, 1], [], []>} : vector<128x128xbf16>, vector<128x128xbf16>, vector<128x128xf32> -> vector<128x128xf32>
    %163 = arith.addf %157, %162 : vector<128x128xf32>
    %164 = vector.extract_strided_slice %121 {offsets = [0, 2, 1, 0], sizes = [2, 8, 8, 128], strides = [1, 1, 1, 1]} : vector<2x10x10x128xbf16> to vector<2x8x8x128xbf16>
    %165 = vector.shape_cast %164 : vector<2x8x8x128xbf16> to vector<128x128xbf16>
    %c25 = arith.constant 25 : index
    %c0_88 = arith.constant 0 : index
    %c0_89 = arith.constant 0 : index
    %166 = vector.load %arg3[%c25, %c0_88, %c0_89] : memref<27x128x128xbf16, #tpu.memory_space<vmem>>, vector<1x128x128xbf16>
    %167 = vector.shape_cast %166 : vector<1x128x128xbf16> to vector<128x128xbf16>
    %cst_90 = arith.constant dense<0.000000e+00> : vector<128x128xf32>
    %168 = tpu.matmul %165, %167, %cst_90 {dimension_numbers = #tpu.dot_dimension_numbers<[1], [0], [0], [1], [0, 0, 1, 1], [], []>} : vector<128x128xbf16>, vector<128x128xbf16>, vector<128x128xf32> -> vector<128x128xf32>
    %169 = arith.addf %163, %168 : vector<128x128xf32>
    %170 = vector.extract_strided_slice %121 {offsets = [0, 2, 2, 0], sizes = [2, 8, 8, 128], strides = [1, 1, 1, 1]} : vector<2x10x10x128xbf16> to vector<2x8x8x128xbf16>
    %171 = vector.shape_cast %170 : vector<2x8x8x128xbf16> to vector<128x128xbf16>
    %c26 = arith.constant 26 : index
    %c0_91 = arith.constant 0 : index
    %c0_92 = arith.constant 0 : index
    %172 = vector.load %arg3[%c26, %c0_91, %c0_92] : memref<27x128x128xbf16, #tpu.memory_space<vmem>>, vector<1x128x128xbf16>
    %173 = vector.shape_cast %172 : vector<1x128x128xbf16> to vector<128x128xbf16>
    %cst_93 = arith.constant dense<0.000000e+00> : vector<128x128xf32>
    %174 = tpu.matmul %171, %173, %cst_93 {dimension_numbers = #tpu.dot_dimension_numbers<[1], [0], [0], [1], [0, 0, 1, 1], [], []>} : vector<128x128xbf16>, vector<128x128xbf16>, vector<128x128xf32> -> vector<128x128xf32>
    %175 = arith.addf %169, %174 : vector<128x128xf32>
    %c0_94 = arith.constant 0 : index
    %c0_95 = arith.constant 0 : index
    %176 = vector.load %arg4[%c0_94, %c0_95] : memref<1x128xf32, #tpu.memory_space<vmem>>, vector<1x128xf32>
    %177 = vector.broadcast %176 : vector<1x128xf32> to vector<128x128xf32>
    %178 = arith.addf %175, %177 : vector<128x128xf32>
    %179 = vector.shape_cast %178 : vector<128x128xf32> to vector<1x2x64x128xf32>
    %c0_96 = arith.constant 0 : index
    %c0_97 = arith.constant 0 : index
    %c0_98 = arith.constant 0 : index
    %c0_99 = arith.constant 0 : index
    %180 = vector.load %arg5[%c0_96, %c0_97, %c0_98, %c0_99] : memref<1x2x64x128xf32, #tpu.memory_space<vmem>>, vector<1x2x64x128xf32>
    tpu.vector_store %arg5[%c0_96, %c0_97, %c0_98, %c0_99], %179 {strides = array<i32>} : memref<1x2x64x128xf32, #tpu.memory_space<vmem>>, vector<1x2x64x128xf32>,
    %cst_100 = arith.constant dense<0.000000e+00> : vector<128xf32>
    %181 = vector.multi_reduction <add>, %178, %cst_100 [0] : vector<128x128xf32> to vector<128xf32>
    %182 = arith.mulf %178, %178 : vector<128x128xf32>
    %cst_101 = arith.constant dense<0.000000e+00> : vector<128xf32>
    %183 = vector.multi_reduction <add>, %182, %cst_101 [0] : vector<128x128xf32> to vector<128xf32>
    %184 = vector.shape_cast %181 : vector<128xf32> to vector<1x128xf32>
    %185 = vector.shape_cast %183 : vector<128xf32> to vector<1x128xf32>
    %186 = tpu.concatenate %184, %185 in 0 : vector<1x128xf32>, vector<1x128xf32> -> vector<2x128xf32>
    %187 = vector.shape_cast %186 : vector<2x128xf32> to vector<1x1x2x128xf32>
    %c0_102 = arith.constant 0 : index
    %c0_103 = arith.constant 0 : index
    %c0_104 = arith.constant 0 : index
    %c0_105 = arith.constant 0 : index
    %188 = vector.load %arg6[%c0_102, %c0_103, %c0_104, %c0_105] : memref<1x1x2x128xf32, #tpu.memory_space<vmem>>, vector<1x1x2x128xf32>
    tpu.vector_store %arg6[%c0_102, %c0_103, %c0_104, %c0_105], %187 {strides = array<i32>} : memref<1x1x2x128xf32, #tpu.memory_space<vmem>>, vector<1x1x2x128xf32>,
    return
  }
  func.func @transform_0(%arg0: i32, %arg1: i32) -> (i32, i32, i32, i32, i32) {
    %c0_i32 = arith.constant 0 : i32
    %c0_i32_0 = arith.constant 0 : i32
    %c0_i32_1 = arith.constant 0 : i32
    %c0_i32_2 = arith.constant 0 : i32
    %c0_i32_3 = arith.constant 0 : i32
    return %arg0, %c0_i32, %c0_i32_0, %c0_i32_1, %c0_i32_2 : i32, i32, i32, i32, i32
  }
  func.func @transform_1(%arg0: i32, %arg1: i32) -> (i32, i32, i32) {
    %c0_i32 = arith.constant 0 : i32
    %c0_i32_0 = arith.constant 0 : i32
    %c0_i32_1 = arith.constant 0 : i32
    %c0_i32_2 = arith.constant 0 : i32
    return %c0_i32, %c0_i32_0, %c0_i32_1 : i32, i32, i32
  }
  func.func @transform_2(%arg0: i32, %arg1: i32) -> (i32, i32) {
    %c0_i32 = arith.constant 0 : i32
    %c0_i32_0 = arith.constant 0 : i32
    %c0_i32_1 = arith.constant 0 : i32
    return %c0_i32, %c0_i32_0 : i32, i32
  }
  func.func @transform_3(%arg0: i32, %arg1: i32) -> (i32, i32, i32, i32) {
    %c0_i32 = arith.constant 0 : i32
    %c0_i32_0 = arith.constant 0 : i32
    %c0_i32_1 = arith.constant 0 : i32
    return %arg0, %arg1, %c0_i32, %c0_i32_0 : i32, i32, i32, i32
  }
  func.func @transform_4(%arg0: i32, %arg1: i32) -> (i32, i32, i32, i32) {
    %c0_i32 = arith.constant 0 : i32
    %c0_i32_0 = arith.constant 0 : i32
    %c0_i32_1 = arith.constant 0 : i32
    return %arg0, %arg1, %c0_i32, %c0_i32_0 : i32, i32, i32, i32
  }
}

module attributes {stable_mosaic.version = 11 : i64} {
  func.func @_norm_act_kernel(%arg0: i32, %arg1: i32, %arg2: memref<1x2x64x128xf32, #tpu.memory_space<vmem>>, %arg3: memref<1x1x128xf32, #tpu.memory_space<vmem>>, %arg4: memref<1x1x128xf32, #tpu.memory_space<vmem>>, %arg5: memref<1x1x128xf32, #tpu.memory_space<vmem>>, %arg6: memref<1x2x64x128xf32, #tpu.memory_space<vmem>>) attributes {dimension_semantics = [#tpu.dimension_semantics<parallel>, #tpu.dimension_semantics<parallel>], iteration_bounds = array<i64: 2, 4>, scalar_prefetch = 0 : i64, scratch_operands = 0 : i64, tpu.core_type = #tpu.core_type<tc>, window_params = [{transform_indices = @transform_0, window_bounds = array<i64: 1, 2, 64, 128>}, {transform_indices = @transform_1, window_bounds = array<i64: 1, 1, 128>}, {transform_indices = @transform_2, window_bounds = array<i64: 1, 1, 128>}, {transform_indices = @transform_3, window_bounds = array<i64: 1, 1, 128>}, {transform_indices = @transform_4, window_bounds = array<i64: 1, 2, 64, 128>}]} {
    %c0 = arith.constant 0 : index
    %c0_0 = arith.constant 0 : index
    %c0_1 = arith.constant 0 : index
    %c0_2 = arith.constant 0 : index
    %0 = vector.load %arg2[%c0, %c0_0, %c0_1, %c0_2] : memref<1x2x64x128xf32, #tpu.memory_space<vmem>>, vector<1x2x64x128xf32>
    %c0_3 = arith.constant 0 : index
    %c0_4 = arith.constant 0 : index
    %c0_5 = arith.constant 0 : index
    %1 = vector.load %arg3[%c0_3, %c0_4, %c0_5] : memref<1x1x128xf32, #tpu.memory_space<vmem>>, vector<1x1x128xf32>
    %2 = vector.shape_cast %1 : vector<1x1x128xf32> to vector<1x1x1x128xf32>
    %3 = vector.broadcast %2 : vector<1x1x1x128xf32> to vector<1x2x64x128xf32>
    %4 = arith.mulf %0, %3 : vector<1x2x64x128xf32>
    %c0_6 = arith.constant 0 : index
    %c0_7 = arith.constant 0 : index
    %c0_8 = arith.constant 0 : index
    %5 = vector.load %arg4[%c0_6, %c0_7, %c0_8] : memref<1x1x128xf32, #tpu.memory_space<vmem>>, vector<1x1x128xf32>
    %6 = vector.shape_cast %5 : vector<1x1x128xf32> to vector<1x1x1x128xf32>
    %7 = vector.broadcast %6 : vector<1x1x1x128xf32> to vector<1x2x64x128xf32>
    %8 = arith.addf %4, %7 : vector<1x2x64x128xf32>
    %cst = arith.constant 0.000000e+00 : f32
    %9 = vector.broadcast %cst : f32 to vector<1x2x64x128xf32>
    %10 = arith.cmpf ogt, %8, %9 : vector<1x2x64x128xf32>
    %cst_9 = arith.constant 1.000000e-01 : f32
    %11 = vector.broadcast %cst_9 : f32 to vector<1x2x64x128xf32>
    %12 = arith.mulf %11, %8 : vector<1x2x64x128xf32>
    %13 = arith.select %10, %8, %12 : vector<1x2x64x128xi1>, vector<1x2x64x128xf32>
    %c0_10 = arith.constant 0 : index
    %c0_11 = arith.constant 0 : index
    %c0_12 = arith.constant 0 : index
    %14 = vector.load %arg5[%c0_10, %c0_11, %c0_12] : memref<1x1x128xf32, #tpu.memory_space<vmem>>, vector<1x1x128xf32>
    %15 = vector.shape_cast %14 : vector<1x1x128xf32> to vector<1x1x1x128xf32>
    %16 = vector.broadcast %15 : vector<1x1x1x128xf32> to vector<1x2x64x128xf32>
    %17 = arith.addf %13, %16 : vector<1x2x64x128xf32>
    %c0_13 = arith.constant 0 : index
    %c0_14 = arith.constant 0 : index
    %c0_15 = arith.constant 0 : index
    %c0_16 = arith.constant 0 : index
    %18 = vector.load %arg6[%c0_13, %c0_14, %c0_15, %c0_16] : memref<1x2x64x128xf32, #tpu.memory_space<vmem>>, vector<1x2x64x128xf32>
    tpu.vector_store %arg6[%c0_13, %c0_14, %c0_15, %c0_16], %17 {strides = array<i32>} : memref<1x2x64x128xf32, #tpu.memory_space<vmem>>, vector<1x2x64x128xf32>,
    return
  }
  func.func @transform_0(%arg0: i32, %arg1: i32) -> (i32, i32, i32, i32) {
    %c0_i32 = arith.constant 0 : i32
    %c0_i32_0 = arith.constant 0 : i32
    %c0_i32_1 = arith.constant 0 : i32
    return %arg0, %arg1, %c0_i32, %c0_i32_0 : i32, i32, i32, i32
  }
  func.func @transform_1(%arg0: i32, %arg1: i32) -> (i32, i32, i32) {
    %c0_i32 = arith.constant 0 : i32
    %c0_i32_0 = arith.constant 0 : i32
    %c0_i32_1 = arith.constant 0 : i32
    return %arg0, %c0_i32, %c0_i32_0 : i32, i32, i32
  }
  func.func @transform_2(%arg0: i32, %arg1: i32) -> (i32, i32, i32) {
    %c0_i32 = arith.constant 0 : i32
    %c0_i32_0 = arith.constant 0 : i32
    %c0_i32_1 = arith.constant 0 : i32
    return %arg0, %c0_i32, %c0_i32_0 : i32, i32, i32
  }
  func.func @transform_3(%arg0: i32, %arg1: i32) -> (i32, i32, i32) {
    %c0_i32 = arith.constant 0 : i32
    %c0_i32_0 = arith.constant 0 : i32
    %c0_i32_1 = arith.constant 0 : i32
    return %arg0, %c0_i32, %c0_i32_0 : i32, i32, i32
  }
  func.func @transform_4(%arg0: i32, %arg1: i32) -> (i32, i32, i32, i32) {
    %c0_i32 = arith.constant 0 : i32
    %c0_i32_0 = arith.constant 0 : i32
    %c0_i32_1 = arith.constant 0 : i32
    return %arg0, %arg1, %c0_i32, %c0_i32_0 : i32, i32, i32, i32
  }
}

</mosaic_0001>

<bundles_post_ra>
// kernel: upcat_forward.5
= control target key start
LH: loop header
LB: loop body
LE: loop exit
PB: predicated region body
PF: predicated region fallthrough
CT: control target
= control target key end

     0   :  { %8 = vsyncpa [#allocation3], 0  ;;  %s457_s0 = inlined_call_operand.vmem [shape: bf16[128,8], index: 0, kind: input, shape index: {}]   ;;  %s458_s1 = inlined_call_operand.hbm [shape: bf16[8,128], index: 1, kind: input, shape index: {}]   ;;  %s459_s2 = inlined_call_operand.hbm [shape: f32[1,128], index: 2, kind: input, shape index: {}]   ;;  %s460_s3 = inlined_call_operand.vmem [shape: bf16[128,128], index: 3, kind: output, shape index: {}]  }
   0x1   :  { %s17_s14 = sshll.u32 %s458_s1, 4  ;;  %s18_s14 = int_to_ptr.hbm [resolvable:$true] %s17_s14 }
   0x2   :  { %9 = vsyncpa [#allocation5], 0  ;;  %s373_s15 = smov [#allocation2]   ;;  %s28_s19 = sshll.u32 %s459_s2, 4  ;;  %s29_s19 = int_to_ptr.hbm [resolvable:$true] %s28_s19 }
   0x3   :  { %s19_s16 = sshll.u32 %s373_s15, 4  ;;  %s374_s20 = smov [#allocation4]   ;;  %s20_s16 = int_to_ptr.vmem [resolvable:$true] %s19_s16 }
   0x4   :  { %22 = dma.hbm_to_vmem [thread:$0]  %s18_s14, 64, %s20_s16, [#allocation3]  }
   0x5   :  { %s30_s21 = sshll.u32 %s374_s20, 4  ;;  %s31_s21 = int_to_ptr.vmem [resolvable:$true] %s30_s21 }
   0x6   :  { %33 = dma.hbm_to_vmem [thread:$0]  %s29_s19, 16, %s31_s21, [#allocation5]  }
   0x7   :  { %369 = dma.done.wait [#allocation3], 64  }
   0x8   :  { %370 = vsyncadd [#allocation3], 4294967232 }
   0x9   :  { %371 = dma.done.wait [#allocation5], 16  }
   0xa   :  { %372 = vsyncadd [#allocation5], 4294967280  ;;  %vm129_vm0 = vcmask 1043456   ;;  %v59_v0 = vld [vmem:[#allocation2] sm:$0xf]  ;;  %v262_v3 = vld [vmem:[%s457_s0 + $0x10] sm:$0xff] }
   0xb   :  { %v131_v1 = vsel %vm129_vm0, %v59_v0, 0  ;;  %v260_v2 = vld [vmem:[%s457_s0] sm:$0xff]  ;;  %vm104_vm1 = vcmask 64512   ;;  %v266_v5 = vld [vmem:[%s457_s0 + $0x30] sm:$0xff]  ;;  %v261_v6 = vld [vmem:[%s457_s0 + $0x8] sm:$0xff] }
   0xc   :  { %140 = vmatpush.bf16.msra.mxu0 %v131_v1  ;;  %315 = vmatpush.bf16.msra.mxu1 %v131_v1  ;;  %v264_v4 = vld [vmem:[%s457_s0 + $0x20] sm:$0xff]  ;;  %v263_v7 = vld [vmem:[%s457_s0 + $0x18] sm:$0xff]  ;;  %v265_v8 = vld [vmem:[%s457_s0 + $0x28] sm:$0xff] }
   0xd   :  { %316 = vmatpush.bf16.msra.mxu2 %v131_v1  ;;  %317 = vmatpush.bf16.msra.mxu3 %v131_v1  ;;  %v267_v9 = vld [vmem:[%s457_s0 + $0x38] sm:$0xff]  ;;  %v320_v12 = vld [vmem:[#allocation4] ss:$0 sm:$0xff] }
   0xf   :  { %252 = vmatmul.msk.bf16.vlgmr.msra.gmra.mxu0 %vm104_vm1, %v260_v2  ;;  %254 = vmatmul.msk.bf16.vlgmr.msra.gmra.mxu1 %vm104_vm1, %v262_v3 }
  0x10   :  { %256 = vmatmul.msk.bf16.vlgmr.msra.gmra.mxu2 %vm104_vm1, %v264_v4  ;;  %258 = vmatmul.msk.bf16.vlgmr.msra.gmra.mxu3 %vm104_vm1, %v266_v5 }
  0x1f   :  { %253 = vmatmul.msk.bf16.gmra.mxu0 %vm104_vm1, %v261_v6  ;;  %255 = vmatmul.msk.bf16.gmra.mxu1 %vm104_vm1, %v263_v7 }
  0x20   :  { %257 = vmatmul.msk.bf16.gmra.mxu2 %vm104_vm1, %v265_v8  ;;  %259 = vmatmul.msk.bf16.gmra.mxu3 %vm104_vm1, %v267_v9 }
  0x8c   :  { %v142_v10 = vpop.f32.mrf.mxu0  ;;  %v152_v11 = vpop.f32.mrf.mxu1 }
  0x8d   :  { %v143_v17 = vadd.f32 %v320_v12, %v142_v10  ;;  %v153_v18 = vadd.f32 %v320_v12, %v152_v11 }
  0x93   :  { %v162_v13 = vpop.f32.mrf.mxu2  ;;  %v172_v14 = vpop.f32.mrf.mxu3 }
  0x94   :  { %v144_v15 = vpop.f32.mrf.mxu0  ;;  %v154_v16 = vpop.f32.mrf.mxu1  ;;  %v163_v25 = vadd.f32 %v320_v12, %v162_v13  ;;  %v173_v26 = vadd.f32 %v320_v12, %v172_v14 }
  0x95   :  { %v145_v19 = vadd.f32 %v320_v12, %v144_v15  ;;  %v155_v20 = vadd.f32 %v320_v12, %v154_v16 }
  0x97   :  { %v271_v21 = vpack.c.bf16 %v145_v19, %v143_v17  ;;  %v281_v22 = vpack.c.bf16 %v155_v20, %v153_v18 }
  0x99   :  { %272 = vst [vmem:[%s460_s3] sm:$0xff] %v271_v21  }
  0x9a   :  { %309 = vst [vmem:[%s460_s3 + $0x10] sm:$0xff] %v281_v22  }
  0x9b   :  { %v164_v23 = vpop.f32.mrf.mxu2  ;;  %v174_v24 = vpop.f32.mrf.mxu3 }
  0x9c   :  { %v165_v27 = vadd.f32 %v320_v12, %v164_v23  ;;  %v175_v28 = vadd.f32 %v320_v12, %v174_v24  ;;  %v147_v29 = vpop.f32.mrf.mxu0  ;;  %v157_v30 = vpop.f32.mrf.mxu1 }
  0x9d   :  { %v148_v37 = vadd.f32 %v320_v12, %v147_v29  ;;  %v158_v38 = vadd.f32 %v320_v12, %v157_v30 }
  0x9e   :  { %v291_v31 = vpack.c.bf16 %v165_v27, %v163_v25  ;;  %v301_v32 = vpack.c.bf16 %v175_v28, %v173_v26 }
  0xa0   :  { %311 = vst [vmem:[%s460_s3 + $0x20] sm:$0xff] %v291_v31  }
  0xa1   :  { %313 = vst [vmem:[%s460_s3 + $0x30] sm:$0xff] %v301_v32  }
  0xa3   :  { %v167_v33 = vpop.f32.mrf.mxu2  ;;  %v177_v34 = vpop.f32.mrf.mxu3 }
  0xa4   :  { %v149_v35 = vpop.f32.mrf.mxu0  ;;  %v159_v36 = vpop.f32.mrf.mxu1  ;;  %v168_v45 = vadd.f32 %v320_v12, %v167_v33  ;;  %v178_v46 = vadd.f32 %v320_v12, %v177_v34 }
  0xa5   :  { %v150_v39 = vadd.f32 %v320_v12, %v149_v35  ;;  %v160_v40 = vadd.f32 %v320_v12, %v159_v36 }
  0xa7   :  { %v276_v41 = vpack.c.bf16 %v150_v39, %v148_v37  ;;  %v286_v42 = vpack.c.bf16 %v160_v40, %v158_v38 }
  0xa9   :  { %308 = vst [vmem:[%s460_s3 + $0x8] sm:$0xff] %v276_v41  }
  0xaa   :  { %310 = vst [vmem:[%s460_s3 + $0x18] sm:$0xff] %v286_v42  }
  0xab   :  { %v169_v43 = vpop.f32.mrf.mxu2  ;;  %v179_v44 = vpop.f32.mrf.mxu3 }
  0xac   :  { %v170_v47 = vadd.f32 %v320_v12, %v169_v43  ;;  %v180_v48 = vadd.f32 %v320_v12, %v179_v44 }
  0xae   :  { %v296_v49 = vpack.c.bf16 %v170_v47, %v168_v45  ;;  %v306_v50 = vpack.c.bf16 %v180_v48, %v178_v46 }
  0xb0   :  { %312 = vst [vmem:[%s460_s3 + $0x28] sm:$0xff] %v296_v49  }
  0xb1   :  { %314 = vst [vmem:[%s460_s3 + $0x38] sm:$0xff] %v306_v50  }
  0xb2   :  { %218 = vsyncpa [#allocation3], 1 }
  0xb3   :  { %219 = vsyncpa [#allocation5], 1 }

// kernel: upcat_forward.7
= control target key start
LH: loop header
LB: loop body
LE: loop exit
PB: predicated region body
PF: predicated region fallthrough
CT: control target
= control target key end

     0   :  { %s736_s15 = smov 0   ;;  %s738_s16 = smov 0   ;;  %s890_s0 = inlined_call_operand.vmem [shape: f32[2,8,64,128], index: 0, kind: input, shape index: {}]   ;;  %s891_s1 = inlined_call_operand.vmem [shape: f32[2,1,128], index: 1, kind: input, shape index: {}]   ;;  %s892_s2 = inlined_call_operand.vmem [shape: f32[2,1,128], index: 2, kind: input, shape index: {}]   ;;  %s893_s3 = inlined_call_operand.vmem [shape: f32[2,1,128], index: 3, kind: input, shape index: {}]   ;;  %s894_s4 = inlined_call_operand.vmem [shape: bf16[2,8,64,128], index: 4, kind: output, shape index: {}]  }
   0x1   :  { %s740_s17 = smov 0   ;;  %s742_s18 = smov 0  }
   0x2   :  { %s744_s19 = smov 0  }
   0x3 LB: > { %s23_s20 = sadd.s32 1, %s701_s17  ;;  %s26_s21 = sadd.s32 1, %s705_s18  ;;  %s709_s19 = sphi %s744_s19, %s14_s19   ;;  %s705_s18 = sphi %s742_s18, %s898_s18   ;;  %s701_s17 = sphi %s740_s17, %s897_s17   ;;  %s697_s16 = sphi %s738_s16, %s896_s16   ;;  %s693_s15 = sphi %s736_s15, %s895_s15  }
   0x4   : > { %p24_p0 = scmp.ge.s32.totalorder %s23_s20, 4  ;;  %p570_p1 = scmp.ge.s32.totalorder %s709_s19, 1 }
   0x5   : > { %p208_p2 = scmp.lt.s32.totalorder %s709_s19, 9 }
   0x6   : > { %s900_s20 = smov (%p24_p0, %s23_s20), 0  ;;  %s902_s21 = smov (!%p24_p0, %s26_s21), %s705_s18 }
   0x7   : > { %p209_p3 = pnand %p570_p1, %p208_p2  ;;  %p28_p4 = scmp.ge.s32.totalorder %s902_s21, 2 }
   0x8   : > { %s571_s22 = sshll.u32 (!%p209_p3), %s693_s15, 1  ;;  %p254_p5 = scmp.lt.s32.totalorder (!%p209_p3), %s697_s16, 1 }
   0x9   : > { %s904_s21 = smov (%p28_p4, %s902_s21), 0  ;;  %212 = sbr.rel (%p209_p3) target bundleno = 53 (0x35), region = 36 }
   0xa   : > { %p256_p6 = scmp.lt.s32.totalorder (!%p209_p3), %s571_s22, 7 }
   0xe   : > { %s906_s16 = smov (!%p254_p5, %s697_s16), 1  ;;  %s908_s22 = smov (!%p256_p6, %s571_s22), 7 }
   0xf   : > { %s573_s23 = sshll.u32 %s906_s16, 6  ;;  %s266_s26 = scalar_lea.vmem %s891_s1, %s906_s16 }
  0x10   : > { %s572_s27 = sshll.u32 %s908_s22, 3  ;;  %s269_s30 = scalar_lea.vmem %s892_s2, %s906_s16  ;;  %v783_v0 = vld [vmem:[%s266_s26] ss:$0 sm:$0xff] }
  0x11   : > { %s777_s5 = sadd.s32 %s573_s23, %s572_s27  ;;  %s272_s8 = scalar_lea.vmem %s893_s3, %s906_s16  ;;  %v791_v1 = vld [vmem:[%s269_s30] ss:$0 sm:$0xff] }
  0x12   : > { %s574_s9 = sshll.u32 %s777_s5, 3  ;;  %s578_s13 = sshll.u32 %s777_s5, 2  ;;  %v812_v20 = vld [vmem:[%s272_s8] ss:$0 sm:$0xff] }
  0x13   : > { %s789_s12 = scalar_lea.vmem %s890_s0, %s574_s9  ;;  %s825_s16 = scalar_lea.vmem %s894_s4, %s578_s13 }
  0x14   : > { %v284_v2 = vld [vmem:[%s789_s12] sm:$0xff]  ;;  %v285_v3 = vld [vmem:[%s789_s12 + $0x8] sm:$0xff]  ;;  %v286_v4 = vld [vmem:[%s789_s12 + $0x10] sm:$0xff] }
  0x15   : > { %v304_v5 = vmul.f32 %v783_v0, %v284_v2  ;;  %v305_v6 = vmul.f32 %v783_v0, %v285_v3  ;;  %v287_v7 = vld [vmem:[%s789_s12 + $0x18] sm:$0xff]  ;;  %v306_v8 = vmul.f32 %v783_v0, %v286_v4  ;;  %v288_v9 = vld [vmem:[%s789_s12 + $0x20] sm:$0xff]  ;;  %v289_v10 = vld [vmem:[%s789_s12 + $0x28] sm:$0xff] }
  0x16   : > { %v307_v11 = vmul.f32 %v783_v0, %v287_v7  ;;  %v308_v12 = vmul.f32 %v783_v0, %v288_v9  ;;  %v309_v13 = vmul.f32 %v783_v0, %v289_v10  ;;  %v290_v14 = vld [vmem:[%s789_s12 + $0x30] sm:$0xff]  ;;  %v291_v15 = vld [vmem:[%s789_s12 + $0x38] sm:$0xff]  ;;  %v292_v31 = vld [vmem:[%s789_s12 + $0x40] sm:$0xff] }
  0x17   : > { %v324_v16 = vadd.f32 %v791_v1, %v304_v5  ;;  %v325_v17 = vadd.f32 %v791_v1, %v305_v6  ;;  %v326_v18 = vadd.f32 %v791_v1, %v306_v8  ;;  %v310_v19 = vmul.f32 %v783_v0, %v290_v14  ;;  %v293_v36 = vld [vmem:[%s789_s12 + $0x48] sm:$0xff]  ;;  %v294_v49 = vld [vmem:[%s789_s12 + $0x50] sm:$0xff]  ;;  %v295_v50 = vld [vmem:[%s789_s12 + $0x58] sm:$0xff] }
  0x18   : > { %v327_v21 = vadd.f32 %v791_v1, %v307_v11  ;;  %v328_v22 = vadd.f32 %v791_v1, %v308_v12  ;;  %v329_v23 = vadd.f32 %v791_v1, %v309_v13  ;;  %v311_v24 = vmul.f32 %v783_v0, %v291_v15  ;;  %v296_v51 = vld [vmem:[%s789_s12 + $0x60] sm:$0xff]  ;;  %v297_v61 = vld [vmem:[%s789_s12 + $0x68] sm:$0xff]  ;;  %v298_v3 = vld [vmem:[%s789_s12 + $0x70] sm:$0xff] }
  0x19   : > { %vm340_vm0 = vcmp.gt.f32.partialorder %v324_v16, 0.0  ;;  %vm341_vm1 = vcmp.gt.f32.partialorder %v325_v17, 0.0  ;;  %v356_v25 = vmul.f32 0.1, %v324_v16  ;;  %v357_v26 = vmul.f32 0.1, %v325_v17 }
  0x1a   : > { %vm342_vm2 = vcmp.gt.f32.partialorder %v326_v18, 0.0  ;;  %vm343_vm3 = vcmp.gt.f32.partialorder %v327_v21, 0.0  ;;  %v358_v27 = vmul.f32 0.1, %v326_v18  ;;  %v359_v28 = vmul.f32 0.1, %v327_v21 }
  0x1b   : > { %v372_v29 = vsel %vm340_vm0, %v324_v16, %v356_v25  ;;  %v373_v30 = vsel %vm341_vm1, %v325_v17, %v357_v26  ;;  %vm344_vm4 = vcmp.gt.f32.partialorder %v328_v22, 0.0  ;;  %vm345_vm5 = vcmp.gt.f32.partialorder %v329_v23, 0.0  ;;  %v299_v15 = vld [vmem:[%s789_s12 + $0x78] sm:$0xff] }
  0x1c   : > { %v392_v32 = vadd.f32 %v812_v20, %v372_v29  ;;  %v393_v33 = vadd.f32 %v812_v20, %v373_v30  ;;  %v374_v34 = vsel %vm342_vm2, %v326_v18, %v358_v27  ;;  %v375_v35 = vsel %vm343_vm3, %v327_v21, %v359_v28 }
  0x1d   : > { %v394_v37 = vadd.f32 %v812_v20, %v374_v34  ;;  %v395_v38 = vadd.f32 %v812_v20, %v375_v35  ;;  %v360_v39 = vmul.f32 0.1, %v328_v22  ;;  %v361_v40 = vmul.f32 0.1, %v329_v23 }
  0x1e   : > { %v584_v41 = vpack.c.bf16 %v393_v33, %v392_v32  ;;  %v330_v42 = vadd.f32 %v791_v1, %v310_v19  ;;  %v331_v43 = vadd.f32 %v791_v1, %v311_v24  ;;  %v312_v44 = vmul.f32 %v783_v0, %v292_v31 }
  0x1f   : > { %v589_v45 = vpack.c.bf16 %v395_v38, %v394_v37  ;;  %v376_v46 = vsel %vm344_vm4, %v328_v22, %v360_v39  ;;  %v377_v47 = vsel %vm345_vm5, %v329_v23, %v361_v40  ;;  %v313_v48 = vmul.f32 %v783_v0, %v293_v36 }
  0x20   : > { %585 = vst [vmem:[%s825_s16] sm:$0xff] %v584_v41   ;;  %v396_v52 = vadd.f32 %v812_v20, %v376_v46  ;;  %v397_v53 = vadd.f32 %v812_v20, %v377_v47  ;;  %vm346_vm6 = vcmp.gt.f32.partialorder %v330_v42, 0.0  ;;  %vm347_vm7 = vcmp.gt.f32.partialorder %v331_v43, 0.0 }
  0x21   : > { %621 = vst [vmem:[%s825_s16 + $0x8] sm:$0xff] %v589_v45   ;;  %v362_v54 = vmul.f32 0.1, %v330_v42  ;;  %v363_v55 = vmul.f32 0.1, %v331_v43  ;;  %v332_v56 = vadd.f32 %v791_v1, %v312_v44  ;;  %v333_v57 = vadd.f32 %v791_v1, %v313_v48 }
  0x22   : > { %v594_v58 = vpack.c.bf16 %v397_v53, %v396_v52  ;;  %v314_v59 = vmul.f32 %v783_v0, %v294_v49  ;;  %v315_v60 = vmul.f32 %v783_v0, %v295_v50  ;;  %v316_v62 = vmul.f32 %v783_v0, %v296_v51 }
  0x23   : > { %v378_v63 = vsel %vm346_vm6, %v330_v42, %v362_v54  ;;  %v379_v2 = vsel %vm347_vm7, %v331_v43, %v363_v55  ;;  %vm348_vm8 = vcmp.gt.f32.partialorder %v332_v56, 0.0  ;;  %vm349_vm9 = vcmp.gt.f32.partialorder %v333_v57, 0.0 }
  0x24   : > { %622 = vst [vmem:[%s825_s16 + $0x10] sm:$0xff] %v594_v58   ;;  %v398_v4 = vadd.f32 %v812_v20, %v378_v63  ;;  %v399_v5 = vadd.f32 %v812_v20, %v379_v2  ;;  %v364_v6 = vmul.f32 0.1, %v332_v56  ;;  %v365_v7 = vmul.f32 0.1, %v333_v57 }
  0x25   : > { %v334_v8 = vadd.f32 %v791_v1, %v314_v59  ;;  %v335_v9 = vadd.f32 %v791_v1, %v315_v60  ;;  %v317_v10 = vmul.f32 %v783_v0, %v297_v61  ;;  %v336_v11 = vadd.f32 %v791_v1, %v316_v62 }
  0x26   : > { %v599_v12 = vpack.c.bf16 %v399_v5, %v398_v4  ;;  %v380_v13 = vsel %vm348_vm8, %v332_v56, %v364_v6  ;;  %v381_v14 = vsel %vm349_vm9, %v333_v57, %v365_v7  ;;  %v318_v16 = vmul.f32 %v783_v0, %v298_v3 }
  0x27   : > { %v400_v17 = vadd.f32 %v812_v20, %v380_v13  ;;  %v401_v18 = vadd.f32 %v812_v20, %v381_v14  ;;  %vm350_vm10 = vcmp.gt.f32.partialorder %v334_v8, 0.0  ;;  %vm351_vm11 = vcmp.gt.f32.partialorder %v335_v9, 0.0 }
  0x28   : > { %623 = vst [vmem:[%s825_s16 + $0x18] sm:$0xff] %v599_v12   ;;  %v366_v19 = vmul.f32 0.1, %v334_v8  ;;  %v367_v21 = vmul.f32 0.1, %v335_v9  ;;  %v337_v22 = vadd.f32 %v791_v1, %v317_v10  ;;  %vm352_vm12 = vcmp.gt.f32.partialorder %v336_v11, 0.0 }
  0x29   : > { %v604_v23 = vpack.c.bf16 %v401_v18, %v400_v17  ;;  %v368_v24 = vmul.f32 0.1, %v336_v11  ;;  %v319_v25 = vmul.f32 %v783_v0, %v299_v15  ;;  %v338_v26 = vadd.f32 %v791_v1, %v318_v16 }
  0x2a   : > { %v382_v27 = vsel %vm350_vm10, %v334_v8, %v366_v19  ;;  %v383_v28 = vsel %vm351_vm11, %v335_v9, %v367_v21  ;;  %vm353_vm13 = vcmp.gt.f32.partialorder %v337_v22, 0.0  ;;  %v369_v29 = vmul.f32 0.1, %v337_v22 }
  0x2b   : > { %624 = vst [vmem:[%s825_s16 + $0x20] sm:$0xff] %v604_v23   ;;  %v402_v30 = vadd.f32 %v812_v20, %v382_v27  ;;  %v403_v31 = vadd.f32 %v812_v20, %v383_v28  ;;  %v384_v32 = vsel %vm352_vm12, %v336_v11, %v368_v24  ;;  %v339_v33 = vadd.f32 %v791_v1, %v319_v25 }
  0x2c   : > { %v385_v34 = vsel %vm353_vm13, %v337_v22, %v369_v29  ;;  %v404_v0 = vadd.f32 %v812_v20, %v384_v32  ;;  %vm354_vm14 = vcmp.gt.f32.partialorder %v338_v26, 0.0  ;;  %v370_v35 = vmul.f32 0.1, %v338_v26 }
  0x2d   : > { %v609_v36 = vpack.c.bf16 %v403_v31, %v402_v30  ;;  %v405_v37 = vadd.f32 %v812_v20, %v385_v34  ;;  %vm355_vm15 = vcmp.gt.f32.partialorder %v339_v33, 0.0  ;;  %v371_v38 = vmul.f32 0.1, %v339_v33 }
  0x2e   : > { %v386_v39 = vsel %vm354_vm14, %v338_v26, %v370_v35 }
  0x2f   : > { %625 = vst [vmem:[%s825_s16 + $0x28] sm:$0xff] %v609_v36   ;;  %v614_v40 = vpack.c.bf16 %v405_v37, %v404_v0  ;;  %v387_v41 = vsel %vm355_vm15, %v339_v33, %v371_v38  ;;  %v406_v42 = vadd.f32 %v812_v20, %v386_v39 }
  0x30   : > { %v407_v43 = vadd.f32 %v812_v20, %v387_v41 }
  0x31   : > { %626 = vst [vmem:[%s825_s16 + $0x30] sm:$0xff] %v614_v40  }
  0x32   : > { %v619_v1 = vpack.c.bf16 %v407_v43, %v406_v42 }
  0x34   : > { %627 = vst [vmem:[%s825_s16 + $0x38] sm:$0xff] %v619_v1  }
  0x35 PF: > { %s14_s19 = sadd.s32 1, %s709_s19   ;;  %s895_s15 = smov %s701_s17 }
  0x36   : > { %p11_p7 = scmp.ge.s32.totalorder %s14_s19, 10   ;;  %s896_s16 = smov %s705_s18 }
  0x37   : > { %s897_s17 = smov %s900_s20  ;;  %s898_s18 = smov %s904_s21 }
  0x38   :  { %13 = sbr.rel (!%p11_p7) target bundleno = 3 (0x3), region = 75 }

// kernel: upcat_forward.9
= control target key start
LH: loop header
LB: loop body
LE: loop exit
PB: predicated region body
PF: predicated region fallthrough
CT: control target
= control target key end

     0   :  { %s673_s15 = smov 0   ;;  %s675_s16 = smov 0   ;;  %s836_s0 = inlined_call_operand.vmem [shape: f32[2,8,64,128], index: 0, kind: input, shape index: {}]   ;;  %s837_s1 = inlined_call_operand.vmem [shape: f32[2,1,128], index: 1, kind: input, shape index: {}]   ;;  %s838_s2 = inlined_call_operand.vmem [shape: f32[2,1,128], index: 2, kind: input, shape index: {}]   ;;  %s839_s3 = inlined_call_operand.vmem [shape: f32[2,1,128], index: 3, kind: input, shape index: {}]   ;;  %s840_s4 = inlined_call_operand.vmem [shape: f32[2,8,64,128], index: 4, kind: output, shape index: {}]  }
   0x1   :  { %s677_s17 = smov 0   ;;  %s679_s18 = smov 0  }
   0x2   :  { %s681_s19 = smov 0  }
   0x3 LB: > { %s23_s20 = sadd.s32 1, %s638_s17  ;;  %s26_s21 = sadd.s32 1, %s642_s18  ;;  %s646_s19 = sphi %s681_s19, %s14_s19   ;;  %s642_s18 = sphi %s679_s18, %s844_s18   ;;  %s638_s17 = sphi %s677_s17, %s843_s17   ;;  %s634_s16 = sphi %s675_s16, %s842_s16   ;;  %s630_s15 = sphi %s673_s15, %s841_s15  }
   0x4   : > { %p24_p0 = scmp.ge.s32.totalorder %s23_s20, 4  ;;  %p554_p1 = scmp.ge.s32.totalorder %s646_s19, 1 }
   0x5   : > { %p208_p2 = scmp.lt.s32.totalorder %s646_s19, 9 }
   0x6   : > { %s846_s20 = smov (%p24_p0, %s23_s20), 0  ;;  %s848_s21 = smov (!%p24_p0, %s26_s21), %s642_s18 }
   0x7   : > { %p209_p3 = pnand %p554_p1, %p208_p2  ;;  %p28_p4 = scmp.ge.s32.totalorder %s848_s21, 2 }
   0x8   : > { %s555_s22 = sshll.u32 (!%p209_p3), %s630_s15, 1  ;;  %p254_p5 = scmp.lt.s32.totalorder (!%p209_p3), %s634_s16, 1 }
   0x9   : > { %s850_s21 = smov (%p28_p4, %s848_s21), 0  ;;  %212 = sbr.rel (%p209_p3) target bundleno = 52 (0x34), region = 36 }
   0xa   : > { %p256_p6 = scmp.lt.s32.totalorder (!%p209_p3), %s555_s22, 7 }
   0xe   : > { %s852_s16 = smov (!%p254_p5, %s634_s16), 1  ;;  %s854_s22 = smov (!%p256_p6, %s555_s22), 7 }
   0xf   : > { %s557_s23 = sshll.u32 %s852_s16, 6  ;;  %s266_s26 = scalar_lea.vmem %s837_s1, %s852_s16 }
  0x10   : > { %s556_s27 = sshll.u32 %s854_s22, 3  ;;  %s269_s30 = scalar_lea.vmem %s838_s2, %s852_s16  ;;  %v720_v0 = vld [vmem:[%s266_s26] ss:$0 sm:$0xff] }
  0x11   : > { %s714_s5 = sadd.s32 %s557_s23, %s556_s27  ;;  %s272_s8 = scalar_lea.vmem %s839_s3, %s852_s16  ;;  %v730_v1 = vld [vmem:[%s269_s30] ss:$0 sm:$0xff] }
  0x12   : > { %s558_s9 = sshll.u32 %s714_s5, 3  ;;  %v750_v20 = vld [vmem:[%s272_s8] ss:$0 sm:$0xff] }
  0x13   : > { %s728_s12 = scalar_lea.vmem %s836_s0, %s558_s9  ;;  %s761_s15 = scalar_lea.vmem %s840_s4, %s558_s9 }
  0x14   : > { %v284_v2 = vld [vmem:[%s728_s12] sm:$0xff]  ;;  %v285_v3 = vld [vmem:[%s728_s12 + $0x8] sm:$0xff]  ;;  %v286_v4 = vld [vmem:[%s728_s12 + $0x10] sm:$0xff] }
  0x15   : > { %v304_v5 = vmul.f32 %v720_v0, %v284_v2  ;;  %v305_v6 = vmul.f32 %v720_v0, %v285_v3  ;;  %v306_v7 = vmul.f32 %v720_v0, %v286_v4  ;;  %v287_v8 = vld [vmem:[%s728_s12 + $0x18] sm:$0xff]  ;;  %v288_v9 = vld [vmem:[%s728_s12 + $0x20] sm:$0xff]  ;;  %v289_v10 = vld [vmem:[%s728_s12 + $0x28] sm:$0xff] }
  0x16   : > { %v307_v11 = vmul.f32 %v720_v0, %v287_v8  ;;  %v308_v12 = vmul.f32 %v720_v0, %v288_v9  ;;  %v309_v13 = vmul.f32 %v720_v0, %v289_v10  ;;  %v290_v14 = vld [vmem:[%s728_s12 + $0x30] sm:$0xff]  ;;  %v291_v15 = vld [vmem:[%s728_s12 + $0x38] sm:$0xff]  ;;  %v292_v32 = vld [vmem:[%s728_s12 + $0x40] sm:$0xff] }
  0x17   : > { %v324_v16 = vadd.f32 %v730_v1, %v304_v5  ;;  %v325_v17 = vadd.f32 %v730_v1, %v305_v6  ;;  %v326_v18 = vadd.f32 %v730_v1, %v306_v7  ;;  %v310_v19 = vmul.f32 %v720_v0, %v290_v14  ;;  %v293_v37 = vld [vmem:[%s728_s12 + $0x48] sm:$0xff]  ;;  %v294_v38 = vld [vmem:[%s728_s12 + $0x50] sm:$0xff]  ;;  %v295_v39 = vld [vmem:[%s728_s12 + $0x58] sm:$0xff] }
  0x18   : > { %v327_v21 = vadd.f32 %v730_v1, %v307_v11  ;;  %v328_v22 = vadd.f32 %v730_v1, %v308_v12  ;;  %v329_v23 = vadd.f32 %v730_v1, %v309_v13  ;;  %v311_v24 = vmul.f32 %v720_v0, %v291_v15  ;;  %v296_v51 = vld [vmem:[%s728_s12 + $0x60] sm:$0xff]  ;;  %v297_v3 = vld [vmem:[%s728_s12 + $0x68] sm:$0xff]  ;;  %v298_v6 = vld [vmem:[%s728_s12 + $0x70] sm:$0xff] }
  0x19   : > { %vm340_vm0 = vcmp.gt.f32.partialorder %v324_v16, 0.0  ;;  %v356_v25 = vmul.f32 0.1, %v324_v16  ;;  %vm341_vm1 = vcmp.gt.f32.partialorder %v325_v17, 0.0  ;;  %v357_v26 = vmul.f32 0.1, %v325_v17 }
  0x1a   : > { %vm342_vm2 = vcmp.gt.f32.partialorder %v326_v18, 0.0  ;;  %v358_v27 = vmul.f32 0.1, %v326_v18  ;;  %vm343_vm3 = vcmp.gt.f32.partialorder %v327_v21, 0.0  ;;  %v359_v28 = vmul.f32 0.1, %v327_v21 }
  0x1b   : > { %v372_v29 = vsel %vm340_vm0, %v324_v16, %v356_v25  ;;  %v373_v30 = vsel %vm341_vm1, %v325_v17, %v357_v26  ;;  %vm344_vm4 = vcmp.gt.f32.partialorder %v328_v22, 0.0  ;;  %v360_v31 = vmul.f32 0.1, %v328_v22  ;;  %v299_v14 = vld [vmem:[%s728_s12 + $0x78] sm:$0xff] }
  0x1c   : > { %v392_v33 = vadd.f32 %v750_v20, %v372_v29  ;;  %v393_v34 = vadd.f32 %v750_v20, %v373_v30  ;;  %v374_v35 = vsel %vm342_vm2, %v326_v18, %v358_v27  ;;  %v375_v36 = vsel %vm343_vm3, %v327_v21, %v359_v28 }
  0x1d   : > { %v394_v40 = vadd.f32 %v750_v20, %v374_v35  ;;  %v395_v41 = vadd.f32 %v750_v20, %v375_v36  ;;  %v376_v42 = vsel %vm344_vm4, %v328_v22, %v360_v31  ;;  %vm345_vm5 = vcmp.gt.f32.partialorder %v329_v23, 0.0 }
  0x1e   : > { %408 = vst [vmem:[%s761_s15] sm:$0xff] %v392_v33  ;;  %v396_v43 = vadd.f32 %v750_v20, %v376_v42  ;;  %v361_v44 = vmul.f32 0.1, %v329_v23  ;;  %v330_v45 = vadd.f32 %v730_v1, %v310_v19  ;;  %v331_v46 = vadd.f32 %v730_v1, %v311_v24 }
  0x1f   : > { %409 = vst [vmem:[%s761_s15 + $0x8] sm:$0xff] %v393_v34  ;;  %v312_v47 = vmul.f32 %v720_v0, %v292_v32  ;;  %v313_v48 = vmul.f32 %v720_v0, %v293_v37  ;;  %v314_v49 = vmul.f32 %v720_v0, %v294_v38  ;;  %v315_v50 = vmul.f32 %v720_v0, %v295_v39 }
  0x20   : > { %410 = vst [vmem:[%s761_s15 + $0x10] sm:$0xff] %v394_v40  ;;  %v377_v52 = vsel %vm345_vm5, %v329_v23, %v361_v44  ;;  %vm346_vm6 = vcmp.gt.f32.partialorder %v330_v45, 0.0  ;;  %v362_v53 = vmul.f32 0.1, %v330_v45  ;;  %vm347_vm7 = vcmp.gt.f32.partialorder %v331_v46, 0.0 }
  0x21   : > { %411 = vst [vmem:[%s761_s15 + $0x18] sm:$0xff] %v395_v41  ;;  %v397_v54 = vadd.f32 %v750_v20, %v377_v52  ;;  %v363_v55 = vmul.f32 0.1, %v331_v46  ;;  %v332_v56 = vadd.f32 %v730_v1, %v312_v47  ;;  %v333_v57 = vadd.f32 %v730_v1, %v313_v48 }
  0x22   : > { %412 = vst [vmem:[%s761_s15 + $0x20] sm:$0xff] %v396_v43  ;;  %v378_v58 = vsel %vm346_vm6, %v330_v45, %v362_v53  ;;  %v334_v59 = vadd.f32 %v730_v1, %v314_v49  ;;  %v335_v60 = vadd.f32 %v730_v1, %v315_v50  ;;  %v316_v61 = vmul.f32 %v720_v0, %v296_v51 }
  0x23   : > { %413 = vst [vmem:[%s761_s15 + $0x28] sm:$0xff] %v397_v54  ;;  %v398_v62 = vadd.f32 %v750_v20, %v378_v58  ;;  %v379_v63 = vsel %vm347_vm7, %v331_v46, %v363_v55  ;;  %vm348_vm8 = vcmp.gt.f32.partialorder %v332_v56, 0.0  ;;  %v364_v2 = vmul.f32 0.1, %v332_v56 }
  0x24   : > { %v399_v4 = vadd.f32 %v750_v20, %v379_v63  ;;  %vm349_vm9 = vcmp.gt.f32.partialorder %v333_v57, 0.0  ;;  %v365_v5 = vmul.f32 0.1, %v333_v57  ;;  %vm350_vm10 = vcmp.gt.f32.partialorder %v334_v59, 0.0 }
  0x25   : > { %414 = vst [vmem:[%s761_s15 + $0x30] sm:$0xff] %v398_v62  ;;  %v380_v7 = vsel %vm348_vm8, %v332_v56, %v364_v2  ;;  %v366_v8 = vmul.f32 0.1, %v334_v59  ;;  %vm351_vm11 = vcmp.gt.f32.partialorder %v335_v60, 0.0  ;;  %v367_v9 = vmul.f32 0.1, %v335_v60 }
  0x26   : > { %415 = vst [vmem:[%s761_s15 + $0x38] sm:$0xff] %v399_v4  ;;  %v400_v10 = vadd.f32 %v750_v20, %v380_v7  ;;  %v381_v11 = vsel %vm349_vm9, %v333_v57, %v365_v5  ;;  %v336_v12 = vadd.f32 %v730_v1, %v316_v61  ;;  %v317_v13 = vmul.f32 %v720_v0, %v297_v3 }
  0x27   : > { %v401_v15 = vadd.f32 %v750_v20, %v381_v11  ;;  %v382_v16 = vsel %vm350_vm10, %v334_v59, %v366_v8  ;;  %v383_v17 = vsel %vm351_vm11, %v335_v60, %v367_v9  ;;  %v318_v18 = vmul.f32 %v720_v0, %v298_v6 }
  0x28   : > { %416 = vst [vmem:[%s761_s15 + $0x40] sm:$0xff] %v400_v10  ;;  %v402_v19 = vadd.f32 %v750_v20, %v382_v16  ;;  %v403_v21 = vadd.f32 %v750_v20, %v383_v17  ;;  %vm352_vm12 = vcmp.gt.f32.partialorder %v336_v12, 0.0  ;;  %v368_v22 = vmul.f32 0.1, %v336_v12 }
  0x29   : > { %417 = vst [vmem:[%s761_s15 + $0x48] sm:$0xff] %v401_v15  ;;  %v337_v23 = vadd.f32 %v730_v1, %v317_v13  ;;  %v338_v24 = vadd.f32 %v730_v1, %v318_v18  ;;  %v319_v25 = vmul.f32 %v720_v0, %v299_v14 }
  0x2a   : > { %418 = vst [vmem:[%s761_s15 + $0x50] sm:$0xff] %v402_v19  ;;  %v384_v26 = vsel %vm352_vm12, %v336_v12, %v368_v22 }
  0x2b   : > { %419 = vst [vmem:[%s761_s15 + $0x58] sm:$0xff] %v403_v21  ;;  %v404_v27 = vadd.f32 %v750_v20, %v384_v26  ;;  %vm353_vm13 = vcmp.gt.f32.partialorder %v337_v23, 0.0  ;;  %v369_v28 = vmul.f32 0.1, %v337_v23  ;;  %vm354_vm14 = vcmp.gt.f32.partialorder %v338_v24, 0.0 }
  0x2c   : > { %v370_v29 = vmul.f32 0.1, %v338_v24  ;;  %v339_v30 = vadd.f32 %v730_v1, %v319_v25 }
  0x2d   : > { %420 = vst [vmem:[%s761_s15 + $0x60] sm:$0xff] %v404_v27  ;;  %v385_v31 = vsel %vm353_vm13, %v337_v23, %v369_v28 }
  0x2e   : > { %v405_v32 = vadd.f32 %v750_v20, %v385_v31  ;;  %v386_v33 = vsel %vm354_vm14, %v338_v24, %v370_v29  ;;  %vm355_vm15 = vcmp.gt.f32.partialorder %v339_v30, 0.0  ;;  %v371_v0 = vmul.f32 0.1, %v339_v30 }
  0x2f   : > { %v406_v34 = vadd.f32 %v750_v20, %v386_v33 }
  0x30   : > { %421 = vst [vmem:[%s761_s15 + $0x68] sm:$0xff] %v405_v32  ;;  %v387_v35 = vsel %vm355_vm15, %v339_v30, %v371_v0 }
  0x31   : > { %422 = vst [vmem:[%s761_s15 + $0x70] sm:$0xff] %v406_v34  ;;  %v407_v36 = vadd.f32 %v750_v20, %v387_v35 }
  0x33   : > { %423 = vst [vmem:[%s761_s15 + $0x78] sm:$0xff] %v407_v36 }
  0x34 PF: > { %s14_s19 = sadd.s32 1, %s646_s19   ;;  %s841_s15 = smov %s638_s17 }
  0x35   : > { %p11_p7 = scmp.ge.s32.totalorder %s14_s19, 10   ;;  %s842_s16 = smov %s642_s18 }
  0x36   : > { %s843_s17 = smov %s846_s20  ;;  %s844_s18 = smov %s850_s21 }
  0x37   :  { %13 = sbr.rel (!%p11_p7) target bundleno = 3 (0x3), region = 75 }

// kernel: upcat_forward.6
= control target key start
LH: loop header
LB: loop body
LE: loop exit
PB: predicated region body
PF: predicated region fallthrough
CT: control target
= control target key end

     0   :  { %s5516_s15 = smov 0   ;;  %s5518_s16 = smov 0   ;;  %s8115_s0 = inlined_call_operand.vmem [shape: bf16[2,10,10,10,24], index: 0, kind: input, shape index: {}]   ;;  %s8116_s1 = inlined_call_operand.vmem [shape: bf16[27,24,128], index: 1, kind: input, shape index: {}]   ;;  %s8117_s2 = inlined_call_operand.vmem [shape: f32[1,128], index: 2, kind: input, shape index: {}]   ;;  %s8118_s3 = inlined_call_operand.vmem [shape: f32[2,8,64,128], index: 3, kind: output, shape index: {0}]   ;;  %s8119_s4 = inlined_call_operand.vmem [shape: f32[2,4,2,128], index: 4, kind: output, shape index: {1}]  }
   0x1   :  { %s5520_s17 = smov 0   ;;  %s5522_s18 = smov 0  }
   0x2   :  { %s5524_s19 = smov 0  }
   0x3 LB: > { %s24_s20 = sadd.s32 1, %s5481_s17  ;;  %s27_s21 = sadd.s32 1, %s5485_s18  ;;  %s5489_s19 = sphi %s5524_s19, %s15_s19   ;;  %s5485_s18 = sphi %s5522_s18, %s8473_s18   ;;  %s5481_s17 = sphi %s5520_s17, %s8472_s17   ;;  %s5477_s16 = sphi %s5518_s16, %s8471_s16   ;;  %s5473_s15 = sphi %s5516_s15, %s8470_s15  }
   0x4   : > { %p25_p0 = scmp.ge.s32.totalorder %s24_s20, 4  ;;  %p4815_p1 = scmp.ge.s32.totalorder %s5489_s19, 1 }
   0x5   : > { %p181_p2 = scmp.lt.s32.totalorder %s5489_s19, 9 }
   0x6   : > { %s8475_s20 = smov (%p25_p0, %s24_s20), 0  ;;  %s8477_s21 = smov (!%p25_p0, %s27_s21), %s5485_s18 }
   0x7   : > { %p182_p3 = pnand %p4815_p1, %p181_p2  ;;  %p29_p4 = scmp.ge.s32.totalorder %s8477_s21, 2 }
   0x9   : > { %s8479_s21 = smov (%p29_p4, %s8477_s21), 0  ;;  %185 = sbr.rel (%p182_p3) target bundleno = 1058 (0x422), region = 32 }
   0xe   : > { %v4871_v0 = vld [vmem:[%s8116_s1 + $0x20] sm:$0xf]  ;;  %v4828_v1 = vld [vmem:[%s8116_s1 + $0x14] sm:$0xf]  ;;  %v291_v4 = vld [vmem:[%s8116_s1 + $0x8] sm:$0xf] }
   0xf   : > { %v875_v2 = vunpack.c.l.b16 %v4871_v0  ;;  %v552_v3 = vunpack.c.l.b16 %v4828_v1  ;;  %p220_p5 = scmp.lt.s32.totalorder %s5477_s16, 1  ;;  %vm581_vm0 = vcmask 1043456   ;;  %v679_v5 = vunpack.c.l.b16 %v291_v4  ;;  %v4933_v8 = vld [vmem:[%s8116_s1 + $0x50] sm:$0xf]  ;;  %s5374_s30 = smul.u32 160, %s5473_s15  ;;  %v5576_v16 = vld [vmem:[%s8116_s1 + $0x18] sm:$0xff] }
  0x10   : > { %vm775_vm1 = vcmask 1042432   ;;  %v1371_v10 = vunpack.c.l.b16 %v4933_v8  ;;  %v4901_v11 = vld [vmem:[%s8116_s1 + $0x38] sm:$0xf]  ;;  %vm776_vm2 = vcmask 1046532   ;;  %v5376_v17 = vld [vmem:[%s8116_s1 + $0xc] sm:$0xff]  ;;  %v5375_v20 = vld [vmem:[%s8116_s1] sm:$0xff] }
  0x11   : > { %v877_v6 = vpack.c.b16 %v875_v2, %v875_v2  ;;  %v554_v7 = vpack.c.b16 %v552_v3, %v552_v3  ;;  %s8481_s16 = smov (!%p220_p5, %s5477_s16), 1  ;;  %v681_v9 = vpack.c.b16 %v679_v5, %v679_v5  ;;  %v1135_v14 = vunpack.c.l.b16 %v4901_v11  ;;  %v4918_v19 = vld [vmem:[%s8116_s1 + $0x44] sm:$0xf]  ;;  %vm5594_vm4 = vmor %vm775_vm1, %vm776_vm2  ;;  %p238_p7 = scmp.lt.s32.totalorder %s5473_s15, 3 }
  0x12   : > { %s5408_s7 = smul.u32 800, %s8481_s16  ;;  %v1373_v18 = vpack.c.b16 %v1371_v10, %v1371_v10  ;;  %vm556_vm3 = vcmask 195584   ;;  %vm292_vm5 = vsmask.f32 3328  ;;  %vm293_vm6 = vsmask.f32 7440 }
  0x13   : > { %v5567_v12 = vsel %vm581_vm0, %v877_v6, 0  ;;  %v583_v13 = vsel %vm581_vm0, %v554_v7, 0  ;;  %v708_v15 = vsel %vm581_vm0, %v681_v9, 0  ;;  %v5606_v26 = vpack.c.b16 %v1135_v14, %v1135_v14  ;;  %vm5642_vm7 = vmor %vm292_vm5, %vm293_vm6  ;;  %s4819_s28 = sshll.u32 %s8481_s16, 6  ;;  %s4821_s10 = sshll.u32 %s8481_s16, 2 }
  0x14   : > { %912 = vmatpush.bf16.msra.mxu2 %v5567_v12  ;;  %591 = vmatpush.bf16.msra.mxu0 %v583_v13  ;;  %s224_s23 = scalar_lea.vmem %s8115_s0, %s5408_s7  ;;  %v1382_v22 = vsel %vm581_vm0, %v1373_v18, 0  ;;  %v1260_v27 = vunpack.c.l.b16 %v4918_v19  ;;  %vm4661_vm8 = vcmask 1040384  }
  0x15   : > { %5402 = vmatpush.bf16.msra.mxu3 %v583_v13  ;;  %716 = vmatpush.bf16.msra.mxu1 %v708_v15  ;;  %s5590_s26 = scalar_lea.vmem %s224_s23, %s5374_s30 }
  0x16   : > { %v5600_v23 = vld [vmem:[%s5590_s26] sm:$0xf]  ;;  %v250_v24 = vld [vmem:[%s5590_s26 + $0x4] sm:$0x1]  ;;  %v5604_v25 = vld [vmem:[%s5590_s26 + $0x8] sm:$0xf]  ;;  %v1262_v1 = vpack.c.b16 %v1260_v27, %v1260_v27 }
  0x17   : > { %v252_v28 = vld [vmem:[%s5590_s26 + $0xc] sm:$0x1]  ;;  %v4853_v29 = vrot.slane %v5600_v23, 9  ;;  %v780_v30 = vrot.slane %v250_v24, 5  ;;  %v4854_v31 = vrot.slane %v5604_v25, 9  ;;  %v296_v32 = vshrl.u32 %v5600_v23, 16 }
  0x18   : > { %913 = vmatpush.bf16.msra.mxu2 %v5576_v16  ;;  %592 = vmatpush.bf16.msra.mxu0 %v5376_v17  ;;  %v784_v33 = vrot.slane %v252_v28, 5  ;;  %v299_v34 = vshll.u32 %v5600_v23, 16  ;;  %v305_v35 = vshll.u32 %v250_v24, 16  ;;  %v310_v36 = vshrl.u32 %v5604_v25, 16  ;;  %v5616_v37 = vld [vmem:[%s5590_s26 + $0x70] sm:$0xf] }
  0x19   : > { %5403 = vmatpush.bf16.msra.mxu3 %v5376_v17  ;;  %717 = vmatpush.bf16.msra.mxu1 %v5375_v20  ;;  %v781_v38 = vsel %vm5594_vm4, %v4853_v29, %v780_v30  ;;  %v298_v39 = vrot.slane %v296_v32, 4  ;;  %v313_v40 = vshll.u32 %v5604_v25, 16  ;;  %v319_v41 = vshll.u32 %v252_v28, 16  ;;  %v5622_v42 = vld [vmem:[%s5590_s26 + $0x74] sm:$0x1] }
  0x1a   : > { %v5626_v43 = vsel %vm5594_vm4, %v4854_v31, %v784_v33  ;;  %v846_v44 = vunpack.c.l.b16 %v781_v38  ;;  %v301_v45 = vrot.slane %v299_v34, 5  ;;  %v307_v46 = vrot.slane %v305_v35, 5  ;;  %v5629_v47 = vld [vmem:[%s5590_s26 + $0x78] sm:$0xf]  ;;  %v5633_v53 = vld [vmem:[%s5590_s26 + $0x7c] sm:$0x1] }
  0x1b   : > { %8246 = vst [vmem:[#allocation2_spill] sm:$0xff] %v5629_v47  ;;  %v8129_v48 = vunpack.c.l.b16 %v5626_v43  ;;  %v312_v49 = vrot.slane %v310_v36, 4  ;;  %v315_v50 = vrot.slane %v313_v40, 5  ;;  %v321_v51 = vrot.slane %v319_v41, 5  ;;  %v254_v14 = vld [vmem:[%s5590_s26 + $0x14] sm:$0x1] }
  0x1c   : > { %1390 = vmatpush.bf16.msrb.mxu2 %v1382_v22  ;;  %v302_v52 = vor.u32 %v301_v45, %v298_v39  ;;  %v464_v54 = vshrl.u32 %v5616_v37, 16  ;;  %v467_v55 = vshll.u32 %v5616_v37, 16  ;;  %v473_v56 = vshll.u32 %v5622_v42, 16  ;;  %v256_v22 = vld [vmem:[%s5590_s26 + $0x1c] sm:$0x1] }
  0x1d   : > { %5404 = vmatpush.bf16.msrb.mxu3 %v708_v15  ;;  %v862_v57 = vpack.c.b16 %v8129_v48, %v846_v44  ;;  %v316_v59 = vor.u32 %v315_v50, %v312_v49  ;;  %v478_v60 = vshrl.u32 %v5629_v47, 16  ;;  %v481_v61 = vshll.u32 %v5629_v47, 16  ;;  %v5673_v32 = vld [vmem:[%s5590_s26 + $0x18] sm:$0xf]  ;;  %v5697_v50 = vld [vmem:[%s5590_s26 + $0x80] sm:$0xf] }
  0x1e   : > { %v303_v62 = vrot.slane %v302_v52, 4  ;;  %v466_v63 = vrot.slane %v464_v54, 4  ;;  %v469_v0 = vrot.slane %v467_v55, 5  ;;  %v487_v5 = vshll.u32 %v5633_v53, 16  ;;  %8249 = vst [vmem:[#allocation3_spill] sm:$0xff] %v5697_v50 }
  0x1f   : > { %4876 = vmatmul.msk.bf16.vlgmr.msra.gmra.mxu2 %vm556_vm3, %v862_v57  ;;  %v317_v2 = vrot.slane %v316_v59, 4  ;;  %v480_v3 = vrot.slane %v478_v60, 4  ;;  %v483_v4 = vrot.slane %v481_v61, 5  ;;  %v475_v8 = vrot.slane %v473_v56, 5  ;;  %v5705_v56 = vld [vmem:[%s5590_s26 + $0x84] sm:$0x1] }
  0x20   : > { %v308_v6 = vsel %vm5642_vm7, %v303_v62, %v307_v46  ;;  %v470_v7 = vor.u32 %v469_v0, %v466_v63  ;;  %v489_v13 = vrot.slane %v487_v5, 5  ;;  %v650_v18 = vunpack.c.l.b16 %v5600_v23  ;;  %v5708_v57 = vld [vmem:[%s5590_s26 + $0x88] sm:$0xf] }
  0x21   : > { %5405 = vmatpush.bf16.msrb.mxu3 %v5375_v20  ;;  %v322_v9 = vsel %vm5642_vm7, %v317_v2, %v321_v51  ;;  %v523_v10 = vunpack.c.l.b16 %v308_v6  ;;  %v484_v11 = vor.u32 %v483_v4, %v480_v3  ;;  %v651_v19 = vunpack.c.l.b16 %v5604_v25  ;;  %v5660_v20 = vld [vmem:[%s5590_s26 + $0x10] sm:$0xf]  ;;  %8251 = vst [vmem:[#allocation5_spill] sm:$0xff] %v5708_v57 }
  0x22   : > { %v5655_v15 = vunpack.c.l.b16 %v322_v9  ;;  %v471_v17 = vrot.slane %v470_v7, 4  ;;  %v1164_v27 = vsel %vm581_vm0, %v5606_v26, 0  ;;  %v1289_v28 = vsel %vm581_vm0, %v1262_v1, 0  ;;  %v5720_v1 = vld [vmem:[%s5590_s26 + $0x8c] sm:$0x1] }
  0x23   : > { %v485_v24 = vrot.slane %v484_v11, 4  ;;  %v4855_v29 = vrot.slane %v5660_v20, 9  ;;  %v666_v23 = vpack.c.b16 %v651_v19, %v650_v18  ;;  %1172 = vmatpush.bf16.msrb.mxu0 %v1164_v27  ;;  %1297 = vmatpush.bf16.msrb.mxu1 %v1289_v28  ;;  %v788_v33 = vrot.slane %v254_v14, 5  ;;  %v258_v28 = vld [vmem:[%s5590_s26 + $0x24] sm:$0x1] }
  0x24   : > { %v539_v30 = vpack.c.b16 %v5655_v15, %v523_v10  ;;  %v476_v31 = vsel %vm5642_vm7, %v471_v17, %v475_v8  ;;  %v4856_v35 = vrot.slane %v5673_v32, 9  ;;  %v792_v36 = vrot.slane %v256_v22, 5 }
  0x25   : > { %v490_v26 = vsel %vm5642_vm7, %v485_v24, %v489_v13  ;;  %v5677_v34 = vunpack.c.l.b16 %v476_v31  ;;  %4845 = vmatmul.msk.bf16.vlgmr.msra.gmra.mxu1 %vm556_vm3, %v666_v23  ;;  %v5686_v39 = vsel %vm5594_vm4, %v4855_v29, %v788_v33  ;;  %v324_v40 = vshrl.u32 %v5660_v20, 16  ;;  %v5739_v33 = vld [vmem:[%s5590_s26 + $0x20] sm:$0xf] }
  0x26   : > { %4833 = vmatmul.msk.bf16.vlgmr.msra.gmra.mxu0 %vm556_vm3, %v539_v30  ;;  %v5681_v38 = vunpack.c.l.b16 %v490_v26  ;;  %v327_v41 = vshll.u32 %v5660_v20, 16  ;;  %v5692_v44 = vsel %vm5594_vm4, %v4856_v35, %v792_v36  ;;  %v8128_v45 = vunpack.c.l.b16 %v5686_v39  ;;  %v260_v26 = vld [vmem:[%s5590_s26 + $0x2c] sm:$0x1] }
  0x27   : > { %v333_v46 = vshll.u32 %v254_v14, 16  ;;  %v338_v49 = vshrl.u32 %v5673_v32, 16  ;;  %v8127_v52 = vunpack.c.l.b16 %v5692_v44  ;;  %v326_v54 = vrot.slane %v324_v40, 4  ;;  %v5748_v40 = vld [vmem:[%s5590_s26 + $0x28] sm:$0xf] }
  0x28   : > { %v5701_v51 = vpack.c.b16 %v5681_v38, %v5677_v34  ;;  %v329_v55 = vrot.slane %v327_v41, 5  ;;  %v341_v61 = vshll.u32 %v5673_v32, 16  ;;  %v347_v62 = vshll.u32 %v256_v22, 16 }
  0x29   : > { %v335_v59 = vrot.slane %v333_v46, 5  ;;  %v340_v60 = vrot.slane %v338_v49, 4  ;;  %v5717_v63 = vpack.c.b16 %v8127_v52, %v8128_v45  ;;  %v492_v2 = vshrl.u32 %v5697_v50, 16 }
  0x2a   : > { %8250 = vst [vmem:[#allocation4_spill] sm:$0xff] %v5701_v51  ;;  %4839 = vmatmul.msk.bf16.vlgmr.msra.gmra.mxu3 %vm556_vm3, %v5701_v51  ;;  %v330_v0 = vor.u32 %v329_v55, %v326_v54  ;;  %v495_v3 = vshll.u32 %v5697_v50, 16  ;;  %v343_v4 = vrot.slane %v341_v61, 5  ;;  %v349_v5 = vrot.slane %v347_v62, 5 }
  0x2b   : > { %8252 = vst [vmem:[#allocation6_spill] sm:$0xff] %v5717_v63  ;;  %v501_v6 = vshll.u32 %v5705_v56, 16  ;;  %v506_v7 = vshrl.u32 %v5708_v57, 16  ;;  %5406 = vmatpush.bf16.msra.mxu3 %v5567_v12  ;;  %v494_v9 = vrot.slane %v492_v2, 4  ;;  %v509_v11 = vshll.u32 %v5708_v57, 16 }
  0x2c   : > { %v331_v8 = vrot.slane %v330_v0, 4  ;;  %v497_v10 = vrot.slane %v495_v3, 5  ;;  %v344_v13 = vor.u32 %v343_v4, %v340_v60  ;;  %v515_v18 = vshll.u32 %v5720_v1, 16 }
  0x2d   : > { %v503_v14 = vrot.slane %v501_v6, 5  ;;  %v508_v17 = vrot.slane %v506_v7, 4  ;;  %v511_v27 = vrot.slane %v509_v11, 5  ;;  %v652_v12 = vunpack.c.l.b16 %v5660_v20 }
  0x2e   : > { %v336_v22 = vsel %vm5642_vm7, %v331_v8, %v335_v59  ;;  %v498_v24 = vor.u32 %v497_v10, %v494_v9  ;;  %v345_v29 = vrot.slane %v344_v13, 4  ;;  %v517_v31 = vrot.slane %v515_v18, 5 }
  0x2f   : > { %4877 = vmatmul.msk.bf16.gmra.mxu2 %vm556_vm3, %v5717_v63  ;;  %v5735_v30 = vunpack.c.l.b16 %v336_v22  ;;  %v8131_v23 = vunpack.c.l.b16 %v5673_v32  ;;  %5407 = vmatpush.bf16.msra.mxu3 %v5576_v16  ;;  %v512_v36 = vor.u32 %v511_v27, %v508_v17  ;;  %v5745_v20 = vpack.c.b16 %v652_v12, %v651_v19 }
  0x30   : > { %v499_v35 = vrot.slane %v498_v24, 4  ;;  %v4857_v41 = vrot.slane %v5739_v33, 9  ;;  %v350_v46 = vsel %vm5642_vm7, %v345_v29, %v349_v5  ;;  %v796_v54 = vrot.slane %v258_v28, 5  ;;  %v262_v29 = vld [vmem:[%s5590_s26 + $0x34] sm:$0x1] }
  0x31   : > { %v5755_v49 = vpack.c.b16 %v8131_v23, %v652_v12  ;;  %v4858_v16 = vrot.slane %v5748_v40, 9  ;;  %v5758_v55 = vunpack.c.l.b16 %v350_v46  ;;  %v513_v19 = vrot.slane %v512_v36, 4  ;;  %v5795_v12 = vld [vmem:[%s5590_s26 + $0x30] sm:$0xf]  ;;  %v5381_v36 = vld [vmem:[%s8116_s1 + $0x48] sm:$0xff]  ;;  %v5380_v46 = vld [vmem:[%s8116_s1 + $0x3c] sm:$0xff] }
  0x32   : > { %v504_v25 = vsel %vm5642_vm7, %v499_v35, %v503_v14  ;;  %v800_v59 = vrot.slane %v260_v26, 5  ;;  %v352_v61 = vshrl.u32 %v5739_v33, 16  ;;  %v355_v62 = vshll.u32 %v5739_v33, 16  ;;  %1391 = vmatpush.bf16.msrb.mxu2 %v5381_v36  ;;  %1298 = vmatpush.bf16.msrb.mxu1 %v5380_v46 }
  0x33   : > { %v5762_v60 = vunpack.c.l.b16 %v504_v25  ;;  %v5768_v0 = vpack.c.b16 %v5758_v55, %v5735_v30  ;;  %v518_v2 = vsel %vm5642_vm7, %v513_v19, %v517_v31  ;;  %v5774_v3 = vsel %vm5594_vm4, %v4857_v41, %v796_v54  ;;  %v264_v31 = vld [vmem:[%s5590_s26 + $0x3c] sm:$0x1]  ;;  %v5379_v41 = vld [vmem:[%s8116_s1 + $0x30] sm:$0xff]  ;;  %v5820_v19 = vld [vmem:[%s5590_s26 + $0x38] sm:$0xf] }
  0x34   : > { %v5778_v4 = vsel %vm5594_vm4, %v4858_v16, %v800_v59  ;;  %v5780_v5 = vunpack.c.l.b16 %v518_v2  ;;  %v354_v6 = vrot.slane %v352_v61, 4  ;;  %v357_v7 = vrot.slane %v355_v62, 5  ;;  %1173 = vmatpush.bf16.msrb.mxu0 %v5379_v41 }
  0x35   : > { %8253 = vst [vmem:[#allocation7_spill] sm:$0xff] %v5768_v0  ;;  %4846 = vmatmul.msk.bf16.gmra.mxu1 %vm556_vm3, %v5755_v49  ;;  %v361_v8 = vshll.u32 %v258_v28, 16  ;;  %v366_v9 = vshrl.u32 %v5748_v40, 16  ;;  %v369_v10 = vshll.u32 %v5748_v40, 16  ;;  %v375_v11 = vshll.u32 %v260_v26, 16 }
  0x36   : > { %8254 = vst [vmem:[#allocation8_spill] sm:$0xff] %v5780_v5  ;;  %4834 = vmatmul.msk.bf16.gmra.mxu0 %vm556_vm3, %v5768_v0  ;;  %v5790_v13 = vpack.c.b16 %v5780_v5, %v5762_v60  ;;  %v8126_v14 = vunpack.c.l.b16 %v5774_v3  ;;  %v8125_v17 = vunpack.c.l.b16 %v5778_v4  ;;  %v358_v18 = vor.u32 %v357_v7, %v354_v6 }
  0x37   : > { %v363_v22 = vrot.slane %v361_v8, 5  ;;  %v368_v24 = vrot.slane %v366_v9, 4  ;;  %v371_v27 = vrot.slane %v369_v10, 5  ;;  %v377_v35 = vrot.slane %v375_v11, 5 }
  0x38   : > { %8255 = vst [vmem:[#allocation9_spill] sm:$0xff] %v5790_v13  ;;  %v359_v28 = vrot.slane %v358_v18, 4  ;;  %v5814_v54 = vpack.c.b16 %v8125_v17, %v8126_v14  ;;  %v8130_v25 = vunpack.c.l.b16 %v5739_v33  ;;  %v8120_v61 = vunpack.c.l.b16 %v5748_v40 }
  0x39   : > { %v372_v26 = vor.u32 %v371_v27, %v368_v24  ;;  %v4859_v62 = vrot.slane %v5795_v12, 9  ;;  %v380_v2 = vshrl.u32 %v5795_v12, 16  ;;  %v804_v6 = vrot.slane %v262_v29, 5 }
  0x3a   : > { %4840 = vmatmul.msk.bf16.gmra.mxu3 %vm556_vm3, %v5790_v13  ;;  %8256 = vst [vmem:[#allocation10_spill] sm:$0xff] %v5814_v54  ;;  %v364_v16 = vsel %vm5642_vm7, %v359_v28, %v363_v22  ;;  %v4860_v7 = vrot.slane %v5820_v19, 9  ;;  %v808_v8 = vrot.slane %v264_v31, 5  ;;  %v383_v9 = vshll.u32 %v5795_v12, 16 }
  0x3b   : > { %v373_v59 = vrot.slane %v372_v26, 4  ;;  %v5829_v11 = vunpack.c.l.b16 %v364_v16  ;;  %v382_v18 = vrot.slane %v380_v2, 4  ;;  %v394_v22 = vshrl.u32 %v5820_v19, 16 }
  0x3c   : > { %v385_v27 = vrot.slane %v383_v9, 5  ;;  %v397_v28 = vshll.u32 %v5820_v19, 16  ;;  %v8122_v26 = vunpack.c.l.b16 %v5616_v37  ;;  %v8121_v36 = vunpack.c.l.b16 %v5629_v47 }
  0x3d   : > { %v378_v10 = vsel %vm5642_vm7, %v373_v59, %v377_v35  ;;  %v396_v41 = vrot.slane %v394_v22, 4  ;;  %v5843_v35 = vpack.c.b16 %v8120_v61, %v8130_v25  ;;  %v5847_v46 = vsel %vm5594_vm4, %v4859_v62, %v804_v6 }
  0x3e   : > { %v5834_v24 = vunpack.c.l.b16 %v378_v10  ;;  %v5851_v16 = vsel %vm5594_vm4, %v4860_v7, %v808_v8  ;;  %v399_v59 = vrot.slane %v397_v28, 5  ;;  %v386_v9 = vor.u32 %v385_v27, %v382_v18  ;;  %v5870_v27 = vld [vmem:[%s5590_s26 + $0x50] sm:$0xf]  ;;  %v5873_v28 = vld [vmem:[%s5590_s26 + $0x58] sm:$0xf] }
  0x3f   : > { %4878 = vmatmul.msk.bf16.gmra.mxu2 %vm556_vm3, %v5814_v54  ;;  %v389_v10 = vshll.u32 %v262_v29, 16  ;;  %v403_v22 = vshll.u32 %v264_v31, 16  ;;  %v5861_v62 = vpack.c.b16 %v8121_v36, %v8122_v26  ;;  %v8124_v6 = vunpack.c.l.b16 %v5847_v46 }
  0x40   : > { %v5855_v2 = vpack.c.b16 %v5834_v24, %v5829_v11  ;;  %v400_v61 = vor.u32 %v399_v59, %v396_v41  ;;  %v8123_v7 = vunpack.c.l.b16 %v5851_v16  ;;  %v387_v29 = vrot.slane %v386_v9, 4 }
  0x41   : > { %v391_v31 = vrot.slane %v389_v10, 5  ;;  %v405_v18 = vrot.slane %v403_v22, 5  ;;  %v828_v41 = vrot.slane %v5622_v42, 5  ;;  %v832_v59 = vrot.slane %v5633_v53, 5  ;;  %v270_v10 = vld [vmem:[%s5590_s26 + $0x54] sm:$0x1] }
  0x42   : > { %8257 = vst [vmem:[#allocation11_spill] sm:$0xff] %v5855_v2  ;;  %v401_v8 = vrot.slane %v400_v61, 4  ;;  %v5881_v36 = vpack.c.b16 %v8123_v7, %v8124_v6  ;;  %v408_v42 = vshrl.u32 %v5870_v27, 16  ;;  %v411_v53 = vshll.u32 %v5870_v27, 16  ;;  %v4886_v22 = vld [vmem:[%s8116_s1 + $0x2c] sm:$0xf] }
  0x43   : > { %v392_v61 = vsel %vm5642_vm7, %v387_v29, %v391_v31  ;;  %v422_v26 = vshrl.u32 %v5873_v28, 16  ;;  %v425_v7 = vshll.u32 %v5873_v28, 16  ;;  %v4865_v6 = vrot.slane %v5616_v37, 9 }
  0x44   : > { %8258 = vst [vmem:[#allocation12_spill] sm:$0xff] %v5881_v36  ;;  %v406_v9 = vsel %vm5642_vm7, %v401_v8, %v405_v18  ;;  %v4866_v29 = vrot.slane %v5629_v47, 9  ;;  %v272_v18 = vld [vmem:[%s5590_s26 + $0x5c] sm:$0x1]  ;;  %v4861_v17 = vrot.slane %v5870_v27, 9  ;;  %v992_v14 = vunpack.c.l.b16 %v4886_v22 }
  0x45   : > { %4847 = vmatmul.msk.bf16.gmra.mxu1 %vm556_vm3, %v5843_v35  ;;  %v812_v52 = vrot.slane %v270_v10, 5  ;;  %v4862_v45 = vrot.slane %v5873_v28, 9  ;;  %v5906_v48 = vsel %vm5594_vm4, %v4865_v6, %v828_v41  ;;  %v5912_v23 = vunpack.c.l.b16 %v392_v61 }
  0x46   : > { %4835 = vmatmul.msk.bf16.gmra.mxu0 %vm556_vm3, %v5855_v2  ;;  %v5910_v25 = vsel %vm5594_vm4, %v4866_v29, %v832_v59  ;;  %v5914_v31 = vunpack.c.l.b16 %v406_v9  ;;  %v410_v8 = vrot.slane %v408_v42, 4  ;;  %v413_v13 = vrot.slane %v411_v53, 5 }
  0x47   : > { %v816_v22 = vrot.slane %v272_v18, 5  ;;  %v424_v51 = vrot.slane %v422_v26, 4  ;;  %v427_v2 = vrot.slane %v425_v7, 5  ;;  %v994_v54 = vpack.c.b16 %v992_v14, %v992_v14 }
  0x48   : > { %v8136_v6 = vunpack.c.l.b16 %v5697_v50  ;;  %v8259_v41 = vunpack.c.l.b16 %v5795_v12  ;;  %v8260_v59 = vunpack.c.l.b16 %v5820_v19  ;;  %v813_v9 = vsel %vm5594_vm4, %v4861_v17, %v812_v52 }
  0x49   : > { %v1021_v42 = vsel %vm581_vm0, %v994_v54, 0  ;;  %v5931_v26 = vpack.c.b16 %v5914_v31, %v5912_v23  ;;  %v414_v14 = vor.u32 %v413_v13, %v410_v8  ;;  %v417_v7 = vshll.u32 %v270_v10, 16 }
  0x4a   : > { %4851 = vmatmul.msk.bf16.vlgmr.msrb.gmra.mxu3 %vm556_vm3, %v5861_v62  ;;  %v5923_v29 = vpack.c.b16 %v8260_v59, %v8259_v41  ;;  %v431_v53 = vshll.u32 %v272_v18, 16  ;;  %v5935_v41 = vsel %vm5594_vm4, %v4862_v45, %v816_v22  ;;  %v428_v59 = vor.u32 %v427_v2, %v424_v51  ;;  %v5951_v18 = vld [vmem:[%s5590_s26 + $0x60] sm:$0xf] }
  0x4b   : > { %8261 = vst [vmem:[#allocation13_spill] sm:$0xff] %v5931_v26  ;;  %1029 = vmatpush.bf16.msrb.mxu3 %v1021_v42  ;;  %v4867_v61 = vrot.slane %v5697_v50, 9  ;;  %v8262_v52 = vunpack.c.l.b16 %v5708_v57  ;;  %v854_v54 = vunpack.c.l.b16 %v813_v9  ;;  %v836_v13 = vrot.slane %v5705_v56, 5  ;;  %v5960_v42 = vld [vmem:[%s5590_s26 + $0x68] sm:$0xf] }
  0x4c   : > { %v8140_v45 = vunpack.c.l.b16 %v5935_v41  ;;  %v415_v51 = vrot.slane %v414_v14, 4  ;;  %v419_v2 = vrot.slane %v417_v7, 5  ;;  %v433_v10 = vrot.slane %v431_v53, 5 }
  0x4d   : > { %v5942_v17 = vpack.c.b16 %v8262_v52, %v8136_v6  ;;  %v429_v8 = vrot.slane %v428_v59, 4  ;;  %v5955_v22 = vsel %vm5594_vm4, %v4867_v61, %v836_v13  ;;  %v4868_v56 = vrot.slane %v5708_v57, 9  ;;  %v274_v13 = vld [vmem:[%s5590_s26 + $0x64] sm:$0x1] }
  0x4e   : > { %v840_v9 = vrot.slane %v5720_v1, 5  ;;  %v420_v7 = vsel %vm5642_vm7, %v415_v51, %v419_v2  ;;  %v436_v53 = vshrl.u32 %v5951_v18, 16  ;;  %v439_v61 = vshll.u32 %v5951_v18, 16  ;;  %v5378_v1 = vld [vmem:[%s8116_s1 + $0x24] sm:$0xff]  ;;  %v276_v51 = vld [vmem:[%s5590_s26 + $0x6c] sm:$0x1] }
  0x4f   : > { %4879 = vmatmul.msk.bf16.gmra.mxu2 %vm556_vm3, %v5881_v36  ;;  %v866_v59 = vpack.c.b16 %v8140_v45, %v854_v54  ;;  %v434_v52 = vsel %vm5642_vm7, %v429_v8, %v433_v10  ;;  %1030 = vmatpush.bf16.msrb.mxu3 %v5378_v1  ;;  %v531_v2 = vunpack.c.l.b16 %v420_v7  ;;  %v658_v6 = vunpack.c.l.b16 %v5870_v27 }
  0x50   : > { %v5964_v14 = vsel %vm5594_vm4, %v4868_v56, %v840_v9  ;;  %v450_v56 = vshrl.u32 %v5960_v42, 16  ;;  %v453_v9 = vshll.u32 %v5960_v42, 16  ;;  %v4863_v36 = vrot.slane %v5951_v18, 9 }
  0x51   : > { %v5986_v0 = vunpack.c.l.b16 %v434_v52  ;;  %v820_v54 = vrot.slane %v274_v13, 5  ;;  %v438_v45 = vrot.slane %v436_v53, 4  ;;  %v441_v63 = vrot.slane %v439_v61, 5 }
  0x52   : > { %v4864_v10 = vrot.slane %v5960_v42, 9  ;;  %v824_v8 = vrot.slane %v276_v51, 5  ;;  %v452_v57 = vrot.slane %v450_v56, 4  ;;  %v455_v5 = vrot.slane %v453_v9, 5 }
  0x53   : > { %v8147_v7 = vunpack.c.l.b16 %v5906_v48  ;;  %v8146_v27 = vunpack.c.l.b16 %v5910_v25  ;;  %v543_v1 = vpack.c.b16 %v5986_v0, %v531_v2  ;;  %v442_v50 = vor.u32 %v441_v63, %v438_v45 }
  0x54   : > { %v445_v47 = vshll.u32 %v274_v13, 16  ;;  %v5997_v53 = vsel %vm5594_vm4, %v4863_v36, %v820_v54  ;;  %v6001_v61 = vsel %vm5594_vm4, %v4864_v10, %v824_v8  ;;  %v459_v56 = vshll.u32 %v276_v51, 16  ;;  %v4948_v51 = vld [vmem:[%s8116_s1 + $0x5c] sm:$0xf] }
  0x55   : > { %4848 = vmatmul.msk.bf16.gmra.mxu1 %vm556_vm3, %v5923_v29  ;;  %v6007_v9 = vpack.c.b16 %v8146_v27, %v8147_v7  ;;  %v856_v63 = vunpack.c.l.b16 %v5997_v53  ;;  %v8148_v36 = vunpack.c.l.b16 %v6001_v61  ;;  %v1490_v10 = vunpack.c.l.b16 %v4948_v51 }
  0x56   : > { %4836 = vmatmul.msk.bf16.gmra.mxu0 %vm556_vm3, %v5931_v26  ;;  %v8149_v26 = vunpack.c.l.b16 %v5873_v28  ;;  %v447_v45 = vrot.slane %v445_v47, 5  ;;  %v461_v2 = vrot.slane %v459_v56, 5  ;;  %v5037_v47 = vld [vmem:[%s8116_s1 + $0x80] sm:$0xf]  ;;  %v660_v56 = vunpack.c.l.b16 %v5951_v18 }
  0x57   : > { %v2115_v8 = vunpack.c.l.b16 %v5037_v47 }
  0x58   : > { %v670_v52 = vpack.c.b16 %v8149_v26, %v658_v6  ;;  %v443_v6 = vrot.slane %v442_v50, 4  ;;  %v4965_v50 = vld [vmem:[%s8116_s1 + $0x68] sm:$0xf]  ;;  %v661_v26 = vunpack.c.l.b16 %v5960_v42 }
  0x5a   : > { %4852 = vmatmul.msk.bf16.gmra.mxu3 %vm556_vm3, %v5942_v17 }
  0x5f   : > { %4880 = vmatmul.msk.bf16.gmra.mxu2 %vm556_vm3, %v866_v59  ;;  %v456_v59 = vor.u32 %v455_v5, %v452_v57  ;;  %v6019_v57 = vpack.c.b16 %v8148_v36, %v856_v63  ;;  %v448_v5 = vsel %vm5642_vm7, %v443_v6, %v447_v45  ;;  %v1492_v6 = vpack.c.b16 %v1490_v10, %v1490_v10 }
  0x60   : > { %v2117_v45 = vpack.c.b16 %v2115_v8, %v2115_v8  ;;  %v6038_v7 = vunpack.c.l.b16 %v448_v5  ;;  %v8264_v10 = vunpack.c.l.b16 %v5739_v33  ;;  %v861_v33 = vunpack.c.l.b16 %v5964_v14 }
  0x61   : > { %v457_v13 = vrot.slane %v456_v59, 4 }
  0x62   : > { %v2144_v51 = vsel %vm581_vm0, %v2117_v45, 0 }
  0x63   : > { %v462_v54 = vsel %vm5642_vm7, %v457_v13, %v461_v2  ;;  %v1501_v2 = vsel %vm581_vm0, %v1492_v6, 0  ;;  %2152 = vmatpush.bf16.msra.mxu2 %v2144_v51  ;;  %v8266_v6 = vunpack.c.l.b16 %v5686_v39  ;;  %v8270_v51 = vunpack.c.l.b16 %v5847_v46 }
  0x64   : > { %v6040_v36 = vunpack.c.l.b16 %v462_v54 }
  0x65   : > { %4849 = vmatmul.msk.bf16.gmra.mxu1 %vm556_vm3, %v670_v52  ;;  %v5022_v52 = vld [vmem:[%s8116_s1 + $0x74] sm:$0xf] }
  0x66   : > { %4837 = vmatmul.msk.bf16.gmra.mxu0 %vm556_vm3, %v543_v1  ;;  %v1591_v1 = vunpack.c.l.b16 %v4965_v50  ;;  %v1762_v59 = vunpack.c.l.b16 %v5022_v52  ;;  %v8263_v50 = vunpack.c.l.b16 %v5673_v32  ;;  %v6055_v8 = vpack.c.b16 %v6040_v36, %v6038_v7 }
  0x67   : > { %v860_v32 = vunpack.c.l.b16 %v5955_v22  ;;  %v1122_v52 = vpack.c.b16 %v5735_v30, %v5655_v15  ;;  %v8267_v15 = vunpack.c.l.b16 %v5692_v44  ;;  %v265_v30 = vld [vmem:[%s5590_s26 + $0x40] sm:$0xf]  ;;  %v1127_v18 = vpack.c.b16 %v5677_v34, %v6040_v36 }
  0x68   : > { %v1593_v27 = vpack.c.b16 %v1591_v1, %v1591_v1  ;;  %v1764_v13 = vpack.c.b16 %v1762_v59, %v1762_v59  ;;  %v980_v5 = vpack.c.b16 %v8264_v10, %v8263_v50  ;;  %v8265_v59 = vunpack.c.l.b16 %v5626_v43 }
  0x69   : > { %v6073_v1 = vpack.c.b16 %v861_v33, %v860_v32  ;;  %v8268_v43 = vunpack.c.l.b16 %v5774_v3  ;;  %v1124_v3 = vpack.c.b16 %v5912_v23, %v5834_v24  ;;  %v977_v24 = vunpack.c.l.b16 %v265_v30 }
  0x6a   : > { %4882 = vmatmul.msk.bf16.vlgmr.msra.gmra.mxu3 %vm556_vm3, %v6007_v9  ;;  %v1602_v47 = vsel %vm581_vm0, %v1593_v27, 0  ;;  %v1791_v54 = vsel %vm581_vm0, %v1764_v13, 0  ;;  %v6061_v27 = vpack.c.b16 %v661_v26, %v660_v56  ;;  %v1247_v45 = vpack.c.b16 %v8266_v6, %v8265_v59  ;;  %v6111_v59 = vld [vmem:[%s5590_s26 + $0x48] sm:$0xf] }
  0x6b   : > { %1509 = vmatpush.bf16.msra.mxu3 %v1501_v2  ;;  %1610 = vmatpush.bf16.msra.mxu0 %v1602_v47  ;;  %v1248_v39 = vpack.c.b16 %v8268_v43, %v8267_v15  ;;  %v1092_v13 = vshll.u32 %v265_v30, 16  ;;  %v1362_v46 = vunpack.c.l.b16 %v6111_v59  ;;  %v4914_v15 = vrot.slane %v265_v30, 9 }
  0x6c   : > { %1799 = vmatpush.bf16.msra.mxu1 %v1791_v54  ;;  %v8279_v34 = vunpack.c.l.b16 %v5616_v37 }
  0x6f   : > { %4881 = vmatmul.msk.bf16.gmra.mxu2 %vm556_vm3, %v6019_v57 }
  0x75   : > { %4850 = vmatmul.msk.bf16.gmra.mxu1 %vm556_vm3, %v6061_v27 }
  0x76   : > { %4838 = vmatmul.msk.bf16.gmra.mxu0 %vm556_vm3, %v6055_v8 }
  0x7a   : > { %4883 = vmatmul.msk.bf16.gmra.mxu3 %vm556_vm3, %v6073_v1 }
  0x7f   : > { %4938 = vmatmul.msk.bf16.vlgmr.msrb.gmra.mxu2 %vm556_vm3, %v5755_v49  ;;  %v1123_v49 = vpack.c.b16 %v5829_v11, %v5758_v55  ;;  %v266_v55 = vld [vmem:[%s5590_s26 + $0x44] sm:$0x1]  ;;  %v8269_v11 = vunpack.c.l.b16 %v5778_v4 }
  0x80   : > { %v1098_v10 = vshll.u32 %v266_v55, 16  ;;  %v1235_v43 = vrot.slane %v266_v55, 5 }
  0x81   : > { %v1249_v47 = vpack.c.b16 %v8270_v51, %v8269_v11  ;;  %v5385_v51 = vld [vmem:[%s8116_s1 + $0x78] sm:$0xff] }
  0x82   : > { %v1100_v4 = vrot.slane %v1098_v10, 5  ;;  %2153 = vmatpush.bf16.msra.mxu2 %v5385_v51 }
  0x85   : > { %4923 = vmatmul.msk.bf16.vlgmr.msrb.gmra.mxu1 %vm556_vm3, %v1247_v45  ;;  %v8272_v45 = vunpack.c.l.b16 %v5795_v12 }
  0x86   : > { %4906 = vmatmul.msk.bf16.vlgmr.msrb.gmra.mxu0 %vm556_vm3, %v1122_v52 }
  0x8a   : > { %4891 = vmatmul.msk.bf16.vlgmr.msrb.gmra.mxu3 %vm556_vm3, %v5745_v20  ;;  %v1089_v20 = vshrl.u32 %v265_v30, 16 }
  0x8c   : > { %v1091_v2 = vrot.slane %v1089_v20, 4 }
  0x8f   : > { %4939 = vmatmul.msk.bf16.gmra.mxu2 %vm556_vm3, %v5843_v35  ;;  %v1094_v35 = vrot.slane %v1092_v13, 5  ;;  %v1364_v13 = vpack.c.b16 %v1362_v46, %v977_v24  ;;  %v8274_v46 = vunpack.c.l.b16 %v5820_v19  ;;  %v1126_v19 = vpack.c.b16 %v6038_v7, %v5986_v0 }
  0x91   : > { %v1095_v50 = vor.u32 %v1094_v35, %v1091_v2  ;;  %v6130_v35 = vsel %vm5594_vm4, %v4914_v15, %v1235_v43  ;;  %v982_v15 = vpack.c.b16 %v977_v24, %v8274_v46  ;;  %v8275_v24 = vunpack.c.l.b16 %v5935_v41 }
  0x92   : > { %v8151_v11 = vunpack.c.l.b16 %v6130_v35 }
  0x93   : > { %v1096_v23 = vrot.slane %v1095_v50, 4  ;;  %v5384_v50 = vld [vmem:[%s8116_s1 + $0x6c] sm:$0xff] }
  0x94   : > { %1800 = vmatpush.bf16.msra.mxu1 %v5384_v50 }
  0x95   : > { %4924 = vmatmul.msk.bf16.gmra.mxu1 %vm556_vm3, %v1248_v39  ;;  %v1101_v2 = vsel %vm5642_vm7, %v1096_v23, %v1100_v4 }
  0x96   : > { %4907 = vmatmul.msk.bf16.gmra.mxu0 %vm556_vm3, %v1123_v49 }
  0x9a   : > { %4892 = vmatmul.msk.bf16.gmra.mxu3 %vm556_vm3, %v980_v5 }
  0x9f   : > { %4940 = vmatmul.msk.bf16.gmra.mxu2 %vm556_vm3, %v5923_v29  ;;  %v8271_v29 = vunpack.c.l.b16 %v5748_v40  ;;  %v5382_v40 = vld [vmem:[%s8116_s1 + $0x54] sm:$0xff] }
  0xa0   : > { %1510 = vmatpush.bf16.msra.mxu3 %v5382_v40 }
  0xa1   : > { %v981_v49 = vpack.c.b16 %v8272_v45, %v8271_v29 }
  0xa2   : > { %v915_v44 = vpop.f32.mrf.mxu2  ;;  %v719_v54 = vpop.f32.mrf.mxu1 }
  0xa3   : > { %v594_v5 = vpop.f32.mrf.mxu0 }
  0xa4   : > { %v720_v52 = vadd.f32 %v719_v54, %v594_v5  ;;  %v8273_v54 = vunpack.c.l.b16 %v5851_v16 }
  0xa5   : > { %4925 = vmatmul.msk.bf16.gmra.mxu1 %vm556_vm3, %v1249_v47  ;;  %v5383_v47 = vld [vmem:[%s8116_s1 + $0x60] sm:$0xff] }
  0xa6   : > { %v6113_v6 = vadd.f32 %v915_v44, %v720_v52  ;;  %4908 = vmatmul.msk.bf16.gmra.mxu0 %vm556_vm3, %v1124_v3  ;;  %v6134_v3 = vunpack.c.l.b16 %v1101_v2  ;;  %v1250_v52 = vpack.c.b16 %v8151_v11, %v8273_v54 }
  0xa7   : > { %1611 = vmatpush.bf16.msra.mxu0 %v5383_v47 }
  0xa8   : > { %v1125_v5 = vpack.c.b16 %v6134_v3, %v5914_v31 }
  0xaa   : > { %4893 = vmatmul.msk.bf16.gmra.mxu3 %vm556_vm3, %v981_v49  ;;  %v917_v39 = vpop.f32.mrf.mxu2  ;;  %v721_v20 = vpop.f32.mrf.mxu1 }
  0xab   : > { %v596_v12 = vpop.f32.mrf.mxu0 }
  0xac   : > { %v722_v44 = vadd.f32 %v721_v20, %v596_v12 }
  0xad   : > { %v624_v30 = vpop.f32.mrf.mxu3 }
  0xae   : > { %v6132_v55 = vadd.f32 %v917_v39, %v722_v44 }
  0xaf   : > { %4941 = vmatmul.msk.bf16.gmra.mxu2 %vm556_vm3, %v1364_v13  ;;  %v1251_v13 = vpack.c.b16 %v856_v63, %v8275_v24 }
  0xb2   : > { %v920_v10 = vpop.f32.mrf.mxu2  ;;  %v724_v45 = vpop.f32.mrf.mxu1 }
  0xb3   : > { %v599_v29 = vpop.f32.mrf.mxu0 }
  0xb4   : > { %v725_v49 = vadd.f32 %v724_v45, %v599_v29 }
  0xb5   : > { %v626_v23 = vpop.f32.mrf.mxu3  ;;  %4926 = vmatmul.msk.bf16.gmra.mxu1 %vm556_vm3, %v1250_v52  ;;  %v8278_v52 = vunpack.c.l.b16 %v5906_v48 }
  0xb6   : > { %v6153_v4 = vadd.f32 %v920_v10, %v725_v49  ;;  %4909 = vmatmul.msk.bf16.gmra.mxu0 %vm556_vm3, %v1125_v5  ;;  %v8276_v10 = vunpack.c.l.b16 %v5873_v28 }
  0xba   : > { %4894 = vmatmul.msk.bf16.gmra.mxu3 %vm556_vm3, %v982_v15  ;;  %v922_v31 = vpop.f32.mrf.mxu2  ;;  %v726_v43 = vpop.f32.mrf.mxu1  ;;  %v6194_v15 = vld [vmem:[%s5590_s26 + $0x90] sm:$0xf] }
  0xbb   : > { %v601_v16 = vpop.f32.mrf.mxu0  ;;  %v1103_v48 = vshrl.u32 %v6194_v15, 16 }
  0xbc   : > { %v727_v39 = vadd.f32 %v726_v43, %v601_v16 }
  0xbd   : > { %v629_v40 = vpop.f32.mrf.mxu3  ;;  %v1105_v42 = vrot.slane %v1103_v48, 4 }
  0xbe   : > { %v6160_v12 = vadd.f32 %v922_v31, %v727_v39 }
  0xbf   : > { %4942 = vmatmul.msk.bf16.gmra.mxu2 %vm556_vm3, %v6061_v27  ;;  %v983_v27 = vpack.c.b16 %v660_v56, %v8276_v10  ;;  %v8277_v56 = vunpack.c.l.b16 %v6001_v61  ;;  %v1106_v61 = vshll.u32 %v6194_v15, 16  ;;  %v6223_v10 = vld [vmem:[%s5590_s26 + $0x98] sm:$0xf] }
  0xc1   : > { %v1252_v29 = vpack.c.b16 %v8278_v52, %v8277_v56  ;;  %v1108_v39 = vrot.slane %v1106_v61, 5  ;;  %v8281_v56 = vld [vmem:[#allocation2_spill] sm:$0xff] }
  0xc2   : > { %v925_v20 = vpop.f32.mrf.mxu2  ;;  %v729_v44 = vpop.f32.mrf.mxu1  ;;  %v8282_v52 = vunpack.c.l.b16 %v8281_v56 }
  0xc3   : > { %v604_v2 = vpop.f32.mrf.mxu0 }
  0xc4   : > { %v730_v51 = vadd.f32 %v729_v44, %v604_v2  ;;  %v1109_v2 = vor.u32 %v1108_v39, %v1105_v42  ;;  %v6220_v44 = vld [vmem:[%s5590_s26 + $0x58] sm:$0xf]  ;;  %v6250_v42 = vld [vmem:[%s5590_s26 + $0x54] sm:$0x1]  ;;  %v6253_v39 = vld [vmem:[%s5590_s26 + $0x5c] sm:$0x1] }
  0xc5   : > { %v6170_v47 = vpop.f32.mrf.mxu3  ;;  %4927 = vmatmul.msk.bf16.gmra.mxu1 %vm556_vm3, %v1251_v13  ;;  %v6215_v13 = vld [vmem:[%s5590_s26 + $0x50] sm:$0xf] }
  0xc6   : > { %v6172_v50 = vadd.f32 %v925_v20, %v730_v51  ;;  %4910 = vmatmul.msk.bf16.gmra.mxu0 %vm556_vm3, %v1126_v19  ;;  %v286_v20 = vld [vmem:[%s5590_s26 + $0x94] sm:$0x1] }
  0xc7   : > { %v1112_v51 = vshll.u32 %v286_v20, 16 }
  0xca   : > { %4895 = vmatmul.msk.bf16.gmra.mxu3 %vm556_vm3, %v983_v27  ;;  %v927_v0 = vpop.f32.mrf.mxu2  ;;  %v731_v7 = vpop.f32.mrf.mxu1  ;;  %v1859_v27 = vshrl.u32 %v6215_v13, 16 }
  0xcb   : > { %v606_v41 = vpop.f32.mrf.mxu0 }
  0xcc   : > { %v732_v53 = vadd.f32 %v731_v7, %v606_v41  ;;  %v8280_v7 = vunpack.c.l.b16 %v5910_v25  ;;  %v1114_v25 = vrot.slane %v1112_v51, 5  ;;  %v1868_v51 = vshll.u32 %v6250_v42, 16 }
  0xcd   : > { %v749_v63 = vpop.f32.mrf.mxu3 }
  0xce   : > { %v6181_v5 = vadd.f32 %v749_v63, %v624_v30  ;;  %v6183_v54 = vadd.f32 %v927_v0, %v732_v53  ;;  %v1862_v0 = vshll.u32 %v6215_v13, 16  ;;  %v1253_v53 = vpack.c.b16 %v860_v32, %v8280_v7 }
  0xcf   : > { %4943 = vmatmul.msk.bf16.gmra.mxu2 %vm556_vm3, %v5861_v62  ;;  %v984_v62 = vpack.c.b16 %v8279_v34, %v661_v26  ;;  %v1876_v63 = vshll.u32 %v6220_v44, 16  ;;  %v4915_v32 = vrot.slane %v6194_v15, 9  ;;  %v1239_v34 = vrot.slane %v286_v20, 5 }
  0xd0   : > { %v1864_v48 = vrot.slane %v1862_v0, 5  ;;  %v5068_v0 = vld [vmem:[%s8116_s1 + $0x8c] sm:$0xf] }
  0xd2   : > { %v930_v28 = vpop.f32.mrf.mxu2  ;;  %v734_v49 = vpop.f32.mrf.mxu1 }
  0xd3   : > { %v609_v45 = vpop.f32.mrf.mxu0 }
  0xd4   : > { %v735_v46 = vadd.f32 %v734_v49, %v609_v45 }
  0xd5   : > { %v751_v30 = vpop.f32.mrf.mxu3  ;;  %4928 = vmatmul.msk.bf16.gmra.mxu1 %vm556_vm3, %v1252_v29  ;;  %v8283_v29 = vld [vmem:[#allocation3_spill] sm:$0xff] }
  0xd6   : > { %v6196_v31 = vadd.f32 %v751_v30, %v626_v23  ;;  %v6198_v16 = vadd.f32 %v930_v28, %v735_v46  ;;  %4911 = vmatmul.msk.bf16.gmra.mxu0 %vm556_vm3, %v1127_v18  ;;  %v8284_v45 = vunpack.c.l.b16 %v8283_v29  ;;  %v1110_v46 = vrot.slane %v1109_v2, 4 }
  0xd8   : > { %v985_v49 = vpack.c.b16 %v8284_v45, %v8282_v52 }
  0xda   : > { %4896 = vmatmul.msk.bf16.gmra.mxu3 %vm556_vm3, %v984_v62  ;;  %v932_v36 = vpop.f32.mrf.mxu2  ;;  %v736_v43 = vpop.f32.mrf.mxu1  ;;  %v1861_v62 = vrot.slane %v1859_v27, 4 }
  0xdb   : > { %v611_v23 = vpop.f32.mrf.mxu0 }
  0xdc   : > { %v737_v37 = vadd.f32 %v736_v43, %v611_v23  ;;  %v1878_v43 = vrot.slane %v1876_v63, 5 }
  0xdd   : > { %v754_v26 = vpop.f32.mrf.mxu3 }
  0xde   : > { %v6210_v19 = vadd.f32 %v754_v26, %v629_v40  ;;  %v6212_v24 = vadd.f32 %v932_v36, %v737_v37  ;;  %v1128_v40 = vpack.c.b16 %v5762_v60, %v5681_v38  ;;  %v978_v38 = vunpack.c.l.b16 %v6194_v15 }
  0xdf   : > { %4944 = vmatmul.msk.bf16.gmra.mxu2 %vm556_vm3, %v5942_v17  ;;  %v1873_v17 = vshrl.u32 %v6220_v44, 16  ;;  %v1363_v60 = vunpack.c.l.b16 %v6223_v10  ;;  %v1115_v37 = vsel %vm5642_vm7, %v1110_v46, %v1114_v25  ;;  %v1865_v26 = vor.u32 %v1864_v48, %v1861_v62 }
  0xe0   : > { %v6274_v56 = vunpack.c.l.b16 %v1115_v37  ;;  %v5083_v37 = vld [vmem:[%s8116_s1 + $0x98] sm:$0xf] }
  0xe1   : > { %v1875_v23 = vrot.slane %v1873_v17, 4  ;;  %v1365_v2 = vpack.c.b16 %v1363_v60, %v978_v38  ;;  %v2324_v17 = vunpack.c.l.b16 %v5068_v0  ;;  %v1866_v45 = vrot.slane %v1865_v26, 4  ;;  %v5098_v26 = vld [vmem:[%s8116_s1 + $0xa4] sm:$0xf] }
  0xe2   : > { %v935_v41 = vpop.f32.mrf.mxu2  ;;  %v739_v18 = vpop.f32.mrf.mxu1 }
  0xe3   : > { %v614_v28 = vpop.f32.mrf.mxu0  ;;  %v1879_v27 = vor.u32 %v1878_v43, %v1875_v23 }
  0xe4   : > { %v740_v30 = vadd.f32 %v739_v18, %v614_v28 }
  0xe5   : > { %v756_v22 = vpop.f32.mrf.mxu3  ;;  %4929 = vmatmul.msk.bf16.gmra.mxu1 %vm556_vm3, %v1253_v53  ;;  %v1882_v53 = vshll.u32 %v6253_v39, 16 }
  0xe6   : > { %v6243_v61 = vadd.f32 %v756_v22, %v6170_v47  ;;  %v6245_v36 = vadd.f32 %v935_v41, %v740_v30  ;;  %4912 = vmatmul.msk.bf16.gmra.mxu0 %vm556_vm3, %v1128_v40  ;;  %v6259_v47 = vsel %vm5594_vm4, %v4915_v32, %v1239_v34  ;;  %v6269_v41 = vld [vmem:[%s5590_s26 + $0x60] sm:$0xf]  ;;  %v1870_v22 = vrot.slane %v1868_v51, 5  ;;  %v6283_v34 = vld [vmem:[%s5590_s26 + $0x64] sm:$0x1] }
  0xe7   : > { %v1887_v63 = vshrl.u32 %v6269_v41, 16  ;;  %v1890_v28 = vshll.u32 %v6269_v41, 16  ;;  %v8150_v52 = vunpack.c.l.b16 %v6259_v47  ;;  %v1880_v32 = vrot.slane %v1879_v27, 4  ;;  %v6298_v27 = vld [vmem:[%s5590_s26 + $0x68] sm:$0xf] }
  0xe8   : > { %v1884_v62 = vrot.slane %v1882_v53, 5  ;;  %v1896_v43 = vshll.u32 %v6283_v34, 16  ;;  %v2584_v51 = vunpack.c.l.b16 %v5098_v26  ;;  %v1901_v14 = vshrl.u32 %v6298_v27, 16  ;;  %v8286_v26 = vld [vmem:[#allocation5_spill] sm:$0xff] }
  0xe9   : > { %v1889_v46 = vrot.slane %v1887_v63, 4  ;;  %v1892_v30 = vrot.slane %v1890_v28, 5  ;;  %v1871_v63 = vsel %vm5642_vm7, %v1866_v45, %v1870_v22  ;;  %v8287_v45 = vunpack.c.l.b16 %v8286_v26 }
  0xea   : > { %4897 = vmatmul.msk.bf16.gmra.mxu3 %vm556_vm3, %v985_v49  ;;  %v937_v20 = vpop.f32.mrf.mxu2  ;;  %v741_v7 = vpop.f32.mrf.mxu1  ;;  %v2326_v49 = vpack.c.b16 %v2324_v17, %v2324_v17  ;;  %v1254_v17 = vpack.c.b16 %v8150_v52, %v861_v33  ;;  %v1898_v28 = vrot.slane %v1896_v43, 5  ;;  %v1904_v33 = vshll.u32 %v6298_v27, 16 }
  0xeb   : > { %v616_v40 = vpop.f32.mrf.mxu0  ;;  %v1893_v23 = vor.u32 %v1892_v30, %v1889_v46  ;;  %v986_v22 = vpack.c.b16 %v978_v38, %v8287_v45  ;;  %v2086_v38 = vunpack.c.l.b16 %v1871_v63  ;;  %v6352_v45 = vld [vmem:[%s5590_s26 + $0x70] sm:$0xf] }
  0xec   : > { %v742_v18 = vadd.f32 %v741_v7, %v616_v40  ;;  %v2353_v48 = vsel %vm581_vm0, %v2326_v49, 0  ;;  %v8285_v7 = vld [vmem:[#allocation8_spill] sm:$0xff]  ;;  %v1885_v49 = vsel %vm5642_vm7, %v1880_v32, %v1884_v62  ;;  %8291 = vst [vmem:[#allocation5_spill] sm:$0xff] %v6352_v45 }
  0xed   : > { %v945_v29 = vpop.f32.mrf.mxu3  ;;  %2361 = vmatpush.bf16.msrb.mxu3 %v2353_v48  ;;  %v1894_v0 = vrot.slane %v1893_v23, 4  ;;  %v1129_v53 = vpack.c.b16 %v6274_v56, %v8285_v7  ;;  %v2586_v48 = vpack.c.b16 %v2584_v51, %v2584_v51  ;;  %v6328_v51 = vunpack.c.l.b16 %v1885_v49 }
  0xee   : > { %v6278_v60 = vadd.f32 %v945_v29, %v6181_v5  ;;  %v6280_v25 = vadd.f32 %v937_v20, %v742_v18  ;;  %v5115_v5 = vld [vmem:[%s8116_s1 + $0xb0] sm:$0xf]  ;;  %v1903_v7 = vrot.slane %v1901_v14, 4 }
  0xef   : > { %4945 = vmatmul.msk.bf16.gmra.mxu2 %vm556_vm3, %v1365_v2  ;;  %v2709_v20 = vunpack.c.l.b16 %v5115_v5  ;;  %v2441_v2 = vunpack.c.l.b16 %v5083_v37  ;;  %v1899_v5 = vsel %vm5642_vm7, %v1894_v0, %v1898_v28  ;;  %v2613_v62 = vsel %vm581_vm0, %v2586_v48, 0  ;;  %8288 = vst [vmem:[#allocation2_spill] sm:$0xff] %v6328_v51 }
  0xf0   : > { %v6330_v15 = vunpack.c.l.b16 %v1899_v5  ;;  %v1734_v0 = vunpack.c.l.b16 %v6220_v44  ;;  %2621 = vmatpush.bf16.msrb.mxu1 %v2613_v62  ;;  %v1906_v28 = vrot.slane %v1904_v33, 5  ;;  %v2102_v49 = vpack.c.b16 %v6328_v51, %v2086_v38 }
  0xf1   : > { %v2711_v46 = vpack.c.b16 %v2709_v20, %v2709_v20  ;;  %v2443_v30 = vpack.c.b16 %v2441_v2, %v2441_v2  ;;  %v1733_v33 = vunpack.c.l.b16 %v6215_v13 }
  0xf2   : > { %v940_v40 = vpop.f32.mrf.mxu2  ;;  %v744_v29 = vpop.f32.mrf.mxu1  ;;  %8289 = vst [vmem:[#allocation3_spill] sm:$0xff] %v6330_v15 }
  0xf3   : > { %v619_v18 = vpop.f32.mrf.mxu0  ;;  %v2738_v43 = vsel %vm581_vm0, %v2711_v46, 0  ;;  %v2470_v32 = vsel %vm581_vm0, %v2443_v30, 0  ;;  %v1907_v30 = vor.u32 %v1906_v28, %v1903_v7  ;;  %v1918_v7 = vshll.u32 %v6352_v45, 16 }
  0xf4   : > { %v745_v23 = vadd.f32 %v744_v29, %v619_v18  ;;  %2746 = vmatpush.bf16.msrb.mxu2 %v2738_v43  ;;  %2478 = vmatpush.bf16.msrb.mxu0 %v2470_v32  ;;  %v1749_v32 = vpack.c.b16 %v1734_v0, %v1733_v33  ;;  %v6372_v33 = vld [vmem:[%s5590_s26 + $0x74] sm:$0x1] }
  0xf5   : > { %v947_v37 = vpop.f32.mrf.mxu3  ;;  %4930 = vmatmul.msk.bf16.gmra.mxu1 %vm556_vm3, %v1254_v17  ;;  %8296 = vst [vmem:[#allocation16_spill] sm:$0xff] %v6372_v33 }
  0xf6   : > { %v6322_v20 = vadd.f32 %v947_v37, %v6196_v31  ;;  %v6324_v2 = vadd.f32 %v940_v40, %v745_v23  ;;  %4913 = vmatmul.msk.bf16.gmra.mxu0 %vm556_vm3, %v1129_v53  ;;  %v1735_v40 = vunpack.c.l.b16 %v6269_v41  ;;  %v6337_v53 = vld [vmem:[%s5590_s26 + $0x6c] sm:$0x1]  ;;  %v1908_v37 = vrot.slane %v1907_v30, 4 }
  0xf7   : > { %v1910_v48 = vshll.u32 %v6337_v53, 16  ;;  %v1920_v30 = vrot.slane %v1918_v7, 5  ;;  %v1924_v7 = vshll.u32 %v6372_v33, 16 }
  0xf8   : > { %v6340_v63 = vpack.c.b16 %v1735_v40, %v1734_v0  ;;  %v8294_v0 = vld [vmem:[#allocation6_spill] sm:$0xff] }
  0xf9   : > { %v1912_v26 = vrot.slane %v1910_v48, 5  ;;  %v1926_v51 = vrot.slane %v1924_v7, 5 }
  0xfa   : > { %4898 = vmatmul.msk.bf16.gmra.mxu3 %vm556_vm3, %v986_v22  ;;  %v942_v17 = vpop.f32.mrf.mxu2  ;;  %8290 = vst [vmem:[#allocation8_spill] sm:$0xff] %v6340_v63  ;;  %v746_v29 = vpop.f32.mrf.mxu1  ;;  %v6355_v22 = vld [vmem:[%s5590_s26 + $0x78] sm:$0xf] }
  0xfb   : > { %v621_v18 = vpop.f32.mrf.mxu0  ;;  %8292 = vst [vmem:[#allocation14_spill] sm:$0xff] %v6355_v22  ;;  %v1913_v13 = vsel %vm5642_vm7, %v1908_v37, %v1912_v26  ;;  %v1929_v28 = vshrl.u32 %v6355_v22, 16  ;;  %v6375_v37 = vld [vmem:[%s5590_s26 + $0x7c] sm:$0x1]  ;;  %v8298_v26 = vld [vmem:[#allocation7_spill] sm:$0xff] }
  0xfc   : > { %v747_v46 = vadd.f32 %v746_v29, %v621_v18  ;;  %8297 = vst [vmem:[#allocation17_spill] sm:$0xff] %v6375_v37 }
  0xfd   : > { %v950_v23 = vpop.f32.mrf.mxu3  ;;  %v1931_v48 = vrot.slane %v1929_v28, 4  ;;  %v1938_v28 = vshll.u32 %v6375_v37, 16  ;;  %v6421_v37 = vld [vmem:[%s5590_s26 + $0x84] sm:$0x1] }
  0xfe   : > { %v6345_v5 = vadd.f32 %v950_v23, %v6210_v19  ;;  %v6347_v14 = vadd.f32 %v942_v17, %v747_v46  ;;  %v1915_v19 = vshrl.u32 %v6352_v45, 16  ;;  %v1932_v17 = vshll.u32 %v6355_v22, 16  ;;  %8305 = vst [vmem:[#allocation21_spill] sm:$0xff] %v6421_v37 }
  0xff   : > { %5042 = vmatmul.msk.bf16.vlgmr.msra.gmra.mxu2 %vm556_vm3, %v2102_v49  ;;  %v6369_v49 = vunpack.c.l.b16 %v1913_v13 }
 0x100   : > { %v1917_v46 = vrot.slane %v1915_v19, 4  ;;  %v1934_v23 = vrot.slane %v1932_v17, 5 }
 0x101   : > { %8295 = vst [vmem:[#allocation6_spill] sm:$0xff] %v6369_v49 }
 0x102   : > { %v1393_v43 = vpop.f32.mrf.mxu2  ;;  %v1300_v38 = vpop.f32.mrf.mxu1  ;;  %v1921_v19 = vor.u32 %v1920_v30, %v1917_v46  ;;  %v1935_v13 = vor.u32 %v1934_v23, %v1931_v48  ;;  %v6393_v46 = vld [vmem:[%s5590_s26 + $0x88] sm:$0xf] }
 0x103   : > { %v1175_v62 = vpop.f32.mrf.mxu0 }
 0x104   : > { %v1922_v52 = vrot.slane %v1921_v19, 4  ;;  %v1936_v63 = vrot.slane %v1935_v13, 4  ;;  %v1957_v13 = vshrl.u32 %v6393_v46, 16 }
 0x105   : > { %v952_v18 = vpop.f32.mrf.mxu3  ;;  %5027 = vmatmul.msk.bf16.vlgmr.msra.gmra.mxu1 %vm556_vm3, %v1749_v32  ;;  %v6381_v32 = vpack.c.b16 %v6369_v49, %v6330_v15  ;;  %v1940_v49 = vrot.slane %v1938_v28, 5  ;;  %v6390_v15 = vld [vmem:[%s5590_s26 + $0x80] sm:$0xf] }
 0x106   : > { %v6364_v29 = vadd.f32 %v952_v18, %v6243_v61  ;;  %4970 = vmatmul.msk.bf16.vlgmr.msra.gmra.mxu0 %vm556_vm3, %v8294_v0  ;;  %v1927_v19 = vsel %vm5642_vm7, %v1922_v52, %v1926_v51 }
 0x107   : > { %8299 = vst [vmem:[#allocation7_spill] sm:$0xff] %v6381_v32  ;;  %v1941_v7 = vsel %vm5642_vm7, %v1936_v63, %v1940_v49  ;;  %v6416_v52 = vunpack.c.l.b16 %v1927_v19 }
 0x108   : > { %8293 = vst [vmem:[#allocation15_spill] sm:$0xff] %v6364_v29  ;;  %v6418_v51 = vunpack.c.l.b16 %v1941_v7  ;;  %v1959_v29 = vrot.slane %v1957_v13, 4 }
 0x10a   : > { %4953 = vmatmul.msk.bf16.vlgmr.msra.gmra.mxu3 %vm556_vm3, %v8298_v26  ;;  %v1395_v61 = vpop.f32.mrf.mxu2  ;;  %v1302_v31 = vpop.f32.mrf.mxu1  ;;  %v8156_v26 = vunpack.c.l.b16 %v6298_v27  ;;  %8304 = vst [vmem:[#allocation20_spill] sm:$0xff] %v6418_v51  ;;  %v6432_v7 = vpack.c.b16 %v6418_v51, %v6416_v52  ;;  %v8165_v51 = vunpack.c.l.b16 %v6352_v45 }
 0x10b   : > { %v1177_v18 = vpop.f32.mrf.mxu0 }
 0x10c   : > { %v6399_v48 = vpack.c.b16 %v8156_v26, %v1735_v40  ;;  %v1960_v40 = vshll.u32 %v6393_v46, 16 }
 0x10d   : > { %v1032_v17 = vpop.f32.mrf.mxu3 }
 0x10e   : > { %v1072_v0 = vadd.f32 %v1032_v17, %v6113_v6  ;;  %8300 = vst [vmem:[#allocation18_spill] sm:$0xff] %v6399_v48 }
 0x10f   : > { %5043 = vmatmul.msk.bf16.gmra.mxu2 %vm556_vm3, %v6381_v32  ;;  %v1943_v32 = vshrl.u32 %v6390_v15, 16 }
 0x110   : > { %v1215_v11 = vadd.f32 %v1175_v62, %v1072_v0  ;;  %v1946_v62 = vshll.u32 %v6390_v15, 16  ;;  %v8302_v0 = vld [vmem:[#allocation10_spill] sm:$0xff] }
 0x111   : > { %8303 = vst [vmem:[#allocation10_spill] sm:$0xff] %v6416_v52  ;;  %v1945_v63 = vrot.slane %v1943_v32, 4 }
 0x112   : > { %v6395_v30 = vpop.f32.mrf.mxu2  ;;  %v1340_v6 = vadd.f32 %v1300_v38, %v1215_v11  ;;  %v1305_v17 = vpop.f32.mrf.mxu1  ;;  %v1948_v49 = vrot.slane %v1946_v62, 5 }
 0x113   : > { %v1180_v23 = vpop.f32.mrf.mxu0 }
 0x114   : > { %v6409_v11 = vadd.f32 %v1393_v43, %v1340_v6  ;;  %v1962_v43 = vrot.slane %v1960_v40, 5  ;;  %v6424_v6 = vld [vmem:[%s5590_s26 + $0x8c] sm:$0x1]  ;;  %v1949_v32 = vor.u32 %v1948_v49, %v1945_v63  ;;  %v8164_v63 = vunpack.c.l.b16 %v6355_v22 }
 0x115   : > { %v1034_v28 = vpop.f32.mrf.mxu3  ;;  %5028 = vmatmul.msk.bf16.gmra.mxu1 %vm556_vm3, %v6399_v48  ;;  %8306 = vst [vmem:[#allocation22_spill] sm:$0xff] %v6424_v6  ;;  %v1966_v13 = vshll.u32 %v6424_v6, 16  ;;  %v6446_v6 = vld [vmem:[%s5590_s26 + $0xa0] sm:$0xf] }
 0x116   : > { %8301 = vst [vmem:[#allocation19_spill] sm:$0xff] %v6409_v11  ;;  %v1073_v38 = vadd.f32 %v1034_v28, %v6132_v55  ;;  %4971 = vmatmul.msk.bf16.gmra.mxu0 %vm556_vm3, %v8302_v0  ;;  %v8307_v55 = vld [vmem:[#allocation11_spill] sm:$0xff]  ;;  %v1963_v62 = vor.u32 %v1962_v43, %v1959_v29  ;;  %v1950_v29 = vrot.slane %v1949_v32, 4 }
 0x117   : > { %8308 = vst [vmem:[#allocation11_spill] sm:$0xff] %v6432_v7 }
 0x118   : > { %v1216_v26 = vadd.f32 %v1177_v18, %v1073_v38  ;;  %v1952_v18 = vshll.u32 %v6421_v37, 16  ;;  %v1450_v38 = vshrl.u32 %v6111_v59, 16 }
 0x11a   : > { %4954 = vmatmul.msk.bf16.gmra.mxu3 %vm556_vm3, %v8307_v55  ;;  %v6428_v28 = vpop.f32.mrf.mxu2  ;;  %v1341_v0 = vadd.f32 %v1302_v31, %v1216_v26  ;;  %v1307_v19 = vpop.f32.mrf.mxu1  ;;  %v1453_v31 = vshll.u32 %v6111_v59, 16  ;;  %v1954_v49 = vrot.slane %v1952_v18, 5  ;;  %v1452_v52 = vrot.slane %v1450_v38, 4 }
 0x11b   : > { %v1182_v48 = vpop.f32.mrf.mxu0  ;;  %v1974_v38 = vshll.u32 %v6446_v6, 16 }
 0x11c   : > { %v6436_v40 = vadd.f32 %v1395_v61, %v1341_v0  ;;  %v1964_v61 = vrot.slane %v1963_v62, 4  ;;  %v1968_v0 = vrot.slane %v1966_v13, 5  ;;  %v1455_v37 = vrot.slane %v1453_v31, 5  ;;  %v268_v62 = vld [vmem:[%s5590_s26 + $0x4c] sm:$0x1] }
 0x11d   : > { %v1037_v55 = vpop.f32.mrf.mxu3  ;;  %v1971_v13 = vshrl.u32 %v6446_v6, 16  ;;  %v1572_v22 = vrot.slane %v268_v62, 5 }
 0x11e   : > { %8309 = vst [vmem:[#allocation23_spill] sm:$0xff] %v6436_v40  ;;  %v1074_v26 = vadd.f32 %v1037_v55, %v6153_v4  ;;  %v6449_v40 = vld [vmem:[%s5590_s26 + $0xa8] sm:$0xf]  ;;  %v6457_v55 = vpack.c.b16 %v8164_v63, %v8165_v51  ;;  %v1969_v31 = vsel %vm5642_vm7, %v1964_v61, %v1968_v0  ;;  %v8312_v51 = vld [vmem:[#allocation12_spill] sm:$0xff]  ;;  %v1456_v61 = vor.u32 %v1455_v37, %v1452_v52 }
 0x11f   : > { %5044 = vmatmul.msk.bf16.gmra.mxu2 %vm556_vm3, %v6432_v7  ;;  %v1988_v63 = vshll.u32 %v6449_v40, 16  ;;  %v1459_v0 = vshll.u32 %v268_v62, 16  ;;  %v6481_v33 = vunpack.c.l.b16 %v1969_v31 }
 0x120   : > { %v1217_v43 = vadd.f32 %v1180_v23, %v1074_v26  ;;  %8310 = vst [vmem:[#allocation24_spill] sm:$0xff] %v6457_v55  ;;  %v1955_v23 = vsel %vm5642_vm7, %v1950_v29, %v1954_v49  ;;  %v1985_v26 = vshrl.u32 %v6449_v40, 16  ;;  %v1457_v37 = vrot.slane %v1456_v61, 4 }
 0x121   : > { %v6479_v11 = vunpack.c.l.b16 %v1955_v23  ;;  %8313 = vst [vmem:[#allocation12_spill] sm:$0xff] %v6481_v33  ;;  %v1461_v52 = vrot.slane %v1459_v0, 5  ;;  %v5386_v23 = vld [vmem:[%s8116_s1 + $0x84] sm:$0xff] }
 0x122   : > { %v6451_v4 = vpop.f32.mrf.mxu2  ;;  %v1342_v7 = vadd.f32 %v1305_v17, %v1217_v43  ;;  %v6459_v18 = vpop.f32.mrf.mxu1  ;;  %v4961_v43 = vrot.slane %v6111_v59, 9  ;;  %v1987_v45 = vrot.slane %v1985_v26, 4  ;;  %2362 = vmatpush.bf16.msrb.mxu3 %v5386_v23 }
 0x123   : > { %v1185_v32 = vpop.f32.mrf.mxu0 }
 0x124   : > { %v6471_v17 = vadd.f32 %v6395_v30, %v1342_v7  ;;  %v1973_v30 = vrot.slane %v1971_v13, 4  ;;  %v1976_v7 = vrot.slane %v1974_v38, 5  ;;  %v6498_v38 = vpack.c.b16 %v6481_v33, %v6479_v11 }
 0x125   : > { %v1039_v29 = vpop.f32.mrf.mxu3  ;;  %5029 = vmatmul.msk.bf16.gmra.mxu1 %vm556_vm3, %v6457_v55  ;;  %v8174_v33 = vunpack.c.l.b16 %v6390_v15 }
 0x126   : > { %8311 = vst [vmem:[#allocation25_spill] sm:$0xff] %v6471_v17  ;;  %v1075_v49 = vadd.f32 %v1039_v29, %v6160_v12  ;;  %4972 = vmatmul.msk.bf16.gmra.mxu0 %vm556_vm3, %v8312_v51  ;;  %v6484_v17 = vld [vmem:[%s5590_s26 + $0xa4] sm:$0x1]  ;;  %v1990_v12 = vrot.slane %v1988_v63, 5  ;;  %v6487_v29 = vld [vmem:[%s5590_s26 + $0xac] sm:$0x1]  ;;  %v1573_v63 = vsel %vm5594_vm4, %v4961_v43, %v1572_v22  ;;  %v1977_v31 = vor.u32 %v1976_v7, %v1973_v30 }
 0x127   : > { %8314 = vst [vmem:[#allocation26_spill] sm:$0xff] %v6484_v17  ;;  %v8315_v51 = vld [vmem:[#allocation13_spill] sm:$0xff]  ;;  %v1980_v26 = vshll.u32 %v6484_v17, 16  ;;  %v1994_v61 = vshll.u32 %v6487_v29, 16  ;;  %v8173_v22 = vunpack.c.l.b16 %v6393_v46  ;;  %v6515_v7 = vld [vmem:[%s5590_s26 + $0xb0] sm:$0xf] }
 0x128   : > { %v1218_v59 = vadd.f32 %v1182_v48, %v1075_v49  ;;  %8316 = vst [vmem:[#allocation13_spill] sm:$0xff] %v6498_v38  ;;  %v1991_v49 = vor.u32 %v1990_v12, %v1987_v45  ;;  %v1462_v45 = vsel %vm5642_vm7, %v1457_v37, %v1461_v52  ;;  %v1978_v43 = vrot.slane %v1977_v31, 4  ;;  %v6527_v37 = vld [vmem:[%s5590_s26 + $0xb8] sm:$0xf]  ;;  %v6562_v17 = vld [vmem:[%s5590_s26 + $0xbc] sm:$0x1] }
 0x129   : > { %v1982_v30 = vrot.slane %v1980_v26, 5  ;;  %v1996_v23 = vrot.slane %v1994_v61, 5  ;;  %v1481_v52 = vunpack.c.l.b16 %v1462_v45  ;;  %v8317_v31 = vunpack.c.l.b16 %v6130_v35  ;;  %8320 = vst [vmem:[#allocation29_spill] sm:$0xff] %v6562_v17 }
 0x12a   : > { %4955 = vmatmul.msk.bf16.gmra.mxu3 %vm556_vm3, %v8315_v51  ;;  %v6491_v55 = vpop.f32.mrf.mxu2  ;;  %v1343_v62 = vadd.f32 %v1307_v19, %v1218_v59  ;;  %v1312_v48 = vpop.f32.mrf.mxu1  ;;  %v1582_v51 = vunpack.c.l.b16 %v1573_v63  ;;  %v1992_v12 = vrot.slane %v1991_v49, 4  ;;  %v5388_v63 = vld [vmem:[%s8116_s1 + $0x9c] sm:$0xff]  ;;  %v6537_v49 = vpack.c.b16 %v8173_v22, %v8174_v33 }
 0x12b   : > { %v1187_v13 = vpop.f32.mrf.mxu0  ;;  %v1983_v45 = vsel %vm5642_vm7, %v1978_v43, %v1982_v30  ;;  %2622 = vmatpush.bf16.msrb.mxu1 %v5388_v63  ;;  %v1999_v35 = vshrl.u32 %v6515_v7, 16  ;;  %v2013_v22 = vshrl.u32 %v6527_v37, 16  ;;  %v1483_v30 = vpack.c.b16 %v1481_v52, %v6134_v3 }
 0x12c   : > { %v6505_v0 = vadd.f32 %v6428_v28, %v1343_v62  ;;  %v5387_v62 = vld [vmem:[%s8116_s1 + $0x90] sm:$0xff]  ;;  %8318 = vst [vmem:[#allocation27_spill] sm:$0xff] %v6537_v49 }
 0x12d   : > { %v1042_v19 = vpop.f32.mrf.mxu3  ;;  %2479 = vmatpush.bf16.msrb.mxu0 %v5387_v62  ;;  %v2094_v62 = vunpack.c.l.b16 %v1983_v45 }
 0x12e   : > { %v1076_v59 = vadd.f32 %v1042_v19, %v6172_v50  ;;  %v5389_v50 = vld [vmem:[%s8116_s1 + $0xa8] sm:$0xff] }
 0x12f   : > { %5045 = vmatmul.msk.bf16.gmra.mxu2 %vm556_vm3, %v6498_v38  ;;  %v6559_v38 = vld [vmem:[%s5590_s26 + $0xb4] sm:$0x1] }
 0x130   : > { %v1219_v28 = vadd.f32 %v1185_v32, %v1076_v59  ;;  %v1584_v32 = vpack.c.b16 %v1582_v51, %v8317_v31  ;;  %2747 = vmatpush.bf16.msrb.mxu2 %v5389_v50  ;;  %v2002_v51 = vshll.u32 %v6515_v7, 16  ;;  %v1997_v31 = vsel %vm5642_vm7, %v1992_v12, %v1996_v23 }
 0x131   : > { %v2016_v50 = vshll.u32 %v6527_v37, 16  ;;  %v6556_v12 = vunpack.c.l.b16 %v1997_v31  ;;  %v2001_v23 = vrot.slane %v1999_v35, 4  ;;  %v2008_v35 = vshll.u32 %v6559_v38, 16 }
 0x132   : > { %v6531_v26 = vpop.f32.mrf.mxu2  ;;  %v1344_v61 = vadd.f32 %v6459_v18, %v1219_v28  ;;  %v1315_v59 = vpop.f32.mrf.mxu1  ;;  %v2004_v63 = vrot.slane %v2002_v51, 5  ;;  %v2022_v51 = vshll.u32 %v6562_v17, 16  ;;  %v6603_v17 = vld [vmem:[%s5590_s26 + $0xc4] sm:$0x1] }
 0x133   : > { %v1190_v19 = vpop.f32.mrf.mxu0  ;;  %8319 = vst [vmem:[#allocation28_spill] sm:$0xff] %v6556_v12 }
 0x134   : > { %v6549_v18 = vadd.f32 %v6451_v4, %v1344_v61  ;;  %v2015_v4 = vrot.slane %v2013_v22, 4  ;;  %v2018_v61 = vrot.slane %v2016_v50, 5  ;;  %v2005_v45 = vor.u32 %v2004_v63, %v2001_v23 }
 0x135   : > { %v1044_v28 = vpop.f32.mrf.mxu3  ;;  %5030 = vmatmul.msk.bf16.gmra.mxu1 %vm556_vm3, %v6537_v49  ;;  %v2024_v63 = vrot.slane %v2022_v51, 5 }
 0x136   : > { %v1077_v43 = vadd.f32 %v1044_v28, %v6183_v54  ;;  %4973 = vmatmul.msk.bf16.gmra.mxu0 %vm556_vm3, %v1584_v32  ;;  %v2106_v28 = vpack.c.b16 %v6556_v12, %v2094_v62 }
 0x138   : > { %v1220_v33 = vadd.f32 %v1187_v13, %v1077_v43  ;;  %v2019_v13 = vor.u32 %v2018_v61, %v2015_v4  ;;  %v2006_v43 = vrot.slane %v2005_v45, 4  ;;  %v6576_v4 = vld [vmem:[%s5590_s26 + $0xc0] sm:$0xf]  ;;  %v6579_v61 = vld [vmem:[%s5590_s26 + $0xc8] sm:$0xf] }
 0x13a   : > { %4956 = vmatmul.msk.bf16.gmra.mxu3 %vm556_vm3, %v1483_v30  ;;  %v1410_v3 = vpop.f32.mrf.mxu2  ;;  %v1345_v54 = vadd.f32 %v1312_v48, %v1220_v33  ;;  %v1317_v32 = vpop.f32.mrf.mxu1  ;;  %v1741_v33 = vunpack.c.l.b16 %v6446_v6  ;;  %v8179_v48 = vunpack.c.l.b16 %v6449_v40  ;;  %v2010_v30 = vrot.slane %v2008_v35, 5 }
 0x13b   : > { %v1192_v52 = vpop.f32.mrf.mxu0  ;;  %v2020_v23 = vrot.slane %v2019_v13, 4  ;;  %v2041_v35 = vshrl.u32 %v6579_v61, 16  ;;  %v2044_v13 = vshll.u32 %v6579_v61, 16 }
 0x13c   : > { %v6569_v22 = vadd.f32 %v6491_v55, %v1345_v54  ;;  %v1753_v54 = vpack.c.b16 %v8179_v48, %v1741_v33  ;;  %v2011_v12 = vsel %vm5642_vm7, %v2006_v43, %v2010_v30 }
 0x13d   : > { %v1047_v31 = vpop.f32.mrf.mxu3  ;;  %v2025_v45 = vsel %vm5642_vm7, %v2020_v23, %v2024_v63  ;;  %v6598_v33 = vunpack.c.l.b16 %v2011_v12  ;;  %v2043_v63 = vrot.slane %v2041_v35, 4  ;;  %v2046_v48 = vrot.slane %v2044_v13, 5 }
 0x13e   : > { %v1078_v50 = vadd.f32 %v1047_v31, %v6198_v16  ;;  %v6600_v43 = vunpack.c.l.b16 %v2025_v45 }
 0x13f   : > { %5046 = vmatmul.msk.bf16.gmra.mxu2 %vm556_vm3, %v2106_v28  ;;  %v2027_v28 = vshrl.u32 %v6576_v4, 16  ;;  %8321 = vst [vmem:[#allocation30_spill] sm:$0xff] %v6598_v33 }
 0x140   : > { %v1221_v62 = vadd.f32 %v1190_v19, %v1078_v50  ;;  %v2030_v19 = vshll.u32 %v6576_v4, 16  ;;  %8322 = vst [vmem:[#allocation31_spill] sm:$0xff] %v6600_v43  ;;  %v6612_v12 = vpack.c.b16 %v6600_v43, %v6598_v33  ;;  %v6655_v33 = vld [vmem:[%s5590_s26 + $0xd4] sm:$0x1] }
 0x141   : > { %v2029_v30 = vrot.slane %v2027_v28, 4  ;;  %8330 = vst [vmem:[#allocation39_spill] sm:$0xff] %v6655_v33 }
 0x142   : > { %v1413_v55 = vpop.f32.mrf.mxu2  ;;  %v1346_v16 = vadd.f32 %v1315_v59, %v1221_v62  ;;  %v1320_v49 = vpop.f32.mrf.mxu1  ;;  %v2032_v62 = vrot.slane %v2030_v19, 5  ;;  %8324 = vst [vmem:[#allocation33_spill] sm:$0xff] %v6612_v12  ;;  %v2047_v19 = vor.u32 %v2046_v48, %v2043_v63  ;;  %v6624_v48 = vld [vmem:[%s5590_s26 + $0xd0] sm:$0xf]  ;;  %v6627_v63 = vld [vmem:[%s5590_s26 + $0xd8] sm:$0xf] }
 0x143   : > { %v1195_v31 = vpop.f32.mrf.mxu0 }
 0x144   : > { %v6592_v59 = vadd.f32 %v6531_v26, %v1346_v16  ;;  %v6606_v26 = vld [vmem:[%s5590_s26 + $0xcc] sm:$0x1]  ;;  %v2033_v28 = vor.u32 %v2032_v62, %v2029_v30 }
 0x145   : > { %v1049_v51 = vpop.f32.mrf.mxu3  ;;  %5031 = vmatmul.msk.bf16.gmra.mxu1 %vm556_vm3, %v1753_v54  ;;  %8323 = vst [vmem:[#allocation32_spill] sm:$0xff] %v6606_v26  ;;  %v2050_v45 = vshll.u32 %v6606_v26, 16 }
 0x146   : > { %v1079_v50 = vadd.f32 %v1049_v51, %v6212_v24  ;;  %4974 = vmatmul.msk.bf16.gmra.mxu0 %vm556_vm3, %v6019_v57  ;;  %v8183_v51 = vunpack.c.l.b16 %v6527_v37 }
 0x147   : > { %v2052_v43 = vrot.slane %v2050_v45, 5  ;;  %v2069_v45 = vshrl.u32 %v6627_v63, 16 }
 0x148   : > { %v1222_v23 = vadd.f32 %v1192_v52, %v1079_v50  ;;  %v2036_v52 = vshll.u32 %v6603_v17, 16  ;;  %v2034_v50 = vrot.slane %v2033_v28, 4  ;;  %v2055_v28 = vshrl.u32 %v6624_v48, 16 }
 0x14a   : > { %4957 = vmatmul.msk.bf16.gmra.mxu3 %vm556_vm3, %v6055_v8  ;;  %v1415_v24 = vpop.f32.mrf.mxu2  ;;  %v1347_v57 = vadd.f32 %v1317_v32, %v1222_v23  ;;  %v1322_v54 = vpop.f32.mrf.mxu1  ;;  %v8184_v32 = vunpack.c.l.b16 %v6515_v7  ;;  %v2038_v62 = vrot.slane %v2036_v52, 5  ;;  %v2048_v23 = vrot.slane %v2047_v19, 4 }
 0x14b   : > { %v1197_v16 = vpop.f32.mrf.mxu0 }
 0x14c   : > { %v6616_v35 = vadd.f32 %v1410_v3, %v1347_v57  ;;  %v2039_v52 = vsel %vm5642_vm7, %v2034_v50, %v2038_v62  ;;  %v2053_v19 = vsel %vm5642_vm7, %v2048_v23, %v2052_v43  ;;  %v2057_v43 = vrot.slane %v2055_v28, 4 }
 0x14d   : > { %v1052_v13 = vpop.f32.mrf.mxu3  ;;  %v6650_v50 = vunpack.c.l.b16 %v2039_v52  ;;  %v6652_v62 = vunpack.c.l.b16 %v2053_v19 }
 0x14e   : > { %8325 = vst [vmem:[#allocation34_spill] sm:$0xff] %v6616_v35  ;;  %v1080_v8 = vadd.f32 %v1052_v13, %v6245_v36  ;;  %v6633_v36 = vpack.c.b16 %v8183_v51, %v8184_v32 }
 0x14f   : > { %5047 = vmatmul.msk.bf16.gmra.mxu2 %vm556_vm3, %v6612_v12  ;;  %8328 = vst [vmem:[#allocation37_spill] sm:$0xff] %v6650_v50  ;;  %v2071_v12 = vrot.slane %v2069_v45, 4  ;;  %v6664_v52 = vpack.c.b16 %v6652_v62, %v6650_v50 }
 0x150   : > { %v1223_v30 = vadd.f32 %v1195_v31, %v1080_v8  ;;  %8326 = vst [vmem:[#allocation35_spill] sm:$0xff] %v6633_v36  ;;  %v2058_v31 = vshll.u32 %v6624_v48, 16  ;;  %v2072_v8 = vshll.u32 %v6627_v63, 16 }
 0x151   : > { %8329 = vst [vmem:[#allocation38_spill] sm:$0xff] %v6652_v62  ;;  %v8192_v62 = vunpack.c.l.b16 %v6579_v61 }
 0x152   : > { %v1418_v3 = vpop.f32.mrf.mxu2  ;;  %v1348_v57 = vadd.f32 %v1320_v49, %v1223_v30  ;;  %v1325_v26 = vpop.f32.mrf.mxu1  ;;  %v2060_v23 = vrot.slane %v2058_v31, 5  ;;  %v2074_v35 = vrot.slane %v2072_v8, 5 }
 0x153   : > { %v1200_v13 = vpop.f32.mrf.mxu0 }
 0x154   : > { %v6643_v49 = vadd.f32 %v1413_v55, %v1348_v57  ;;  %v6658_v55 = vld [vmem:[%s5590_s26 + $0xdc] sm:$0x1]  ;;  %v2061_v28 = vor.u32 %v2060_v23, %v2057_v43  ;;  %v2075_v31 = vor.u32 %v2074_v35, %v2071_v12 }
 0x155   : > { %v1054_v51 = vpop.f32.mrf.mxu3  ;;  %5032 = vmatmul.msk.bf16.gmra.mxu1 %vm556_vm3, %v6633_v36  ;;  %8331 = vst [vmem:[#allocation40_spill] sm:$0xff] %v6658_v55  ;;  %v2078_v19 = vshll.u32 %v6658_v55, 16 }
 0x156   : > { %8327 = vst [vmem:[#allocation36_spill] sm:$0xff] %v6643_v49  ;;  %v1081_v30 = vadd.f32 %v1054_v51, %v6280_v25  ;;  %4975 = vmatmul.msk.bf16.gmra.mxu0 %vm556_vm3, %v6007_v9  ;;  %v8332_v25 = vld [vmem:[#allocation4_spill] sm:$0xff]  ;;  %v2062_v12 = vrot.slane %v2061_v28, 4 }
 0x157   : > { %v2080_v23 = vrot.slane %v2078_v19, 5 }
 0x158   : > { %v1224_v32 = vadd.f32 %v1197_v16, %v1081_v30  ;;  %v2064_v16 = vshll.u32 %v6655_v33, 16  ;;  %v1464_v30 = vshrl.u32 %v6223_v10, 16 }
 0x15a   : > { %4958 = vmatmul.msk.bf16.gmra.mxu3 %vm556_vm3, %v8332_v25  ;;  %v1420_v9 = vpop.f32.mrf.mxu2  ;;  %v1349_v51 = vadd.f32 %v1322_v54, %v1224_v32  ;;  %v1327_v36 = vpop.f32.mrf.mxu1  ;;  %v1467_v54 = vshll.u32 %v6223_v10, 16  ;;  %v8193_v25 = vunpack.c.l.b16 %v6576_v4  ;;  %v2066_v43 = vrot.slane %v2064_v16, 5 }
 0x15b   : > { %v1202_v57 = vpop.f32.mrf.mxu0 }
 0x15c   : > { %v6668_v45 = vadd.f32 %v1415_v24, %v1349_v51  ;;  %v2076_v24 = vrot.slane %v2075_v31, 4  ;;  %v1466_v51 = vrot.slane %v1464_v30, 4  ;;  %v1469_v55 = vrot.slane %v1467_v54, 5 }
 0x15d   : > { %v1057_v8 = vpop.f32.mrf.mxu3 }
 0x15e   : > { %8333 = vst [vmem:[#allocation4_spill] sm:$0xff] %v6668_v45  ;;  %v1082_v32 = vadd.f32 %v1057_v8, %v6324_v2  ;;  %v6683_v2 = vpack.c.b16 %v8192_v62, %v8193_v25  ;;  %v288_v8 = vld [vmem:[%s5590_s26 + $0x9c] sm:$0x1]  ;;  %v2081_v28 = vsel %vm5642_vm7, %v2076_v24, %v2080_v23  ;;  %v1470_v19 = vor.u32 %v1469_v55, %v1466_v51 }
 0x15f   : > { %5048 = vmatmul.msk.bf16.gmra.mxu2 %vm556_vm3, %v6664_v52  ;;  %v1473_v30 = vshll.u32 %v288_v8, 16  ;;  %v8335_v55 = vld [vmem:[#allocation9_spill] sm:$0xff] }
 0x160   : > { %v1225_v35 = vadd.f32 %v1200_v13, %v1082_v32  ;;  %8334 = vst [vmem:[#allocation41_spill] sm:$0xff] %v6683_v2  ;;  %v2067_v13 = vsel %vm5642_vm7, %v2062_v12, %v2066_v43  ;;  %v6699_v32 = vunpack.c.l.b16 %v2081_v28  ;;  %v4962_v12 = vrot.slane %v6223_v10, 9 }
 0x161   : > { %v1475_v43 = vrot.slane %v1473_v30, 5  ;;  %v2237_v28 = vrot.slane %v6283_v34, 5  ;;  %v5052_v34 = vrot.slane %v6269_v41, 9 }
 0x162   : > { %v6677_v45 = vpop.f32.mrf.mxu2  ;;  %v1350_v50 = vadd.f32 %v1325_v26, %v1225_v35  ;;  %v1330_v49 = vpop.f32.mrf.mxu1  ;;  %v6697_v26 = vunpack.c.l.b16 %v2067_v13  ;;  %v1576_v35 = vrot.slane %v288_v8, 5 }
 0x163   : > { %v1205_v33 = vpop.f32.mrf.mxu0 }
 0x164   : > { %v6690_v16 = vadd.f32 %v1418_v3, %v1350_v50  ;;  %v1471_v50 = vrot.slane %v1470_v19, 4  ;;  %v6711_v13 = vpack.c.b16 %v6699_v32, %v6697_v26  ;;  %v1577_v10 = vsel %vm5594_vm4, %v4962_v12, %v1576_v35 }
 0x165   : > { %v1059_v31 = vpop.f32.mrf.mxu3  ;;  %5033 = vmatmul.msk.bf16.gmra.mxu1 %vm556_vm3, %v6683_v2  ;;  %v2233_v12 = vrot.slane %v6253_v39, 5 }
 0x166   : > { %v1083_v54 = vadd.f32 %v1059_v31, %v6347_v14  ;;  %4976 = vmatmul.msk.bf16.gmra.mxu0 %vm556_vm3, %v6073_v1  ;;  %v5130_v1 = vld [vmem:[%s8116_s1 + $0xbc] sm:$0xf]  ;;  %8336 = vst [vmem:[#allocation9_spill] sm:$0xff] %v6711_v13  ;;  %v1476_v19 = vsel %vm5642_vm7, %v1471_v50, %v1475_v43  ;;  %v5145_v43 = vld [vmem:[%s8116_s1 + $0xc8] sm:$0xf] }
 0x167   : > { %v2939_v39 = vunpack.c.l.b16 %v5145_v43  ;;  %v1482_v41 = vunpack.c.l.b16 %v1476_v19 }
 0x168   : > { %v1226_v3 = vadd.f32 %v1202_v57, %v1083_v54  ;;  %v2820_v57 = vunpack.c.l.b16 %v5130_v1  ;;  %v1583_v54 = vunpack.c.l.b16 %v1577_v10  ;;  %v8337_v10 = vunpack.c.l.b16 %v6259_v47 }
 0x169   : > { %v2941_v62 = vpack.c.b16 %v2939_v39, %v2939_v39  ;;  %v6750_v47 = vsel %vm5594_vm4, %v5052_v34, %v2237_v28 }
 0x16a   : > { %4959 = vmatmul.msk.bf16.gmra.mxu3 %vm556_vm3, %v8335_v55  ;;  %v6704_v14 = vpop.f32.mrf.mxu2  ;;  %v1351_v24 = vadd.f32 %v1327_v36, %v1226_v3  ;;  %v1332_v51 = vpop.f32.mrf.mxu1  ;;  %v2822_v30 = vpack.c.b16 %v2820_v57, %v2820_v57  ;;  %v8196_v3 = vunpack.c.l.b16 %v6624_v48  ;;  %v8195_v55 = vunpack.c.l.b16 %v6627_v63 }
 0x16b   : > { %v1207_v23 = vpop.f32.mrf.mxu0  ;;  %v2950_v43 = vsel %vm581_vm0, %v2941_v62, 0 }
 0x16c   : > { %v6715_v8 = vadd.f32 %v1420_v9, %v1351_v24  ;;  %v5051_v9 = vrot.slane %v6220_v44, 9  ;;  %v2831_v35 = vsel %vm581_vm0, %v2822_v30, 0  ;;  %v5162_v44 = vld [vmem:[%s8116_s1 + $0xd4] sm:$0xf]  ;;  %2958 = vmatpush.bf16.msra.mxu0 %v2950_v43 }
 0x16d   : > { %v1062_v31 = vpop.f32.mrf.mxu3  ;;  %2839 = vmatpush.bf16.msra.mxu3 %v2831_v35  ;;  %v3040_v24 = vunpack.c.l.b16 %v5162_v44 }
 0x16e   : > { %v1084_v36 = vadd.f32 %v1062_v31, %v6278_v60  ;;  %v5219_v60 = vld [vmem:[%s8116_s1 + $0xe0] sm:$0xf]  ;;  %v6744_v31 = vpack.c.b16 %v8195_v55, %v8196_v3 }
 0x16f   : > { %5049 = vmatmul.msk.bf16.gmra.mxu2 %vm556_vm3, %v6711_v13  ;;  %v3211_v1 = vunpack.c.l.b16 %v5219_v60  ;;  %v3042_v25 = vpack.c.b16 %v3040_v24, %v3040_v24  ;;  %v2234_v60 = vsel %vm5594_vm4, %v5051_v9, %v2233_v12  ;;  %v2297_v9 = vunpack.c.l.b16 %v6750_v47 }
 0x170   : > { %v1227_v50 = vadd.f32 %v1205_v33, %v1084_v36  ;;  %v1585_v33 = vpack.c.b16 %v1583_v54, %v8337_v10  ;;  %8338 = vst [vmem:[#allocation42_spill] sm:$0xff] %v6744_v31  ;;  %v2296_v28 = vunpack.c.l.b16 %v2234_v60  ;;  %v8339_v60 = vld [vmem:[#allocation5_spill] sm:$0xff] }
 0x171   : > { %v3213_v35 = vpack.c.b16 %v3211_v1, %v3211_v1  ;;  %v3051_v44 = vsel %vm581_vm0, %v3042_v25, 0  ;;  %v1484_v1 = vpack.c.b16 %v1482_v41, %v6274_v56  ;;  %v5053_v41 = vrot.slane %v6298_v27, 9 }
 0x172   : > { %v1428_v57 = vpop.f32.mrf.mxu2  ;;  %v1335_v36 = vpop.f32.mrf.mxu1  ;;  %v1352_v13 = vadd.f32 %v1330_v49, %v1227_v50  ;;  %3059 = vmatpush.bf16.msra.mxu1 %v3051_v44  ;;  %v2696_v34 = vpack.c.b16 %v2297_v9, %v2296_v28  ;;  %v5450_v50 = vld [vmem:[%s5590_s26 + $0x50] sm:$0xf] }
 0x173   : > { %v1210_v30 = vpop.f32.mrf.mxu0  ;;  %v3240_v54 = vsel %vm581_vm0, %v3213_v35, 0  ;;  %v5050_v39 = vrot.slane %v5450_v50, 9  ;;  %v2241_v35 = vrot.slane %v6337_v53, 5  ;;  %v8341_v53 = vld [vmem:[#allocation15_spill] sm:$0xff] }
 0x174   : > { %v6761_v49 = vadd.f32 %v6677_v45, %v1352_v13  ;;  %3248 = vmatpush.bf16.msra.mxu2 %v3240_v54  ;;  %v2229_v45 = vrot.slane %v6250_v42, 5  ;;  %v8340_v54 = vld [vmem:[#allocation16_spill] sm:$0xff] }
 0x175   : > { %v1064_v19 = vpop.f32.mrf.mxu3  ;;  %5034 = vmatmul.msk.bf16.gmra.mxu1 %vm556_vm3, %v6744_v31  ;;  %v2245_v42 = vrot.slane %v8340_v54, 5  ;;  %v8359_v31 = vld [vmem:[#allocation20_spill] sm:$0xff] }
 0x176   : > { %v1085_v10 = vadd.f32 %v1064_v19, %v6322_v20  ;;  %4977 = vmatmul.msk.bf16.gmra.mxu0 %vm556_vm3, %v1585_v33  ;;  %v5054_v19 = vrot.slane %v8339_v60, 9 }
 0x178   : > { %v1228_v62 = vadd.f32 %v1207_v23, %v1085_v10 }
 0x17a   : > { %4960 = vmatmul.msk.bf16.gmra.mxu3 %vm556_vm3, %v1484_v1  ;;  %v1430_v20 = vpop.f32.mrf.mxu2  ;;  %v1353_v56 = vadd.f32 %v1332_v51, %v1228_v62  ;;  %v1337_v12 = vpop.f32.mrf.mxu1  ;;  %v2230_v51 = vsel %vm5594_vm4, %v5050_v39, %v2229_v45  ;;  %v6784_v62 = vsel %vm5594_vm4, %v5054_v19, %v2245_v42  ;;  %v8342_v39 = vld [vmem:[#allocation8_spill] sm:$0xff]  ;;  %v8343_v45 = vld [vmem:[#allocation3_spill] sm:$0xff] }
 0x17b   : > { %v1212_v25 = vpop.f32.mrf.mxu0  ;;  %v2295_v43 = vunpack.c.l.b16 %v2230_v51  ;;  %v8198_v51 = vunpack.c.l.b16 %v6784_v62 }
 0x17c   : > { %v6770_v13 = vadd.f32 %v6704_v14, %v1353_v56 }
 0x17d   : > { %v1067_v24 = vpop.f32.mrf.mxu3  ;;  %v2311_v50 = vpack.c.b16 %v2296_v28, %v2295_v43  ;;  %v8346_v43 = vld [vmem:[#allocation19_spill] sm:$0xff] }
 0x17e   : > { %v1086_v23 = vadd.f32 %v1067_v24, %v6345_v5  ;;  %v2242_v5 = vsel %vm5594_vm4, %v5053_v41, %v2241_v35  ;;  %v8344_v24 = vld [vmem:[#allocation2_spill] sm:$0xff] }
 0x17f   : > { %5120 = vmatmul.msk.bf16.vlgmr.msrb.gmra.mxu2 %vm556_vm3, %v2696_v34 }
 0x180   : > { %v1229_v33 = vadd.f32 %v1210_v30, %v1086_v23  ;;  %v8345_v23 = vpack.c.b16 %v8343_v45, %v8344_v24  ;;  %v8350_v45 = vunpack.c.l.b16 %v6298_v27  ;;  %v8351_v24 = vunpack.c.l.b16 %v8339_v60  ;;  %v8354_v60 = vld [vmem:[#allocation23_spill] sm:$0xff] }
 0x182   : > { %v2155_v14 = vpop.f32.mrf.mxu2  ;;  %v1802_v10 = vpop.f32.mrf.mxu1  ;;  %v1354_v1 = vadd.f32 %v1335_v36, %v1229_v33  ;;  %v2298_v36 = vunpack.c.l.b16 %v2242_v5  ;;  %v8347_v5 = vld [vmem:[#allocation14_spill] sm:$0xff] }
 0x183   : > { %v1613_v44 = vpop.f32.mrf.mxu0 }
 0x184   : > { %v6786_v30 = vadd.f32 %v1428_v57, %v1354_v1  ;;  %v2697_v28 = vpack.c.b16 %v8198_v51, %v2298_v36 }
 0x185   : > { %v1069_v56 = vpop.f32.mrf.mxu3  ;;  %5103 = vmatmul.msk.bf16.vlgmr.msrb.gmra.mxu1 %vm556_vm3, %v8345_v23 }
 0x186   : > { %v1087_v34 = vadd.f32 %v1069_v56, %v8341_v53  ;;  %5088 = vmatmul.msk.bf16.vlgmr.msrb.gmra.mxu0 %vm556_vm3, %v8342_v39  ;;  %v5055_v56 = vrot.slane %v8347_v5, 9 }
 0x188   : > { %v1230_v41 = vadd.f32 %v1212_v25, %v1087_v34  ;;  %v8348_v25 = vld [vmem:[#allocation17_spill] sm:$0xff] }
 0x189   : > { %v2249_v34 = vrot.slane %v8348_v25, 5 }
 0x18a   : > { %5073 = vmatmul.msk.bf16.vlgmr.msrb.gmra.mxu3 %vm556_vm3, %v2311_v50  ;;  %v2157_v33 = vpop.f32.mrf.mxu2  ;;  %v1355_v57 = vadd.f32 %v1337_v12, %v1230_v41  ;;  %v1804_v19 = vpop.f32.mrf.mxu1  ;;  %v5056_v50 = vrot.slane %v6390_v15, 9  ;;  %v8349_v12 = vld [vmem:[#allocation21_spill] sm:$0xff]  ;;  %v8352_v41 = vld [vmem:[#allocation6_spill] sm:$0xff] }
 0x18b   : > { %v1615_v35 = vpop.f32.mrf.mxu0  ;;  %v2253_v39 = vrot.slane %v8349_v12, 5 }
 0x18c   : > { %v6799_v54 = vadd.f32 %v1430_v20, %v1355_v57  ;;  %v2429_v20 = vpack.c.b16 %v8351_v24, %v8350_v45  ;;  %v8353_v57 = vld [vmem:[#allocation10_spill] sm:$0xff]  ;;  %v6824_v45 = vpack.c.b16 %v2298_v36, %v2297_v9 }
 0x18d   : > { %v1512_v42 = vpop.f32.mrf.mxu3 }
 0x18e   : > { %v1552_v1 = vadd.f32 %v1512_v42, %v8346_v43  ;;  %v2572_v42 = vpack.c.b16 %v8353_v57, %v8352_v41  ;;  %v8355_v41 = vld [vmem:[#allocation25_spill] sm:$0xff] }
 0x18f   : > { %5121 = vmatmul.msk.bf16.gmra.mxu2 %vm556_vm3, %v2697_v28 }
 0x190   : > { %v1653_v53 = vadd.f32 %v1613_v44, %v1552_v1  ;;  %v2250_v44 = vsel %vm5594_vm4, %v5055_v56, %v2249_v34  ;;  %v6817_v1 = vsel %vm5594_vm4, %v5056_v50, %v2253_v39  ;;  %v6830_v34 = vld [vmem:[%s5590_s26 + $0x90] sm:$0xf] }
 0x191   : > { %v8197_v56 = vunpack.c.l.b16 %v6817_v1  ;;  %v2538_v36 = vshrl.u32 %v6830_v34, 16  ;;  %v2541_v39 = vshll.u32 %v6830_v34, 16 }
 0x192   : > { %v2160_v23 = vpop.f32.mrf.mxu2  ;;  %v1807_v43 = vpop.f32.mrf.mxu1  ;;  %v1842_v55 = vadd.f32 %v1802_v10, %v1653_v53  ;;  %v2300_v10 = vunpack.c.l.b16 %v2250_v44 }
 0x193   : > { %v1618_v28 = vpop.f32.mrf.mxu0  ;;  %v2543_v44 = vrot.slane %v2541_v39, 5 }
 0x194   : > { %v6819_v27 = vadd.f32 %v2155_v14, %v1842_v55  ;;  %v2698_v9 = vpack.c.b16 %v8197_v56, %v2300_v10  ;;  %v8357_v56 = vunpack.c.l.b16 %v8347_v5 }
 0x195   : > { %v1514_v25 = vpop.f32.mrf.mxu3  ;;  %5104 = vmatmul.msk.bf16.gmra.mxu1 %vm556_vm3, %v2572_v42  ;;  %v5057_v42 = vrot.slane %v6393_v46, 9 }
 0x196   : > { %v1553_v12 = vadd.f32 %v1514_v25, %v8354_v60  ;;  %5089 = vmatmul.msk.bf16.gmra.mxu0 %vm556_vm3, %v2429_v20  ;;  %v8356_v60 = vld [vmem:[#allocation22_spill] sm:$0xff] }
 0x198   : > { %v1654_v53 = vadd.f32 %v1615_v35, %v1553_v12  ;;  %v4997_v35 = vld [vmem:[%s5590_s26 + $0x94] sm:$0x1]  ;;  %v2257_v12 = vrot.slane %v8356_v60, 5 }
 0x199   : > { %v2684_v3 = vrot.slane %v4997_v35, 5 }
 0x19a   : > { %5074 = vmatmul.msk.bf16.gmra.mxu3 %vm556_vm3, %v6824_v45  ;;  %v2162_v55 = vpop.f32.mrf.mxu2  ;;  %v1843_v14 = vadd.f32 %v1804_v19, %v1654_v53  ;;  %v1809_v47 = vpop.f32.mrf.mxu1  ;;  %v2540_v19 = vrot.slane %v2538_v36, 4  ;;  %v5111_v53 = vrot.slane %v6830_v34, 9  ;;  %v2547_v36 = vshll.u32 %v4997_v35, 16 }
 0x19b   : > { %v1620_v50 = vpop.f32.mrf.mxu0 }
 0x19c   : > { %v6838_v24 = vadd.f32 %v2157_v33, %v1843_v14  ;;  %v8358_v33 = vunpack.c.l.b16 %v6390_v15  ;;  %v2544_v2 = vor.u32 %v2543_v44, %v2540_v19 }
 0x19d   : > { %v1517_v20 = vpop.f32.mrf.mxu3 }
 0x19e   : > { %v1554_v57 = vadd.f32 %v1517_v20, %v8355_v41  ;;  %v2430_v14 = vpack.c.b16 %v8358_v33, %v8357_v56  ;;  %v2573_v20 = vpack.c.b16 %v6479_v11, %v8359_v31  ;;  %v8360_v56 = vunpack.c.l.b16 %v6784_v62 }
 0x19f   : > { %5122 = vmatmul.msk.bf16.gmra.mxu2 %vm556_vm3, %v2698_v9  ;;  %v2545_v35 = vrot.slane %v2544_v2, 4 }
 0x1a0   : > { %v1655_v25 = vadd.f32 %v1618_v28, %v1554_v57  ;;  %v2258_v28 = vsel %vm5594_vm4, %v5057_v42, %v2257_v12  ;;  %v6856_v57 = vsel %vm5594_vm4, %v5111_v53, %v2684_v3  ;;  %v6863_v11 = vpack.c.b16 %v2300_v10, %v8360_v56 }
 0x1a1   : > { %v2302_v31 = vunpack.c.l.b16 %v2258_v28  ;;  %v2549_v42 = vrot.slane %v2547_v36, 5  ;;  %v8201_v53 = vunpack.c.l.b16 %v6830_v34  ;;  %v5060_v36 = vrot.slane %v6515_v7, 9  ;;  %v5392_v28 = vld [vmem:[%s8116_s1 + $0xcc] sm:$0xff] }
 0x1a2   : > { %v2165_v51 = vpop.f32.mrf.mxu2  ;;  %v1812_v41 = vpop.f32.mrf.mxu1  ;;  %v1844_v39 = vadd.f32 %v1807_v43, %v1655_v25  ;;  %v2694_v43 = vunpack.c.l.b16 %v6856_v57  ;;  %3060 = vmatpush.bf16.msra.mxu1 %v5392_v28 }
 0x1a3   : > { %v1623_v9 = vpop.f32.mrf.mxu0  ;;  %v2550_v25 = vsel %vm5642_vm7, %v2545_v35, %v2549_v42 }
 0x1a4   : > { %v6858_v60 = vadd.f32 %v2160_v23, %v1844_v39  ;;  %v2699_v44 = vpack.c.b16 %v2694_v43, %v2302_v31  ;;  %v6881_v33 = vunpack.c.l.b16 %v2550_v25  ;;  %v2269_v39 = vrot.slane %v6559_v38, 5 }
 0x1a5   : > { %v1519_v5 = vpop.f32.mrf.mxu3  ;;  %5105 = vmatmul.msk.bf16.gmra.mxu1 %vm556_vm3, %v2573_v20  ;;  %v2265_v20 = vrot.slane %v6487_v29, 5  ;;  %v8363_v25 = vunpack.c.l.b16 %v6817_v1  ;;  %v5058_v1 = vrot.slane %v6446_v6, 9  ;;  %v2277_v6 = vrot.slane %v6603_v17, 5 }
 0x1a6   : > { %v1555_v15 = vadd.f32 %v1519_v5, %v6505_v0  ;;  %5090 = vmatmul.msk.bf16.gmra.mxu0 %vm556_vm3, %v2430_v14  ;;  %v5390_v0 = vld [vmem:[%s8116_s1 + $0xb4] sm:$0xff] }
 0x1a7   : > { %2840 = vmatpush.bf16.msra.mxu3 %v5390_v0  ;;  %v6907_v0 = vsel %vm5594_vm4, %v5060_v36, %v2269_v39 }
 0x1a8   : > { %v1656_v3 = vadd.f32 %v1620_v50, %v1555_v15  ;;  %v8362_v15 = vld [vmem:[#allocation12_spill] sm:$0xff] }
 0x1a9   : > { %v2574_v38 = vpack.c.b16 %v6881_v33, %v8362_v15 }
 0x1aa   : > { %5075 = vmatmul.msk.bf16.gmra.mxu3 %vm556_vm3, %v6863_v11  ;;  %v2167_v23 = vpop.f32.mrf.mxu2  ;;  %v1845_v62 = vadd.f32 %v1809_v47, %v1656_v3  ;;  %v1814_v19 = vpop.f32.mrf.mxu1  ;;  %v5059_v47 = vrot.slane %v6449_v40, 9 }
 0x1ab   : > { %v1625_v10 = vpop.f32.mrf.mxu0 }
 0x1ac   : > { %v6877_v2 = vadd.f32 %v2162_v55, %v1845_v62  ;;  %v5393_v55 = vld [vmem:[%s8116_s1 + $0xd8] sm:$0xff]  ;;  %v2266_v3 = vsel %vm5594_vm4, %v5059_v47, %v2265_v20 }
 0x1ad   : > { %v1522_v50 = vpop.f32.mrf.mxu3  ;;  %3249 = vmatpush.bf16.msra.mxu2 %v5393_v55 }
 0x1ae   : > { %v1556_v12 = vadd.f32 %v1522_v50, %v6549_v18  ;;  %v5391_v18 = vld [vmem:[%s8116_s1 + $0xc0] sm:$0xff]  ;;  %v6914_v50 = vpack.c.b16 %v2302_v31, %v8363_v25 }
 0x1af   : > { %5123 = vmatmul.msk.bf16.gmra.mxu2 %vm556_vm3, %v2699_v44  ;;  %2959 = vmatpush.bf16.msra.mxu0 %v5391_v18  ;;  %v8364_v31 = vld [vmem:[#allocation26_spill] sm:$0xff] }
 0x1b0   : > { %v1657_v14 = vadd.f32 %v1623_v9, %v1556_v12  ;;  %v8361_v9 = vunpack.c.l.b16 %v6393_v46  ;;  %v2305_v12 = vunpack.c.l.b16 %v6907_v0  ;;  %v2261_v39 = vrot.slane %v8364_v31, 5  ;;  %v8369_v25 = vld [vmem:[#allocation30_spill] sm:$0xff] }
 0x1b2   : > { %v2431_v29 = vpack.c.b16 %v8201_v53, %v8361_v9  ;;  %v2170_v5 = vpop.f32.mrf.mxu2  ;;  %v1817_v35 = vpop.f32.mrf.mxu1  ;;  %v1846_v42 = vadd.f32 %v1812_v41, %v1657_v14  ;;  %v2304_v41 = vunpack.c.l.b16 %v2266_v3  ;;  %v8367_v3 = vunpack.c.l.b16 %v6515_v7 }
 0x1b3   : > { %v1628_v56 = vpop.f32.mrf.mxu0 }
 0x1b4   : > { %v6909_v62 = vadd.f32 %v2165_v51, %v1846_v42 }
 0x1b5   : > { %v1524_v46 = vpop.f32.mrf.mxu3  ;;  %5106 = vmatmul.msk.bf16.gmra.mxu1 %vm556_vm3, %v2574_v38  ;;  %v5062_v38 = vrot.slane %v6576_v4, 9 }
 0x1b6   : > { %v1557_v44 = vadd.f32 %v1524_v46, %v6569_v22  ;;  %5091 = vmatmul.msk.bf16.gmra.mxu0 %vm556_vm3, %v2431_v29  ;;  %v2700_v22 = vpack.c.b16 %v2305_v12, %v2304_v41  ;;  %v8365_v29 = vld [vmem:[#allocation29_spill] sm:$0xff] }
 0x1b7   : > { %v2273_v15 = vrot.slane %v8365_v29, 5  ;;  %v6945_v31 = vsel %vm5594_vm4, %v5062_v38, %v2277_v6  ;;  %v8371_v6 = vld [vmem:[#allocation36_spill] sm:$0xff] }
 0x1b8   : > { %v1658_v47 = vadd.f32 %v1625_v10, %v1557_v44  ;;  %v2262_v10 = vsel %vm5594_vm4, %v5058_v1, %v2261_v39  ;;  %v8368_v44 = vld [vmem:[#allocation28_spill] sm:$0xff] }
 0x1b9   : > { %v2303_v42 = vunpack.c.l.b16 %v2262_v10 }
 0x1ba   : > { %5076 = vmatmul.msk.bf16.gmra.mxu3 %vm556_vm3, %v6914_v50  ;;  %v2172_v14 = vpop.f32.mrf.mxu2  ;;  %v1847_v51 = vadd.f32 %v1814_v19, %v1658_v47  ;;  %v1819_v36 = vpop.f32.mrf.mxu1  ;;  %v5061_v19 = vrot.slane %v6527_v37, 9  ;;  %v2575_v47 = vpack.c.b16 %v8369_v25, %v8368_v44  ;;  %v5064_v44 = vrot.slane %v6624_v48, 9 }
 0x1bb   : > { %v1630_v20 = vpop.f32.mrf.mxu0 }
 0x1bc   : > { %v6925_v55 = vadd.f32 %v2167_v23, %v1847_v51  ;;  %v8366_v23 = vunpack.c.l.b16 %v6449_v40  ;;  %v8370_v40 = vld [vmem:[#allocation34_spill] sm:$0xff] }
 0x1bd   : > { %v1527_v18 = vpop.f32.mrf.mxu3 }
 0x1be   : > { %v1558_v28 = vadd.f32 %v1527_v18, %v6592_v59  ;;  %v2432_v59 = vpack.c.b16 %v8367_v3, %v8366_v23  ;;  %v2315_v18 = vpack.c.b16 %v2304_v41, %v2303_v42  ;;  %v5063_v23 = vrot.slane %v6579_v61, 9 }
 0x1bf   : > { %5124 = vmatmul.msk.bf16.gmra.mxu2 %vm556_vm3, %v2700_v22 }
 0x1c0   : > { %v1659_v9 = vadd.f32 %v1628_v56, %v1558_v28  ;;  %v2274_v56 = vsel %vm5594_vm4, %v5061_v19, %v2273_v15 }
 0x1c1   : > { %v2306_v28 = vunpack.c.l.b16 %v2274_v56 }
 0x1c2   : > { %v2175_v46 = vpop.f32.mrf.mxu2  ;;  %v1822_v22 = vpop.f32.mrf.mxu1  ;;  %v1848_v1 = vadd.f32 %v1817_v35, %v1659_v9  ;;  %v2307_v35 = vunpack.c.l.b16 %v6945_v31 }
 0x1c3   : > { %v1633_v51 = vpop.f32.mrf.mxu0 }
 0x1c4   : > { %v6947_v39 = vadd.f32 %v2170_v5, %v1848_v1  ;;  %v2701_v5 = vpack.c.b16 %v2307_v35, %v2306_v28  ;;  %v8375_v1 = vunpack.c.l.b16 %v6576_v4  ;;  %v8378_v4 = vld [vmem:[#allocation4_spill] sm:$0xff] }
 0x1c5   : > { %v1529_v17 = vpop.f32.mrf.mxu3  ;;  %5107 = vmatmul.msk.bf16.gmra.mxu1 %vm556_vm3, %v2575_v47  ;;  %v8374_v47 = vunpack.c.l.b16 %v6527_v37 }
 0x1c6   : > { %v1559_v7 = vadd.f32 %v1529_v17, %v8370_v40  ;;  %5092 = vmatmul.msk.bf16.gmra.mxu0 %vm556_vm3, %v2432_v59  ;;  %v8376_v17 = vld [vmem:[#allocation31_spill] sm:$0xff]  ;;  %v8377_v40 = vld [vmem:[#allocation37_spill] sm:$0xff] }
 0x1c8   : > { %v1660_v10 = vadd.f32 %v1630_v20, %v1559_v7  ;;  %v8372_v20 = vld [vmem:[#allocation32_spill] sm:$0xff]  ;;  %v2576_v7 = vpack.c.b16 %v8377_v40, %v8376_v17 }
 0x1c9   : > { %v2281_v59 = vrot.slane %v8372_v20, 5  ;;  %v6987_v20 = vld [vmem:[%s5590_s26 + $0xe0] sm:$0xf] }
 0x1ca   : > { %5077 = vmatmul.msk.bf16.gmra.mxu3 %vm556_vm3, %v2315_v18  ;;  %v2177_v19 = vpop.f32.mrf.mxu2  ;;  %v1849_v9 = vadd.f32 %v1819_v36, %v1660_v10  ;;  %v1824_v15 = vpop.f32.mrf.mxu1  ;;  %v8373_v36 = vld [vmem:[#allocation39_spill] sm:$0xff] }
 0x1cb   : > { %v1635_v29 = vpop.f32.mrf.mxu0  ;;  %v2285_v25 = vrot.slane %v8373_v36, 5  ;;  %v2555_v36 = vshll.u32 %v6987_v20, 16 }
 0x1cc   : > { %v6956_v38 = vadd.f32 %v2172_v14, %v1849_v9  ;;  %v2433_v14 = vpack.c.b16 %v8375_v1, %v8374_v47 }
 0x1cd   : > { %v1532_v41 = vpop.f32.mrf.mxu3  ;;  %v2557_v17 = vrot.slane %v2555_v36, 5 }
 0x1ce   : > { %v1560_v42 = vadd.f32 %v1532_v41, %v8371_v6 }
 0x1cf   : > { %5125 = vmatmul.msk.bf16.gmra.mxu2 %vm556_vm3, %v2701_v5  ;;  %v6974_v5 = vsel %vm5594_vm4, %v5064_v44, %v2285_v25 }
 0x1d0   : > { %v1661_v3 = vadd.f32 %v1633_v51, %v1560_v42  ;;  %v2282_v51 = vsel %vm5594_vm4, %v5063_v23, %v2281_v59  ;;  %v6981_v42 = vpack.c.b16 %v2306_v28, %v2305_v12  ;;  %v2309_v23 = vunpack.c.l.b16 %v6974_v5 }
 0x1d1   : > { %v2552_v28 = vshrl.u32 %v6987_v20, 16 }
 0x1d2   : > { %v2180_v56 = vpop.f32.mrf.mxu2  ;;  %v1850_v18 = vadd.f32 %v1822_v22, %v1661_v3  ;;  %v1827_v9 = vpop.f32.mrf.mxu1  ;;  %v2308_v22 = vunpack.c.l.b16 %v2282_v51  ;;  %v5112_v51 = vrot.slane %v6987_v20, 9 }
 0x1d3   : > { %v1638_v10 = vpop.f32.mrf.mxu0 }
 0x1d4   : > { %v6976_v41 = vadd.f32 %v2175_v46, %v1850_v18  ;;  %v2702_v12 = vpack.c.b16 %v2309_v23, %v2308_v22 }
 0x1d5   : > { %v1534_v37 = vpop.f32.mrf.mxu3  ;;  %5108 = vmatmul.msk.bf16.gmra.mxu1 %vm556_vm3, %v2576_v7  ;;  %v8379_v7 = vld [vmem:[#allocation40_spill] sm:$0xff] }
 0x1d6   : > { %v1561_v6 = vadd.f32 %v1534_v37, %v8378_v4  ;;  %5093 = vmatmul.msk.bf16.gmra.mxu0 %vm556_vm3, %v2433_v14  ;;  %v5065_v14 = vrot.slane %v6627_v63, 9  ;;  %v2289_v18 = vrot.slane %v8379_v7, 5  ;;  %v8380_v4 = vunpack.c.l.b16 %v6579_v61 }
 0x1d8   : > { %v1662_v3 = vadd.f32 %v1635_v29, %v1561_v6  ;;  %v5017_v29 = vld [vmem:[%s5590_s26 + $0xe4] sm:$0x1] }
 0x1d9   : > { %v2688_v37 = vrot.slane %v5017_v29, 5  ;;  %v2561_v36 = vshll.u32 %v5017_v29, 16 }
 0x1da   : > { %5078 = vmatmul.msk.bf16.gmra.mxu3 %vm556_vm3, %v6981_v42  ;;  %v2182_v46 = vpop.f32.mrf.mxu2  ;;  %v1851_v59 = vadd.f32 %v1824_v15, %v1662_v3  ;;  %v1829_v0 = vpop.f32.mrf.mxu1  ;;  %v2554_v15 = vrot.slane %v2552_v28, 4 }
 0x1db   : > { %v1640_v44 = vpop.f32.mrf.mxu0 }
 0x1dc   : > { %v6995_v25 = vadd.f32 %v2177_v19, %v1851_v59  ;;  %v8381_v19 = vunpack.c.l.b16 %v6624_v48  ;;  %v8382_v59 = vld [vmem:[#allocation38_spill] sm:$0xff]  ;;  %v2558_v28 = vor.u32 %v2557_v17, %v2554_v15  ;;  %v2563_v15 = vrot.slane %v2561_v36, 5 }
 0x1dd   : > { %v1537_v47 = vpop.f32.mrf.mxu3 }
 0x1de   : > { %v1562_v1 = vadd.f32 %v1537_v47, %v6690_v16  ;;  %v2434_v6 = vpack.c.b16 %v8381_v19, %v8380_v4  ;;  %v2577_v16 = vpack.c.b16 %v6697_v26, %v8382_v59  ;;  %v7020_v26 = vpack.c.b16 %v2308_v22, %v2307_v35 }
 0x1df   : > { %5126 = vmatmul.msk.bf16.gmra.mxu2 %vm556_vm3, %v2702_v12 }
 0x1e0   : > { %v1663_v40 = vadd.f32 %v1638_v10, %v1562_v1  ;;  %v2290_v10 = vsel %vm5594_vm4, %v5065_v14, %v2289_v18  ;;  %v7013_v1 = vsel %vm5594_vm4, %v5112_v51, %v2688_v37  ;;  %v2559_v14 = vrot.slane %v2558_v28, 4 }
 0x1e1   : > { %v8203_v29 = vunpack.c.l.b16 %v7013_v1 }
 0x1e2   : > { %v2185_v3 = vpop.f32.mrf.mxu2  ;;  %v1852_v12 = vadd.f32 %v1827_v9, %v1663_v40  ;;  %v1832_v53 = vpop.f32.mrf.mxu1  ;;  %v2310_v9 = vunpack.c.l.b16 %v2290_v10  ;;  %v2564_v18 = vsel %vm5642_vm7, %v2559_v14, %v2563_v15 }
 0x1e3   : > { %v1643_v47 = vpop.f32.mrf.mxu0  ;;  %v7038_v59 = vunpack.c.l.b16 %v2564_v18 }
 0x1e4   : > { %v7015_v61 = vadd.f32 %v2180_v56, %v1852_v12  ;;  %v2703_v40 = vpack.c.b16 %v8203_v29, %v2310_v9  ;;  %v5280_v12 = vld [vmem:[%s8116_s1 + $0x104] sm:$0xf] }
 0x1e5   : > { %v1539_v48 = vpop.f32.mrf.mxu3  ;;  %5109 = vmatmul.msk.bf16.gmra.mxu1 %vm556_vm3, %v2577_v16  ;;  %v3890_v10 = vunpack.c.l.b16 %v5280_v12  ;;  %v2578_v14 = vpack.c.b16 %v7038_v59, %v6699_v32  ;;  %v7069_v32 = vld [vmem:[%s5590_s26 + $0xb0] sm:$0xf] }
 0x1e6   : > { %v1563_v7 = vadd.f32 %v1539_v48, %v6715_v8  ;;  %5094 = vmatmul.msk.bf16.gmra.mxu0 %vm556_vm3, %v2434_v6  ;;  %v5234_v8 = vld [vmem:[%s8116_s1 + $0xec] sm:$0xf]  ;;  %v8211_v6 = vunpack.c.l.b16 %v6987_v20  ;;  %v8383_v48 = vunpack.c.l.b16 %v6627_v63 }
 0x1e7   : > { %v3564_v51 = vunpack.c.l.b16 %v5234_v8 }
 0x1e8   : > { %v1664_v17 = vadd.f32 %v1640_v44, %v1563_v7 }
 0x1e9   : > { %v3566_v4 = vpack.c.b16 %v3564_v51, %v3564_v51  ;;  %v3892_v51 = vpack.c.b16 %v3890_v10, %v3890_v10 }
 0x1ea   : > { %5079 = vmatmul.msk.bf16.gmra.mxu3 %vm556_vm3, %v7020_v26  ;;  %v2187_v56 = vpop.f32.mrf.mxu2  ;;  %v1853_v31 = vadd.f32 %v1829_v0, %v1664_v17  ;;  %v1834_v22 = vpop.f32.mrf.mxu1 }
 0x1eb   : > { %v1645_v35 = vpop.f32.mrf.mxu0  ;;  %v3593_v0 = vsel %vm581_vm0, %v3566_v4, 0 }
 0x1ec   : > { %v7034_v37 = vadd.f32 %v2182_v46, %v1853_v31  ;;  %3601 = vmatpush.bf16.msrb.mxu3 %v3593_v0  ;;  %v5295_v46 = vld [vmem:[%s8116_s1 + $0x110] sm:$0xf]  ;;  %v7058_v31 = vld [vmem:[%s5590_s26 + $0xa8] sm:$0xf] }
 0x1ed   : > { %v1542_v44 = vpop.f32.mrf.mxu3  ;;  %v4033_v28 = vunpack.c.l.b16 %v5295_v46  ;;  %v3919_v46 = vsel %vm581_vm0, %v3892_v51, 0 }
 0x1ee   : > { %v1564_v19 = vadd.f32 %v1542_v44, %v6761_v49  ;;  %v5265_v49 = vld [vmem:[%s8116_s1 + $0xf8] sm:$0xf]  ;;  %v7061_v44 = vld [vmem:[%s5590_s26 + $0xa0] sm:$0xf]  ;;  %3927 = vmatpush.bf16.msrb.mxu1 %v3919_v46  ;;  %v8384_v46 = vld [vmem:[#allocation7_spill] sm:$0xff] }
 0x1ef   : > { %5127 = vmatmul.msk.bf16.gmra.mxu2 %vm556_vm3, %v2703_v40  ;;  %v3773_v36 = vunpack.c.l.b16 %v5265_v49  ;;  %v4035_v40 = vpack.c.b16 %v4033_v28, %v4033_v28  ;;  %v3184_v49 = vunpack.c.l.b16 %v7069_v32  ;;  %v3182_v12 = vunpack.c.l.b16 %v7061_v44 }
 0x1f0   : > { %v1665_v16 = vadd.f32 %v1643_v47, %v1564_v19  ;;  %v2435_v47 = vpack.c.b16 %v8211_v6, %v8383_v48  ;;  %v3322_v6 = vshrl.u32 %v7058_v31, 16 }
 0x1f1   : > { %v3775_v18 = vpack.c.b16 %v3773_v36, %v3773_v36  ;;  %v4062_v19 = vsel %vm581_vm0, %v4035_v40, 0 }
 0x1f2   : > { %v2190_v7 = vpop.f32.mrf.mxu2  ;;  %v1854_v15 = vadd.f32 %v1832_v53, %v1665_v16  ;;  %v1837_v8 = vpop.f32.mrf.mxu1  ;;  %v7074_v16 = vpack.c.b16 %v2310_v9, %v2309_v23  ;;  %4070 = vmatpush.bf16.msrb.mxu2 %v4062_v19 }
 0x1f3   : > { %v1648_v17 = vpop.f32.mrf.mxu0  ;;  %v3802_v0 = vsel %vm581_vm0, %v3775_v18, 0 }
 0x1f4   : > { %v7063_v4 = vadd.f32 %v2185_v3, %v1854_v15  ;;  %v3183_v3 = vunpack.c.l.b16 %v7058_v31  ;;  %3810 = vmatpush.bf16.msrb.mxu0 %v3802_v0 }
 0x1f5   : > { %v1544_v63 = vpop.f32.mrf.mxu3  ;;  %5110 = vmatmul.msk.bf16.gmra.mxu1 %vm556_vm3, %v2578_v14 }
 0x1f6   : > { %v1565_v53 = vadd.f32 %v1544_v63, %v6770_v13  ;;  %5095 = vmatmul.msk.bf16.gmra.mxu0 %vm556_vm3, %v2435_v47  ;;  %v7081_v36 = vpack.c.b16 %v3184_v49, %v3183_v3  ;;  %v3198_v10 = vpack.c.b16 %v3183_v3, %v3182_v12  ;;  %v7090_v63 = vld [vmem:[%s5590_s26 + $0xb8] sm:$0xf] }
 0x1f8   : > { %v1666_v28 = vadd.f32 %v1645_v35, %v1565_v53 }
 0x1fa   : > { %5080 = vmatmul.msk.bf16.gmra.mxu3 %vm556_vm3, %v7074_v16  ;;  %v2192_v13 = vpop.f32.mrf.mxu2  ;;  %v1855_v5 = vadd.f32 %v1834_v22, %v1666_v28  ;;  %v1839_v9 = vpop.f32.mrf.mxu1 }
 0x1fb   : > { %v1650_v23 = vpop.f32.mrf.mxu0 }
 0x1fc   : > { %v7085_v48 = vadd.f32 %v2187_v56, %v1855_v5 }
 0x1fd   : > { %v1547_v47 = vpop.f32.mrf.mxu3 }
 0x1fe   : > { %v1566_v14 = vadd.f32 %v1547_v47, %v6786_v30  ;;  %v8202_v30 = vunpack.c.l.b16 %v7090_v63 }
 0x1ff   : > { %5224 = vmatmul.msk.bf16.vlgmr.msra.gmra.mxu2 %vm556_vm3, %v3198_v10 }
 0x200   : > { %v1667_v35 = vadd.f32 %v1648_v17, %v1566_v14  ;;  %v8385_v17 = vld [vmem:[#allocation18_spill] sm:$0xff] }
 0x201   : > { %v7112_v14 = vld [vmem:[%s5590_s26 + $0xc0] sm:$0xf] }
 0x202   : > { %v2749_v15 = vpop.f32.mrf.mxu2  ;;  %v1856_v40 = vadd.f32 %v1837_v8, %v1667_v35  ;;  %v2624_v51 = vpop.f32.mrf.mxu1  ;;  %v7115_v35 = vld [vmem:[%s5590_s26 + $0xc8] sm:$0xf] }
 0x203   : > { %v2481_v18 = vpop.f32.mrf.mxu0 }
 0x204   : > { %v7092_v19 = vadd.f32 %v2190_v7, %v1856_v40 }
 0x205   : > { %v1549_v22 = vpop.f32.mrf.mxu3  ;;  %5167 = vmatmul.msk.bf16.vlgmr.msra.gmra.mxu1 %vm556_vm3, %v6824_v45 }
 0x206   : > { %v1567_v0 = vadd.f32 %v1549_v22, %v6799_v54  ;;  %5150 = vmatmul.msk.bf16.vlgmr.msra.gmra.mxu0 %vm556_vm3, %v8384_v46  ;;  %v7104_v54 = vpack.c.b16 %v8202_v30, %v3184_v49  ;;  %v8387_v22 = vld [vmem:[#allocation11_spill] sm:$0xff]  ;;  %v8388_v46 = vld [vmem:[#allocation24_spill] sm:$0xff] }
 0x208   : > { %v1668_v56 = vadd.f32 %v1650_v23, %v1567_v0  ;;  %8386 = vst [vmem:[#allocation5_spill] sm:$0xff] %v7104_v54 }
 0x20a   : > { %5135 = vmatmul.msk.bf16.vlgmr.msra.gmra.mxu3 %vm556_vm3, %v8385_v17  ;;  %v2751_v8 = vpop.f32.mrf.mxu2  ;;  %v1857_v7 = vadd.f32 %v1839_v9, %v1668_v56  ;;  %v2626_v3 = vpop.f32.mrf.mxu1 }
 0x20b   : > { %v2483_v53 = vpop.f32.mrf.mxu0 }
 0x20c   : > { %v7106_v12 = vadd.f32 %v2192_v13, %v1857_v7 }
 0x20d   : > { %v2364_v28 = vpop.f32.mrf.mxu3 }
 0x20e   : > { %v2404_v45 = vadd.f32 %v2364_v28, %v6819_v27  ;;  %v8205_v27 = vunpack.c.l.b16 %v7112_v14 }
 0x20f   : > { %5225 = vmatmul.msk.bf16.gmra.mxu2 %vm556_vm3, %v7104_v54 }
 0x210   : > { %v2521_v5 = vadd.f32 %v2481_v18, %v2404_v45  ;;  %v8204_v18 = vunpack.c.l.b16 %v7115_v35 }
 0x212   : > { %v2754_v23 = vpop.f32.mrf.mxu2  ;;  %v2664_v10 = vadd.f32 %v2624_v51, %v2521_v5  ;;  %v2629_v9 = vpop.f32.mrf.mxu1  ;;  %v7127_v51 = vld [vmem:[%s5590_s26 + $0x98] sm:$0xf] }
 0x213   : > { %v2486_v47 = vpop.f32.mrf.mxu0  ;;  %v2902_v56 = vshll.u32 %v7127_v51, 16 }
 0x214   : > { %v7117_v49 = vadd.f32 %v2749_v15, %v2664_v10 }
 0x215   : > { %v2366_v13 = vpop.f32.mrf.mxu3  ;;  %5168 = vmatmul.msk.bf16.gmra.mxu1 %vm556_vm3, %v6863_v11  ;;  %v7137_v11 = vpack.c.b16 %v8204_v18, %v8205_v27  ;;  %v7146_v27 = vld [vmem:[%s5590_s26 + $0xd0] sm:$0xf] }
 0x216   : > { %v2405_v40 = vadd.f32 %v2366_v13, %v6838_v24  ;;  %5151 = vmatmul.msk.bf16.gmra.mxu0 %vm556_vm3, %v8387_v22  ;;  %v2899_v24 = vshrl.u32 %v7127_v51, 16  ;;  %v2904_v13 = vrot.slane %v2902_v56, 5  ;;  %v8390_v56 = vld [vmem:[#allocation13_spill] sm:$0xff] }
 0x217   : > { %8389 = vst [vmem:[#allocation16_spill] sm:$0xff] %v7137_v11 }
 0x218   : > { %v2522_v0 = vadd.f32 %v2483_v53, %v2405_v40  ;;  %v2901_v10 = vrot.slane %v2899_v24, 4 }
 0x21a   : > { %5136 = vmatmul.msk.bf16.gmra.mxu3 %vm556_vm3, %v8388_v46  ;;  %v2756_v15 = vpop.f32.mrf.mxu2  ;;  %v2665_v17 = vadd.f32 %v2626_v3, %v2522_v0  ;;  %v2631_v28 = vpop.f32.mrf.mxu1  ;;  %v4999_v3 = vld [vmem:[%s5590_s26 + $0x9c] sm:$0x1]  ;;  %v2905_v0 = vor.u32 %v2904_v13, %v2901_v10  ;;  %v5158_v10 = vrot.slane %v7127_v51, 9 }
 0x21b   : > { %v2488_v7 = vpop.f32.mrf.mxu0  ;;  %v2908_v46 = vshll.u32 %v4999_v3, 16  ;;  %v3021_v13 = vrot.slane %v4999_v3, 5 }
 0x21c   : > { %v7139_v53 = vadd.f32 %v2751_v8, %v2665_v17  ;;  %v7149_v8 = vld [vmem:[%s5590_s26 + $0xd8] sm:$0xf] }
 0x21d   : > { %v2369_v45 = vpop.f32.mrf.mxu3  ;;  %v3022_v3 = vsel %vm5594_vm4, %v5158_v10, %v3021_v13 }
 0x21e   : > { %v2406_v5 = vadd.f32 %v2369_v45, %v6858_v60  ;;  %v2910_v45 = vrot.slane %v2908_v46, 5 }
 0x21f   : > { %5226 = vmatmul.msk.bf16.gmra.mxu2 %vm556_vm3, %v7137_v11 }
 0x220   : > { %v2523_v40 = vadd.f32 %v2486_v47, %v2406_v5  ;;  %v2906_v47 = vrot.slane %v2905_v0, 4  ;;  %v8206_v5 = vunpack.c.l.b16 %v7149_v8 }
 0x222   : > { %v2759_v22 = vpop.f32.mrf.mxu2  ;;  %v2666_v30 = vadd.f32 %v2629_v9, %v2523_v40  ;;  %v2634_v18 = vpop.f32.mrf.mxu1  ;;  %v8207_v9 = vunpack.c.l.b16 %v7146_v27  ;;  %v5394_v40 = vld [vmem:[%s8116_s1 + $0xe4] sm:$0xff] }
 0x223   : > { %v2491_v29 = vpop.f32.mrf.mxu0  ;;  %3602 = vmatpush.bf16.msrb.mxu3 %v5394_v40 }
 0x224   : > { %v7151_v17 = vadd.f32 %v2754_v23, %v2666_v30  ;;  %v8391_v23 = vld [vmem:[#allocation27_spill] sm:$0xff]  ;;  %v7170_v46 = vpack.c.b16 %v8206_v5, %v8207_v9 }
 0x225   : > { %v2371_v60 = vpop.f32.mrf.mxu3  ;;  %5169 = vmatmul.msk.bf16.gmra.mxu1 %vm556_vm3, %v6914_v50 }
 0x226   : > { %v2407_v24 = vadd.f32 %v2371_v60, %v6877_v2  ;;  %5152 = vmatmul.msk.bf16.gmra.mxu0 %vm556_vm3, %v8390_v56  ;;  %8392 = vst [vmem:[#allocation15_spill] sm:$0xff] %v7170_v46 }
 0x228   : > { %v2524_v30 = vadd.f32 %v2488_v7, %v2407_v24  ;;  %v2911_v7 = vsel %vm5642_vm7, %v2906_v47, %v2910_v45  ;;  %v5397_v47 = vld [vmem:[%s8116_s1 + $0x108] sm:$0xff]  ;;  %v2811_v45 = vunpack.c.l.b16 %v7127_v51 }
 0x229   : > { %4071 = vmatpush.bf16.msrb.mxu2 %v5397_v47 }
 0x22a   : > { %5137 = vmatmul.msk.bf16.gmra.mxu3 %vm556_vm3, %v8391_v23  ;;  %v2761_v2 = vpop.f32.mrf.mxu2  ;;  %v2667_v60 = vadd.f32 %v2631_v28, %v2524_v30  ;;  %v2636_v0 = vpop.f32.mrf.mxu1  ;;  %v2930_v30 = vunpack.c.l.b16 %v2911_v7  ;;  %v3031_v23 = vunpack.c.l.b16 %v3022_v3  ;;  %v7195_v3 = vld [vmem:[%s5590_s26 + $0xf0] sm:$0xf] }
 0x22b   : > { %v2493_v50 = vpop.f32.mrf.mxu0  ;;  %v3190_v57 = vunpack.c.l.b16 %v7195_v3 }
 0x22c   : > { %v7176_v24 = vadd.f32 %v2756_v15, %v2667_v60  ;;  %v5395_v15 = vld [vmem:[%s8116_s1 + $0xf0] sm:$0xff]  ;;  %v2932_v10 = vpack.c.b16 %v2930_v30, %v6881_v33  ;;  %v8393_v33 = vunpack.c.l.b16 %v6830_v34 }
 0x22d   : > { %v2374_v56 = vpop.f32.mrf.mxu3  ;;  %3811 = vmatpush.bf16.msrb.mxu0 %v5395_v15 }
 0x22e   : > { %v2408_v28 = vadd.f32 %v2374_v56, %v6909_v62  ;;  %v5396_v62 = vld [vmem:[%s8116_s1 + $0xfc] sm:$0xff]  ;;  %v7198_v56 = vld [vmem:[%s5590_s26 + $0xf8] sm:$0xf]  ;;  %v2813_v30 = vpack.c.b16 %v2811_v45, %v8393_v33 }
 0x22f   : > { %5227 = vmatmul.msk.bf16.gmra.mxu2 %vm556_vm3, %v7170_v46  ;;  %3928 = vmatpush.bf16.msrb.mxu1 %v5396_v62 }
 0x230   : > { %v2525_v5 = vadd.f32 %v2491_v29, %v2408_v28  ;;  %v3033_v29 = vpack.c.b16 %v3031_v23, %v2694_v43  ;;  %v8210_v43 = vunpack.c.l.b16 %v7198_v56 }
 0x232   : > { %v2764_v13 = vpop.f32.mrf.mxu2  ;;  %v2668_v40 = vadd.f32 %v2634_v18, %v2525_v5  ;;  %v2639_v7 = vpop.f32.mrf.mxu1  ;;  %v3202_v34 = vpack.c.b16 %v8210_v43, %v3190_v57  ;;  %v8396_v57 = vld [vmem:[#allocation35_spill] sm:$0xff] }
 0x233   : > { %v2496_v60 = vpop.f32.mrf.mxu0 }
 0x234   : > { %v7200_v28 = vadd.f32 %v2759_v22, %v2668_v40  ;;  %v7217_v40 = vld [vmem:[%s5590_s26 + $0x100] sm:$0xf] }
 0x235   : > { %v2376_v9 = vpop.f32.mrf.mxu3  ;;  %5170 = vmatmul.msk.bf16.gmra.mxu1 %vm556_vm3, %v3033_v29 }
 0x236   : > { %v2409_v51 = vadd.f32 %v2376_v9, %v6925_v55  ;;  %5153 = vmatmul.msk.bf16.gmra.mxu0 %vm556_vm3, %v2932_v10 }
 0x238   : > { %v2526_v18 = vadd.f32 %v2493_v50, %v2409_v51 }
 0x23a   : > { %5138 = vmatmul.msk.bf16.gmra.mxu3 %vm556_vm3, %v2813_v30  ;;  %v2766_v22 = vpop.f32.mrf.mxu2  ;;  %v2669_v5 = vadd.f32 %v2636_v0, %v2526_v18  ;;  %v2641_v55 = vpop.f32.mrf.mxu1  ;;  %v7220_v0 = vld [vmem:[%s5590_s26 + $0x108] sm:$0xf]  ;;  %v8395_v30 = vld [vmem:[#allocation33_spill] sm:$0xff] }
 0x23b   : > { %v2498_v23 = vpop.f32.mrf.mxu0 }
 0x23c   : > { %v7212_v9 = vadd.f32 %v2761_v2, %v2669_v5 }
 0x23d   : > { %v2379_v47 = vpop.f32.mrf.mxu3 }
 0x23e   : > { %v2410_v15 = vadd.f32 %v2379_v47, %v6947_v39  ;;  %v8209_v39 = vunpack.c.l.b16 %v7217_v40 }
 0x23f   : > { %5228 = vmatmul.msk.bf16.gmra.mxu2 %vm556_vm3, %v3202_v34 }
 0x240   : > { %v2527_v62 = vadd.f32 %v2496_v60, %v2410_v15  ;;  %v8208_v60 = vunpack.c.l.b16 %v7220_v0 }
 0x242   : > { %v2769_v50 = vpop.f32.mrf.mxu2  ;;  %v2670_v45 = vadd.f32 %v2639_v7, %v2527_v62  ;;  %v2644_v29 = vpop.f32.mrf.mxu1 }
 0x243   : > { %v2501_v10 = vpop.f32.mrf.mxu0 }
 0x244   : > { %v7222_v51 = vadd.f32 %v2764_v13, %v2670_v45 }
 0x245   : > { %v2381_v33 = vpop.f32.mrf.mxu3  ;;  %5171 = vmatmul.msk.bf16.gmra.mxu1 %vm556_vm3, %v6981_v42  ;;  %v7237_v42 = vpack.c.b16 %v8208_v60, %v8209_v39  ;;  %v5019_v39 = vld [vmem:[%s5590_s26 + $0xec] sm:$0x1] }
 0x246   : > { %8394 = vst [vmem:[#allocation8_spill] sm:$0xff] %v7222_v51  ;;  %v2411_v2 = vadd.f32 %v2381_v33, %v6956_v38  ;;  %5154 = vmatmul.msk.bf16.gmra.mxu0 %vm556_vm3, %v8395_v30  ;;  %v7248_v30 = vld [vmem:[%s5590_s26 + $0x118] sm:$0xf] }
 0x247   : > { %8397 = vst [vmem:[#allocation3_spill] sm:$0xff] %v7237_v42 }
 0x248   : > { %v2528_v7 = vadd.f32 %v2498_v23, %v2411_v2  ;;  %v7245_v2 = vld [vmem:[%s5590_s26 + $0x110] sm:$0xf]  ;;  %8399 = vst [vmem:[#allocation19_spill] sm:$0xff] %v7248_v30 }
 0x24a   : > { %5139 = vmatmul.msk.bf16.gmra.mxu3 %vm556_vm3, %v8396_v57  ;;  %v2771_v13 = vpop.f32.mrf.mxu2  ;;  %v2671_v18 = vadd.f32 %v2641_v55, %v2528_v7  ;;  %v2646_v5 = vpop.f32.mrf.mxu1  ;;  %v7251_v7 = vld [vmem:[%s5590_s26 + $0xe8] sm:$0xf] }
 0x24b   : > { %v2503_v38 = vpop.f32.mrf.mxu0 }
 0x24c   : > { %v7239_v34 = vadd.f32 %v2766_v22, %v2671_v18 }
 0x24d   : > { %v2384_v47 = vpop.f32.mrf.mxu3 }
 0x24e   : > { %8398 = vst [vmem:[#allocation2_spill] sm:$0xff] %v7239_v34  ;;  %v2412_v23 = vadd.f32 %v2384_v47, %v6976_v41  ;;  %v8213_v41 = vunpack.c.l.b16 %v7245_v2  ;;  %v2916_v47 = vshll.u32 %v7251_v7, 16  ;;  %v7298_v34 = vld [vmem:[%s5590_s26 + $0xac] sm:$0x1] }
 0x24f   : > { %5229 = vmatmul.msk.bf16.gmra.mxu2 %vm556_vm3, %v7237_v42  ;;  %v3324_v42 = vrot.slane %v3322_v6, 4 }
 0x250   : > { %v2529_v15 = vadd.f32 %v2501_v10, %v2412_v23  ;;  %v8212_v10 = vunpack.c.l.b16 %v7248_v30  ;;  %v8401_v23 = vld [vmem:[#allocation41_spill] sm:$0xff]  ;;  %v2918_v60 = vrot.slane %v2916_v47, 5  ;;  %v3339_v47 = vshll.u32 %v7069_v32, 16 }
 0x252   : > { %v2774_v62 = vpop.f32.mrf.mxu2  ;;  %v2672_v45 = vadd.f32 %v2644_v29, %v2529_v15  ;;  %v2649_v33 = vpop.f32.mrf.mxu1  ;;  %v2913_v29 = vshrl.u32 %v7251_v7, 16 }
 0x253   : > { %v2506_v55 = vpop.f32.mrf.mxu0 }
 0x254   : > { %v7253_v57 = vadd.f32 %v2769_v50, %v2672_v45 }
 0x255   : > { %v2386_v22 = vpop.f32.mrf.mxu3  ;;  %5172 = vmatmul.msk.bf16.gmra.mxu1 %vm556_vm3, %v7020_v26  ;;  %v7272_v26 = vpack.c.b16 %v8212_v10, %v8213_v41  ;;  %v3325_v10 = vshll.u32 %v7058_v31, 16 }
 0x256   : > { %8400 = vst [vmem:[#allocation14_spill] sm:$0xff] %v7253_v57  ;;  %v2413_v18 = vadd.f32 %v2386_v22, %v6995_v25  ;;  %5155 = vmatmul.msk.bf16.gmra.mxu0 %vm556_vm3, %v6664_v52  ;;  %v2915_v22 = vrot.slane %v2913_v29, 4  ;;  %v3336_v29 = vshrl.u32 %v7069_v32, 16 }
 0x257   : > { %8402 = vst [vmem:[#allocation17_spill] sm:$0xff] %v7272_v26  ;;  %v3327_v46 = vrot.slane %v3325_v10, 5 }
 0x258   : > { %v2530_v50 = vadd.f32 %v2503_v38, %v2413_v18  ;;  %v3338_v54 = vrot.slane %v3336_v29, 4  ;;  %v3331_v29 = vshll.u32 %v7298_v34, 16 }
 0x25a   : > { %5140 = vmatmul.msk.bf16.gmra.mxu3 %vm556_vm3, %v8401_v23  ;;  %v7266_v25 = vpop.f32.mrf.mxu2  ;;  %v2673_v15 = vadd.f32 %v2646_v5, %v2530_v50  ;;  %v2651_v52 = vpop.f32.mrf.mxu1  ;;  %v2919_v5 = vor.u32 %v2918_v60, %v2915_v22  ;;  %v2922_v50 = vshll.u32 %v5019_v39, 16  ;;  %v7292_v60 = vld [vmem:[%s5590_s26 + $0x128] sm:$0xf] }
 0x25b   : > { %v2508_v45 = vpop.f32.mrf.mxu0  ;;  %8405 = vst [vmem:[#allocation10_spill] sm:$0xff] %v7292_v60 }
 0x25c   : > { %v7275_v43 = vadd.f32 %v2771_v13, %v2673_v15  ;;  %v7287_v15 = vld [vmem:[%s5590_s26 + $0x120] sm:$0xf]  ;;  %v2924_v22 = vrot.slane %v2922_v50, 5  ;;  %v3328_v50 = vor.u32 %v3327_v46, %v3324_v42  ;;  %v2812_v46 = vunpack.c.l.b16 %v7251_v7 }
 0x25d   : > { %v2389_v38 = vpop.f32.mrf.mxu3  ;;  %8404 = vst [vmem:[#allocation6_spill] sm:$0xff] %v7287_v15 }
 0x25e   : > { %8403 = vst [vmem:[#allocation21_spill] sm:$0xff] %v7275_v43  ;;  %v2414_v18 = vadd.f32 %v2389_v38, %v7015_v61  ;;  %v3341_v43 = vrot.slane %v3339_v47, 5 }
 0x25f   : > { %5230 = vmatmul.msk.bf16.gmra.mxu2 %vm556_vm3, %v7272_v26  ;;  %v3025_v26 = vrot.slane %v5019_v39, 5  ;;  %v7308_v39 = vld [vmem:[%s5590_s26 + $0xb4] sm:$0x1] }
 0x260   : > { %v2531_v23 = vadd.f32 %v2506_v55, %v2414_v18  ;;  %v2920_v55 = vrot.slane %v2919_v5, 4  ;;  %v5159_v18 = vrot.slane %v7251_v7, 9  ;;  %v8221_v5 = vunpack.c.l.b16 %v7287_v15 }
 0x261   : > { %v3342_v47 = vor.u32 %v3341_v43, %v3338_v54  ;;  %v5312_v54 = vld [vmem:[%s8116_s1 + $0x11c] sm:$0xf] }
 0x262   : > { %v7284_v13 = vpop.f32.mrf.mxu2  ;;  %v2674_v61 = vadd.f32 %v2649_v33, %v2531_v23  ;;  %v7289_v41 = vpop.f32.mrf.mxu1  ;;  %v8407_v23 = vld [vmem:[#allocation9_spill] sm:$0xff]  ;;  %v3026_v10 = vsel %vm5594_vm4, %v5159_v18, %v3025_v26  ;;  %v8409_v26 = vunpack.c.l.b16 %v7292_v60  ;;  %v3333_v60 = vrot.slane %v3331_v29, 5 }
 0x263   : > { %v2511_v38 = vpop.f32.mrf.mxu0  ;;  %v3032_v18 = vunpack.c.l.b16 %v3026_v10  ;;  %v3343_v15 = vrot.slane %v3342_v47, 4 }
 0x264   : > { %v7295_v11 = vadd.f32 %v2774_v62, %v2674_v61  ;;  %v2925_v62 = vsel %vm5642_vm7, %v2920_v55, %v2924_v22  ;;  %v3345_v61 = vshll.u32 %v7308_v39, 16  ;;  %v7326_v55 = vpack.c.b16 %v8409_v26, %v8221_v5  ;;  %v7339_v26 = vld [vmem:[%s5590_s26 + $0xa4] sm:$0x1] }
 0x265   : > { %v2391_v57 = vpop.f32.mrf.mxu3  ;;  %5173 = vmatmul.msk.bf16.gmra.mxu1 %vm556_vm3, %v7074_v16  ;;  %v3311_v16 = vshll.u32 %v7061_v44, 16  ;;  %v2931_v22 = vunpack.c.l.b16 %v2925_v62  ;;  %v8411_v62 = vunpack.c.l.b16 %v6987_v20  ;;  %v5359_v20 = vld [vmem:[%s8116_s1 + $0x140] sm:$0xf] }
 0x266   : > { %8406 = vst [vmem:[#allocation23_spill] sm:$0xff] %v7295_v11  ;;  %v2415_v33 = vadd.f32 %v2391_v57, %v7034_v37  ;;  %5156 = vmatmul.msk.bf16.gmra.mxu0 %vm556_vm3, %v8407_v23  ;;  %v3308_v37 = vshrl.u32 %v7061_v44, 16  ;;  %v8408_v23 = vld [vmem:[#allocation42_spill] sm:$0xff]  ;;  %v3329_v11 = vrot.slane %v3328_v50, 4  ;;  %v3317_v50 = vshll.u32 %v7339_v26, 16 }
 0x267   : > { %8410 = vst [vmem:[#allocation25_spill] sm:$0xff] %v7326_v55  ;;  %v7341_v5 = vrot.slane %v3311_v16, 5  ;;  %v2814_v10 = vpack.c.b16 %v2812_v46, %v8411_v62  ;;  %v8412_v16 = vunpack.c.l.b16 %v7013_v1  ;;  %v5342_v1 = vld [vmem:[%s8116_s1 + $0x134] sm:$0xf]  ;;  %v3682_v46 = vrot.slane %v7298_v34, 5 }
 0x268   : > { %v2532_v57 = vadd.f32 %v2508_v45, %v2415_v33  ;;  %v7336_v33 = vrot.slane %v3308_v37, 4  ;;  %v2933_v37 = vpack.c.b16 %v2931_v22, %v7038_v59  ;;  %v5327_v59 = vld [vmem:[%s8116_s1 + $0x128] sm:$0xf]  ;;  %v3364_v62 = vshrl.u32 %v7112_v14, 16 }
 0x269   : > { %v3034_v47 = vpack.c.b16 %v3032_v18, %v8412_v16 }
 0x26a   : > { %5141 = vmatmul.msk.bf16.gmra.mxu3 %vm556_vm3, %v8408_v23  ;;  %v7320_v6 = vpop.f32.mrf.mxu2  ;;  %v2675_v43 = vadd.f32 %v2651_v52, %v2532_v57  ;;  %v7334_v45 = vpop.f32.mrf.mxu1  ;;  %v4158_v23 = vunpack.c.l.b16 %v5312_v54  ;;  %v3347_v57 = vrot.slane %v3345_v61, 5  ;;  %v3334_v61 = vsel %vm5642_vm7, %v3329_v11, %v3333_v60 }
 0x26b   : > { %v7332_v42 = vpop.f32.mrf.mxu0  ;;  %v4489_v11 = vunpack.c.l.b16 %v5359_v20  ;;  %v3350_v54 = vshrl.u32 %v7090_v63, 16  ;;  %v5249_v20 = vrot.slane %v7069_v32, 9 }
 0x26c   : > { %v7344_v7 = vadd.f32 %v7266_v25, %v2675_v43  ;;  %v4160_v30 = vpack.c.b16 %v4158_v23, %v4158_v23 }
 0x26d   : > { %v2394_v52 = vpop.f32.mrf.mxu3  ;;  %v3352_v32 = vrot.slane %v3350_v54, 4 }
 0x26e   : > { %v2416_v51 = vadd.f32 %v2394_v52, %v7063_v4  ;;  %v4187_v29 = vsel %vm581_vm0, %v4160_v30, 0  ;;  %v3314_v4 = vor.u32 %v7341_v5, %v7336_v33  ;;  %v4269_v30 = vunpack.c.l.b16 %v5327_v59 }
 0x26f   : > { %5231 = vmatmul.msk.bf16.gmra.mxu2 %vm556_vm3, %v7326_v55  ;;  %4195 = vmatpush.bf16.msra.mxu3 %v4187_v29  ;;  %v5248_v5 = vrot.slane %v7058_v31, 9  ;;  %v4491_v33 = vpack.c.b16 %v4489_v11, %v4489_v11  ;;  %v3367_v31 = vshll.u32 %v7112_v14, 16 }
 0x270   : > { %v2533_v25 = vadd.f32 %v2511_v38, %v2416_v51  ;;  %v3348_v51 = vsel %vm5642_vm7, %v3343_v15, %v3347_v57  ;;  %v4388_v38 = vunpack.c.l.b16 %v5342_v1  ;;  %v4271_v23 = vpack.c.b16 %v4269_v30, %v4269_v30 }
 0x271   : > { %v3353_v15 = vshll.u32 %v7090_v63, 16  ;;  %v5247_v57 = vrot.slane %v7061_v44, 9  ;;  %v7393_v44 = vunpack.c.l.b16 %v3334_v61  ;;  %v3686_v1 = vrot.slane %v7308_v39, 5  ;;  %v7408_v39 = vld [vmem:[%s5590_s26 + $0xc4] sm:$0x1] }
 0x272   : > { %v7371_v60 = vpop.f32.mrf.mxu2  ;;  %v2676_v43 = vadd.f32 %v7289_v41, %v2533_v25  ;;  %v7377_v18 = vpop.f32.mrf.mxu1  ;;  %v4390_v52 = vpack.c.b16 %v4388_v38, %v4388_v38  ;;  %v4500_v41 = vsel %vm581_vm0, %v4491_v33, 0  ;;  %v4280_v25 = vsel %vm581_vm0, %v4271_v23, 0 }
 0x273   : > { %v2516_v22 = vpop.f32.mrf.mxu0  ;;  %v7398_v11 = vunpack.c.l.b16 %v3348_v51  ;;  %v3678_v30 = vrot.slane %v7339_v26, 5  ;;  %4508 = vmatpush.bf16.msra.mxu2 %v4500_v41  ;;  %4288 = vmatpush.bf16.msra.mxu0 %v4280_v25  ;;  %v3369_v61 = vrot.slane %v3367_v31, 5  ;;  %v7404_v38 = vsel %vm5594_vm4, %v5249_v20, %v3686_v1 }
 0x274   : > { %v7384_v34 = vadd.f32 %v7284_v13, %v2676_v43  ;;  %v4399_v16 = vsel %vm581_vm0, %v4390_v52, 0  ;;  %v3683_v13 = vsel %vm5594_vm4, %v5248_v5, %v3682_v46  ;;  %v5184_v46 = vld [vmem:[%s5590_s26 + $0xbc] sm:$0x1]  ;;  %v3746_v51 = vunpack.c.l.b16 %v7404_v38 }
 0x275   : > { %v2396_v29 = vpop.f32.mrf.mxu3  ;;  %5174 = vmatmul.msk.bf16.gmra.mxu1 %vm556_vm3, %v3034_v47  ;;  %v3366_v47 = vrot.slane %v3364_v62, 4  ;;  %v3745_v5 = vunpack.c.l.b16 %v3683_v13  ;;  %v3315_v54 = vrot.slane %v3314_v4, 4  ;;  %v3319_v43 = vrot.slane %v3317_v50, 5 }
 0x276   : > { %v2417_v59 = vadd.f32 %v2396_v29, %v7085_v48  ;;  %5157 = vmatmul.msk.bf16.gmra.mxu0 %vm556_vm3, %v2933_v37  ;;  %v3355_v48 = vrot.slane %v3353_v15, 5  ;;  %4407 = vmatpush.bf16.msra.mxu1 %v4399_v16  ;;  %v4020_v52 = vpack.c.b16 %v7398_v11, %v7393_v44  ;;  %v3679_v15 = vsel %vm5594_vm4, %v5247_v57, %v3678_v30 }
 0x277   : > { %v7421_v31 = vpack.c.b16 %v3746_v51, %v3745_v5  ;;  %v3370_v29 = vor.u32 %v3369_v61, %v3366_v47  ;;  %v3373_v4 = vshll.u32 %v7408_v39, 16  ;;  %v3320_v25 = vsel %vm5642_vm7, %v3315_v54, %v3319_v43 }
 0x278   : > { %v2534_v37 = vadd.f32 %v7332_v42, %v2417_v59  ;;  %v3356_v62 = vor.u32 %v3355_v48, %v3352_v32  ;;  %v3744_v16 = vunpack.c.l.b16 %v3679_v15  ;;  %v3535_v30 = vunpack.c.l.b16 %v3320_v25 }
 0x279   : > { %v3371_v13 = vrot.slane %v3370_v29, 4  ;;  %v3375_v1 = vrot.slane %v3373_v4, 5  ;;  %v3392_v54 = vshrl.u32 %v7146_v27, 16  ;;  %v3395_v43 = vshll.u32 %v7146_v27, 16 }
 0x27a   : > { %5142 = vmatmul.msk.bf16.gmra.mxu3 %vm556_vm3, %v2814_v10  ;;  %v7412_v26 = vpop.f32.mrf.mxu2  ;;  %v2677_v42 = vadd.f32 %v7334_v45, %v2534_v37  ;;  %v2661_v23 = vpop.f32.mrf.mxu1  ;;  %v3359_v10 = vshll.u32 %v5184_v46, 16  ;;  %v3357_v57 = vrot.slane %v3356_v62, 4  ;;  %v3760_v32 = vpack.c.b16 %v3745_v5, %v3744_v16 }
 0x27b   : > { %v2518_v33 = vpop.f32.mrf.mxu0  ;;  %v3381_v37 = vshll.u32 %v7115_v35, 16  ;;  %v3376_v5 = vsel %vm5642_vm7, %v3371_v13, %v3375_v1  ;;  %v5250_v15 = vrot.slane %v7090_v63, 9  ;;  %v3394_v25 = vrot.slane %v3392_v54, 4 }
 0x27c   : > { %v7425_v50 = vadd.f32 %v7320_v6, %v2677_v42  ;;  %v3361_v59 = vrot.slane %v3359_v10, 5  ;;  %v3378_v6 = vshrl.u32 %v7115_v35, 16  ;;  %v3690_v10 = vrot.slane %v5184_v46, 5 }
 0x27d   : > { %v2399_v45 = vpop.f32.mrf.mxu3  ;;  %v3383_v4 = vrot.slane %v3381_v37, 5  ;;  %v3397_v16 = vrot.slane %v3395_v43, 5 }
 0x27e   : > { %v2418_v41 = vadd.f32 %v2399_v45, %v7092_v19  ;;  %v3380_v29 = vrot.slane %v3378_v6, 4 }
 0x27f   : > { %5300 = vmatmul.msk.bf16.vlgmr.msrb.gmra.mxu2 %vm556_vm3, %v4020_v52 }
 0x280   : > { %v2535_v20 = vadd.f32 %v2516_v22, %v2418_v41  ;;  %v3362_v22 = vsel %vm5642_vm7, %v3357_v57, %v3361_v59  ;;  %v7449_v41 = vunpack.c.l.b16 %v3376_v5  ;;  %v7455_v57 = vld [vmem:[%s5590_s26 + $0xd4] sm:$0x1]  ;;  %v3384_v46 = vor.u32 %v3383_v4, %v3380_v29 }
 0x281   : > { %v3538_v45 = vunpack.c.l.b16 %v3362_v22  ;;  %v3409_v4 = vshll.u32 %v7149_v8, 16 }
 0x282   : > { %v3251_v48 = vpop.f32.mrf.mxu2  ;;  %v2678_v19 = vadd.f32 %v7377_v18, %v2535_v20  ;;  %v3062_v61 = vpop.f32.mrf.mxu1  ;;  %v3551_v18 = vpack.c.b16 %v7393_v44, %v3535_v30  ;;  %v3385_v43 = vrot.slane %v3384_v46, 4 }
 0x283   : > { %v2961_v47 = vpop.f32.mrf.mxu0  ;;  %v4021_v30 = vpack.c.b16 %v7449_v41, %v3538_v45 }
 0x284   : > { %v7441_v42 = vadd.f32 %v7371_v60, %v2678_v19  ;;  %v7452_v60 = vld [vmem:[%s5590_s26 + $0xcc] sm:$0x1] }
 0x285   : > { %v2401_v52 = vpop.f32.mrf.mxu3  ;;  %5285 = vmatmul.msk.bf16.vlgmr.msrb.gmra.mxu1 %vm556_vm3, %v7081_v36  ;;  %v7462_v36 = vsel %vm5594_vm4, %v5250_v15, %v3690_v10  ;;  %v3387_v20 = vshll.u32 %v7452_v60, 16  ;;  %v8413_v15 = vunpack.c.l.b16 %v7090_v63 }
 0x286   : > { %v2419_v62 = vadd.f32 %v2401_v52, %v7106_v12  ;;  %5270 = vmatmul.msk.bf16.vlgmr.msrb.gmra.mxu0 %vm556_vm3, %v3760_v32  ;;  %v3401_v32 = vshll.u32 %v7455_v57, 16  ;;  %v8228_v19 = vunpack.c.l.b16 %v7462_v36 }
 0x287   : > { %v3389_v22 = vrot.slane %v3387_v20, 5 }
 0x288   : > { %v2536_v44 = vadd.f32 %v2518_v33, %v2419_v62  ;;  %v3398_v33 = vor.u32 %v3397_v16, %v3394_v25  ;;  %v3403_v5 = vrot.slane %v3401_v32, 5  ;;  %v8414_v62 = vunpack.c.l.b16 %v7112_v14 }
 0x289   : > { %v3390_v29 = vsel %vm5642_vm7, %v3385_v43, %v3389_v22  ;;  %v7512_v43 = vld [vmem:[%s5590_s26 + $0xdc] sm:$0x1] }
 0x28a   : > { %5239 = vmatmul.msk.bf16.vlgmr.msrb.gmra.mxu3 %vm556_vm3, %v3551_v18  ;;  %v7458_v12 = vpop.f32.mrf.mxu2  ;;  %v2679_v59 = vadd.f32 %v2661_v23, %v2536_v44  ;;  %v3064_v1 = vpop.f32.mrf.mxu1  ;;  %v3399_v23 = vrot.slane %v3398_v33, 4  ;;  %v7474_v18 = vld [vmem:[%s5590_s26 + $0xe0] sm:$0xf]  ;;  %v3694_v33 = vrot.slane %v7408_v39, 5 }
 0x28b   : > { %v2963_v13 = vpop.f32.mrf.mxu0  ;;  %v3987_v63 = vshrl.u32 %v7474_v18, 16  ;;  %v3990_v44 = vshll.u32 %v7474_v18, 16 }
 0x28c   : > { %v7468_v6 = vadd.f32 %v7412_v26, %v2679_v59  ;;  %v7480_v26 = vpack.c.b16 %v8228_v19, %v3746_v51  ;;  %v3404_v51 = vsel %vm5642_vm7, %v3399_v23, %v3403_v5  ;;  %v7499_v59 = vpack.c.b16 %v3538_v45, %v7398_v11  ;;  %v7515_v23 = vld [vmem:[%s5590_s26 + $0xe4] sm:$0x1] }
 0x28d   : > { %v2842_v37 = vpop.f32.mrf.mxu3  ;;  %v5252_v11 = vrot.slane %v7115_v35, 9  ;;  %v3698_v45 = vrot.slane %v7452_v60, 5  ;;  %v3992_v22 = vrot.slane %v3990_v44, 5 }
 0x28e   : > { %v2882_v54 = vadd.f32 %v2842_v37, %v7117_v49  ;;  %v3878_v49 = vpack.c.b16 %v8414_v62, %v8413_v15  ;;  %v7507_v37 = vunpack.c.l.b16 %v3404_v51  ;;  %v3415_v15 = vshll.u32 %v7512_v43, 16 }
 0x28f   : > { %5301 = vmatmul.msk.bf16.gmra.mxu2 %vm556_vm3, %v4021_v30  ;;  %v3540_v30 = vunpack.c.l.b16 %v3390_v29 }
 0x290   : > { %v3001_v52 = vadd.f32 %v2961_v47, %v2882_v54  ;;  %v3406_v47 = vshrl.u32 %v7149_v8, 16  ;;  %v3411_v54 = vrot.slane %v3409_v4, 5  ;;  %v3996_v4 = vshll.u32 %v7515_v23, 16 }
 0x291   : > { %v4022_v29 = vpack.c.b16 %v7507_v37, %v3540_v30 }
 0x292   : > { %v7486_v10 = vpop.f32.mrf.mxu2  ;;  %v3102_v25 = vadd.f32 %v3062_v61, %v3001_v52  ;;  %v3067_v16 = vpop.f32.mrf.mxu1  ;;  %v5251_v61 = vrot.slane %v7112_v14, 9  ;;  %v3989_v14 = vrot.slane %v3987_v63, 4 }
 0x293   : > { %v2966_v38 = vpop.f32.mrf.mxu0 }
 0x294   : > { %v7496_v46 = vadd.f32 %v3251_v48, %v3102_v25  ;;  %v3408_v48 = vrot.slane %v3406_v47, 4  ;;  %v7523_v5 = vsel %vm5594_vm4, %v5251_v61, %v3694_v33  ;;  %v3993_v47 = vor.u32 %v3992_v22, %v3989_v14 }
 0x295   : > { %v2844_v20 = vpop.f32.mrf.mxu3  ;;  %5286 = vmatmul.msk.bf16.gmra.mxu1 %vm556_vm3, %v3878_v49  ;;  %v8227_v63 = vunpack.c.l.b16 %v7523_v5  ;;  %v3417_v61 = vrot.slane %v3415_v15, 5  ;;  %v3434_v15 = vshrl.u32 %v7198_v56, 16 }
 0x296   : > { %v2883_v32 = vadd.f32 %v2844_v20, %v7139_v53  ;;  %5271 = vmatmul.msk.bf16.gmra.mxu0 %vm556_vm3, %v7480_v26  ;;  %v3412_v52 = vor.u32 %v3411_v54, %v3408_v48  ;;  %v3994_v33 = vrot.slane %v3993_v47, 4 }
 0x298   : > { %v3002_v39 = vadd.f32 %v2963_v13, %v2883_v32  ;;  %v7529_v13 = vsel %vm5594_vm4, %v5252_v11, %v3698_v45  ;;  %v3413_v20 = vrot.slane %v3412_v52, 4  ;;  %v3998_v32 = vrot.slane %v3996_v4, 5 }
 0x299   : > { %v8415_v11 = vunpack.c.l.b16 %v7115_v35  ;;  %v3451_v35 = vshll.u32 %v7217_v40, 16 }
 0x29a   : > { %5240 = vmatmul.msk.bf16.gmra.mxu3 %vm556_vm3, %v7499_v59  ;;  %v7519_v53 = vpop.f32.mrf.mxu2  ;;  %v3103_v60 = vadd.f32 %v3064_v1, %v3002_v39  ;;  %v3069_v49 = vpop.f32.mrf.mxu1  ;;  %v8226_v1 = vunpack.c.l.b16 %v7529_v13  ;;  %v3418_v14 = vsel %vm5642_vm7, %v3413_v20, %v3417_v61  ;;  %v3702_v20 = vrot.slane %v7455_v57, 5 }
 0x29b   : > { %v2968_v62 = vpop.f32.mrf.mxu0  ;;  %v3453_v57 = vrot.slane %v3451_v35, 5  ;;  %v3420_v35 = vshrl.u32 %v7195_v3, 16 }
 0x29c   : > { %v7533_v25 = vadd.f32 %v7458_v12, %v3103_v60  ;;  %v7543_v12 = vpack.c.b16 %v8226_v1, %v8227_v63  ;;  %v3437_v60 = vshll.u32 %v7198_v56, 16 }
 0x29d   : > { %v2847_v51 = vpop.f32.mrf.mxu3 }
 0x29e   : > { %v2884_v44 = vadd.f32 %v2847_v51, %v7151_v17  ;;  %v8416_v17 = vunpack.c.l.b16 %v7146_v27  ;;  %v7567_v51 = vunpack.c.l.b16 %v3418_v14  ;;  %v5398_v14 = vld [vmem:[%s8116_s1 + $0x114] sm:$0xff] }
 0x29f   : > { %5302 = vmatmul.msk.bf16.gmra.mxu2 %vm556_vm3, %v4022_v29  ;;  %v3448_v29 = vshrl.u32 %v7217_v40, 16  ;;  %4196 = vmatpush.bf16.msra.mxu3 %v5398_v14 }
 0x2a0   : > { %v3003_v48 = vadd.f32 %v2966_v38, %v2884_v44  ;;  %v3879_v45 = vpack.c.b16 %v8416_v17, %v8415_v11  ;;  %v3999_v38 = vsel %vm5642_vm7, %v3994_v33, %v3998_v32  ;;  %v5253_v44 = vrot.slane %v7146_v27, 9  ;;  %v7580_v11 = vld [vmem:[%s5590_s26 + $0xfc] sm:$0x1]  ;;  %v7583_v17 = vld [vmem:[%s5590_s26 + $0x104] sm:$0x1] }
 0x2a1   : > { %v5254_v33 = vrot.slane %v7149_v8, 9  ;;  %v3439_v32 = vrot.slane %v3437_v60, 5  ;;  %v3450_v27 = vrot.slane %v3448_v29, 4  ;;  %v3443_v29 = vshll.u32 %v7580_v11, 16 }
 0x2a2   : > { %v7545_v54 = vpop.f32.mrf.mxu2  ;;  %v3104_v22 = vadd.f32 %v3067_v16, %v3003_v48  ;;  %v7553_v52 = vpop.f32.mrf.mxu1  ;;  %v7565_v16 = vpack.c.b16 %v3540_v30, %v7449_v41  ;;  %v3706_v41 = vrot.slane %v7512_v43, 5  ;;  %v3436_v30 = vrot.slane %v3434_v15, 4 }
 0x2a3   : > { %v2971_v39 = vpop.f32.mrf.mxu0  ;;  %v7593_v43 = vsel %vm5594_vm4, %v5253_v44, %v3702_v20  ;;  %v3454_v44 = vor.u32 %v3453_v57, %v3450_v27  ;;  %v3457_v20 = vshll.u32 %v7583_v17, 16  ;;  %v3445_v1 = vrot.slane %v3443_v29, 5  ;;  %v5198_v27 = vld [vmem:[%s5590_s26 + $0xf4] sm:$0x1] }
 0x2a4   : > { %v7562_v47 = vadd.f32 %v7486_v10, %v3104_v22  ;;  %v7575_v10 = vunpack.c.l.b16 %v3999_v38  ;;  %v3440_v60 = vor.u32 %v3439_v32, %v3436_v30  ;;  %v8234_v32 = vunpack.c.l.b16 %v7474_v18 }
 0x2a5   : > { %v2849_v4 = vpop.f32.mrf.mxu3  ;;  %5287 = vmatmul.msk.bf16.gmra.mxu1 %vm556_vm3, %v3879_v45  ;;  %v3422_v57 = vrot.slane %v3420_v35, 4  ;;  %v3455_v19 = vrot.slane %v3454_v44, 4  ;;  %v3465_v29 = vshll.u32 %v7220_v0, 16 }
 0x2a6   : > { %v2885_v61 = vadd.f32 %v2849_v4, %v7176_v24  ;;  %5272 = vmatmul.msk.bf16.gmra.mxu0 %vm556_vm3, %v7543_v12  ;;  %8417 = vst [vmem:[#allocation22_spill] sm:$0xff] %v7575_v10  ;;  %v4023_v45 = vpack.c.b16 %v7575_v10, %v7567_v51  ;;  %v3423_v4 = vshll.u32 %v7195_v3, 16  ;;  %v3429_v10 = vshll.u32 %v5198_v27, 16 }
 0x2a8   : > { %v3004_v48 = vadd.f32 %v2968_v62, %v2885_v61  ;;  %v7597_v62 = vsel %vm5594_vm4, %v5254_v33, %v3706_v41  ;;  %v3425_v63 = vrot.slane %v3423_v4, 5  ;;  %v8419_v4 = vunpack.c.l.b16 %v7149_v8 }
 0x2a9   : > { %8418 = vst [vmem:[#allocation20_spill] sm:$0xff] %v7597_v62  ;;  %v8229_v41 = vunpack.c.l.b16 %v7597_v62 }
 0x2aa   : > { %5241 = vmatmul.msk.bf16.gmra.mxu3 %vm556_vm3, %v7565_v16  ;;  %v7587_v24 = vpop.f32.mrf.mxu2  ;;  %v3105_v22 = vadd.f32 %v3069_v49, %v3004_v48  ;;  %v7602_v15 = vpop.f32.mrf.mxu1  ;;  %v8230_v49 = vunpack.c.l.b16 %v7593_v43  ;;  %v3441_v48 = vrot.slane %v3440_v60, 4  ;;  %v3880_v44 = vpack.c.b16 %v8234_v32, %v8419_v4 }
 0x2ab   : > { %v2973_v38 = vpop.f32.mrf.mxu0  ;;  %v3426_v62 = vor.u32 %v3425_v63, %v3422_v57  ;;  %v3714_v32 = vrot.slane %v7580_v11, 5  ;;  %v3467_v63 = vrot.slane %v3465_v29, 5  ;;  %v7666_v11 = vld [vmem:[%s5590_s26 + $0x10c] sm:$0x1] }
 0x2ac   : > { %v7609_v61 = vadd.f32 %v7519_v53, %v3105_v22  ;;  %v3459_v53 = vrot.slane %v3457_v20, 5  ;;  %v5401_v22 = vld [vmem:[%s8116_s1 + $0x138] sm:$0xff]  ;;  %v7630_v60 = vpack.c.b16 %v8229_v41, %v8230_v49  ;;  %v3476_v20 = vshrl.u32 %v7245_v2, 16 }
 0x2ad   : > { %v2852_v33 = vpop.f32.mrf.mxu3  ;;  %4509 = vmatpush.bf16.msra.mxu2 %v5401_v22  ;;  %v3446_v55 = vsel %vm5642_vm7, %v3441_v48, %v3445_v1  ;;  %v5255_v22 = vrot.slane %v7195_v3, 9 }
 0x2ae   : > { %v2886_v30 = vadd.f32 %v2852_v33, %v7200_v28  ;;  %v5399_v28 = vld [vmem:[%s8116_s1 + $0x120] sm:$0xff]  ;;  %v3479_v33 = vshll.u32 %v7245_v2, 16  ;;  %v3460_v8 = vsel %vm5642_vm7, %v3455_v19, %v3459_v53  ;;  %v7656_v19 = vpack.c.b16 %v7567_v51, %v7507_v37  ;;  %v7669_v53 = vld [vmem:[%s5590_s26 + $0x114] sm:$0x1] }
 0x2af   : > { %5303 = vmatmul.msk.bf16.gmra.mxu2 %vm556_vm3, %v4023_v45  ;;  %v5400_v45 = vld [vmem:[%s8116_s1 + $0x12c] sm:$0xff]  ;;  %4289 = vmatpush.bf16.msra.mxu0 %v5399_v28  ;;  %v3710_v28 = vrot.slane %v5198_v27, 5  ;;  %v3478_v3 = vrot.slane %v3476_v20, 4  ;;  %v7661_v27 = vunpack.c.l.b16 %v3446_v55  ;;  %v7663_v57 = vunpack.c.l.b16 %v3460_v8 }
 0x2b0   : > { %v3005_v14 = vadd.f32 %v2971_v39, %v2886_v30  ;;  %v3462_v39 = vshrl.u32 %v7220_v0, 16  ;;  %4408 = vmatpush.bf16.msra.mxu1 %v5400_v45  ;;  %v3427_v45 = vrot.slane %v3426_v62, 4 }
 0x2b1   : > { %v3711_v37 = vsel %vm5594_vm4, %v5255_v22, %v3710_v28 }
 0x2b2   : > { %v7634_v35 = vpop.f32.mrf.mxu2  ;;  %v3106_v30 = vadd.f32 %v7553_v52, %v3005_v14  ;;  %v3077_v49 = vpop.f32.mrf.mxu1  ;;  %v5256_v14 = vrot.slane %v7198_v56, 9  ;;  %v3464_v1 = vrot.slane %v3462_v39, 4  ;;  %v3431_v39 = vrot.slane %v3429_v10, 5 }
 0x2b3   : > { %v2976_v41 = vpop.f32.mrf.mxu0  ;;  %v3752_v28 = vunpack.c.l.b16 %v3711_v37 }
 0x2b4   : > { %v7649_v4 = vadd.f32 %v7545_v54, %v3106_v30  ;;  %v3481_v54 = vrot.slane %v3479_v33, 5  ;;  %v7675_v51 = vsel %vm5594_vm4, %v5256_v14, %v3714_v32  ;;  %v3468_v29 = vor.u32 %v3467_v63, %v3464_v1  ;;  %v8422_v1 = vld [vmem:[#allocation8_spill] sm:$0xff] }
 0x2b5   : > { %v2854_v52 = vpop.f32.mrf.mxu3  ;;  %5288 = vmatmul.msk.bf16.gmra.mxu1 %vm556_vm3, %v3880_v44  ;;  %8420 = vst [vmem:[#allocation12_spill] sm:$0xff] %v7675_v51  ;;  %v3471_v44 = vshll.u32 %v7666_v11, 16  ;;  %v4024_v30 = vpack.c.b16 %v7663_v57, %v7661_v27  ;;  %v3432_v22 = vsel %vm5642_vm7, %v3427_v45, %v3431_v39 }
 0x2b6   : > { %v2887_v48 = vadd.f32 %v2854_v52, %v7212_v9  ;;  %5273 = vmatmul.msk.bf16.gmra.mxu0 %vm556_vm3, %v7630_v60  ;;  %v3482_v20 = vor.u32 %v3481_v54, %v3478_v3  ;;  %v8235_v52 = vunpack.c.l.b16 %v7675_v51  ;;  %v3469_v14 = vrot.slane %v3468_v29, 4  ;;  %v7724_v51 = vld [vmem:[%s5590_s26 + $0x11c] sm:$0x1] }
 0x2b8   : > { %v3006_v9 = vadd.f32 %v2973_v38, %v2887_v48  ;;  %v3485_v38 = vshll.u32 %v7669_v53, 16  ;;  %v3473_v48 = vrot.slane %v3471_v44, 5  ;;  %v3764_v45 = vpack.c.b16 %v8235_v52, %v3752_v28 }
 0x2ba   : > { %5242 = vmatmul.msk.bf16.gmra.mxu3 %vm556_vm3, %v7656_v19  ;;  %v7679_v55 = vpop.f32.mrf.mxu2  ;;  %v3107_v10 = vadd.f32 %v7602_v15, %v3006_v9  ;;  %v3079_v33 = vpop.f32.mrf.mxu1  ;;  %v3483_v15 = vrot.slane %v3482_v20, 4  ;;  %v3487_v3 = vrot.slane %v3485_v38, 5  ;;  %v3543_v9 = vunpack.c.l.b16 %v3432_v22  ;;  %v8425_v38 = vld [vmem:[#allocation19_spill] sm:$0xff] }
 0x2bb   : > { %v2978_v62 = vpop.f32.mrf.mxu0  ;;  %v3474_v37 = vsel %vm5642_vm7, %v3469_v14, %v3473_v48  ;;  %v3718_v48 = vrot.slane %v7583_v17, 5  ;;  %v7727_v17 = vld [vmem:[%s5590_s26 + $0x124] sm:$0x1] }
 0x2bc   : > { %v7687_v32 = vadd.f32 %v7587_v24, %v3107_v10  ;;  %v8423_v24 = vunpack.c.l.b16 %v7198_v56  ;;  %v8424_v10 = vunpack.c.l.b16 %v7217_v40  ;;  %v3488_v29 = vsel %vm5642_vm7, %v3483_v15, %v3487_v3  ;;  %v8427_v3 = vld [vmem:[#allocation2_spill] sm:$0xff] }
 0x2bd   : > { %v2857_v8 = vpop.f32.mrf.mxu3  ;;  %v3493_v56 = vshll.u32 %v8425_v38, 16  ;;  %v3555_v14 = vpack.c.b16 %v7661_v27, %v3543_v9  ;;  %v5258_v15 = vrot.slane %v7220_v0, 9 }
 0x2be   : > { %8421 = vst [vmem:[#allocation26_spill] sm:$0xff] %v7687_v32  ;;  %v2888_v63 = vadd.f32 %v2857_v8, %v8422_v1  ;;  %v3881_v32 = vpack.c.b16 %v8424_v10, %v8423_v24  ;;  %v8426_v8 = vld [vmem:[#allocation6_spill] sm:$0xff]  ;;  %v3546_v24 = vunpack.c.l.b16 %v3474_v37  ;;  %v3722_v10 = vrot.slane %v7666_v11, 5 }
 0x2bf   : > { %5304 = vmatmul.msk.bf16.gmra.mxu2 %vm556_vm3, %v4024_v30  ;;  %v3490_v30 = vshrl.u32 %v8425_v38, 16  ;;  %v3504_v22 = vshrl.u32 %v8426_v8, 16  ;;  %v3507_v1 = vshll.u32 %v8426_v8, 16  ;;  %v3495_v27 = vrot.slane %v3493_v56, 5 }
 0x2c0   : > { %v3007_v54 = vadd.f32 %v2976_v41, %v2888_v63  ;;  %v7739_v11 = vsel %vm5594_vm4, %v5258_v15, %v3722_v10  ;;  %v3499_v56 = vshll.u32 %v7724_v51, 16 }
 0x2c1   : > { %v3506_v9 = vrot.slane %v3504_v22, 4  ;;  %v3509_v52 = vrot.slane %v3507_v1, 5  ;;  %8429 = vst [vmem:[#allocation28_spill] sm:$0xff] %v7739_v11  ;;  %v3513_v1 = vshll.u32 %v7727_v17, 16  ;;  %v8237_v15 = vunpack.c.l.b16 %v7739_v11 }
 0x2c2   : > { %v7700_v39 = vpop.f32.mrf.mxu2  ;;  %v3108_v44 = vadd.f32 %v3077_v49, %v3007_v54  ;;  %v3082_v41 = vpop.f32.mrf.mxu1  ;;  %v5257_v49 = vrot.slane %v7217_v40, 9  ;;  %v3501_v10 = vrot.slane %v3499_v56, 5 }
 0x2c3   : > { %v2981_v20 = vpop.f32.mrf.mxu0  ;;  %v3510_v22 = vor.u32 %v3509_v52, %v3506_v9  ;;  %v7751_v52 = vld [vmem:[%s5590_s26 + $0x130] sm:$0xf] }
 0x2c4   : > { %v7711_v28 = vadd.f32 %v7634_v35, %v3108_v44  ;;  %v7720_v35 = vunpack.c.l.b16 %v3488_v29  ;;  %v3492_v44 = vrot.slane %v3490_v30, 4 }
 0x2c5   : > { %v2859_v63 = vpop.f32.mrf.mxu3  ;;  %5289 = vmatmul.msk.bf16.gmra.mxu1 %vm556_vm3, %v3881_v32 }
 0x2c6   : > { %v2889_v54 = vadd.f32 %v2859_v63, %v8427_v3  ;;  %5274 = vmatmul.msk.bf16.gmra.mxu0 %vm556_vm3, %v3764_v45  ;;  %v4025_v32 = vpack.c.b16 %v7720_v35, %v3546_v24  ;;  %v7735_v45 = vsel %vm5594_vm4, %v5257_v49, %v3718_v48  ;;  %v3496_v30 = vor.u32 %v3495_v27, %v3492_v44  ;;  %v8431_v49 = vld [vmem:[#allocation14_spill] sm:$0xff] }
 0x2c7   : > { %8428 = vst [vmem:[#allocation29_spill] sm:$0xff] %v7735_v45  ;;  %v3511_v44 = vrot.slane %v3510_v22, 4  ;;  %v3515_v27 = vrot.slane %v3513_v1, 5  ;;  %v8435_v1 = vld [vmem:[#allocation10_spill] sm:$0xff] }
 0x2c8   : > { %v3008_v40 = vadd.f32 %v2978_v62, %v2889_v54  ;;  %v8238_v54 = vunpack.c.l.b16 %v7735_v45 }
 0x2c9   : > { %v3516_v22 = vsel %vm5642_vm7, %v3511_v44, %v3515_v27 }
 0x2ca   : > { %5243 = vmatmul.msk.bf16.gmra.mxu3 %vm556_vm3, %v3555_v14  ;;  %v7730_v63 = vpop.f32.mrf.mxu2  ;;  %v3109_v37 = vadd.f32 %v3079_v33, %v3008_v40  ;;  %v3084_v29 = vpop.f32.mrf.mxu1  ;;  %v3497_v33 = vrot.slane %v3496_v30, 4 }
 0x2cb   : > { %v2983_v62 = vpop.f32.mrf.mxu0 }
 0x2cc   : > { %v7744_v14 = vadd.f32 %v7679_v55, %v3109_v37  ;;  %v7757_v55 = vpack.c.b16 %v8237_v15, %v8238_v54  ;;  %v8433_v37 = vunpack.c.l.b16 %v7220_v0  ;;  %v3521_v15 = vshll.u32 %v8435_v1, 16 }
 0x2cd   : > { %v2862_v3 = vpop.f32.mrf.mxu3  ;;  %v4001_v54 = vshrl.u32 %v7751_v52, 16  ;;  %v4004_v0 = vshll.u32 %v7751_v52, 16 }
 0x2ce   : > { %8430 = vst [vmem:[#allocation30_spill] sm:$0xff] %v7744_v14  ;;  %v2890_v48 = vadd.f32 %v2862_v3, %v8431_v49  ;;  %v8434_v3 = vunpack.c.l.b16 %v7245_v2 }
 0x2cf   : > { %5305 = vmatmul.msk.bf16.gmra.mxu2 %vm556_vm3, %v4025_v32  ;;  %8432 = vst [vmem:[#allocation34_spill] sm:$0xff] %v7757_v55  ;;  %v4006_v45 = vrot.slane %v4004_v0, 5 }
 0x2d0   : > { %v3009_v40 = vadd.f32 %v2981_v20, %v2890_v48  ;;  %v3882_v49 = vpack.c.b16 %v8434_v3, %v8433_v37  ;;  %v3502_v20 = vsel %vm5642_vm7, %v3497_v33, %v3501_v10  ;;  %v3518_v48 = vshrl.u32 %v8435_v1, 16  ;;  %v8438_v10 = vld [vmem:[#allocation21_spill] sm:$0xff] }
 0x2d1   : > { %v5259_v33 = vrot.slane %v7245_v2, 9  ;;  %v3548_v27 = vunpack.c.l.b16 %v3502_v20  ;;  %v7782_v37 = vunpack.c.l.b16 %v3516_v22  ;;  %v5260_v3 = vrot.slane %v8425_v38, 9 }
 0x2d2   : > { %v3276_v9 = vpop.f32.mrf.mxu2  ;;  %v3110_v32 = vadd.f32 %v3082_v41, %v3009_v40  ;;  %v3087_v56 = vpop.f32.mrf.mxu1  ;;  %v7775_v40 = vpack.c.b16 %v3546_v24, %v7663_v57  ;;  %v3730_v57 = vrot.slane %v7724_v51, 5  ;;  %v3520_v24 = vrot.slane %v3518_v48, 4 }
 0x2d3   : > { %v2986_v30 = vpop.f32.mrf.mxu0  ;;  %v4003_v2 = vrot.slane %v4001_v54, 4 }
 0x2d4   : > { %v7772_v11 = vadd.f32 %v7700_v39, %v3110_v32  ;;  %8437 = vst [vmem:[#allocation32_spill] sm:$0xff] %v7775_v40  ;;  %v3726_v39 = vrot.slane %v7669_v53, 5  ;;  %v3523_v32 = vrot.slane %v3521_v15, 5  ;;  %v4026_v53 = vpack.c.b16 %v7782_v37, %v3548_v27 }
 0x2d5   : > { %v2864_v41 = vpop.f32.mrf.mxu3  ;;  %5290 = vmatmul.msk.bf16.gmra.mxu1 %vm556_vm3, %v3882_v49  ;;  %v4007_v48 = vor.u32 %v4006_v45, %v4003_v2  ;;  %v8441_v2 = vunpack.c.l.b16 %v8425_v38  ;;  %v5261_v38 = vrot.slane %v8426_v8, 9 }
 0x2d6   : > { %8436 = vst [vmem:[#allocation36_spill] sm:$0xff] %v7772_v11  ;;  %v2891_v44 = vadd.f32 %v2864_v41, %v8438_v10  ;;  %5275 = vmatmul.msk.bf16.gmra.mxu0 %vm556_vm3, %v7757_v55  ;;  %v5212_v41 = vld [vmem:[%s5590_s26 + $0x12c] sm:$0x1]  ;;  %v7789_v10 = vld [vmem:[%s5590_s26 + $0x134] sm:$0x1]  ;;  %v7796_v51 = vsel %vm5594_vm4, %v5259_v33, %v3726_v39  ;;  %v3524_v54 = vor.u32 %v3523_v32, %v3520_v24 }
 0x2d7   : > { %8439 = vst [vmem:[#allocation39_spill] sm:$0xff] %v7789_v10  ;;  %v3527_v15 = vshll.u32 %v5212_v41, 16  ;;  %v4010_v0 = vshll.u32 %v7789_v10, 16  ;;  %v3756_v55 = vunpack.c.l.b16 %v7796_v51  ;;  %v4008_v24 = vrot.slane %v4007_v48, 4 }
 0x2d8   : > { %v3010_v11 = vadd.f32 %v2983_v62, %v2891_v44  ;;  %v7800_v62 = vsel %vm5594_vm4, %v5260_v3, %v3730_v57  ;;  %v3525_v39 = vrot.slane %v3524_v54, 4 }
 0x2d9   : > { %v3757_v33 = vunpack.c.l.b16 %v7800_v62  ;;  %v3529_v57 = vrot.slane %v3527_v15, 5  ;;  %v4012_v32 = vrot.slane %v4010_v0, 5  ;;  %v7828_v0 = vpack.c.b16 %v3548_v27, %v7720_v35 }
 0x2da   : > { %5244 = vmatmul.msk.bf16.gmra.mxu3 %vm556_vm3, %v7775_v40  ;;  %v3278_v49 = vpop.f32.mrf.mxu2  ;;  %v3111_v20 = vadd.f32 %v3084_v29, %v3010_v11  ;;  %v3089_v14 = vpop.f32.mrf.mxu1  ;;  %v8440_v29 = vld [vmem:[#allocation23_spill] sm:$0xff] }
 0x2db   : > { %v2988_v22 = vpop.f32.mrf.mxu0 }
 0x2dc   : > { %v7804_v44 = vadd.f32 %v7730_v63, %v3111_v20  ;;  %v7814_v63 = vpack.c.b16 %v3757_v33, %v3756_v55  ;;  %v8442_v20 = vunpack.c.l.b16 %v8426_v8 }
 0x2dd   : > { %v2867_v11 = vpop.f32.mrf.mxu3 }
 0x2de   : > { %v2892_v40 = vadd.f32 %v2867_v11, %v8440_v29  ;;  %v3883_v11 = vpack.c.b16 %v8442_v20, %v8441_v2 }
 0x2df   : > { %5306 = vmatmul.msk.bf16.gmra.mxu2 %vm556_vm3, %v4026_v53 }
 0x2e0   : > { %v3011_v3 = vadd.f32 %v2986_v30, %v2892_v40  ;;  %v3530_v30 = vsel %vm5642_vm7, %v3525_v39, %v3529_v57  ;;  %v4013_v40 = vsel %vm5642_vm7, %v4008_v24, %v4012_v32  ;;  %v3738_v57 = vrot.slane %v5212_v41, 5 }
 0x2e1   : > { %v3550_v39 = vunpack.c.l.b16 %v3530_v30 }
 0x2e2   : > { %v3281_v45 = vpop.f32.mrf.mxu2  ;;  %v3112_v29 = vadd.f32 %v3087_v56, %v3011_v3  ;;  %v3092_v53 = vpop.f32.mrf.mxu1  ;;  %v3734_v56 = vrot.slane %v7727_v17, 5  ;;  %v7835_v3 = vunpack.c.l.b16 %v4013_v40 }
 0x2e3   : > { %v2991_v10 = vpop.f32.mrf.mxu0 }
 0x2e4   : > { %v7824_v54 = vadd.f32 %v3276_v9, %v3112_v29  ;;  %v5262_v9 = vrot.slane %v8435_v1, 9  ;;  %v4027_v2 = vpack.c.b16 %v7835_v3, %v3550_v39  ;;  %v7843_v8 = vsel %vm5594_vm4, %v5261_v38, %v3734_v56 }
 0x2e5   : > { %v2869_v15 = vpop.f32.mrf.mxu3  ;;  %5291 = vmatmul.msk.bf16.gmra.mxu1 %vm556_vm3, %v3883_v11  ;;  %v3758_v11 = vunpack.c.l.b16 %v7843_v8  ;;  %v3876_v29 = vunpack.c.l.b16 %v7751_v52 }
 0x2e6   : > { %v2893_v48 = vadd.f32 %v2869_v15, %v7344_v7  ;;  %5276 = vmatmul.msk.bf16.gmra.mxu0 %vm556_vm3, %v7814_v63  ;;  %v7847_v17 = vsel %vm5594_vm4, %v5262_v9, %v3738_v57  ;;  %v8443_v15 = vunpack.c.l.b16 %v8435_v1 }
 0x2e8   : > { %v3012_v24 = vadd.f32 %v2988_v22, %v2893_v48 }
 0x2ea   : > { %5245 = vmatmul.msk.bf16.gmra.mxu3 %vm556_vm3, %v7828_v0  ;;  %v3283_v7 = vpop.f32.mrf.mxu2  ;;  %v3113_v35 = vadd.f32 %v3089_v14, %v3012_v24  ;;  %v3094_v32 = vpop.f32.mrf.mxu1  ;;  %v3759_v14 = vunpack.c.l.b16 %v7847_v17  ;;  %v7870_v24 = vpack.c.b16 %v3550_v39, %v7782_v37 }
 0x2eb   : > { %v2993_v27 = vpop.f32.mrf.mxu0 }
 0x2ec   : > { %v7849_v20 = vadd.f32 %v3278_v49, %v3113_v35  ;;  %v7860_v40 = vpack.c.b16 %v3759_v14, %v3758_v11 }
 0x2ed   : > { %v2872_v41 = vpop.f32.mrf.mxu3 }
 0x2ee   : > { %v2894_v22 = vadd.f32 %v2872_v41, %v7384_v34  ;;  %v3884_v34 = vpack.c.b16 %v3876_v29, %v8443_v15 }
 0x2ef   : > { %5307 = vmatmul.msk.bf16.gmra.mxu2 %vm556_vm3, %v4027_v2 }
 0x2f0   : > { %v3013_v30 = vadd.f32 %v2991_v10, %v2894_v22 }
 0x2f2   : > { %v3286_v49 = vpop.f32.mrf.mxu2  ;;  %v3114_v48 = vadd.f32 %v3092_v53, %v3013_v30  ;;  %v3097_v56 = vpop.f32.mrf.mxu1 }
 0x2f3   : > { %v2996_v38 = vpop.f32.mrf.mxu0 }
 0x2f4   : > { %v7866_v9 = vadd.f32 %v3281_v45, %v3114_v48 }
 0x2f5   : > { %v2874_v57 = vpop.f32.mrf.mxu3  ;;  %5292 = vmatmul.msk.bf16.gmra.mxu1 %vm556_vm3, %v3884_v34 }
 0x2f6   : > { %v2895_v10 = vadd.f32 %v2874_v57, %v7425_v50  ;;  %5277 = vmatmul.msk.bf16.gmra.mxu0 %vm556_vm3, %v7860_v40  ;;  %v8444_v57 = vld [vmem:[#allocation5_spill] sm:$0xff] }
 0x2f8   : > { %v3014_v1 = vadd.f32 %v2993_v27, %v2895_v10 }
 0x2fa   : > { %5246 = vmatmul.msk.bf16.gmra.mxu3 %vm556_vm3, %v7870_v24  ;;  %v3288_v53 = vpop.f32.mrf.mxu2  ;;  %v3115_v35 = vadd.f32 %v3094_v32, %v3014_v1  ;;  %v3099_v45 = vpop.f32.mrf.mxu1 }
 0x2fb   : > { %v2998_v2 = vpop.f32.mrf.mxu0 }
 0x2fc   : > { %v7877_v41 = vadd.f32 %v3283_v7, %v3115_v35 }
 0x2fd   : > { %v2877_v22 = vpop.f32.mrf.mxu3 }
 0x2fe   : > { %v2896_v50 = vadd.f32 %v2877_v22, %v7441_v42 }
 0x2ff   : > { %5364 = vmatmul.msk.bf16.vlgmr.msra.gmra.mxu2 %vm556_vm3, %v7480_v26 }
 0x300   : > { %v3015_v37 = vadd.f32 %v2996_v38, %v2896_v50 }
 0x302   : > { %v4073_v39 = vpop.f32.mrf.mxu2  ;;  %v3116_v30 = vadd.f32 %v3097_v56, %v3015_v37  ;;  %v3930_v27 = vpop.f32.mrf.mxu1  ;;  %v8446_v37 = vunpack.c.l.b16 %v7523_v5 }
 0x303   : > { %v3813_v15 = vpop.f32.mrf.mxu0 }
 0x304   : > { %v7882_v34 = vadd.f32 %v3286_v49, %v3116_v30 }
 0x305   : > { %v2879_v48 = vpop.f32.mrf.mxu3  ;;  %5347 = vmatmul.msk.bf16.vlgmr.msra.gmra.mxu1 %vm556_vm3, %v7499_v59 }
 0x306   : > { %v2897_v32 = vadd.f32 %v2879_v48, %v7468_v6  ;;  %5332 = vmatmul.msk.bf16.vlgmr.msra.gmra.mxu0 %vm556_vm3, %v8444_v57 }
 0x308   : > { %v3016_v42 = vadd.f32 %v2998_v2, %v2897_v32 }
 0x30a   : > { %5317 = vmatmul.msk.bf16.vlgmr.msra.gmra.mxu3 %vm556_vm3, %v7421_v31  ;;  %v4075_v26 = vpop.f32.mrf.mxu2  ;;  %v3117_v7 = vadd.f32 %v3099_v45, %v3016_v42  ;;  %v3932_v56 = vpop.f32.mrf.mxu1  ;;  %v5196_v42 = vld [vmem:[%s5590_s26 + $0xec] sm:$0x1] }
 0x30b   : > { %v3815_v38 = vpop.f32.mrf.mxu0 }
 0x30c   : > { %v7891_v10 = vadd.f32 %v3288_v53, %v3117_v7  ;;  %v8445_v53 = vunpack.c.l.b16 %v7462_v36 }
 0x30d   : > { %v3604_v49 = vpop.f32.mrf.mxu3 }
 0x30e   : > { %v3644_v6 = vadd.f32 %v3604_v49, %v7496_v46  ;;  %v4146_v30 = vpack.c.b16 %v8446_v37, %v8445_v53  ;;  %v8447_v46 = vld [vmem:[#allocation16_spill] sm:$0xff] }
 0x30f   : > { %5365 = vmatmul.msk.bf16.gmra.mxu2 %vm556_vm3, %v7543_v12 }
 0x310   : > { %v3853_v1 = vadd.f32 %v3813_v15, %v3644_v6  ;;  %v5195_v15 = vld [vmem:[%s5590_s26 + $0xe8] sm:$0xf] }
 0x311   : > { %v4351_v57 = vshll.u32 %v5195_v15, 16 }
 0x312   : > { %v4078_v35 = vpop.f32.mrf.mxu2  ;;  %v3970_v59 = vadd.f32 %v3930_v27, %v3853_v1  ;;  %v3935_v22 = vpop.f32.mrf.mxu1  ;;  %v5355_v1 = vrot.slane %v5195_v15, 9 }
 0x313   : > { %v3818_v2 = vpop.f32.mrf.mxu0  ;;  %v4353_v49 = vrot.slane %v4351_v57, 5 }
 0x314   : > { %v7896_v50 = vadd.f32 %v4073_v39, %v3970_v59  ;;  %v4470_v59 = vrot.slane %v5196_v42, 5 }
 0x315   : > { %v3606_v31 = vpop.f32.mrf.mxu3  ;;  %5348 = vmatmul.msk.bf16.gmra.mxu1 %vm556_vm3, %v7565_v16  ;;  %v5308_v16 = vrot.slane %v7474_v18, 9 }
 0x316   : > { %v3645_v45 = vadd.f32 %v3606_v31, %v7533_v25  ;;  %5333 = vmatmul.msk.bf16.gmra.mxu0 %vm556_vm3, %v8447_v46  ;;  %v4348_v25 = vshrl.u32 %v5195_v15, 16 }
 0x318   : > { %v3854_v12 = vadd.f32 %v3815_v38, %v3645_v45  ;;  %v4350_v38 = vrot.slane %v4348_v25, 4  ;;  %v8450_v25 = vld [vmem:[#allocation15_spill] sm:$0xff] }
 0x31a   : > { %5318 = vmatmul.msk.bf16.gmra.mxu3 %vm556_vm3, %v4146_v30  ;;  %v4080_v39 = vpop.f32.mrf.mxu2  ;;  %v3971_v27 = vadd.f32 %v3932_v56, %v3854_v12  ;;  %v3937_v32 = vpop.f32.mrf.mxu1  ;;  %v4133_v56 = vrot.slane %v7515_v23, 5  ;;  %v4354_v37 = vor.u32 %v4353_v49, %v4350_v38  ;;  %v4357_v30 = vshll.u32 %v5196_v42, 16 }
 0x31b   : > { %v3820_v48 = vpop.f32.mrf.mxu0  ;;  %v8448_v23 = vunpack.c.l.b16 %v7529_v13 }
 0x31c   : > { %v7909_v36 = vadd.f32 %v4075_v26, %v3971_v27  ;;  %v8449_v27 = vunpack.c.l.b16 %v7593_v43  ;;  %v4355_v42 = vrot.slane %v4354_v37, 4 }
 0x31d   : > { %v3609_v5 = vpop.f32.mrf.mxu3 }
 0x31e   : > { %v3646_v7 = vadd.f32 %v3609_v5, %v7562_v47  ;;  %v4134_v47 = vsel %vm5594_vm4, %v5308_v16, %v4133_v56 }
 0x31f   : > { %5366 = vmatmul.msk.bf16.gmra.mxu2 %vm556_vm3, %v7630_v60  ;;  %v4471_v60 = vsel %vm5594_vm4, %v5355_v1, %v4470_v59  ;;  %v4143_v57 = vunpack.c.l.b16 %v4134_v47  ;;  %v4260_v1 = vunpack.c.l.b16 %v5195_v15 }
 0x320   : > { %v3855_v6 = vadd.f32 %v3818_v2, %v3646_v7  ;;  %v4480_v5 = vunpack.c.l.b16 %v4471_v60  ;;  %v4359_v7 = vrot.slane %v4357_v30, 5  ;;  %v8452_v30 = vld [vmem:[#allocation22_spill] sm:$0xff] }
 0x322   : > { %v4083_v31 = vpop.f32.mrf.mxu2  ;;  %v3972_v45 = vadd.f32 %v3935_v22, %v3855_v6  ;;  %v3940_v53 = vpop.f32.mrf.mxu1  ;;  %v4147_v22 = vpack.c.b16 %v8449_v27, %v8448_v23  ;;  %v4482_v49 = vpack.c.b16 %v4480_v5, %v4143_v57  ;;  %v4360_v43 = vsel %vm5642_vm7, %v4355_v42, %v4359_v7  ;;  %v8453_v27 = vld [vmem:[#allocation26_spill] sm:$0xff] }
 0x323   : > { %v3823_v26 = vpop.f32.mrf.mxu0  ;;  %v4379_v59 = vunpack.c.l.b16 %v4360_v43 }
 0x324   : > { %v7921_v46 = vadd.f32 %v4078_v35, %v3972_v45  ;;  %v8451_v45 = vunpack.c.l.b16 %v7474_v18 }
 0x325   : > { %v3611_v12 = vpop.f32.mrf.mxu3  ;;  %5349 = vmatmul.msk.bf16.gmra.mxu1 %vm556_vm3, %v7656_v19  ;;  %v4381_v47 = vpack.c.b16 %v4379_v59, %v8452_v30  ;;  %v8457_v59 = vld [vmem:[#allocation30_spill] sm:$0xff] }
 0x326   : > { %v3647_v2 = vadd.f32 %v3611_v12, %v7609_v61  ;;  %5334 = vmatmul.msk.bf16.gmra.mxu0 %vm556_vm3, %v8450_v25  ;;  %v4262_v37 = vpack.c.b16 %v4260_v1, %v8451_v45 }
 0x328   : > { %v3856_v35 = vadd.f32 %v3820_v48, %v3647_v2 }
 0x32a   : > { %5319 = vmatmul.msk.bf16.gmra.mxu3 %vm556_vm3, %v4147_v22  ;;  %v4085_v16 = vpop.f32.mrf.mxu2  ;;  %v3973_v61 = vadd.f32 %v3937_v32, %v3856_v35  ;;  %v3942_v13 = vpop.f32.mrf.mxu1 }
 0x32b   : > { %v3825_v38 = vpop.f32.mrf.mxu0 }
 0x32c   : > { %v7935_v6 = vadd.f32 %v4080_v39, %v3973_v61  ;;  %v8456_v61 = vld [vmem:[#allocation34_spill] sm:$0xff] }
 0x32d   : > { %v3614_v56 = vpop.f32.mrf.mxu3 }
 0x32e   : > { %v3648_v19 = vadd.f32 %v3614_v56, %v7649_v4  ;;  %v8454_v4 = vld [vmem:[#allocation20_spill] sm:$0xff] }
 0x32f   : > { %5367 = vmatmul.msk.bf16.gmra.mxu2 %vm556_vm3, %v4482_v49  ;;  %v8455_v15 = vunpack.c.l.b16 %v8454_v4  ;;  %v8464_v4 = vld [vmem:[#allocation36_spill] sm:$0xff] }
 0x330   : > { %v3857_v48 = vadd.f32 %v3823_v26, %v3648_v19 }
 0x331   : > { %v4148_v25 = vpack.c.b16 %v4143_v57, %v8455_v15 }
 0x332   : > { %v4088_v32 = vpop.f32.mrf.mxu2  ;;  %v3974_v60 = vadd.f32 %v3940_v53, %v3857_v48  ;;  %v3945_v2 = vpop.f32.mrf.mxu1  ;;  %v8458_v48 = vld [vmem:[#allocation12_spill] sm:$0xff] }
 0x333   : > { %v3828_v12 = vpop.f32.mrf.mxu0  ;;  %v8459_v45 = vunpack.c.l.b16 %v8458_v48 }
 0x334   : > { %v7942_v23 = vadd.f32 %v4083_v31, %v3974_v60 }
 0x335   : > { %v3616_v39 = vpop.f32.mrf.mxu3  ;;  %5350 = vmatmul.msk.bf16.gmra.mxu1 %vm556_vm3, %v4381_v47  ;;  %v8462_v47 = vld [vmem:[#allocation3_spill] sm:$0xff] }
 0x336   : > { %v3649_v22 = vadd.f32 %v3616_v39, %v8453_v27  ;;  %5335 = vmatmul.msk.bf16.gmra.mxu0 %vm556_vm3, %v4262_v37 }
 0x338   : > { %v3858_v18 = vadd.f32 %v3825_v38, %v3649_v22 }
 0x33a   : > { %5320 = vmatmul.msk.bf16.gmra.mxu3 %vm556_vm3, %v4148_v25  ;;  %v4090_v26 = vpop.f32.mrf.mxu2  ;;  %v3975_v5 = vadd.f32 %v3942_v13, %v3858_v18  ;;  %v3947_v42 = vpop.f32.mrf.mxu1 }
 0x33b   : > { %v3830_v53 = vpop.f32.mrf.mxu0 }
 0x33c   : > { %v7950_v7 = vadd.f32 %v4085_v16, %v3975_v5  ;;  %v8460_v16 = vld [vmem:[#allocation29_spill] sm:$0xff] }
 0x33d   : > { %v3619_v31 = vpop.f32.mrf.mxu3  ;;  %v8461_v37 = vunpack.c.l.b16 %v8460_v16 }
 0x33e   : > { %v3650_v35 = vadd.f32 %v3619_v31, %v7711_v28  ;;  %v8463_v28 = vld [vmem:[#allocation32_spill] sm:$0xff] }
 0x33f   : > { %5368 = vmatmul.msk.bf16.gmra.mxu2 %vm556_vm3, %v8456_v61  ;;  %v4149_v30 = vpack.c.b16 %v8461_v37, %v8459_v45 }
 0x340   : > { %v3859_v57 = vadd.f32 %v3828_v12, %v3650_v35 }
 0x342   : > { %v4093_v49 = vpop.f32.mrf.mxu2  ;;  %v3976_v43 = vadd.f32 %v3945_v2, %v3859_v57  ;;  %v3950_v19 = vpop.f32.mrf.mxu1 }
 0x343   : > { %v3833_v56 = vpop.f32.mrf.mxu0 }
 0x344   : > { %v7955_v38 = vadd.f32 %v4088_v32, %v3976_v43 }
 0x345   : > { %v3621_v1 = vpop.f32.mrf.mxu3  ;;  %5351 = vmatmul.msk.bf16.gmra.mxu1 %vm556_vm3, %v8463_v28  ;;  %v8468_v28 = vld [vmem:[#allocation39_spill] sm:$0xff] }
 0x346   : > { %v3651_v13 = vadd.f32 %v3621_v1, %v8457_v59  ;;  %5336 = vmatmul.msk.bf16.gmra.mxu0 %vm556_vm3, %v8462_v47  ;;  %v8467_v1 = vld [vmem:[#allocation17_spill] sm:$0xff] }
 0x348   : > { %v3860_v60 = vadd.f32 %v3830_v53, %v3651_v13 }
 0x34a   : > { %5321 = vmatmul.msk.bf16.gmra.mxu3 %vm556_vm3, %v4149_v30  ;;  %v4095_v12 = vpop.f32.mrf.mxu2  ;;  %v3977_v32 = vadd.f32 %v3947_v42, %v3860_v60  ;;  %v3952_v39 = vpop.f32.mrf.mxu1  ;;  %v4137_v60 = vrot.slane %v8468_v28, 5 }
 0x34b   : > { %v3835_v2 = vpop.f32.mrf.mxu0 }
 0x34c   : > { %v7967_v27 = vadd.f32 %v4090_v26, %v3977_v32  ;;  %v8465_v26 = vld [vmem:[#allocation28_spill] sm:$0xff] }
 0x34d   : > { %v3624_v22 = vpop.f32.mrf.mxu3  ;;  %v8466_v57 = vunpack.c.l.b16 %v8465_v26 }
 0x34e   : > { %v3652_v15 = vadd.f32 %v3624_v22, %v8464_v4 }
 0x34f   : > { %5369 = vmatmul.msk.bf16.gmra.mxu2 %vm556_vm3, %v7814_v63  ;;  %v4150_v43 = vpack.c.b16 %v3756_v55, %v8466_v57  ;;  %v5216_v55 = vld [vmem:[%s5590_s26 + $0x13c] sm:$0x1] }
 0x350   : > { %v3861_v25 = vadd.f32 %v3833_v56, %v3652_v15  ;;  %v5215_v56 = vld [vmem:[%s5590_s26 + $0x138] sm:$0xf]  ;;  %s4817_s26 = sshll.u32 %s5473_s15, 1  ;;  %s8485_s15 = smov (!%p238_p7, %s5473_s15), 3 }
 0x351   : > { %v4365_v48 = vshll.u32 %v5215_v56, 16  ;;  %v5356_v32 = vrot.slane %v5215_v56, 9  ;;  %p228_p6 = scmp.lt.s32.totalorder %s4817_s26, 7  ;;  %s241_s11 = sadd.s32 %s4821_s10, %s8485_s15 }
 0x352   : > { %v4098_v18 = vpop.f32.mrf.mxu2  ;;  %v3978_v5 = vadd.f32 %v3950_v19, %v3861_v25  ;;  %v3955_v53 = vpop.f32.mrf.mxu1  ;;  %v4371_v25 = vshll.u32 %v5216_v55, 16  ;;  %s4822_s12 = sshll.u32 %s241_s11, 1 }
 0x353   : > { %v3838_v31 = vpop.f32.mrf.mxu0  ;;  %v4367_v30 = vrot.slane %v4365_v48, 5  ;;  %s8483_s26 = smov (!%p228_p6, %s4817_s26), 7  ;;  %s243_s22 = scalar_lea.vmem %s8119_s4, %s4822_s12 }
 0x354   : > { %v7972_v35 = vadd.f32 %v4093_v49, %v3978_v5  ;;  %s4818_s27 = sshll.u32 %s8483_s26, 3 }
 0x355   : > { %v3626_v61 = vpop.f32.mrf.mxu3  ;;  %5352 = vmatmul.msk.bf16.gmra.mxu1 %vm556_vm3, %v7828_v0  ;;  %v5309_v0 = vrot.slane %v7751_v52, 9  ;;  %s232_s29 = sadd.s32 %s4819_s28, %s4818_s27 }
 0x356   : > { %v3653_v42 = vadd.f32 %v3626_v61, %v7804_v44  ;;  %5337 = vmatmul.msk.bf16.gmra.mxu0 %vm556_vm3, %v8467_v1  ;;  %v4362_v44 = vshrl.u32 %v5215_v56, 16  ;;  %s4820_s30 = sshll.u32 %s232_s29, 3 }
 0x357   : > { %s8045_s9 = scalar_lea.vmem %s8118_s3, %s4820_s30 }
 0x358   : > { %v3862_v63 = vadd.f32 %v3835_v2, %v3653_v42  ;;  %v4364_v37 = vrot.slane %v4362_v44, 4  ;;  %v4474_v2 = vrot.slane %v5216_v55, 5  ;;  %v8469_v42 = vld [vmem:[#allocation25_spill] sm:$0xff]  ;;  %v4261_v44 = vunpack.c.l.b16 %v5215_v56 }
 0x35a   : > { %5322 = vmatmul.msk.bf16.gmra.mxu3 %vm556_vm3, %v4150_v43  ;;  %v4100_v49 = vpop.f32.mrf.mxu2  ;;  %v3979_v19 = vadd.f32 %v3952_v39, %v3862_v63  ;;  %v3957_v13 = vpop.f32.mrf.mxu1  ;;  %v4368_v15 = vor.u32 %v4367_v30, %v4364_v37  ;;  %v4373_v43 = vrot.slane %v4371_v25, 5 }
 0x35b   : > { %v3840_v59 = vpop.f32.mrf.mxu0 }
 0x35c   : > { %v7985_v45 = vadd.f32 %v4095_v12, %v3979_v19  ;;  %v4369_v21 = vrot.slane %v4368_v15, 4 }
 0x35d   : > { %v3629_v51 = vpop.f32.mrf.mxu3 }
 0x35e   : > { %v3654_v16 = vadd.f32 %v3629_v51, %v7824_v54  ;;  %v4138_v54 = vsel %vm5594_vm4, %v5309_v0, %v4137_v60  ;;  %v4263_v51 = vpack.c.b16 %v4261_v44, %v3876_v29 }
 0x35f   : > { %5370 = vmatmul.msk.bf16.gmra.mxu2 %vm556_vm3, %v7860_v40  ;;  %v4475_v40 = vsel %vm5594_vm4, %v5356_v32, %v4474_v2  ;;  %v4144_v26 = vunpack.c.l.b16 %v4138_v54 }
 0x360   : > { %v3863_v47 = vadd.f32 %v3838_v31, %v3654_v16  ;;  %v4481_v57 = vunpack.c.l.b16 %v4475_v40 }
 0x361   : > { %v4152_v56 = vpack.c.b16 %v4144_v26, %v3759_v14 }
 0x362   : > { %v4103_v39 = vpop.f32.mrf.mxu2  ;;  %v3980_v22 = vadd.f32 %v3955_v53, %v3863_v47  ;;  %v3960_v4 = vpop.f32.mrf.mxu1  ;;  %v4151_v53 = vpack.c.b16 %v3758_v11, %v3757_v33  ;;  %v4483_v19 = vpack.c.b16 %v4481_v57, %v4144_v26  ;;  %v4374_v33 = vsel %vm5642_vm7, %v4369_v21, %v4373_v43 }
 0x363   : > { %v3843_v12 = vpop.f32.mrf.mxu0  ;;  %v4380_v48 = vunpack.c.l.b16 %v4374_v33 }
 0x364   : > { %v7997_v5 = vadd.f32 %v4098_v18, %v3980_v22 }
 0x365   : > { %v3631_v61 = vpop.f32.mrf.mxu3  ;;  %5353 = vmatmul.msk.bf16.gmra.mxu1 %vm556_vm3, %v7870_v24  ;;  %v4382_v55 = vpack.c.b16 %v4380_v48, %v7835_v3 }
 0x366   : > { %v3655_v31 = vadd.f32 %v3631_v61, %v7849_v20  ;;  %5338 = vmatmul.msk.bf16.gmra.mxu0 %vm556_vm3, %v8469_v42 }
 0x368   : > { %v3864_v18 = vadd.f32 %v3840_v59, %v3655_v31 }
 0x36a   : > { %5323 = vmatmul.msk.bf16.gmra.mxu3 %vm556_vm3, %v4151_v53  ;;  %v4105_v1 = vpop.f32.mrf.mxu2  ;;  %v3981_v20 = vadd.f32 %v3957_v13, %v3864_v18  ;;  %v3962_v62 = vpop.f32.mrf.mxu1 }
 0x36b   : > { %v3845_v63 = vpop.f32.mrf.mxu0 }
 0x36c   : > { %v8011_v8 = vadd.f32 %v4100_v49, %v3981_v20 }
 0x36d   : > { %v3634_v11 = vpop.f32.mrf.mxu3 }
 0x36e   : > { %v3656_v24 = vadd.f32 %v3634_v11, %v7866_v9 }
 0x36f   : > { %5371 = vmatmul.msk.bf16.gmra.mxu2 %vm556_vm3, %v4483_v19 }
 0x370   : > { %v3865_v59 = vadd.f32 %v3843_v12, %v3656_v24 }
 0x372   : > { %v4108_v13 = vpop.f32.mrf.mxu2  ;;  %v3982_v16 = vadd.f32 %v3960_v4, %v3865_v59  ;;  %v3965_v58 = vpop.f32.mrf.mxu1 }
 0x373   : > { %v3848_v0 = vpop.f32.mrf.mxu0 }
 0x374   : > { %v8018_v37 = vadd.f32 %v4103_v39, %v3982_v16 }
 0x375   : > { %v3636_v49 = vpop.f32.mrf.mxu3  ;;  %5354 = vmatmul.msk.bf16.gmra.mxu1 %vm556_vm3, %v4382_v55 }
 0x376   : > { %v3657_v9 = vadd.f32 %v3636_v49, %v7877_v41  ;;  %5339 = vmatmul.msk.bf16.gmra.mxu0 %vm556_vm3, %v4263_v51 }
 0x378   : > { %v3866_v52 = vadd.f32 %v3845_v63, %v3657_v9 }
 0x37a   : > { %5324 = vmatmul.msk.bf16.gmra.mxu3 %vm556_vm3, %v4152_v56  ;;  %v4110_v3 = vpop.f32.mrf.mxu2  ;;  %v3983_v29 = vadd.f32 %v3962_v62, %v3866_v52  ;;  %v3967_v47 = vpop.f32.mrf.mxu1 }
 0x37b   : > { %v3850_v30 = vpop.f32.mrf.mxu0 }
 0x37c   : > { %v8026_v28 = vadd.f32 %v4105_v1, %v3983_v29 }
 0x37d   : > { %v3639_v60 = vpop.f32.mrf.mxu3 }
 0x37e   : > { %v3658_v32 = vadd.f32 %v3639_v60, %v7882_v34 }
 0x380   : > { %v3867_v41 = vadd.f32 %v3848_v0, %v3658_v32 }
 0x382   : > { %v4511_v17 = vpop.f32.mrf.mxu2  ;;  %v3984_v14 = vadd.f32 %v3965_v58, %v3867_v41  ;;  %v4410_v39 = vpop.f32.mrf.mxu1 }
 0x383   : > { %v4291_v2 = vpop.f32.mrf.mxu0 }
 0x384   : > { %v8030_v22 = vadd.f32 %v4108_v13, %v3984_v14 }
 0x385   : > { %v3641_v12 = vpop.f32.mrf.mxu3 }
 0x386   : > { %v3659_v4 = vadd.f32 %v3641_v12, %v7891_v10  ;;  %v8040_v10 = vld [vmem:[%s8117_s2] ss:$0 sm:$0xff] }
 0x388   : > { %v3868_v15 = vadd.f32 %v3850_v30, %v3659_v4 }
 0x38a   : > { %v4513_v25 = vpop.f32.mrf.mxu2  ;;  %v3985_v54 = vadd.f32 %v3967_v47, %v3868_v15  ;;  %v4412_v61 = vpop.f32.mrf.mxu1 }
 0x38b   : > { %v4293_v40 = vpop.f32.mrf.mxu0 }
 0x38c   : > { %v8034_v34 = vadd.f32 %v4110_v3, %v3985_v54 }
 0x38d   : > { %v4198_v31 = vpop.f32.mrf.mxu3 }
 0x38e   : > { %v4238_v53 = vadd.f32 %v4198_v31, %v7896_v50 }
 0x390   : > { %v4331_v42 = vadd.f32 %v4291_v2, %v4238_v53 }
 0x392   : > { %v4450_v26 = vadd.f32 %v4410_v39, %v4331_v42  ;;  %v4516_v57 = vpop.f32.mrf.mxu2  ;;  %v4415_v43 = vpop.f32.mrf.mxu1 }
 0x393   : > { %v4296_v21 = vpop.f32.mrf.mxu0 }
 0x394   : > { %v4551_v18 = vadd.f32 %v4511_v17, %v4450_v26 }
 0x395   : > { %v4200_v50 = vpop.f32.mrf.mxu3 }
 0x396   : > { %v4571_v1 = vadd.f32 %v8040_v10, %v4551_v18  ;;  %v4239_v20 = vadd.f32 %v4200_v50, %v7909_v36 }
 0x398   : > { %4587 = vst [vmem:[%s8045_s9] sm:$0xff] %v4571_v1  ;;  %v4332_v63 = vadd.f32 %v4293_v40, %v4239_v20  ;;  %v4624_v51 = vmul.f32 %v4571_v1, %v4571_v1 }
 0x39a   : > { %v4451_v62 = vadd.f32 %v4412_v61, %v4332_v63  ;;  %v4518_v19 = vpop.f32.mrf.mxu2  ;;  %v4417_v11 = vpop.f32.mrf.mxu1 }
 0x39b   : > { %v4298_v33 = vpop.f32.mrf.mxu0 }
 0x39c   : > { %v4552_v24 = vadd.f32 %v4513_v25, %v4451_v62 }
 0x39d   : > { %v4203_v44 = vpop.f32.mrf.mxu3 }
 0x39e   : > { %v4572_v48 = vadd.f32 %v8040_v10, %v4552_v24  ;;  %v4240_v59 = vadd.f32 %v4203_v44, %v7921_v46 }
 0x3a0   : > { %4588 = vst [vmem:[%s8045_s9 + $0x8] sm:$0xff] %v4572_v48  ;;  %v4603_v13 = vadd.f32 %v4572_v48, %v4571_v1  ;;  %v4625_v55 = vmul.f32 %v4572_v48, %v4572_v48  ;;  %v4333_v16 = vadd.f32 %v4296_v21, %v4240_v59 }
 0x3a2   : > { %v4640_v0 = vadd.f32 %v4625_v55, %v4624_v51  ;;  %v4452_v36 = vadd.f32 %v4415_v43, %v4333_v16  ;;  %v4521_v58 = vpop.f32.mrf.mxu2  ;;  %v4420_v9 = vpop.f32.mrf.mxu1 }
 0x3a3   : > { %v4301_v49 = vpop.f32.mrf.mxu0 }
 0x3a4   : > { %v4553_v56 = vadd.f32 %v4516_v57, %v4452_v36 }
 0x3a5   : > { %v4205_v52 = vpop.f32.mrf.mxu3 }
 0x3a6   : > { %v4573_v3 = vadd.f32 %v8040_v10, %v4553_v56  ;;  %v4241_v29 = vadd.f32 %v4205_v52, %v7935_v6 }
 0x3a8   : > { %4589 = vst [vmem:[%s8045_s9 + $0x10] sm:$0xff] %v4573_v3  ;;  %v4604_v30 = vadd.f32 %v4603_v13, %v4573_v3  ;;  %v4626_v46 = vmul.f32 %v4573_v3, %v4573_v3  ;;  %v4334_v47 = vadd.f32 %v4298_v33, %v4241_v29 }
 0x3aa   : > { %v4641_v60 = vadd.f32 %v4640_v0, %v4626_v46  ;;  %v4453_v32 = vadd.f32 %v4417_v11, %v4334_v47  ;;  %v4523_v41 = vpop.f32.mrf.mxu2  ;;  %v4422_v14 = vpop.f32.mrf.mxu1 }
 0x3ab   : > { %v4303_v17 = vpop.f32.mrf.mxu0 }
 0x3ac   : > { %v4554_v2 = vadd.f32 %v4518_v19, %v4453_v32 }
 0x3ad   : > { %v4208_v39 = vpop.f32.mrf.mxu3 }
 0x3ae   : > { %v4574_v12 = vadd.f32 %v8040_v10, %v4554_v2  ;;  %v4242_v4 = vadd.f32 %v4208_v39, %v7942_v23 }
 0x3b0   : > { %4590 = vst [vmem:[%s8045_s9 + $0x18] sm:$0xff] %v4574_v12  ;;  %v4605_v15 = vadd.f32 %v4604_v30, %v4574_v12  ;;  %v4627_v25 = vmul.f32 %v4574_v12, %v4574_v12  ;;  %v4335_v6 = vadd.f32 %v4301_v49, %v4242_v4 }
 0x3b2   : > { %v4642_v54 = vadd.f32 %v4641_v60, %v4627_v25  ;;  %v4454_v40 = vadd.f32 %v4420_v9, %v4335_v6  ;;  %v4526_v61 = vpop.f32.mrf.mxu2  ;;  %v4425_v53 = vpop.f32.mrf.mxu1 }
 0x3b3   : > { %v4306_v31 = vpop.f32.mrf.mxu0 }
 0x3b4   : > { %v4555_v42 = vadd.f32 %v4521_v58, %v4454_v40 }
 0x3b5   : > { %v4210_v26 = vpop.f32.mrf.mxu3 }
 0x3b6   : > { %v4575_v57 = vadd.f32 %v8040_v10, %v4555_v42  ;;  %v4243_v21 = vadd.f32 %v4210_v26, %v7950_v7 }
 0x3b8   : > { %4591 = vst [vmem:[%s8045_s9 + $0x20] sm:$0xff] %v4575_v57  ;;  %v4606_v43 = vadd.f32 %v4605_v15, %v4575_v57  ;;  %v4628_v18 = vmul.f32 %v4575_v57, %v4575_v57  ;;  %v4336_v23 = vadd.f32 %v4303_v17, %v4243_v21 }
 0x3ba   : > { %v4643_v50 = vadd.f32 %v4642_v54, %v4628_v18  ;;  %v4455_v1 = vadd.f32 %v4422_v14, %v4336_v23  ;;  %v4528_v20 = vpop.f32.mrf.mxu2  ;;  %v4427_v62 = vpop.f32.mrf.mxu1 }
 0x3bb   : > { %v4308_v63 = vpop.f32.mrf.mxu0 }
 0x3bc   : > { %v4556_v19 = vadd.f32 %v4523_v41, %v4455_v1 }
 0x3bd   : > { %v4213_v33 = vpop.f32.mrf.mxu3 }
 0x3be   : > { %v4576_v11 = vadd.f32 %v8040_v10, %v4556_v19  ;;  %v4244_v24 = vadd.f32 %v4213_v33, %v7955_v38 }
 0x3c0   : > { %4592 = vst [vmem:[%s8045_s9 + $0x28] sm:$0xff] %v4576_v11  ;;  %v4607_v44 = vadd.f32 %v4606_v43, %v4576_v11  ;;  %v4629_v48 = vmul.f32 %v4576_v11, %v4576_v11  ;;  %v4337_v7 = vadd.f32 %v4306_v31, %v4244_v24 }
 0x3c2   : > { %v4644_v59 = vadd.f32 %v4643_v50, %v4629_v48  ;;  %v4456_v51 = vadd.f32 %v4425_v53, %v4337_v7  ;;  %v4430_v55 = vpop.f32.mrf.mxu1  ;;  %v4531_v36 = vpop.f32.mrf.mxu2 }
 0x3c3   : > { %v4311_v13 = vpop.f32.mrf.mxu0 }
 0x3c4   : > { %v4557_v16 = vadd.f32 %v4526_v61, %v4456_v51 }
 0x3c5   : > { %v4215_v0 = vpop.f32.mrf.mxu3 }
 0x3c6   : > { %v4577_v58 = vadd.f32 %v8040_v10, %v4557_v16  ;;  %v4245_v49 = vadd.f32 %v4215_v0, %v7967_v27 }
 0x3c8   : > { %4593 = vst [vmem:[%s8045_s9 + $0x30] sm:$0xff] %v4577_v58  ;;  %v4608_v9 = vadd.f32 %v4607_v44, %v4577_v58  ;;  %v4630_v56 = vmul.f32 %v4577_v58, %v4577_v58  ;;  %v4338_v38 = vadd.f32 %v4308_v63, %v4245_v49 }
 0x3ca   : > { %v4645_v52 = vadd.f32 %v4644_v59, %v4630_v56  ;;  %v4457_v3 = vadd.f32 %v4427_v62, %v4338_v38  ;;  %v4432_v47 = vpop.f32.mrf.mxu1  ;;  %v4533_v41 = vpop.f32.mrf.mxu2 }
 0x3cb   : > { %v4313_v29 = vpop.f32.mrf.mxu0 }
 0x3cc   : > { %v4558_v30 = vadd.f32 %v4528_v20, %v4457_v3 }
 0x3cd   : > { %v4218_v46 = vpop.f32.mrf.mxu3 }
 0x3ce   : > { %v4578_v60 = vadd.f32 %v8040_v10, %v4558_v30  ;;  %v4246_v32 = vadd.f32 %v4218_v46, %v7972_v35 }
 0x3d0   : > { %4594 = vst [vmem:[%s8045_s9 + $0x38] sm:$0xff] %v4578_v60  ;;  %v4609_v17 = vadd.f32 %v4608_v9, %v4578_v60  ;;  %v4631_v14 = vmul.f32 %v4578_v60, %v4578_v60  ;;  %v4339_v27 = vadd.f32 %v4311_v13, %v4246_v32 }
 0x3d2   : > { %v4646_v2 = vadd.f32 %v4645_v52, %v4631_v14  ;;  %v4458_v39 = vadd.f32 %v4430_v55, %v4339_v27  ;;  %v4435_v54 = vpop.f32.mrf.mxu1  ;;  %v4536_v31 = vpop.f32.mrf.mxu2 }
 0x3d3   : > { %v4316_v15 = vpop.f32.mrf.mxu0 }
 0x3d4   : > { %v4559_v12 = vadd.f32 %v4531_v36, %v4458_v39 }
 0x3d5   : > { %v4220_v4 = vpop.f32.mrf.mxu3 }
 0x3d6   : > { %v4579_v25 = vadd.f32 %v8040_v10, %v4559_v12  ;;  %v4247_v6 = vadd.f32 %v4220_v4, %v7985_v45 }
 0x3d8   : > { %4595 = vst [vmem:[%s8045_s9 + $0x40] sm:$0xff] %v4579_v25  ;;  %v4610_v40 = vadd.f32 %v4609_v17, %v4579_v25  ;;  %v4632_v61 = vmul.f32 %v4579_v25, %v4579_v25  ;;  %v4340_v35 = vadd.f32 %v4313_v29, %v4247_v6 }
 0x3da   : > { %v4647_v53 = vadd.f32 %v4646_v2, %v4632_v61  ;;  %v4459_v42 = vadd.f32 %v4432_v47, %v4340_v35  ;;  %v4437_v1 = vpop.f32.mrf.mxu1  ;;  %v4538_v62 = vpop.f32.mrf.mxu2 }
 0x3db   : > { %v4318_v18 = vpop.f32.mrf.mxu0 }
 0x3dc   : > { %v4560_v26 = vadd.f32 %v4533_v41, %v4459_v42 }
 0x3dd   : > { %v4223_v57 = vpop.f32.mrf.mxu3 }
 0x3de   : > { %v4580_v21 = vadd.f32 %v8040_v10, %v4560_v26  ;;  %v4248_v43 = vadd.f32 %v4223_v57, %v7997_v5 }
 0x3e0   : > { %4596 = vst [vmem:[%s8045_s9 + $0x48] sm:$0xff] %v4580_v21  ;;  %v4611_v23 = vadd.f32 %v4610_v40, %v4580_v21  ;;  %v4633_v50 = vmul.f32 %v4580_v21, %v4580_v21  ;;  %v4341_v45 = vadd.f32 %v4316_v15, %v4248_v43 }
 0x3e2   : > { %v4648_v20 = vadd.f32 %v4647_v53, %v4633_v50  ;;  %v4460_v63 = vadd.f32 %v4435_v54, %v4341_v45  ;;  %v4440_v13 = vpop.f32.mrf.mxu1  ;;  %v4541_v16 = vpop.f32.mrf.mxu2 }
 0x3e3   : > { %v4321_v7 = vpop.f32.mrf.mxu0 }
 0x3e4   : > { %v4561_v19 = vadd.f32 %v4536_v31, %v4460_v63 }
 0x3e5   : > { %v4225_v33 = vpop.f32.mrf.mxu3 }
 0x3e6   : > { %v4581_v11 = vadd.f32 %v8040_v10, %v4561_v19  ;;  %v4249_v24 = vadd.f32 %v4225_v33, %v8011_v8 }
 0x3e8   : > { %4597 = vst [vmem:[%s8045_s9 + $0x50] sm:$0xff] %v4581_v11  ;;  %v4612_v44 = vadd.f32 %v4611_v23, %v4581_v11  ;;  %v4634_v48 = vmul.f32 %v4581_v11, %v4581_v11  ;;  %v4342_v5 = vadd.f32 %v4318_v18, %v4249_v24 }
 0x3ea   : > { %v4649_v59 = vadd.f32 %v4648_v20, %v4634_v48  ;;  %v4461_v51 = vadd.f32 %v4437_v1, %v4342_v5  ;;  %v4442_v29 = vpop.f32.mrf.mxu1  ;;  %v4543_v60 = vpop.f32.mrf.mxu2 }
 0x3eb   : > { %v4323_v52 = vpop.f32.mrf.mxu0 }
 0x3ec   : > { %v4562_v55 = vadd.f32 %v4538_v62, %v4461_v51 }
 0x3ed   : > { %v4228_v0 = vpop.f32.mrf.mxu3 }
 0x3ee   : > { %v4582_v36 = vadd.f32 %v8040_v10, %v4562_v55  ;;  %v4250_v58 = vadd.f32 %v4228_v0, %v8018_v37 }
 0x3f0   : > { %4598 = vst [vmem:[%s8045_s9 + $0x58] sm:$0xff] %v4582_v36  ;;  %v4613_v49 = vadd.f32 %v4612_v44, %v4582_v36  ;;  %v4635_v9 = vmul.f32 %v4582_v36, %v4582_v36  ;;  %v4343_v8 = vadd.f32 %v4321_v7, %v4250_v58 }
 0x3f2   : > { %v4650_v56 = vadd.f32 %v4649_v59, %v4635_v9  ;;  %v4462_v38 = vadd.f32 %v4440_v13, %v4343_v8  ;;  %v4445_v15 = vpop.f32.mrf.mxu1  ;;  %v4546_v54 = vpop.f32.mrf.mxu2 }
 0x3f3   : > { %v4326_v2 = vpop.f32.mrf.mxu0 }
 0x3f4   : > { %v4563_v3 = vadd.f32 %v4541_v16, %v4462_v38 }
 0x3f5   : > { %v4230_v30 = vpop.f32.mrf.mxu3 }
 0x3f6   : > { %v4583_v46 = vadd.f32 %v8040_v10, %v4563_v3  ;;  %v4251_v47 = vadd.f32 %v4230_v30, %v8026_v28 }
 0x3f8   : > { %4599 = vst [vmem:[%s8045_s9 + $0x60] sm:$0xff] %v4583_v46  ;;  %v4614_v32 = vadd.f32 %v4613_v49, %v4583_v46  ;;  %v4636_v41 = vmul.f32 %v4583_v46, %v4583_v46  ;;  %v4344_v37 = vadd.f32 %v4323_v52, %v4251_v47 }
 0x3fa   : > { %v4651_v17 = vadd.f32 %v4650_v56, %v4636_v41  ;;  %v4463_v14 = vadd.f32 %v4442_v29, %v4344_v37  ;;  %v4447_v43 = vpop.f32.mrf.mxu1  ;;  %v4548_v50 = vpop.f32.mrf.mxu2 }
 0x3fb   : > { %v4328_v26 = vpop.f32.mrf.mxu0 }
 0x3fc   : > { %v4564_v27 = vadd.f32 %v4543_v60, %v4463_v14 }
 0x3fd   : > { %v4233_v39 = vpop.f32.mrf.mxu3 }
 0x3fe   : > { %v4584_v12 = vadd.f32 %v8040_v10, %v4564_v27  ;;  %v4252_v4 = vadd.f32 %v4233_v39, %v8030_v22 }
 0x400   : > { %4600 = vst [vmem:[%s8045_s9 + $0x68] sm:$0xff] %v4584_v12  ;;  %v4615_v25 = vadd.f32 %v4614_v32, %v4584_v12  ;;  %v4637_v6 = vmul.f32 %v4584_v12, %v4584_v12  ;;  %v4345_v28 = vadd.f32 %v4326_v2, %v4252_v4 }
 0x402   : > { %v4652_v40 = vadd.f32 %v4651_v17, %v4637_v6  ;;  %v4464_v61 = vadd.f32 %v4445_v15, %v4345_v28 }
 0x404   : > { %v4565_v35 = vadd.f32 %v4546_v54, %v4464_v61 }
 0x405   : > { %v4235_v31 = vpop.f32.mrf.mxu3 }
 0x406   : > { %v4585_v53 = vadd.f32 %v8040_v10, %v4565_v35  ;;  %v4253_v42 = vadd.f32 %v4235_v31, %v8034_v34 }
 0x408   : > { %4601 = vst [vmem:[%s8045_s9 + $0x70] sm:$0xff] %v4585_v53  ;;  %v4616_v22 = vadd.f32 %v4615_v25, %v4585_v53  ;;  %v4638_v57 = vmul.f32 %v4585_v53, %v4585_v53  ;;  %v4346_v21 = vadd.f32 %v4328_v26, %v4253_v42 }
 0x40a   : > { %v4653_v18 = vadd.f32 %v4652_v40, %v4638_v57  ;;  %v4465_v23 = vadd.f32 %v4447_v43, %v4346_v21 }
 0x40c   : > { %v4566_v45 = vadd.f32 %v4548_v50, %v4465_v23 }
 0x40e   : > { %v4586_v1 = vadd.f32 %v8040_v10, %v4566_v45 }
 0x410   : > { %4602 = vst [vmem:[%s8045_s9 + $0x78] sm:$0xff] %v4586_v1  ;;  %v4617_v20 = vadd.f32 %v4616_v22, %v4586_v1  ;;  %v4639_v63 = vmul.f32 %v4586_v1, %v4586_v1 }
 0x412   : > { %v4618_v62 = vrot.slane %v4617_v20, 4  ;;  %v4654_v34 = vadd.f32 %v4653_v18, %v4639_v63 }
 0x414   : > { %v4619_v19 = vadd.f32 %v4618_v62, %v4617_v20  ;;  %v4655_v33 = vrot.slane %v4654_v34, 4 }
 0x416   : > { %v4620_v11 = vrot.slane %v4619_v19, 2  ;;  %v4656_v24 = vadd.f32 %v4655_v33, %v4654_v34 }
 0x418   : > { %v4621_v44 = vadd.f32 %v4620_v11, %v4619_v19  ;;  %v4657_v48 = vrot.slane %v4656_v24, 2 }
 0x41a   : > { %v4622_v5 = vrot.slane %v4621_v44, 1  ;;  %v4658_v7 = vadd.f32 %v4657_v48, %v4656_v24 }
 0x41c   : > { %v4659_v59 = vrot.slane %v4658_v7, 1  ;;  %v4623_v10 = vadd.f32 %v4622_v5, %v4621_v44 }
 0x41e   : > { %v4660_v51 = vadd.f32 %v4659_v59, %v4658_v7 }
 0x420   : > { %v4662_v13 = vsel %vm4661_vm8, %v4623_v10, %v4660_v51 }
 0x421   : > { %4663 = vst [vmem:[%s243_s22] sm:$0x3] %v4662_v13 }
 0x422 PF: > { %s15_s19 = sadd.s32 1, %s5489_s19   ;;  %s8470_s15 = smov %s5481_s17 }
 0x423   : > { %p12_p8 = scmp.ge.s32.totalorder %s15_s19, 10   ;;  %s8471_s16 = smov %s5485_s18 }
 0x424   : > { %s8472_s17 = smov %s8475_s20  ;;  %s8473_s18 = smov %s8479_s21 }
 0x425   :  { %14 = sbr.rel (!%p12_p8) target bundleno = 3 (0x3), region = 103 }

// kernel: upcat_forward.8
= control target key start
LH: loop header
LB: loop body
LE: loop exit
PB: predicated region body
PF: predicated region fallthrough
CT: control target
= control target key end

     0   :  { %s7599_s15 = smov 0   ;;  %s7601_s16 = smov 0   ;;  %s10338_s0 = inlined_call_operand.vmem [shape: bf16[2,10,10,10,128], index: 0, kind: input, shape index: {}]   ;;  %s10339_s1 = inlined_call_operand.vmem [shape: bf16[27,128,128], index: 1, kind: input, shape index: {}]   ;;  %s10340_s2 = inlined_call_operand.vmem [shape: f32[1,128], index: 2, kind: input, shape index: {}]   ;;  %s10341_s3 = inlined_call_operand.vmem [shape: f32[2,8,64,128], index: 3, kind: output, shape index: {0}]   ;;  %s10342_s4 = inlined_call_operand.vmem [shape: f32[2,4,2,128], index: 4, kind: output, shape index: {1}]  }
   0x1   :  { %s7603_s17 = smov 0   ;;  %s7605_s18 = smov 0  }
   0x2   :  { %s7607_s19 = smov 0  }
   0x3 LB: > { %s24_s20 = sadd.s32 1, %s7564_s17  ;;  %s27_s21 = sadd.s32 1, %s7568_s18  ;;  %s7572_s19 = sphi %s7607_s19, %s15_s19   ;;  %s7568_s18 = sphi %s7605_s18, %s10655_s18   ;;  %s7564_s17 = sphi %s7603_s17, %s10654_s17   ;;  %s7560_s16 = sphi %s7601_s16, %s10653_s16   ;;  %s7556_s15 = sphi %s7599_s15, %s10652_s15  }
   0x4   : > { %p25_p0 = scmp.ge.s32.totalorder %s24_s20, 4  ;;  %p5811_p1 = scmp.ge.s32.totalorder %s7572_s19, 1 }
   0x5   : > { %p181_p2 = scmp.lt.s32.totalorder %s7572_s19, 9 }
   0x6   : > { %s10657_s20 = smov (%p25_p0, %s24_s20), 0  ;;  %s10659_s21 = smov (!%p25_p0, %s27_s21), %s7568_s18 }
   0x7   : > { %p182_p3 = pnand %p5811_p1, %p181_p2  ;;  %p29_p4 = scmp.ge.s32.totalorder %s10659_s21, 2 }
   0x9   : > { %s10661_s21 = smov (%p29_p4, %s10659_s21), 0  ;;  %185 = sbr.rel (%p182_p3) target bundleno = 1062 (0x426), region = 32 }
   0xe   : > { %v7264_v0 = vld [vmem:[%s10339_s1 + $0x78] sm:$0xff]  ;;  %p220_p5 = scmp.lt.s32.totalorder %s7560_s16, 1  ;;  %v7263_v3 = vld [vmem:[%s10339_s1 + $0x70] sm:$0xff]  ;;  %s7248_s8 = smul.u32 160, %s7556_s15  ;;  %v7262_v6 = vld [vmem:[%s10339_s1 + $0x68] sm:$0xff]  ;;  %vm838_vm2 = vcmask 1042432  }
   0xf   : > { %v7637_v1 = vld [vmem:[%s10339_s1 + $0xb8] sm:$0xff]  ;;  %628 = vmatpush.bf16.msra.mxu0 %v7264_v0  ;;  %7465 = vmatpush.bf16.msra.mxu3 %v7264_v0  ;;  %v7654_v4 = vld [vmem:[%s10339_s1 + $0xb0] sm:$0xff]  ;;  %vm304_vm0 = vsmask.f32 3328  ;;  %v7674_v7 = vld [vmem:[%s10339_s1 + $0xa8] sm:$0xff]  ;;  %vm839_vm3 = vcmask 1046532  }
  0x10   : > { %v7642_v2 = vld [vmem:[%s10339_s1 + $0x38] sm:$0xff]  ;;  %s10663_s16 = smov (!%p220_p5, %s7560_s16), 1  ;;  %7481 = vmatpush.bf16.msra.mxu2 %v7637_v1  ;;  %v7659_v5 = vld [vmem:[%s10339_s1 + $0x30] sm:$0xff]  ;;  %v7679_v8 = vld [vmem:[%s10339_s1 + $0x28] sm:$0xff]  ;;  %vm305_vm1 = vsmask.f32 7440 }
  0x11   : > { %7473 = vmatpush.bf16.msra.mxu1 %v7642_v2  ;;  %s7489_s9 = smul.u32 800, %s10663_s16  ;;  %v7261_v9 = vld [vmem:[%s10339_s1 + $0x60] sm:$0xff]  ;;  %v7260_v36 = vld [vmem:[%s10339_s1 + $0x58] sm:$0xff]  ;;  %vm7731_vm4 = vmor %vm304_vm0, %vm305_vm1  ;;  %s5815_s28 = sshll.u32 %s10663_s16, 6  ;;  %vm5657_vm6 = vcmask 1040384  }
  0x12   : > { %v7705_v18 = vld [vmem:[%s10339_s1 + $0xa0] sm:$0xff]  ;;  %v7742_v42 = vld [vmem:[%s10339_s1 + $0x98] sm:$0xff]  ;;  %vm7751_vm5 = vmor %vm838_vm2, %vm839_vm3  ;;  %p238_p7 = scmp.lt.s32.totalorder %s7556_s15, 3  ;;  %s5817_s10 = sshll.u32 %s10663_s16, 2 }
  0x13   : > { %629 = vmatpush.bf16.msra.mxu0 %v7263_v3  ;;  %7466 = vmatpush.bf16.msra.mxu3 %v7263_v3  ;;  %s224_s14 = scalar_lea.vmem %s10338_s0, %s7489_s9  ;;  %v7710_v19 = vld [vmem:[%s10339_s1 + $0x20] sm:$0xff]  ;;  %v7747_v43 = vld [vmem:[%s10339_s1 + $0x18] sm:$0xff]  ;;  %v7259_v58 = vld [vmem:[%s10339_s1 + $0x50] sm:$0xff] }
  0x14   : > { %7482 = vmatpush.bf16.msra.mxu2 %v7654_v4  ;;  %s7681_s26 = scalar_lea.vmem %s224_s14, %s7248_s8  ;;  %v7774_v63 = vld [vmem:[%s10339_s1 + $0x90] sm:$0xff] }
  0x15   : > { %7474 = vmatpush.bf16.msra.mxu1 %v7659_v5  ;;  %v7687_v10 = vld [vmem:[%s7681_s26] sm:$0xf]  ;;  %v7690_v11 = vld [vmem:[%s7681_s26 + $0x4] sm:$0x1]  ;;  %v7693_v12 = vld [vmem:[%s7681_s26 + $0x8] sm:$0xf] }
  0x16   : > { %v7696_v13 = vld [vmem:[%s7681_s26 + $0xc] sm:$0x1]  ;;  %v308_v14 = vshrl.u32 %v7687_v10, 16  ;;  %v311_v15 = vshll.u32 %v7687_v10, 16  ;;  %v317_v16 = vshll.u32 %v7690_v11, 16  ;;  %v322_v17 = vshrl.u32 %v7693_v12, 16 }
  0x17   : > { %630 = vmatpush.bf16.msra.mxu0 %v7262_v6  ;;  %7467 = vmatpush.bf16.msra.mxu3 %v7262_v6  ;;  %v325_v20 = vshll.u32 %v7693_v12, 16  ;;  %v331_v21 = vshll.u32 %v7696_v13, 16  ;;  %v7715_v22 = vld [vmem:[%s7681_s26 + $0x20] sm:$0xf]  ;;  %v257_v27 = vld [vmem:[%s7681_s26 + $0x24] sm:$0x1] }
  0x18   : > { %7483 = vmatpush.bf16.msra.mxu2 %v7674_v7  ;;  %v310_v23 = vrot.slane %v308_v14, 4  ;;  %v313_v24 = vrot.slane %v311_v15, 5  ;;  %v319_v25 = vrot.slane %v317_v16, 5  ;;  %v324_v26 = vrot.slane %v322_v17, 4  ;;  %v7721_v30 = vld [vmem:[%s7681_s26 + $0x28] sm:$0xf] }
  0x19   : > { %7475 = vmatpush.bf16.msra.mxu1 %v7679_v8  ;;  %v327_v28 = vrot.slane %v325_v20, 5  ;;  %v333_v29 = vrot.slane %v331_v21, 5  ;;  %v259_v31 = vld [vmem:[%s7681_s26 + $0x2c] sm:$0x1]  ;;  %v364_v33 = vshrl.u32 %v7715_v22, 16  ;;  %v367_v34 = vshll.u32 %v7715_v22, 16 }
  0x1a   : > { %v314_v32 = vor.u32 %v313_v24, %v310_v23  ;;  %v373_v35 = vshll.u32 %v257_v27, 16  ;;  %v378_v39 = vshrl.u32 %v7721_v30, 16  ;;  %v381_v40 = vshll.u32 %v7721_v30, 16  ;;  %v7759_v57 = vld [vmem:[%s7681_s26 + $0x10] sm:$0xf] }
  0x1b   : > { %631 = vmatpush.bf16.msra.mxu0 %v7261_v9  ;;  %7468 = vmatpush.bf16.msra.mxu3 %v7261_v9  ;;  %v328_v38 = vor.u32 %v327_v28, %v324_v26  ;;  %v387_v41 = vshll.u32 %v259_v31, 16  ;;  %v366_v45 = vrot.slane %v364_v33, 4  ;;  %v369_v46 = vrot.slane %v367_v34, 5  ;;  %v7779_v0 = vld [vmem:[%s10339_s1 + $0x10] sm:$0xff]  ;;  %v7798_v23 = vld [vmem:[%s7681_s26 + $0x18] sm:$0xf] }
  0x1c   : > { %7484 = vmatpush.bf16.msra.mxu2 %v7705_v18  ;;  %v315_v44 = vrot.slane %v314_v32, 4  ;;  %v375_v47 = vrot.slane %v373_v35, 5  ;;  %v380_v49 = vrot.slane %v378_v39, 4  ;;  %v383_v50 = vrot.slane %v381_v40, 5  ;;  %v7788_v16 = vld [vmem:[%s7681_s26 + $0x14] sm:$0x1] }
  0x1d   : > { %7476 = vmatpush.bf16.msra.mxu1 %v7710_v19  ;;  %v329_v48 = vrot.slane %v328_v38, 4  ;;  %v389_v51 = vrot.slane %v387_v41, 5  ;;  %v370_v54 = vor.u32 %v369_v46, %v366_v45  ;;  %v5906_v55 = vrot.slane %v7715_v22, 9  ;;  %v7807_v26 = vld [vmem:[%s10339_s1 + $0x88] sm:$0xff]  ;;  %v7815_v32 = vld [vmem:[%s7681_s26 + $0x30] sm:$0xf] }
  0x1e   : > { %v320_v53 = vsel %vm7731_vm4, %v315_v44, %v319_v25  ;;  %v859_v56 = vrot.slane %v257_v27, 5  ;;  %v384_v61 = vor.u32 %v383_v50, %v380_v49  ;;  %v5907_v62 = vrot.slane %v7721_v30, 9  ;;  %v7258_v25 = vld [vmem:[%s10339_s1 + $0x48] sm:$0xff]  ;;  %v7827_v35 = vld [vmem:[%s7681_s26 + $0x1c] sm:$0x1] }
  0x1f   : > { %632 = vmatpush.bf16.msra.mxu0 %v7260_v36  ;;  %7469 = vmatpush.bf16.msra.mxu3 %v7260_v36  ;;  %v334_v59 = vsel %vm7731_vm4, %v329_v48, %v333_v29  ;;  %v7766_v60 = vunpack.c.l.b16 %v320_v53  ;;  %v371_v6 = vrot.slane %v370_v54, 4  ;;  %v863_v14 = vrot.slane %v259_v31, 5  ;;  %v7822_v33 = vld [vmem:[%s10339_s1 + $0x8] sm:$0xff]  ;;  %v7836_v46 = vld [vmem:[%s7681_s26 + $0x34] sm:$0x1]  ;;  %v7257_v48 = vld [vmem:[%s10339_s1 + $0x40] sm:$0xff] }
  0x20   : > { %7485 = vmatpush.bf16.msra.mxu2 %v7742_v42  ;;  %v7781_v3 = vunpack.c.l.b16 %v334_v59  ;;  %v7785_v9 = vsel %vm7751_vm5, %v5906_v55, %v859_v56  ;;  %v385_v15 = vrot.slane %v384_v61, 4  ;;  %v336_v17 = vshrl.u32 %v7759_v57, 16  ;;  %v7850_v54 = vld [vmem:[%s10339_s1 + $0x80] sm:$0xff] }
  0x21   : > { %7477 = vmatpush.bf16.msra.mxu1 %v7747_v43  ;;  %v376_v20 = vsel %vm7731_vm4, %v371_v6, %v375_v47  ;;  %v7795_v21 = vsel %vm7751_vm5, %v5907_v62, %v863_v14  ;;  %v339_v24 = vshll.u32 %v7759_v57, 16  ;;  %v10345_v28 = vunpack.c.l.b16 %v7785_v9  ;;  %v7839_v47 = vld [vmem:[%s7681_s26 + $0x38] sm:$0xf]  ;;  %v7855_v55 = vld [vmem:[%s10339_s1] sm:$0xff]  ;;  %v263_v62 = vld [vmem:[%s7681_s26 + $0x3c] sm:$0x1] }
  0x22   : > { %v390_v27 = vsel %vm7731_vm4, %v385_v15, %v389_v51  ;;  %v10346_v29 = vunpack.c.l.b16 %v7715_v22  ;;  %v10344_v31 = vunpack.c.l.b16 %v7721_v30  ;;  %v564_v34 = vpack.c.b16 %v7781_v3, %v7766_v60 }
  0x23   : > { %633 = vmatpush.bf16.msra.mxu0 %v7259_v58  ;;  %7470 = vmatpush.bf16.msra.mxu3 %v7259_v58  ;;  %v338_v36 = vrot.slane %v336_v17, 4  ;;  %v341_v38 = vrot.slane %v339_v24, 5  ;;  %v345_v39 = vshll.u32 %v7788_v16, 16  ;;  %v7830_v40 = vunpack.c.l.b16 %v376_v20  ;;  %v7280_v17 = vld [vmem:[%s10339_s1 + $0xf8] sm:$0xff] }
  0x24   : > { %7486 = vmatpush.bf16.msra.mxu2 %v7774_v63  ;;  %v10343_v41 = vunpack.c.l.b16 %v7795_v21  ;;  %v350_v44 = vshrl.u32 %v7798_v23, 16  ;;  %v353_v45 = vshll.u32 %v7798_v23, 16  ;;  %v7844_v49 = vunpack.c.l.b16 %v390_v27 }
  0x25   : > { %7478 = vmatpush.bf16.msra.mxu1 %v7779_v0  ;;  %v342_v50 = vor.u32 %v341_v38, %v338_v36  ;;  %v347_v51 = vrot.slane %v345_v39, 5  ;;  %v392_v53 = vshrl.u32 %v7815_v32, 16  ;;  %v359_v59 = vshll.u32 %v7827_v35, 16 }
  0x26   : > { %v352_v56 = vrot.slane %v350_v44, 4  ;;  %v355_v58 = vrot.slane %v353_v45, 5  ;;  %v395_v60 = vshll.u32 %v7815_v32, 16  ;;  %v401_v14 = vshll.u32 %v7836_v46, 16 }
  0x27   : > { %634 = vmatpush.bf16.msra.mxu0 %v7258_v25  ;;  %7471 = vmatpush.bf16.msra.mxu3 %v7258_v25  ;;  %v343_v61 = vrot.slane %v342_v50, 4  ;;  %v394_v6 = vrot.slane %v392_v53, 4  ;;  %v406_v15 = vshrl.u32 %v7839_v47, 16  ;;  %v7871_v20 = vpack.c.b16 %v10344_v31, %v10346_v29  ;;  %v271_v29 = vld [vmem:[%s7681_s26 + $0x5c] sm:$0x1] }
  0x28   : > { %7487 = vmatpush.bf16.msra.mxu2 %v7807_v26  ;;  %v356_v24 = vor.u32 %v355_v58, %v352_v56  ;;  %v397_v25 = vrot.slane %v395_v60, 5  ;;  %v409_v27 = vshll.u32 %v7839_v47, 16  ;;  %v7876_v36 = vpack.c.b16 %v7844_v49, %v7830_v40  ;;  %v7304_v58 = vld [vmem:[%s10339_s1 + $0x1b8] sm:$0xff] }
  0x29   : > { %7479 = vmatpush.bf16.msra.mxu1 %v7822_v33  ;;  %v7882_v38 = vpack.c.b16 %v10343_v41, %v10345_v28  ;;  %v348_v39 = vsel %vm7731_vm4, %v343_v61, %v347_v51  ;;  %v408_v44 = vrot.slane %v406_v15, 4  ;;  %v415_v56 = vshll.u32 %v263_v62, 16  ;;  %v7296_v51 = vld [vmem:[%s10339_s1 + $0x178] sm:$0xff]  ;;  %v7909_v41 = vld [vmem:[%s7681_s26 + $0x50] sm:$0xf] }
  0x2a   : > { %10458 = vst [vmem:[#allocation2_spill] sm:$0xff] %v7876_v36  ;;  %v7886_v45 = vunpack.c.l.b16 %v348_v39  ;;  %v398_v50 = vor.u32 %v397_v25, %v394_v6  ;;  %v411_v53 = vrot.slane %v409_v27, 5  ;;  %v361_v60 = vrot.slane %v359_v59, 5 }
  0x2b   : > { %10459 = vst [vmem:[#allocation3_spill] sm:$0xff] %v7882_v38  ;;  %635 = vmatpush.bf16.msra.mxu0 %v7257_v48  ;;  %7472 = vmatpush.bf16.msra.mxu3 %v7257_v48  ;;  %v403_v61 = vrot.slane %v401_v14, 5  ;;  %v7279_v48 = vld [vmem:[%s10339_s1 + $0xf0] sm:$0xff]  ;;  %v357_v6 = vrot.slane %v356_v24, 4  ;;  %v5908_v27 = vrot.slane %v7815_v32, 9  ;;  %v867_v14 = vrot.slane %v7836_v46, 5 }
  0x2c   : > { %7488 = vmatpush.bf16.msra.mxu2 %v7850_v54  ;;  %v412_v25 = vor.u32 %v411_v53, %v408_v44  ;;  %v399_v59 = vrot.slane %v398_v50, 4  ;;  %v417_v39 = vrot.slane %v415_v56, 5  ;;  %v7295_v46 = vld [vmem:[%s10339_s1 + $0x170] sm:$0xff]  ;;  %v7918_v44 = vld [vmem:[%s7681_s26 + $0x58] sm:$0xf]  ;;  %v7278_v50 = vld [vmem:[%s10339_s1 + $0xe8] sm:$0xff] }
  0x2d   : > { %7480 = vmatpush.bf16.msra.mxu1 %v7855_v55  ;;  %v7930_v56 = vsel %vm7751_vm5, %v5908_v27, %v867_v14  ;;  %v10350_v14 = vunpack.c.l.b16 %v7815_v32  ;;  %v843_v15 = vrot.slane %v7690_v11, 5  ;;  %v693_v11 = vunpack.c.l.b16 %v7687_v10 }
  0x2e   : > { %636 = vmatmul.bf16.vlgmr.msra.gmra.mxu0 %v564_v34  ;;  %646 = vmatmul.bf16.vlgmr.msra.gmra.mxu3 %v7876_v36  ;;  %v413_v24 = vrot.slane %v412_v25, 4  ;;  %v7303_v34 = vld [vmem:[%s10339_s1 + $0x1b0] sm:$0xff]  ;;  %v404_v53 = vsel %vm7731_vm4, %v399_v59, %v403_v61  ;;  %v437_v61 = vshll.u32 %v7918_v44, 16  ;;  %v7294_v25 = vld [vmem:[%s10339_s1 + $0x168] sm:$0xff]  ;;  %v10349_v59 = vunpack.c.l.b16 %v7930_v56 }
  0x2f   : > { %1152 = vmatpush.bf16.msrb.mxu3 %v7280_v17  ;;  %773 = vmatpush.bf16.msrb.mxu0 %v7642_v2  ;;  %v5909_v2 = vrot.slane %v7839_v47, 9  ;;  %v871_v17 = vrot.slane %v263_v62, 5  ;;  %v362_v62 = vsel %vm7731_vm4, %v357_v6, %v361_v60  ;;  %v423_v60 = vshll.u32 %v7909_v41, 16  ;;  %v7302_v6 = vld [vmem:[%s10339_s1 + $0x1a8] sm:$0xff] }
  0x30   : > { %1020 = vmatmul.bf16.vlgmr.msra.gmra.mxu2 %v7882_v38  ;;  %791 = vmatmul.bf16.vlgmr.msra.gmra.mxu1 %v7871_v20  ;;  %v7949_v27 = vunpack.c.l.b16 %v362_v62  ;;  %v439_v28 = vrot.slane %v437_v61, 5 }
  0x31   : > { %1624 = vmatpush.bf16.msrb.mxu2 %v7304_v58  ;;  %1486 = vmatpush.bf16.msrb.mxu1 %v7296_v51  ;;  %v7934_v58 = vsel %vm7751_vm5, %v5909_v2, %v871_v17  ;;  %v418_v51 = vsel %vm7731_vm4, %v413_v24, %v417_v39  ;;  %v7277_v2 = vld [vmem:[%s10339_s1 + $0xe0] sm:$0xff]  ;;  %v7956_v17 = vunpack.c.l.b16 %v404_v53  ;;  %v425_v62 = vrot.slane %v423_v60, 5 }
  0x32   : > { %v7958_v24 = vunpack.c.l.b16 %v418_v51  ;;  %v10347_v39 = vunpack.c.l.b16 %v7934_v58  ;;  %v7293_v53 = vld [vmem:[%s10339_s1 + $0x160] sm:$0xff] }
  0x33   : > { %774 = vmatpush.bf16.msrb.mxu0 %v7659_v5  ;;  %1153 = vmatpush.bf16.msrb.mxu3 %v7279_v48  ;;  %v420_v5 = vshrl.u32 %v7909_v41, 16  ;;  %v434_v48 = vshrl.u32 %v7918_v44, 16 }
  0x34   : > { %v7977_v51 = vpack.c.b16 %v7958_v24, %v7956_v17  ;;  %v7983_v60 = vpack.c.b16 %v10347_v39, %v10349_v59  ;;  %v7998_v39 = vld [vmem:[%s7681_s26 + $0x68] sm:$0xf]  ;;  %v879_v59 = vrot.slane %v271_v29, 5 }
  0x35   : > { %1625 = vmatpush.bf16.msrb.mxu2 %v7303_v34  ;;  %1487 = vmatpush.bf16.msrb.mxu1 %v7295_v46  ;;  %v269_v34 = vld [vmem:[%s7681_s26 + $0x54] sm:$0x1]  ;;  %v422_v46 = vrot.slane %v420_v5, 4  ;;  %v436_v31 = vrot.slane %v434_v48, 4  ;;  %v7973_v5 = vpack.c.b16 %v7949_v27, %v7886_v45 }
  0x36   : > { %10461 = vst [vmem:[#allocation5_spill] sm:$0xff] %v7977_v51  ;;  %v429_v48 = vshll.u32 %v269_v34, 16 }
  0x37   : > { %775 = vmatpush.bf16.msrb.mxu0 %v7679_v8  ;;  %1154 = vmatpush.bf16.msrb.mxu3 %v7278_v50  ;;  %v10348_v8 = vunpack.c.l.b16 %v7839_v47  ;;  %v7301_v50 = vld [vmem:[%s10339_s1 + $0x1a0] sm:$0xff]  ;;  %10460 = vst [vmem:[#allocation4_spill] sm:$0xff] %v7973_v5  ;;  %v426_v61 = vor.u32 %v425_v62, %v422_v46  ;;  %v5910_v62 = vrot.slane %v7909_v41, 9 }
  0x38   : > { %10462 = vst [vmem:[#allocation6_spill] sm:$0xff] %v7983_v60  ;;  %v431_v46 = vrot.slane %v429_v48, 5 }
  0x39   : > { %1626 = vmatpush.bf16.msrb.mxu2 %v7302_v6  ;;  %1488 = vmatpush.bf16.msrb.mxu1 %v7294_v25  ;;  %v440_v6 = vor.u32 %v439_v28, %v436_v31  ;;  %v443_v25 = vshll.u32 %v271_v29, 16  ;;  %v462_v29 = vshrl.u32 %v7998_v39, 16 }
  0x3b   : > { %776 = vmatpush.bf16.msrb.mxu0 %v7710_v19  ;;  %1155 = vmatpush.bf16.msrb.mxu3 %v7277_v2  ;;  %v7989_v19 = vpack.c.b16 %v10348_v8, %v10350_v14  ;;  %v7995_v2 = vld [vmem:[%s7681_s26 + $0x60] sm:$0xf]  ;;  %v427_v8 = vrot.slane %v426_v61, 4  ;;  %v441_v28 = vrot.slane %v440_v6, 4  ;;  %v445_v31 = vrot.slane %v443_v25, 5  ;;  %v7300_v14 = vld [vmem:[%s10339_s1 + $0x198] sm:$0xff] }
  0x3c   : > { %v448_v48 = vshrl.u32 %v7995_v2, 16  ;;  %v451_v61 = vshll.u32 %v7995_v2, 16  ;;  %v465_v25 = vshll.u32 %v7998_v39, 16  ;;  %v464_v36 = vrot.slane %v462_v29, 4 }
  0x3d   : > { %1627 = vmatpush.bf16.msrb.mxu2 %v7301_v50  ;;  %1489 = vmatpush.bf16.msrb.mxu1 %v7293_v53  ;;  %v875_v50 = vrot.slane %v269_v34, 5  ;;  %v5911_v53 = vrot.slane %v7918_v44, 9  ;;  %v432_v6 = vsel %vm7731_vm4, %v427_v8, %v431_v46  ;;  %v446_v34 = vsel %vm7731_vm4, %v441_v28, %v445_v31  ;;  %v7292_v8 = vld [vmem:[%s10339_s1 + $0x158] sm:$0xff]  ;;  %v7275_v46 = vld [vmem:[%s10339_s1 + $0xd0] sm:$0xff] }
  0x3e   : > { %641 = vmatmul.bf16.gmra.mxu0 %v7973_v5  ;;  %651 = vmatmul.bf16.gmra.mxu3 %v7977_v51  ;;  %v701_v28 = vunpack.c.l.b16 %v7909_v41  ;;  %v556_v31 = vunpack.c.l.b16 %v432_v6  ;;  %v467_v5 = vrot.slane %v465_v25, 5  ;;  %v10463_v41 = vunpack.c.l.b16 %v7693_v12 }
  0x3f   : > { %777 = vmatpush.bf16.msrb.mxu0 %v7747_v43  ;;  %v7276_v43 = vld [vmem:[%s10339_s1 + $0xd8] sm:$0xff] }
  0x40   : > { %1025 = vmatmul.bf16.gmra.mxu2 %v7983_v60  ;;  %796 = vmatmul.bf16.gmra.mxu1 %v7989_v19  ;;  %v453_v60 = vrot.slane %v451_v61, 5  ;;  %v709_v6 = vpack.c.b16 %v10463_v41, %v693_v11  ;;  %v8062_v41 = vld [vmem:[%s7681_s26 + $0x70] sm:$0xf] }
  0x41   : > { %1156 = vmatpush.bf16.msrb.mxu3 %v7276_v43  ;;  %1628 = vmatpush.bf16.msrb.mxu2 %v7300_v14  ;;  %v876_v43 = vsel %vm7751_vm5, %v5910_v62, %v875_v50  ;;  %v8025_v14 = vsel %vm7751_vm5, %v5911_v53, %v879_v59  ;;  %v10357_v59 = vunpack.c.l.b16 %v7918_v44  ;;  %v8038_v62 = vunpack.c.l.b16 %v446_v34  ;;  %v273_v50 = vld [vmem:[%s7681_s26 + $0x64] sm:$0x1] }
  0x42   : > { %v450_v53 = vrot.slane %v448_v48, 4  ;;  %1490 = vmatpush.bf16.msrb.mxu1 %v7292_v8  ;;  %v930_v51 = vunpack.c.l.b16 %v876_v43  ;;  %v10356_v38 = vunpack.c.l.b16 %v8025_v14  ;;  %v457_v61 = vshll.u32 %v273_v50, 16 }
  0x43   : > { %778 = vmatpush.bf16.msrb.mxu0 %v7779_v0  ;;  %v847_v0 = vrot.slane %v7696_v13, 5  ;;  %v5902_v13 = vrot.slane %v7687_v10, 9  ;;  %v713_v48 = vpack.c.b16 %v10357_v59, %v701_v28  ;;  %v5903_v34 = vrot.slane %v7693_v12, 9 }
  0x44   : > { %v568_v43 = vpack.c.b16 %v8038_v62, %v556_v31  ;;  %v454_v29 = vor.u32 %v453_v60, %v450_v53  ;;  %v468_v8 = vor.u32 %v467_v5, %v464_v36  ;;  %v459_v31 = vrot.slane %v457_v61, 5  ;;  %v7291_v53 = vld [vmem:[%s10339_s1 + $0x150] sm:$0xff] }
  0x45   : > { %1157 = vmatpush.bf16.msrb.mxu3 %v7275_v46  ;;  %v844_v10 = vsel %vm7751_vm5, %v5902_v13, %v843_v15  ;;  %v8058_v46 = vsel %vm7751_vm5, %v5903_v34, %v847_v0  ;;  %v5912_v15 = vrot.slane %v7995_v2, 9  ;;  %v8070_v0 = vld [vmem:[%s7681_s26 + $0x78] sm:$0xf]  ;;  %v7299_v13 = vld [vmem:[%s10339_s1 + $0x190] sm:$0xff]  ;;  %v476_v34 = vshrl.u32 %v8062_v41, 16 }
  0x46   : > { %v922_v11 = vunpack.c.l.b16 %v844_v10  ;;  %v10366_v28 = vunpack.c.l.b16 %v8058_v46  ;;  %v469_v5 = vrot.slane %v468_v8, 4  ;;  %1629 = vmatpush.bf16.msrb.mxu2 %v7299_v13  ;;  %1491 = vmatpush.bf16.msrb.mxu1 %v7291_v53  ;;  %v10363_v13 = vunpack.c.l.b16 %v7798_v23 }
  0x47   : > { %779 = vmatpush.bf16.msrb.mxu0 %v7822_v33  ;;  %v275_v33 = vld [vmem:[%s7681_s26 + $0x6c] sm:$0x1] }
  0x48   : > { %v471_v25 = vshll.u32 %v275_v33, 16  ;;  %v8067_v36 = vpack.c.b16 %v10366_v28, %v922_v11  ;;  %v887_v61 = vrot.slane %v275_v33, 5  ;;  %v10364_v11 = vunpack.c.l.b16 %v7759_v57  ;;  %v281_v28 = vld [vmem:[%s7681_s26 + $0x84] sm:$0x1] }
  0x4a   : > { %v473_v60 = vrot.slane %v471_v25, 5 }
  0x4b   : > { %780 = vmatpush.bf16.msrb.mxu0 %v7855_v55  ;;  %v942_v55 = vpack.c.b16 %v10356_v38, %v930_v51  ;;  %v883_v51 = vrot.slane %v273_v50, 5  ;;  %v7274_v50 = vld [vmem:[%s10339_s1 + $0xc8] sm:$0xff] }
  0x4c   : > { %1158 = vmatpush.bf16.msrb.mxu3 %v7274_v50  ;;  %v474_v33 = vsel %vm7731_vm4, %v469_v5, %v473_v60 }
  0x4d   : > { %v8094_v25 = vsel %vm7751_vm5, %v5912_v15, %v883_v51  ;;  %v8109_v15 = vunpack.c.l.b16 %v474_v33  ;;  %v851_v33 = vrot.slane %v7788_v16, 5 }
  0x4e   : > { %656 = vmatmul.bf16.gmra.mxu3 %v568_v43  ;;  %781 = vmatmul.bf16.vlgmr.msrb.gmra.mxu0 %v709_v6  ;;  %v5913_v6 = vrot.slane %v7998_v39, 9  ;;  %v490_v43 = vshrl.u32 %v8070_v0, 16  ;;  %v10359_v53 = vunpack.c.l.b16 %v8094_v25 }
  0x4f   : > { %1002 = vmatpush.bf16.msra.mxu0 %v7637_v1  ;;  %v455_v1 = vrot.slane %v454_v29, 4  ;;  %v493_v29 = vshll.u32 %v8070_v0, 16 }
  0x50   : > { %1030 = vmatmul.bf16.gmra.mxu2 %v942_v55  ;;  %801 = vmatmul.bf16.gmra.mxu1 %v713_v48  ;;  %v479_v48 = vshll.u32 %v8062_v41, 16  ;;  %v8098_v10 = vsel %vm7751_vm5, %v5913_v6, %v887_v61  ;;  %v478_v55 = vrot.slane %v476_v34, 4  ;;  %v492_v5 = vrot.slane %v490_v43, 4 }
  0x51   : > { %v495_v51 = vrot.slane %v493_v29, 5  ;;  %v10358_v6 = vunpack.c.l.b16 %v8098_v10  ;;  %v10361_v61 = vunpack.c.l.b16 %v7995_v2  ;;  %v10360_v34 = vunpack.c.l.b16 %v7998_v39 }
  0x52   : > { %v481_v8 = vrot.slane %v479_v48, 5  ;;  %v5905_v43 = vrot.slane %v7798_v23, 9  ;;  %v855_v29 = vrot.slane %v7827_v35, 5 }
  0x53   : > { %1003 = vmatpush.bf16.msra.mxu0 %v7654_v4  ;;  %v460_v4 = vsel %vm7731_vm4, %v455_v1, %v459_v31  ;;  %v277_v31 = vld [vmem:[%s7681_s26 + $0x74] sm:$0x1]  ;;  %v279_v1 = vld [vmem:[%s7681_s26 + $0x7c] sm:$0x1]  ;;  %v8134_v16 = vpack.c.b16 %v10358_v6, %v10359_v53  ;;  %v8140_v35 = vpack.c.b16 %v10360_v34, %v10361_v61 }
  0x54   : > { %v8107_v60 = vunpack.c.l.b16 %v460_v4  ;;  %v482_v48 = vor.u32 %v481_v8, %v478_v55  ;;  %v485_v50 = vshll.u32 %v277_v31, 16  ;;  %v499_v38 = vshll.u32 %v279_v1, 16 }
  0x55   : > { %v5904_v4 = vrot.slane %v7759_v57, 9  ;;  %v496_v55 = vor.u32 %v495_v51, %v492_v5  ;;  %10465 = vst [vmem:[#allocation8_spill] sm:$0xff] %v8134_v16 }
  0x56   : > { %v8122_v59 = vpack.c.b16 %v8109_v15, %v8107_v60  ;;  %v483_v6 = vrot.slane %v482_v48, 4  ;;  %v487_v53 = vrot.slane %v485_v50, 5  ;;  %v501_v34 = vrot.slane %v499_v38, 5  ;;  %v8166_v50 = vld [vmem:[%s7681_s26 + $0x80] sm:$0xf] }
  0x57   : > { %1004 = vmatpush.bf16.msra.mxu0 %v7674_v7  ;;  %v7298_v7 = vld [vmem:[%s10339_s1 + $0x188] sm:$0xff]  ;;  %v8144_v8 = vsel %vm7751_vm5, %v5904_v4, %v851_v33  ;;  %v497_v4 = vrot.slane %v496_v55, 4  ;;  %v5914_v33 = vrot.slane %v8062_v41, 9  ;;  %v5915_v38 = vrot.slane %v8070_v0, 9 }
  0x58   : > { %1630 = vmatpush.bf16.msrb.mxu2 %v7298_v7  ;;  %10464 = vst [vmem:[#allocation7_spill] sm:$0xff] %v8122_v59  ;;  %v8148_v7 = vsel %vm7751_vm5, %v5905_v43, %v855_v29  ;;  %v10365_v5 = vunpack.c.l.b16 %v8144_v8  ;;  %v891_v43 = vrot.slane %v277_v31, 5  ;;  %v895_v48 = vrot.slane %v279_v1, 5  ;;  %v7290_v29 = vld [vmem:[%s10339_s1 + $0x148] sm:$0xff]  ;;  %v7273_v31 = vld [vmem:[%s10339_s1 + $0xc0] sm:$0xff] }
  0x59   : > { %v10362_v51 = vunpack.c.l.b16 %v8148_v7  ;;  %v8176_v55 = vld [vmem:[%s7681_s26 + $0x88] sm:$0xf]  ;;  %1492 = vmatpush.bf16.msrb.mxu1 %v7290_v29  ;;  %1159 = vmatpush.bf16.msrb.mxu3 %v7273_v31  ;;  %v7297_v1 = vld [vmem:[%s10339_s1 + $0x180] sm:$0xff]  ;;  %v488_v61 = vsel %vm7731_vm4, %v483_v6, %v487_v53 }
  0x5a   : > { %v8193_v29 = vsel %vm7751_vm5, %v5915_v38, %v895_v48  ;;  %v518_v31 = vshrl.u32 %v8176_v55, 16  ;;  %v8198_v53 = vunpack.c.l.b16 %v488_v61  ;;  %v10371_v61 = vunpack.c.l.b16 %v8070_v0 }
  0x5b   : > { %1005 = vmatpush.bf16.msra.mxu0 %v7705_v18  ;;  %v8128_v18 = vpack.c.b16 %v10363_v13, %v10364_v11  ;;  %v504_v13 = vshrl.u32 %v8166_v50, 16  ;;  %v507_v11 = vshll.u32 %v8166_v50, 16 }
  0x5c   : > { %1631 = vmatpush.bf16.msrb.mxu2 %v7297_v1 }
  0x5d   : > { %v506_v38 = vrot.slane %v504_v13, 4  ;;  %v509_v48 = vrot.slane %v507_v11, 5 }
  0x5e   : > { %661 = vmatmul.bf16.gmra.mxu3 %v8122_v59  ;;  %786 = vmatmul.bf16.gmra.mxu0 %v8128_v18 }
  0x5f   : > { %1006 = vmatpush.bf16.msra.mxu0 %v7742_v42  ;;  %v8160_v42 = vpack.c.b16 %v10362_v51, %v10365_v5  ;;  %v502_v51 = vsel %vm7731_vm4, %v497_v4, %v501_v34  ;;  %v521_v5 = vshll.u32 %v8176_v55, 16  ;;  %v7288_v34 = vld [vmem:[%s10339_s1 + $0x138] sm:$0xff]  ;;  %v7289_v4 = vld [vmem:[%s10339_s1 + $0x140] sm:$0xff] }
  0x60   : > { %1035 = vmatmul.bf16.gmra.mxu2 %v8134_v16  ;;  %806 = vmatmul.bf16.gmra.mxu1 %v8140_v35  ;;  %v8200_v6 = vunpack.c.l.b16 %v502_v51  ;;  %v520_v51 = vrot.slane %v518_v31, 4  ;;  %v283_v16 = vld [vmem:[%s7681_s26 + $0x8c] sm:$0x1] }
  0x61   : > { %v523_v1 = vrot.slane %v521_v5, 5  ;;  %1493 = vmatpush.bf16.msrb.mxu1 %v7289_v4  ;;  %v510_v5 = vor.u32 %v509_v48, %v506_v38  ;;  %v527_v59 = vshll.u32 %v283_v16, 16 }
  0x62   : > { %10466 = vst [vmem:[#allocation9_spill] sm:$0xff] %v8200_v6  ;;  %v8220_v13 = vpack.c.b16 %v8200_v6, %v8198_v53  ;;  %v7286_v6 = vld [vmem:[%s10339_s1 + $0x128] sm:$0xff] }
  0x63   : > { %1007 = vmatpush.bf16.msra.mxu0 %v7774_v63  ;;  %v8189_v63 = vsel %vm7751_vm5, %v5914_v33, %v891_v43  ;;  %v10370_v43 = vunpack.c.l.b16 %v8193_v29  ;;  %v7287_v33 = vld [vmem:[%s10339_s1 + $0x130] sm:$0xff]  ;;  %v524_v4 = vor.u32 %v523_v1, %v520_v51  ;;  %v10468_v51 = vunpack.c.l.b16 %v8058_v46  ;;  %v7285_v46 = vld [vmem:[%s10339_s1 + $0x120] sm:$0xff] }
  0x64   : > { %v10467_v11 = vunpack.c.l.b16 %v8189_v63  ;;  %v10469_v1 = vunpack.c.l.b16 %v8144_v8 }
  0x65   : > { %v525_v48 = vrot.slane %v524_v4, 4  ;;  %v903_v4 = vrot.slane %v283_v16, 5 }
  0x66   : > { %v8226_v31 = vpack.c.b16 %v10370_v43, %v10467_v11  ;;  %v511_v11 = vrot.slane %v510_v5, 4  ;;  %v529_v43 = vrot.slane %v527_v59, 5  ;;  %v5916_v5 = vrot.slane %v8166_v50, 9  ;;  %v7328_v59 = vld [vmem:[%s10339_s1 + $0x278] sm:$0xff] }
  0x67   : > { %1008 = vmatpush.bf16.msra.mxu0 %v7807_v26  ;;  %v10372_v26 = vunpack.c.l.b16 %v8062_v41  ;;  %2156 = vmatpush.bf16.msra.mxu1 %v7328_v59  ;;  %v7311_v59 = vld [vmem:[%s10339_s1 + $0x1f0] sm:$0xff] }
  0x6b   : > { %1009 = vmatpush.bf16.msra.mxu0 %v7850_v54  ;;  %v8232_v54 = vpack.c.b16 %v10371_v61, %v10372_v26  ;;  %v1422_v61 = vpack.c.b16 %v10469_v1, %v10468_v51  ;;  %v899_v26 = vrot.slane %v281_v28, 5 }
  0x6d   : > { %v8265_v16 = vsel %vm7751_vm5, %v5916_v5, %v899_v26  ;;  %v707_v26 = vunpack.c.l.b16 %v8166_v50 }
  0x6e   : > { %666 = vmatmul.bf16.gmra.mxu3 %v8220_v13  ;;  %1010 = vmatmul.bf16.vlgmr.msra.gmra.mxu0 %v8067_v36  ;;  %v7336_v36 = vld [vmem:[%s10339_s1 + $0x2b8] sm:$0xff] }
  0x6f   : > { %1328 = vmatpush.bf16.msrb.mxu0 %v7288_v34  ;;  %v513_v34 = vshll.u32 %v281_v28, 16  ;;  %2542 = vmatpush.bf16.msra.mxu2 %v7336_v36  ;;  %v530_v28 = vsel %vm7731_vm4, %v525_v48, %v529_v43  ;;  %v7283_v48 = vld [vmem:[%s10339_s1 + $0x110] sm:$0xff] }
  0x70   : > { %1040 = vmatmul.bf16.gmra.mxu2 %v8226_v31  ;;  %811 = vmatmul.bf16.gmra.mxu1 %v8232_v54  ;;  %v8276_v1 = vunpack.c.l.b16 %v530_v28  ;;  %v7281_v28 = vld [vmem:[%s10339_s1 + $0x100] sm:$0xff] }
  0x71   : > { %v515_v38 = vrot.slane %v513_v34, 5  ;;  %v5917_v34 = vrot.slane %v8176_v55, 9 }
  0x73   : > { %1329 = vmatpush.bf16.msrb.mxu0 %v7287_v33  ;;  %v7312_v33 = vld [vmem:[%s10339_s1 + $0x1f8] sm:$0xff]  ;;  %v516_v8 = vsel %vm7731_vm4, %v511_v11, %v515_v38  ;;  %v936_v11 = vunpack.c.l.b16 %v8265_v16  ;;  %v10374_v38 = vunpack.c.l.b16 %v8176_v55 }
  0x74   : > { %1788 = vmatpush.bf16.msra.mxu3 %v7312_v33  ;;  %v7284_v33 = vld [vmem:[%s10339_s1 + $0x118] sm:$0xff]  ;;  %v8274_v51 = vunpack.c.l.b16 %v516_v8  ;;  %v7327_v8 = vld [vmem:[%s10339_s1 + $0x270] sm:$0xff] }
  0x75   : > { %2157 = vmatpush.bf16.msra.mxu1 %v7327_v8  ;;  %v10476_v8 = vunpack.c.l.b16 %v7785_v9  ;;  %v7317_v9 = vld [vmem:[%s10339_s1 + $0x220] sm:$0xff] }
  0x76   : > { %v8287_v36 = vpack.c.b16 %v8276_v1, %v8274_v51 }
  0x77   : > { %1330 = vmatpush.bf16.msrb.mxu0 %v7286_v6  ;;  %v8269_v6 = vsel %vm7751_vm5, %v5917_v34, %v903_v4  ;;  %v8299_v34 = vpack.c.b16 %v10374_v38, %v707_v26  ;;  %v7282_v4 = vld [vmem:[%s10339_s1 + $0x108] sm:$0xff] }
  0x78   : > { %v10373_v43 = vunpack.c.l.b16 %v8269_v6  ;;  %1789 = vmatpush.bf16.msra.mxu3 %v7311_v59  ;;  %v10472_v59 = vpack.c.b16 %v7886_v45, %v7781_v3  ;;  %v7326_v3 = vld [vmem:[%s10339_s1 + $0x268] sm:$0xff]  ;;  %v10473_v45 = vunpack.c.l.b16 %v7798_v23  ;;  %v7309_v23 = vld [vmem:[%s10339_s1 + $0x1e0] sm:$0xff] }
  0x79   : > { %2158 = vmatpush.bf16.msra.mxu1 %v7326_v3 }
  0x7a   : > { %v8293_v5 = vpack.c.b16 %v10373_v43, %v936_v11  ;;  %v10470_v43 = vunpack.c.l.b16 %v7693_v12  ;;  %v7334_v12 = vld [vmem:[%s10339_s1 + $0x2a8] sm:$0xff] }
  0x7b   : > { %1331 = vmatpush.bf16.msrb.mxu0 %v7285_v46  ;;  %v7335_v46 = vld [vmem:[%s10339_s1 + $0x2b0] sm:$0xff] }
  0x7c   : > { %2543 = vmatpush.bf16.msra.mxu2 %v7335_v46  ;;  %v7310_v46 = vld [vmem:[%s10339_s1 + $0x1e8] sm:$0xff] }
  0x7d   : > { %1790 = vmatpush.bf16.msra.mxu3 %v7310_v46  ;;  %v10478_v46 = vunpack.c.l.b16 %v7815_v32 }
  0x7e   : > { %671 = vmatmul.bf16.gmra.mxu3 %v8287_v36  ;;  %1015 = vmatmul.bf16.gmra.mxu0 %v8160_v42 }
  0x7f   : > { %1332 = vmatpush.bf16.msrb.mxu0 %v7284_v33  ;;  %v7320_v33 = vld [vmem:[%s10339_s1 + $0x238] sm:$0xff] }
  0x80   : > { %1045 = vmatmul.bf16.gmra.mxu2 %v8293_v5  ;;  %816 = vmatmul.bf16.gmra.mxu1 %v8299_v34 }
  0x81   : > { %2544 = vmatpush.bf16.msra.mxu2 %v7334_v12  ;;  %1791 = vmatpush.bf16.msra.mxu3 %v7309_v23 }
  0x83   : > { %1333 = vmatpush.bf16.msrb.mxu0 %v7283_v48  ;;  %v7319_v48 = vld [vmem:[%s10339_s1 + $0x230] sm:$0xff] }
  0x87   : > { %1334 = vmatpush.bf16.msrb.mxu0 %v7282_v4  ;;  %v10471_v4 = vunpack.c.l.b16 %v7759_v57  ;;  %v7318_v57 = vld [vmem:[%s10339_s1 + $0x228] sm:$0xff] }
  0x89   : > { %v1088_v38 = vpack.c.b16 %v10471_v4, %v10470_v43  ;;  %v1265_v43 = vpack.c.b16 %v7830_v40, %v7949_v27  ;;  %v7333_v40 = vld [vmem:[%s10339_s1 + $0x2a0] sm:$0xff] }
  0x8a   : > { %2545 = vmatpush.bf16.msra.mxu2 %v7333_v40  ;;  %v265_v4 = vld [vmem:[%s7681_s26 + $0x44] sm:$0x1]  ;;  %v8392_v40 = vld [vmem:[%s7681_s26 + $0x48] sm:$0xf] }
  0x8b   : > { %1335 = vmatpush.bf16.msrb.mxu0 %v7281_v28 }
  0x8e   : > { %1160 = vmatmul.bf16.vlgmr.msrb.gmra.mxu3 %v1088_v38  ;;  %1336 = vmatmul.bf16.vlgmr.msrb.gmra.mxu0 %v10472_v59  ;;  %v10475_v38 = vunpack.c.l.b16 %v8148_v7  ;;  %v10477_v59 = vunpack.c.l.b16 %v7721_v30 }
  0x8f   : > { %1934 = vmatpush.bf16.msra.mxu0 %v7320_v33 }
  0x90   : > { %1632 = vmatmul.bf16.vlgmr.msrb.gmra.mxu2 %v8128_v18  ;;  %1494 = vmatmul.bf16.vlgmr.msrb.gmra.mxu1 %v1422_v61  ;;  %v10474_v18 = vunpack.c.l.b16 %v7715_v22  ;;  %v1423_v28 = vpack.c.b16 %v10476_v8, %v10475_v38  ;;  %v264_v22 = vld [vmem:[%s7681_s26 + $0x40] sm:$0xf]  ;;  %v1090_v12 = vpack.c.b16 %v10478_v46, %v10477_v59  ;;  %v1227_v38 = vshll.u32 %v265_v4, 16 }
  0x91   : > { %v1218_v33 = vshrl.u32 %v264_v22, 16  ;;  %v1086_v59 = vunpack.c.l.b16 %v264_v22 }
  0x92   : > { %v1089_v61 = vpack.c.b16 %v10474_v18, %v10473_v45  ;;  %v10479_v45 = vunpack.c.l.b16 %v7795_v21  ;;  %v10480_v18 = vunpack.c.l.b16 %v7930_v56  ;;  %v1229_v32 = vrot.slane %v1227_v38, 5 }
  0x93   : > { %1935 = vmatpush.bf16.msra.mxu0 %v7319_v48  ;;  %v1221_v48 = vshll.u32 %v264_v22, 16  ;;  %v1220_v27 = vrot.slane %v1218_v33, 4  ;;  %v1397_v21 = vrot.slane %v265_v4, 5  ;;  %v7324_v4 = vld [vmem:[%s10339_s1 + $0x258] sm:$0xff] }
  0x95   : > { %v1223_v7 = vrot.slane %v1221_v48, 5 }
  0x97   : > { %1936 = vmatpush.bf16.msra.mxu0 %v7318_v57  ;;  %v1266_v57 = vpack.c.b16 %v7956_v17, %v7844_v49  ;;  %v7308_v49 = vld [vmem:[%s10339_s1 + $0x1d8] sm:$0xff]  ;;  %v6062_v17 = vrot.slane %v264_v22, 9 }
  0x98   : > { %1792 = vmatpush.bf16.msra.mxu3 %v7308_v49 }
  0x9b   : > { %1937 = vmatpush.bf16.msra.mxu0 %v7317_v9 }
  0x9e   : > { %1165 = vmatmul.bf16.gmra.mxu3 %v1089_v61  ;;  %1341 = vmatmul.bf16.gmra.mxu0 %v1265_v43  ;;  %v1424_v61 = vpack.c.b16 %v10480_v18, %v10479_v45  ;;  %v1224_v43 = vor.u32 %v1223_v7, %v1220_v27  ;;  %v7332_v27 = vld [vmem:[%s10339_s1 + $0x298] sm:$0xff] }
  0x9f   : > { %v7316_v7 = vld [vmem:[%s10339_s1 + $0x218] sm:$0xff]  ;;  %2546 = vmatpush.bf16.msra.mxu2 %v7332_v27  ;;  %v7315_v27 = vld [vmem:[%s10339_s1 + $0x210] sm:$0xff] }
  0xa0   : > { %1637 = vmatmul.bf16.gmra.mxu2 %v7871_v20  ;;  %1499 = vmatmul.bf16.gmra.mxu1 %v1423_v28  ;;  %v7325_v20 = vld [vmem:[%s10339_s1 + $0x260] sm:$0xff]  ;;  %v1225_v30 = vrot.slane %v1224_v43, 4  ;;  %v10481_v43 = vunpack.c.l.b16 %v7839_v47  ;;  %v7307_v47 = vld [vmem:[%s10339_s1 + $0x1d0] sm:$0xff] }
  0xa1   : > { %2159 = vmatpush.bf16.msra.mxu1 %v7325_v20  ;;  %v8398_v20 = vsel %vm7751_vm5, %v6062_v17, %v1397_v21  ;;  %1938 = vmatpush.bf16.msra.mxu0 %v7316_v7  ;;  %v7323_v7 = vld [vmem:[%s10339_s1 + $0x250] sm:$0xff] }
  0xa2   : > { %v1230_v48 = vsel %vm7731_vm4, %v1225_v30, %v1229_v32  ;;  %v1091_v38 = vpack.c.b16 %v1086_v59, %v10481_v43  ;;  %v10482_v32 = vunpack.c.l.b16 %v7934_v58  ;;  %1793 = vmatpush.bf16.msra.mxu3 %v7307_v47  ;;  %v1268_v43 = vpack.c.b16 %v8107_v60, %v8038_v62 }
  0xa3   : > { %v8409_v46 = vunpack.c.l.b16 %v1230_v48 }
  0xa5   : > { %2160 = vmatpush.bf16.msra.mxu1 %v7324_v4  ;;  %1939 = vmatpush.bf16.msra.mxu0 %v7315_v27  ;;  %v10487_v27 = vunpack.c.l.b16 %v7998_v39  ;;  %v8485_v39 = vld [vmem:[%s7681_s26 + $0x90] sm:$0xf] }
  0xa9   : > { %2161 = vmatpush.bf16.msra.mxu1 %v7323_v7  ;;  %v10488_v7 = vunpack.c.l.b16 %v8062_v41  ;;  %v7305_v41 = vld [vmem:[%s10339_s1 + $0x1c0] sm:$0xff] }
  0xab   : > { %v8377_v3 = vpop.f32.mrf.mxu0 }
  0xad   : > { %v792_v8 = vpop.f32.mrf.mxu1 }
  0xae   : > { %1170 = vmatmul.bf16.gmra.mxu3 %v1090_v12  ;;  %1346 = vmatmul.bf16.gmra.mxu0 %v1266_v57  ;;  %v1570_v12 = vunpack.c.l.b16 %v8392_v40  ;;  %v10376_v57 = vunpack.c.l.b16 %v8398_v20 }
  0xb0   : > { %1642 = vmatmul.bf16.gmra.mxu2 %v7989_v19  ;;  %1504 = vmatmul.bf16.gmra.mxu1 %v1424_v61  ;;  %v1572_v22 = vpack.c.b16 %v1570_v12, %v1086_v59  ;;  %v1425_v49 = vpack.c.b16 %v10376_v57, %v10482_v32 }
  0xb1   : > { %v647_v28 = vpop.f32.mrf.mxu3 }
  0xb2   : > { %v793_v56 = vadd.f32 %v792_v8, %v647_v28  ;;  %v1267_v8 = vpack.c.b16 %v8409_v46, %v7958_v24 }
  0xb3   : > { %v1021_v23 = vpop.f32.mrf.mxu2  ;;  %v8387_v33 = vpop.f32.mrf.mxu0 }
  0xb4   : > { %v8394_v19 = vadd.f32 %v1021_v23, %v793_v56 }
  0xb5   : > { %v794_v9 = vpop.f32.mrf.mxu1 }
  0xb9   : > { %v649_v45 = vpop.f32.mrf.mxu3 }
  0xba   : > { %v795_v18 = vadd.f32 %v794_v9, %v649_v45  ;;  %v7331_v9 = vld [vmem:[%s10339_s1 + $0x290] sm:$0xff]  ;;  %v10483_v45 = vunpack.c.l.b16 %v7918_v44  ;;  %v7306_v44 = vld [vmem:[%s10339_s1 + $0x1c8] sm:$0xff] }
  0xbb   : > { %v1023_v61 = vpop.f32.mrf.mxu2  ;;  %v642_v30 = vpop.f32.mrf.mxu0  ;;  %2547 = vmatpush.bf16.msra.mxu2 %v7331_v9  ;;  %1794 = vmatpush.bf16.msra.mxu3 %v7306_v44  ;;  %v7329_v44 = vld [vmem:[%s10339_s1 + $0x280] sm:$0xff] }
  0xbc   : > { %v8421_v17 = vadd.f32 %v1023_v61, %v795_v18  ;;  %v10484_v18 = vunpack.c.l.b16 %v7995_v2 }
  0xbd   : > { %v797_v21 = vpop.f32.mrf.mxu1 }
  0xbe   : > { %1175 = vmatmul.bf16.gmra.mxu3 %v1091_v38  ;;  %1351 = vmatmul.bf16.gmra.mxu0 %v1267_v8  ;;  %v1092_v61 = vpack.c.b16 %v10484_v18, %v10483_v45  ;;  %v10485_v8 = vunpack.c.l.b16 %v8025_v14  ;;  %v10489_v45 = vunpack.c.l.b16 %v8098_v10  ;;  %v10490_v18 = vunpack.c.l.b16 %v8189_v63 }
  0xbf   : > { %v1235_v63 = vshll.u32 %v8485_v39, 16  ;;  %1795 = vmatpush.bf16.msra.mxu3 %v7305_v41 }
  0xc0   : > { %1647 = vmatmul.bf16.gmra.mxu2 %v1572_v22  ;;  %1509 = vmatmul.bf16.gmra.mxu1 %v1425_v49  ;;  %v10486_v22 = vunpack.c.l.b16 %v8094_v25 }
  0xc1   : > { %v652_v28 = vpop.f32.mrf.mxu3 }
  0xc2   : > { %v798_v24 = vadd.f32 %v797_v21, %v652_v28  ;;  %v1426_v32 = vpack.c.b16 %v10486_v22, %v10485_v8 }
  0xc3   : > { %v1026_v56 = vpop.f32.mrf.mxu2  ;;  %v644_v23 = vpop.f32.mrf.mxu0 }
  0xc4   : > { %v8426_v58 = vadd.f32 %v1026_v56, %v798_v24  ;;  %v7314_v24 = vld [vmem:[%s10339_s1 + $0x208] sm:$0xff] }
  0xc5   : > { %v799_v48 = vpop.f32.mrf.mxu1  ;;  %v7322_v56 = vld [vmem:[%s10339_s1 + $0x248] sm:$0xff]  ;;  %1940 = vmatpush.bf16.msra.mxu0 %v7314_v24 }
  0xc6   : > { %2162 = vmatpush.bf16.msra.mxu1 %v7322_v56 }
  0xc9   : > { %v654_v4 = vpop.f32.mrf.mxu3 }
  0xca   : > { %v800_v59 = vadd.f32 %v799_v48, %v654_v4  ;;  %v1093_v4 = vpack.c.b16 %v10488_v7, %v10487_v27  ;;  %v10492_v7 = vld [vmem:[#allocation9_spill] sm:$0xff] }
  0xcb   : > { %v1028_v12 = vpop.f32.mrf.mxu2  ;;  %v782_v38 = vpop.f32.mrf.mxu0 }
  0xcc   : > { %v8447_v49 = vadd.f32 %v1028_v12, %v800_v59  ;;  %v8450_v21 = vadd.f32 %v782_v38, %v8377_v3  ;;  %v1269_v59 = vpack.c.b16 %v8198_v53, %v8109_v15  ;;  %v1232_v15 = vshrl.u32 %v8485_v39, 16 }
  0xcd   : > { %v802_v47 = vpop.f32.mrf.mxu1 }
  0xce   : > { %1180 = vmatmul.bf16.gmra.mxu3 %v1092_v61  ;;  %1356 = vmatmul.bf16.gmra.mxu0 %v1268_v43  ;;  %v1427_v61 = vpack.c.b16 %v10490_v18, %v10489_v45 }
  0xd0   : > { %1652 = vmatmul.bf16.gmra.mxu2 %v8140_v35  ;;  %1514 = vmatmul.bf16.gmra.mxu1 %v1426_v32  ;;  %v7330_v35 = vld [vmem:[%s10339_s1 + $0x288] sm:$0xff] }
  0xd1   : > { %v657_v2 = vpop.f32.mrf.mxu3  ;;  %2548 = vmatpush.bf16.msra.mxu2 %v7330_v35 }
  0xd2   : > { %v803_v14 = vadd.f32 %v802_v47, %v657_v2  ;;  %v7313_v2 = vld [vmem:[%s10339_s1 + $0x200] sm:$0xff] }
  0xd3   : > { %v1031_v62 = vpop.f32.mrf.mxu2  ;;  %v784_v25 = vpop.f32.mrf.mxu0  ;;  %1941 = vmatpush.bf16.msra.mxu0 %v7313_v2 }
  0xd4   : > { %v8456_v60 = vadd.f32 %v1031_v62, %v803_v14  ;;  %v8459_v3 = vadd.f32 %v784_v25, %v8387_v33  ;;  %v7321_v14 = vld [vmem:[%s10339_s1 + $0x240] sm:$0xff]  ;;  %v1234_v62 = vrot.slane %v1232_v15, 4  ;;  %v1237_v25 = vrot.slane %v1235_v63, 5  ;;  %v6263_v15 = vld [vmem:[%s7681_s26 + $0x5c] sm:$0x1] }
  0xd5   : > { %v804_v28 = vpop.f32.mrf.mxu1  ;;  %2549 = vmatpush.bf16.msra.mxu2 %v7329_v44  ;;  %2163 = vmatpush.bf16.msra.mxu1 %v7321_v14 }
  0xd6   : > { %v1238_v24 = vor.u32 %v1237_v25, %v1234_v62  ;;  %v8548_v62 = vld [vmem:[%s7681_s26 + $0x98] sm:$0xf] }
  0xd9   : > { %v659_v48 = vpop.f32.mrf.mxu3 }
  0xda   : > { %v805_v33 = vadd.f32 %v804_v28, %v659_v48  ;;  %v285_v28 = vld [vmem:[%s7681_s26 + $0x94] sm:$0x1] }
  0xdb   : > { %v1033_v9 = vpop.f32.mrf.mxu2  ;;  %v787_v12 = vpop.f32.mrf.mxu0  ;;  %v1241_v56 = vshll.u32 %v285_v28, 16  ;;  %v1401_v16 = vrot.slane %v285_v28, 5 }
  0xdc   : > { %v8480_v43 = vadd.f32 %v1033_v9, %v805_v33  ;;  %v8482_v38 = vadd.f32 %v787_v12, %v642_v30  ;;  %v10491_v9 = vunpack.c.l.b16 %v8070_v0  ;;  %v10493_v12 = vunpack.c.l.b16 %v8193_v29 }
  0xdd   : > { %v807_v8 = vpop.f32.mrf.mxu1  ;;  %v6063_v29 = vrot.slane %v8485_v39, 9 }
  0xde   : > { %1185 = vmatmul.bf16.gmra.mxu3 %v1093_v4  ;;  %1361 = vmatmul.bf16.gmra.mxu0 %v1269_v59  ;;  %v1094_v27 = vpack.c.b16 %v707_v26, %v10491_v9  ;;  %v1270_v4 = vpack.c.b16 %v8274_v51, %v10492_v7  ;;  %v1428_v45 = vpack.c.b16 %v936_v11, %v10493_v12  ;;  %v1239_v26 = vrot.slane %v1238_v24, 4 }
  0xdf   : > { %v1243_v51 = vrot.slane %v1241_v56, 5  ;;  %v2245_v24 = vshll.u32 %v6263_v15, 16  ;;  %v1087_v7 = vunpack.c.l.b16 %v8485_v39  ;;  %v1571_v12 = vunpack.c.l.b16 %v8548_v62  ;;  %v7368_v39 = vld [vmem:[%s10339_s1 + $0x3b8] sm:$0xff]  ;;  %v8576_v15 = vld [vmem:[%s7681_s26 + $0x54] sm:$0x1] }
  0xe0   : > { %1657 = vmatmul.bf16.gmra.mxu2 %v8232_v54  ;;  %1519 = vmatmul.bf16.gmra.mxu1 %v1427_v61 }
  0xe1   : > { %v662_v10 = vpop.f32.mrf.mxu3  ;;  %3268 = vmatpush.bf16.msrb.mxu2 %v7368_v39 }
  0xe2   : > { %v808_v53 = vadd.f32 %v807_v8, %v662_v10  ;;  %v8533_v10 = vld [vmem:[%s7681_s26 + $0x50] sm:$0xf] }
  0xe3   : > { %v1036_v30 = vpop.f32.mrf.mxu2  ;;  %v789_v22 = vpop.f32.mrf.mxu0  ;;  %v2222_v25 = vshrl.u32 %v8533_v10, 16  ;;  %v2225_v28 = vshll.u32 %v8533_v10, 16 }
  0xe4   : > { %v8493_v32 = vadd.f32 %v1036_v30, %v808_v53  ;;  %v8495_v47 = vadd.f32 %v789_v22, %v644_v23  ;;  %v8508_v23 = vld [vmem:[%s7681_s26 + $0x58] sm:$0xf]  ;;  %v1244_v53 = vsel %vm7731_vm4, %v1239_v26, %v1243_v51  ;;  %v8539_v30 = vld [vmem:[%s7681_s26 + $0x60] sm:$0xf]  ;;  %v2247_v26 = vrot.slane %v2245_v24, 5 }
  0xe5   : > { %v809_v54 = vpop.f32.mrf.mxu1  ;;  %v2236_v18 = vshrl.u32 %v8508_v23, 16  ;;  %v2239_v61 = vshll.u32 %v8508_v23, 16  ;;  %v2250_v44 = vshrl.u32 %v8539_v30, 16  ;;  %v2253_v2 = vshll.u32 %v8539_v30, 16 }
  0xe6   : > { %v2227_v51 = vrot.slane %v2225_v28, 5 }
  0xe7   : > { %v2238_v11 = vrot.slane %v2236_v18, 4  ;;  %v2241_v41 = vrot.slane %v2239_v61, 5  ;;  %v2252_v9 = vrot.slane %v2250_v44, 4 }
  0xe9   : > { %v664_v35 = vpop.f32.mrf.mxu3 }
  0xea   : > { %v810_v48 = vadd.f32 %v809_v54, %v664_v35  ;;  %v8543_v54 = vsel %vm7751_vm5, %v6063_v29, %v1401_v16  ;;  %v2242_v35 = vor.u32 %v2241_v41, %v2238_v11  ;;  %v7352_v29 = vld [vmem:[%s10339_s1 + $0x338] sm:$0xff] }
  0xeb   : > { %v1038_v33 = vpop.f32.mrf.mxu2  ;;  %v1011_v59 = vpop.f32.mrf.mxu0  ;;  %v10375_v61 = vunpack.c.l.b16 %v8543_v54  ;;  %v7360_v16 = vld [vmem:[%s10339_s1 + $0x378] sm:$0xff]  ;;  %2934 = vmatpush.bf16.msrb.mxu0 %v7352_v29 }
  0xec   : > { %v8522_v8 = vadd.f32 %v1038_v33, %v810_v48  ;;  %v8525_v0 = vadd.f32 %v1011_v59, %v8450_v21  ;;  %v7344_v21 = vld [vmem:[%s10339_s1 + $0x2f8] sm:$0xff]  ;;  %v8561_v59 = vunpack.c.l.b16 %v1244_v53  ;;  %3110 = vmatpush.bf16.msrb.mxu1 %v7360_v16 }
  0xed   : > { %v812_v50 = vpop.f32.mrf.mxu1  ;;  %2784 = vmatpush.bf16.msrb.mxu3 %v7344_v21 }
  0xee   : > { %1190 = vmatmul.bf16.gmra.mxu3 %v1094_v27  ;;  %1366 = vmatmul.bf16.gmra.mxu0 %v1270_v4  ;;  %v2255_v27 = vrot.slane %v2253_v2, 5  ;;  %v8559_v4 = vld [vmem:[%s7681_s26 + $0x64] sm:$0x1]  ;;  %v1271_v44 = vpack.c.b16 %v8561_v59, %v8276_v1 }
  0xef   : > { %v2259_v18 = vshll.u32 %v8559_v4, 16 }
  0xf0   : > { %1662 = vmatmul.bf16.gmra.mxu2 %v8299_v34  ;;  %1524 = vmatmul.bf16.gmra.mxu1 %v1428_v45  ;;  %v2256_v45 = vor.u32 %v2255_v27, %v2252_v9 }
  0xf1   : > { %v667_v63 = vpop.f32.mrf.mxu3  ;;  %v2261_v41 = vrot.slane %v2259_v18, 5  ;;  %v8603_v18 = vld [vmem:[%s7681_s26 + $0x68] sm:$0xf] }
  0xf2   : > { %v813_v22 = vadd.f32 %v812_v50, %v667_v63  ;;  %v2224_v50 = vrot.slane %v2222_v25, 4  ;;  %v2257_v11 = vrot.slane %v2256_v45, 4  ;;  %v10495_v25 = vunpack.c.l.b16 %v8269_v6 }
  0xf3   : > { %v1041_v34 = vpop.f32.mrf.mxu2  ;;  %v1013_v14 = vpop.f32.mrf.mxu0  ;;  %v2231_v6 = vshll.u32 %v8576_v15, 16  ;;  %v2078_v45 = vunpack.c.l.b16 %v8539_v30  ;;  %v2264_v16 = vshrl.u32 %v8603_v18, 16  ;;  %v10505_v30 = vld [vmem:[#allocation2_spill] sm:$0xff] }
  0xf4   : > { %v8552_v56 = vadd.f32 %v1041_v34, %v813_v22  ;;  %v8555_v48 = vadd.f32 %v1013_v14, %v8459_v3  ;;  %v2243_v3 = vrot.slane %v2242_v35, 4  ;;  %v10494_v22 = vunpack.c.l.b16 %v8176_v55 }
  0xf5   : > { %v814_v33 = vpop.f32.mrf.mxu1  ;;  %v1573_v14 = vpack.c.b16 %v1571_v12, %v1087_v7  ;;  %v1429_v28 = vpack.c.b16 %v10375_v61, %v10495_v25  ;;  %v2262_v55 = vsel %vm7731_vm4, %v2257_v11, %v2261_v41  ;;  %v2228_v9 = vor.u32 %v2227_v51, %v2224_v50  ;;  %v8625_v25 = vld [vmem:[%s7681_s26 + $0x6c] sm:$0x1] }
  0xf6   : > { %v1095_v34 = vpack.c.b16 %v1087_v7, %v10494_v22  ;;  %v2248_v35 = vsel %vm7731_vm4, %v2243_v3, %v2247_v26  ;;  %v2077_v7 = vunpack.c.l.b16 %v8508_v23  ;;  %v8599_v12 = vunpack.c.l.b16 %v2262_v55  ;;  %v7343_v26 = vld [vmem:[%s10339_s1 + $0x2f0] sm:$0xff]  ;;  %10496 = vst [vmem:[#allocation9_spill] sm:$0xff] %v8625_v25 }
  0xf7   : > { %v8596_v27 = vunpack.c.l.b16 %v2248_v35  ;;  %v2233_v3 = vrot.slane %v2231_v6, 5  ;;  %v2267_v11 = vshll.u32 %v8603_v18, 16  ;;  %2785 = vmatpush.bf16.msrb.mxu3 %v7343_v26  ;;  %v7359_v35 = vld [vmem:[%s10339_s1 + $0x370] sm:$0xff] }
  0xf8   : > { %v8612_v23 = vpack.c.b16 %v2078_v45, %v2077_v7  ;;  %3111 = vmatpush.bf16.msrb.mxu1 %v7359_v35 }
  0xf9   : > { %v669_v21 = vpop.f32.mrf.mxu3 }
  0xfa   : > { %v815_v63 = vadd.f32 %v814_v33, %v669_v21 }
  0xfb   : > { %v1043_v53 = vpop.f32.mrf.mxu2  ;;  %v1016_v2 = vpop.f32.mrf.mxu0 }
  0xfc   : > { %v8590_v24 = vadd.f32 %v1043_v53, %v815_v63  ;;  %v8593_v1 = vadd.f32 %v1016_v2, %v8482_v38  ;;  %v2229_v38 = vrot.slane %v2228_v9, 4 }
  0xfd   : > { %v817_v33 = vpop.f32.mrf.mxu1 }
  0xfe   : > { %1195 = vmatmul.bf16.gmra.mxu3 %v1095_v34  ;;  %1371 = vmatmul.bf16.gmra.mxu0 %v1271_v44  ;;  %v2234_v22 = vsel %vm7731_vm4, %v2229_v38, %v2233_v3  ;;  %v2266_v34 = vrot.slane %v2264_v16, 4  ;;  %v2269_v44 = vrot.slane %v2267_v11, 5  ;;  %v2273_v38 = vshll.u32 %v8625_v25, 16  ;;  %v10497_v16 = vld [vmem:[#allocation4_spill] sm:$0xff] }
  0xff   : > { %v2462_v2 = vunpack.c.l.b16 %v2234_v22  ;;  %v8646_v22 = vld [vmem:[%s7681_s26 + $0x78] sm:$0xf] }
 0x100   : > { %1667 = vmatmul.bf16.gmra.mxu2 %v1573_v14  ;;  %1529 = vmatmul.bf16.gmra.mxu1 %v1429_v28  ;;  %v2076_v14 = vunpack.c.l.b16 %v8533_v10  ;;  %v7367_v28 = vld [vmem:[%s10339_s1 + $0x3b0] sm:$0xff]  ;;  %v2270_v6 = vor.u32 %v2269_v44, %v2266_v34  ;;  %10498 = vst [vmem:[#allocation4_spill] sm:$0xff] %v8646_v22  ;;  %v2292_v35 = vshrl.u32 %v8646_v22, 16 }
 0x101   : > { %v672_v51 = vpop.f32.mrf.mxu3  ;;  %3269 = vmatpush.bf16.msrb.mxu2 %v7367_v28  ;;  %v2478_v26 = vpack.c.b16 %v8596_v27, %v2462_v2 }
 0x102   : > { %v818_v39 = vadd.f32 %v817_v33, %v672_v51  ;;  %v2092_v51 = vpack.c.b16 %v2077_v7, %v2076_v14  ;;  %v2271_v11 = vrot.slane %v2270_v6, 4  ;;  %v7342_v7 = vld [vmem:[%s10339_s1 + $0x2e8] sm:$0xff] }
 0x103   : > { %v1046_v29 = vpop.f32.mrf.mxu2  ;;  %v1018_v41 = vpop.f32.mrf.mxu0  ;;  %2786 = vmatpush.bf16.msrb.mxu3 %v7342_v7 }
 0x104   : > { %v8616_v21 = vadd.f32 %v1046_v29, %v818_v39  ;;  %v8619_v63 = vadd.f32 %v1018_v41, %v8495_v47  ;;  %v7351_v47 = vld [vmem:[%s10339_s1 + $0x330] sm:$0xff]  ;;  %v2275_v41 = vrot.slane %v2273_v38, 5  ;;  %v10378_v38 = vunpack.c.l.b16 %v8603_v18 }
 0x105   : > { %v819_v53 = vpop.f32.mrf.mxu1  ;;  %2935 = vmatpush.bf16.msrb.mxu0 %v7351_v47 }
 0x109   : > { %v674_v55 = vpop.f32.mrf.mxu3 }
 0x10a   : > { %v820_v33 = vadd.f32 %v819_v53, %v674_v55  ;;  %v8643_v53 = vld [vmem:[%s7681_s26 + $0x70] sm:$0xf]  ;;  %v2295_v55 = vshll.u32 %v8646_v22, 16 }
 0x10b   : > { %v1048_v9 = vpop.f32.mrf.mxu2  ;;  %v1337_v3 = vpop.f32.mrf.mxu0  ;;  %v2278_v14 = vshrl.u32 %v8643_v53, 16  ;;  %v2281_v28 = vshll.u32 %v8643_v53, 16 }
 0x10c   : > { %v8638_v39 = vadd.f32 %v1048_v9, %v820_v33  ;;  %v2297_v7 = vrot.slane %v2295_v55, 5 }
 0x10d   : > { %v1495_v29 = vpop.f32.mrf.mxu1 }
 0x10e   : > { %1796 = vmatmul.bf16.vlgmr.msra.gmra.mxu3 %v10497_v16  ;;  %1942 = vmatmul.bf16.vlgmr.msra.gmra.mxu0 %v8160_v42  ;;  %v2276_v42 = vsel %vm7731_vm4, %v2271_v11, %v2275_v41  ;;  %v8662_v16 = vld [vmem:[%s7681_s26 + $0x74] sm:$0x1]  ;;  %v8665_v11 = vld [vmem:[%s7681_s26 + $0x7c] sm:$0x1]  ;;  %v2294_v41 = vrot.slane %v2292_v35, 4  ;;  %v8687_v35 = vpack.c.b16 %v10378_v38, %v2078_v45 }
 0x10f   : > { %v8658_v6 = vunpack.c.l.b16 %v2276_v42  ;;  %10500 = vst [vmem:[#allocation11_spill] sm:$0xff] %v8662_v16 }
 0x110   : > { %2550 = vmatmul.bf16.vlgmr.msra.gmra.mxu2 %v2478_v26  ;;  %2164 = vmatmul.bf16.vlgmr.msra.gmra.mxu1 %v2092_v51  ;;  %v2280_v26 = vrot.slane %v2278_v14, 4  ;;  %v2283_v51 = vrot.slane %v2281_v28, 5  ;;  %10501 = vst [vmem:[#allocation12_spill] sm:$0xff] %v8665_v11  ;;  %v2298_v50 = vor.u32 %v2297_v7, %v2294_v41  ;;  %v8698_v7 = vld [vmem:[%s7681_s26 + $0x80] sm:$0xf] }
 0x111   : > { %v1161_v34 = vpop.f32.mrf.mxu3  ;;  %10499 = vst [vmem:[#allocation10_spill] sm:$0xff] %v8658_v6 }
 0x112   : > { %v1201_v44 = vadd.f32 %v1161_v34, %v8525_v0  ;;  %10504 = vst [vmem:[#allocation15_spill] sm:$0xff] %v8687_v35 }
 0x113   : > { %v1633_v2 = vpop.f32.mrf.mxu2  ;;  %v1339_v47 = vpop.f32.mrf.mxu0 }
 0x114   : > { %v1377_v33 = vadd.f32 %v1337_v3, %v1201_v44  ;;  %v7366_v3 = vld [vmem:[%s10339_s1 + $0x3a8] sm:$0xff] }
 0x115   : > { %v1497_v9 = vpop.f32.mrf.mxu1  ;;  %v7358_v44 = vld [vmem:[%s10339_s1 + $0x368] sm:$0xff]  ;;  %3270 = vmatpush.bf16.msrb.mxu2 %v7366_v3 }
 0x116   : > { %v1535_v0 = vadd.f32 %v1495_v29, %v1377_v33  ;;  %v7350_v29 = vld [vmem:[%s10339_s1 + $0x328] sm:$0xff]  ;;  %v2284_v33 = vor.u32 %v2283_v51, %v2280_v26  ;;  %3112 = vmatpush.bf16.msrb.mxu1 %v7358_v44  ;;  %v2299_v51 = vrot.slane %v2298_v50, 4  ;;  %v1693_v44 = vshll.u32 %v8392_v40, 16 }
 0x117   : > { %2936 = vmatpush.bf16.msrb.mxu0 %v7350_v29 }
 0x118   : > { %v8667_v34 = vadd.f32 %v1633_v2, %v1535_v0  ;;  %v8681_v2 = vpack.c.b16 %v8658_v6, %v8599_v12  ;;  %v2287_v0 = vshll.u32 %v8662_v16, 16  ;;  %v10506_v6 = vld [vmem:[#allocation3_spill] sm:$0xff]  ;;  %v2285_v45 = vrot.slane %v2284_v33, 4 }
 0x119   : > { %v1163_v42 = vpop.f32.mrf.mxu3 }
 0x11a   : > { %10502 = vst [vmem:[#allocation13_spill] sm:$0xff] %v8667_v34  ;;  %v1202_v14 = vadd.f32 %v1163_v42, %v8555_v48  ;;  %v2301_v48 = vshll.u32 %v8665_v11, 16  ;;  %v2289_v26 = vrot.slane %v2287_v0, 5  ;;  %v2306_v0 = vshrl.u32 %v8698_v7, 16  ;;  %v8725_v11 = vld [vmem:[%s7681_s26 + $0x84] sm:$0x1] }
 0x11b   : > { %v1635_v28 = vpop.f32.mrf.mxu2  ;;  %10503 = vst [vmem:[#allocation14_spill] sm:$0xff] %v8681_v2  ;;  %v1342_v55 = vpop.f32.mrf.mxu0  ;;  %v2315_v25 = vshll.u32 %v8725_v11, 16 }
 0x11c   : > { %v1378_v42 = vadd.f32 %v1339_v47, %v1202_v14  ;;  %v2303_v3 = vrot.slane %v2301_v48, 5  ;;  %v7341_v47 = vld [vmem:[%s10339_s1 + $0x2e0] sm:$0xff]  ;;  %v2309_v48 = vshll.u32 %v8698_v7, 16 }
 0x11d   : > { %v1500_v61 = vpop.f32.mrf.mxu1  ;;  %2787 = vmatpush.bf16.msrb.mxu3 %v7341_v47 }
 0x11e   : > { %v1536_v57 = vadd.f32 %v1497_v9, %v1378_v42  ;;  %1801 = vmatmul.bf16.gmra.mxu3 %v10505_v30  ;;  %1947 = vmatmul.bf16.gmra.mxu0 %v10506_v6  ;;  %v1690_v9 = vshrl.u32 %v8392_v40, 16  ;;  %v8705_v6 = vld [vmem:[%s7681_s26 + $0x88] sm:$0xf] }
 0x11f   : > { %v2320_v38 = vshrl.u32 %v8705_v6, 16 }
 0x120   : > { %2555 = vmatmul.bf16.gmra.mxu2 %v8681_v2  ;;  %2169 = vmatmul.bf16.gmra.mxu1 %v8687_v35  ;;  %v8695_v41 = vadd.f32 %v1635_v28, %v1536_v57  ;;  %v2290_v57 = vsel %vm7731_vm4, %v2285_v45, %v2289_v26  ;;  %v2304_v28 = vsel %vm7731_vm4, %v2299_v51, %v2303_v3  ;;  %v1692_v47 = vrot.slane %v1690_v9, 4  ;;  %v267_v3 = vld [vmem:[%s7681_s26 + $0x4c] sm:$0x1] }
 0x121   : > { %v1166_v29 = vpop.f32.mrf.mxu3  ;;  %v8717_v35 = vunpack.c.l.b16 %v2290_v57  ;;  %v8719_v45 = vunpack.c.l.b16 %v2304_v28  ;;  %v10389_v26 = vunpack.c.l.b16 %v8643_v53  ;;  %v10388_v51 = vunpack.c.l.b16 %v8646_v22  ;;  %v7357_v57 = vld [vmem:[%s10339_s1 + $0x360] sm:$0xff] }
 0x122   : > { %10507 = vst [vmem:[#allocation2_spill] sm:$0xff] %v8695_v41  ;;  %v1203_v14 = vadd.f32 %v1166_v29, %v8593_v1  ;;  %v2323_v1 = vshll.u32 %v8705_v6, 16  ;;  %v1695_v29 = vrot.slane %v1693_v44, 5  ;;  %v2322_v34 = vrot.slane %v2320_v38, 4  ;;  %v7349_v44 = vld [vmem:[%s10339_s1 + $0x320] sm:$0xff]  ;;  %3113 = vmatpush.bf16.msrb.mxu1 %v7357_v57 }
 0x123   : > { %v1638_v33 = vpop.f32.mrf.mxu2  ;;  %v1344_v50 = vpop.f32.mrf.mxu0  ;;  %10508 = vst [vmem:[#allocation3_spill] sm:$0xff] %v8717_v35  ;;  %2937 = vmatpush.bf16.msrb.mxu0 %v7349_v44 }
 0x124   : > { %v1379_v42 = vadd.f32 %v1342_v55, %v1203_v14  ;;  %10509 = vst [vmem:[#allocation16_spill] sm:$0xff] %v8719_v45  ;;  %v2308_v55 = vrot.slane %v2306_v0, 4  ;;  %v2311_v14 = vrot.slane %v2309_v48, 5  ;;  %v2325_v9 = vrot.slane %v2323_v1, 5 }
 0x125   : > { %v1502_v30 = vpop.f32.mrf.mxu1  ;;  %v1696_v38 = vor.u32 %v1695_v29, %v1692_v47  ;;  %v1699_v0 = vshll.u32 %v267_v3, 16  ;;  %v8744_v1 = vpack.c.b16 %v8719_v45, %v8717_v35  ;;  %v10514_v45 = vld [vmem:[#allocation6_spill] sm:$0xff] }
 0x126   : > { %v1537_v2 = vadd.f32 %v1500_v61, %v1379_v42  ;;  %v7365_v61 = vld [vmem:[%s10339_s1 + $0x3a0] sm:$0xff]  ;;  %v8739_v42 = vld [vmem:[%s7681_s26 + $0x8c] sm:$0x1]  ;;  %v2312_v16 = vor.u32 %v2311_v14, %v2308_v55  ;;  %v2326_v29 = vor.u32 %v2325_v9, %v2322_v34  ;;  %v6208_v55 = vrot.slane %v8392_v40, 9 }
 0x127   : > { %3271 = vmatpush.bf16.msrb.mxu2 %v7365_v61  ;;  %10511 = vst [vmem:[#allocation18_spill] sm:$0xff] %v8744_v1  ;;  %v2329_v61 = vshll.u32 %v8739_v42, 16  ;;  %v1697_v35 = vrot.slane %v1696_v38, 4  ;;  %v1701_v22 = vrot.slane %v1699_v0, 5  ;;  %v2317_v34 = vrot.slane %v2315_v25, 5 }
 0x128   : > { %v8727_v41 = vadd.f32 %v1638_v33, %v1537_v2  ;;  %v2313_v14 = vrot.slane %v2312_v16, 4  ;;  %v2327_v57 = vrot.slane %v2326_v29, 4  ;;  %v8768_v0 = vld [vmem:[%s7681_s26 + $0xa8] sm:$0xf] }
 0x129   : > { %v1168_v28 = vpop.f32.mrf.mxu3  ;;  %v1702_v40 = vsel %vm7731_vm4, %v1697_v35, %v1701_v22  ;;  %v2351_v22 = vshll.u32 %v8768_v0, 16 }
 0x12a   : > { %10510 = vst [vmem:[#allocation17_spill] sm:$0xff] %v8727_v41  ;;  %v1204_v2 = vadd.f32 %v1168_v28, %v8619_v63  ;;  %v8750_v41 = vpack.c.b16 %v10388_v51, %v10389_v26  ;;  %v10513_v28 = vld [vmem:[#allocation5_spill] sm:$0xff]  ;;  %v1734_v35 = vunpack.c.l.b16 %v1702_v40 }
 0x12b   : > { %v1640_v33 = vpop.f32.mrf.mxu2  ;;  %v1347_v48 = vpop.f32.mrf.mxu0  ;;  %v2353_v26 = vrot.slane %v2351_v22, 5  ;;  %v7348_v40 = vld [vmem:[%s10339_s1 + $0x318] sm:$0xff] }
 0x12c   : > { %10512 = vst [vmem:[#allocation19_spill] sm:$0xff] %v8750_v41  ;;  %v1380_v63 = vadd.f32 %v1344_v50, %v1204_v2  ;;  %v1857_v50 = vrot.slane %v267_v3, 5  ;;  %v8762_v2 = vld [vmem:[%s7681_s26 + $0xa0] sm:$0xf]  ;;  %v2318_v3 = vsel %vm7731_vm4, %v2313_v14, %v2317_v34  ;;  %v10391_v14 = vunpack.c.l.b16 %v8698_v7  ;;  %2938 = vmatpush.bf16.msrb.mxu0 %v7348_v40 }
 0x12d   : > { %v1505_v47 = vpop.f32.mrf.mxu1  ;;  %v2337_v29 = vshll.u32 %v8762_v2, 16 }
 0x12e   : > { %v1538_v44 = vadd.f32 %v1502_v30, %v1380_v63  ;;  %1806 = vmatmul.bf16.gmra.mxu3 %v10513_v28  ;;  %1952 = vmatmul.bf16.gmra.mxu0 %v10514_v45  ;;  %v2331_v30 = vrot.slane %v2329_v61, 5  ;;  %v7340_v45 = vld [vmem:[%s10339_s1 + $0x2d8] sm:$0xff]  ;;  %v1858_v16 = vsel %vm7751_vm5, %v6208_v55, %v1857_v50  ;;  %v8783_v50 = vunpack.c.l.b16 %v2318_v3 }
 0x12f   : > { %2788 = vmatpush.bf16.msrb.mxu3 %v7340_v45  ;;  %v1880_v55 = vunpack.c.l.b16 %v1858_v16  ;;  %v2339_v51 = vrot.slane %v2337_v29, 5  ;;  %v7356_v16 = vld [vmem:[%s10339_s1 + $0x358] sm:$0xff] }
 0x130   : > { %2560 = vmatmul.bf16.gmra.mxu2 %v8744_v1  ;;  %2174 = vmatmul.bf16.gmra.mxu1 %v8750_v41  ;;  %v8759_v9 = vadd.f32 %v1640_v33, %v1538_v44  ;;  %v2334_v33 = vshrl.u32 %v8762_v2, 16  ;;  %v10520_v1 = vunpack.c.l.b16 %v8705_v6 }
 0x131   : > { %v1171_v38 = vpop.f32.mrf.mxu3  ;;  %3114 = vmatpush.bf16.msrb.mxu1 %v7356_v16 }
 0x132   : > { %v1205_v63 = vadd.f32 %v1171_v38, %v8394_v19  ;;  %v2332_v19 = vsel %vm7731_vm4, %v2327_v57, %v2331_v30  ;;  %v2348_v38 = vshrl.u32 %v8768_v0, 16 }
 0x133   : > { %v1643_v28 = vpop.f32.mrf.mxu2  ;;  %v1349_v25 = vpop.f32.mrf.mxu0  ;;  %v8786_v34 = vunpack.c.l.b16 %v2332_v19  ;;  %v1736_v19 = vpack.c.b16 %v1734_v35, %v8409_v46 }
 0x134   : > { %v1381_v61 = vadd.f32 %v1347_v48, %v1205_v63  ;;  %v2336_v63 = vrot.slane %v2334_v33, 4  ;;  %v2350_v30 = vrot.slane %v2348_v38, 4  ;;  %v8804_v33 = vld [vmem:[%s7681_s26 + $0xac] sm:$0x1]  ;;  %v10518_v38 = vunpack.c.l.b16 %v8398_v20 }
 0x135   : > { %v1507_v44 = vpop.f32.mrf.mxu1  ;;  %10515 = vst [vmem:[#allocation5_spill] sm:$0xff] %v8786_v34  ;;  %v8812_v48 = vpack.c.b16 %v8786_v34, %v8783_v50 }
 0x136   : > { %v1539_v45 = vadd.f32 %v1505_v47, %v1381_v61  ;;  %v7364_v47 = vld [vmem:[%s10339_s1 + $0x398] sm:$0xff]  ;;  %v8801_v61 = vld [vmem:[%s7681_s26 + $0xa4] sm:$0x1]  ;;  %10517 = vst [vmem:[#allocation20_spill] sm:$0xff] %v8804_v33  ;;  %v1882_v22 = vpack.c.b16 %v1880_v55, %v10518_v38  ;;  %v2354_v55 = vor.u32 %v2353_v26, %v2350_v30  ;;  %v8823_v38 = vld [vmem:[%s7681_s26 + $0xb0] sm:$0xf] }
 0x137   : > { %10516 = vst [vmem:[#allocation6_spill] sm:$0xff] %v8801_v61  ;;  %3272 = vmatpush.bf16.msrb.mxu2 %v7364_v47  ;;  %v2343_v35 = vshll.u32 %v8801_v61, 16  ;;  %v2357_v47 = vshll.u32 %v8804_v33, 16  ;;  %v7339_v26 = vld [vmem:[%s10339_s1 + $0x2d0] sm:$0xff]  ;;  %v2362_v30 = vshrl.u32 %v8823_v38, 16 }
 0x138   : > { %v8789_v57 = vadd.f32 %v1643_v28, %v1539_v45  ;;  %10519 = vst [vmem:[#allocation21_spill] sm:$0xff] %v8812_v48  ;;  %2789 = vmatpush.bf16.msrb.mxu3 %v7339_v26  ;;  %v2084_v26 = vunpack.c.l.b16 %v8762_v2 }
 0x139   : > { %v1173_v3 = vpop.f32.mrf.mxu3  ;;  %v2359_v16 = vrot.slane %v2357_v47, 5 }
 0x13a   : > { %v1206_v28 = vadd.f32 %v1173_v3, %v8421_v17  ;;  %v8818_v17 = vpack.c.b16 %v10520_v1, %v10391_v14  ;;  %v2340_v3 = vor.u32 %v2339_v51, %v2336_v63  ;;  %v8828_v14 = vld [vmem:[%s7681_s26 + $0xb8] sm:$0xf]  ;;  %v2355_v63 = vrot.slane %v2354_v55, 4 }
 0x13b   : > { %v1645_v29 = vpop.f32.mrf.mxu2  ;;  %v1352_v45 = vpop.f32.mrf.mxu0  ;;  %10522 = vst [vmem:[#allocation23_spill] sm:$0xff] %v8828_v14 }
 0x13c   : > { %10521 = vst [vmem:[#allocation22_spill] sm:$0xff] %v8818_v17  ;;  %v1382_v46 = vadd.f32 %v1349_v25, %v1206_v28  ;;  %v2341_v1 = vrot.slane %v2340_v3, 4  ;;  %v2345_v25 = vrot.slane %v2343_v35, 5  ;;  %v2365_v28 = vshll.u32 %v8823_v38, 16 }
 0x13d   : > { %v1510_v20 = vpop.f32.mrf.mxu1  ;;  %v2376_v3 = vshrl.u32 %v8828_v14, 16 }
 0x13e   : > { %v1540_v40 = vadd.f32 %v1507_v44, %v1382_v46  ;;  %1811 = vmatmul.bf16.gmra.mxu3 %v1736_v19  ;;  %1957 = vmatmul.bf16.gmra.mxu0 %v1882_v22  ;;  %v2346_v47 = vsel %vm7731_vm4, %v2341_v1, %v2345_v25  ;;  %v7363_v25 = vld [vmem:[%s10339_s1 + $0x390] sm:$0xff] }
 0x13f   : > { %v2470_v61 = vunpack.c.l.b16 %v2346_v47  ;;  %3273 = vmatpush.bf16.msrb.mxu2 %v7363_v25 }
 0x140   : > { %2565 = vmatmul.bf16.gmra.mxu2 %v8812_v48  ;;  %2179 = vmatmul.bf16.gmra.mxu1 %v8818_v17  ;;  %v8830_v51 = vadd.f32 %v1645_v29, %v1540_v40  ;;  %v2379_v29 = vshll.u32 %v8828_v14, 16  ;;  %v2360_v40 = vsel %vm7731_vm4, %v2355_v63, %v2359_v16  ;;  %v2364_v48 = vrot.slane %v2362_v30, 4  ;;  %v7355_v63 = vld [vmem:[%s10339_s1 + $0x350] sm:$0xff] }
 0x141   : > { %v1176_v44 = vpop.f32.mrf.mxu3  ;;  %v2367_v17 = vrot.slane %v2365_v28, 5  ;;  %v8847_v34 = vunpack.c.l.b16 %v2360_v40  ;;  %3115 = vmatpush.bf16.msrb.mxu1 %v7355_v63 }
 0x142   : > { %v1207_v19 = vadd.f32 %v1176_v44, %v8426_v58  ;;  %v8845_v58 = vld [vmem:[%s7681_s26 + $0xb4] sm:$0x1]  ;;  %v2378_v44 = vrot.slane %v2376_v3, 4  ;;  %v2381_v33 = vrot.slane %v2379_v29, 5 }
 0x143   : > { %v1648_v22 = vpop.f32.mrf.mxu2  ;;  %v1354_v46 = vpop.f32.mrf.mxu0  ;;  %10523 = vst [vmem:[#allocation24_spill] sm:$0xff] %v8845_v58  ;;  %v2368_v30 = vor.u32 %v2367_v17, %v2364_v48  ;;  %v2371_v28 = vshll.u32 %v8845_v58, 16  ;;  %v2482_v47 = vpack.c.b16 %v8847_v34, %v2470_v61 }
 0x144   : > { %v1383_v35 = vadd.f32 %v1352_v45, %v1207_v19  ;;  %10524 = vst [vmem:[#allocation25_spill] sm:$0xff] %v8847_v34  ;;  %v10400_v45 = vunpack.c.l.b16 %v8768_v0  ;;  %v8852_v19 = vld [vmem:[%s7681_s26 + $0xbc] sm:$0x1] }
 0x145   : > { %v1512_v55 = vpop.f32.mrf.mxu1  ;;  %10525 = vst [vmem:[#allocation26_spill] sm:$0xff] %v8852_v19  ;;  %v2385_v29 = vshll.u32 %v8852_v19, 16  ;;  %v2373_v58 = vrot.slane %v2371_v28, 5  ;;  %v8879_v19 = vld [vmem:[%s7681_s26 + $0xc8] sm:$0xf] }
 0x146   : > { %v1541_v41 = vadd.f32 %v1510_v20, %v1383_v35  ;;  %v7347_v20 = vld [vmem:[%s10339_s1 + $0x310] sm:$0xff]  ;;  %v2096_v40 = vpack.c.b16 %v10400_v45, %v2084_v26 }
 0x147   : > { %2939 = vmatpush.bf16.msrb.mxu0 %v7347_v20  ;;  %v2387_v25 = vrot.slane %v2385_v29, 5  ;;  %v8874_v20 = vld [vmem:[%s7681_s26 + $0xc0] sm:$0xf]  ;;  %v2404_v29 = vshrl.u32 %v8879_v19, 16 }
 0x148   : > { %v8854_v1 = vadd.f32 %v1648_v22, %v1541_v41  ;;  %v2382_v22 = vor.u32 %v2381_v33, %v2378_v44  ;;  %v10528_v33 = vld [vmem:[#allocation8_spill] sm:$0xff] }
 0x149   : > { %v1178_v16 = vpop.f32.mrf.mxu3 }
 0x14a   : > { %10526 = vst [vmem:[#allocation27_spill] sm:$0xff] %v8854_v1  ;;  %v1208_v3 = vadd.f32 %v1178_v16, %v8447_v49  ;;  %v2369_v1 = vrot.slane %v2368_v30, 4  ;;  %v10527_v16 = vld [vmem:[#allocation7_spill] sm:$0xff]  ;;  %v2383_v44 = vrot.slane %v2382_v22, 4 }
 0x14b   : > { %v1650_v41 = vpop.f32.mrf.mxu2  ;;  %v1357_v35 = vpop.f32.mrf.mxu0 }
 0x14c   : > { %v1384_v48 = vadd.f32 %v1354_v46, %v1208_v3  ;;  %v7338_v46 = vld [vmem:[%s10339_s1 + $0x2c8] sm:$0xff]  ;;  %v2388_v28 = vsel %vm7731_vm4, %v2383_v44, %v2387_v25  ;;  %v2390_v3 = vshrl.u32 %v8874_v20, 16  ;;  %v8900_v25 = vld [vmem:[%s7681_s26 + $0xc4] sm:$0x1] }
 0x14d   : > { %v1515_v17 = vpop.f32.mrf.mxu1  ;;  %2790 = vmatpush.bf16.msrb.mxu3 %v7338_v46  ;;  %10530 = vst [vmem:[#allocation8_spill] sm:$0xff] %v8900_v25  ;;  %v8903_v46 = vld [vmem:[%s7681_s26 + $0xcc] sm:$0x1] }
 0x14e   : > { %v1542_v49 = vadd.f32 %v1512_v55, %v1384_v48  ;;  %1816 = vmatmul.bf16.gmra.mxu3 %v10527_v16  ;;  %1962 = vmatmul.bf16.gmra.mxu0 %v10528_v33  ;;  %v2374_v55 = vsel %vm7731_vm4, %v2369_v1, %v2373_v58  ;;  %v10404_v48 = vunpack.c.l.b16 %v8823_v38  ;;  %v10403_v16 = vunpack.c.l.b16 %v8828_v14  ;;  %10531 = vst [vmem:[#allocation28_spill] sm:$0xff] %v8903_v46 }
 0x14f   : > { %v8893_v1 = vunpack.c.l.b16 %v2374_v55  ;;  %v2392_v33 = vrot.slane %v2390_v3, 4  ;;  %v7354_v55 = vld [vmem:[%s10339_s1 + $0x348] sm:$0xff] }
 0x150   : > { %2570 = vmatmul.bf16.gmra.mxu2 %v2482_v47  ;;  %2184 = vmatmul.bf16.gmra.mxu1 %v2096_v40  ;;  %v8876_v61 = vadd.f32 %v1650_v41, %v1542_v49  ;;  %v2393_v41 = vshll.u32 %v8874_v20, 16  ;;  %v2407_v47 = vshll.u32 %v8879_v19, 16 }
 0x151   : > { %v1181_v26 = vpop.f32.mrf.mxu3  ;;  %3116 = vmatpush.bf16.msrb.mxu1 %v7354_v55 }
 0x152   : > { %v1209_v63 = vadd.f32 %v1181_v26, %v8456_v60  ;;  %v8895_v60 = vunpack.c.l.b16 %v2388_v28  ;;  %v2395_v44 = vrot.slane %v2393_v41, 5  ;;  %v2406_v26 = vrot.slane %v2404_v29, 4 }
 0x153   : > { %v1653_v30 = vpop.f32.mrf.mxu2  ;;  %v1359_v22 = vpop.f32.mrf.mxu0  ;;  %v2409_v45 = vrot.slane %v2407_v47, 5  ;;  %v8925_v41 = vpack.c.b16 %v10403_v16, %v10404_v48 }
 0x154   : > { %v1385_v40 = vadd.f32 %v1357_v35, %v1209_v63  ;;  %10529 = vst [vmem:[#allocation7_spill] sm:$0xff] %v8895_v60  ;;  %v7362_v35 = vld [vmem:[%s10339_s1 + $0x388] sm:$0xff]  ;;  %v2396_v47 = vor.u32 %v2395_v44, %v2392_v33 }
 0x155   : > { %v1517_v58 = vpop.f32.mrf.mxu1  ;;  %10534 = vst [vmem:[#allocation31_spill] sm:$0xff] %v8925_v41  ;;  %3274 = vmatpush.bf16.msrb.mxu2 %v7362_v35 }
 0x156   : > { %v1543_v49 = vadd.f32 %v1515_v17, %v1385_v40  ;;  %v7346_v17 = vld [vmem:[%s10339_s1 + $0x308] sm:$0xff]  ;;  %v2399_v40 = vshll.u32 %v8900_v25, 16  ;;  %v2397_v33 = vrot.slane %v2396_v47, 4  ;;  %v1707_v47 = vshll.u32 %v8548_v62, 16 }
 0x157   : > { %2940 = vmatpush.bf16.msrb.mxu0 %v7346_v17 }
 0x158   : > { %v8905_v34 = vadd.f32 %v1653_v30, %v1543_v49  ;;  %v8919_v30 = vpack.c.b16 %v8895_v60, %v8893_v1  ;;  %v2410_v49 = vor.u32 %v2409_v45, %v2406_v26  ;;  %v2401_v44 = vrot.slane %v2399_v40, 5  ;;  %v8936_v26 = vld [vmem:[%s7681_s26 + $0xd0] sm:$0xf] }
 0x159   : > { %v1183_v63 = vpop.f32.mrf.mxu3 }
 0x15a   : > { %10532 = vst [vmem:[#allocation29_spill] sm:$0xff] %v8905_v34  ;;  %v1210_v28 = vadd.f32 %v1183_v63, %v8480_v43  ;;  %v2413_v43 = vshll.u32 %v8903_v46, 16  ;;  %v2411_v35 = vrot.slane %v2410_v49, 4  ;;  %v2418_v49 = vshrl.u32 %v8936_v26, 16 }
 0x15b   : > { %v1655_v3 = vpop.f32.mrf.mxu2  ;;  %10533 = vst [vmem:[#allocation30_spill] sm:$0xff] %v8919_v30  ;;  %v1362_v29 = vpop.f32.mrf.mxu0 }
 0x15c   : > { %v1386_v63 = vadd.f32 %v1359_v22, %v1210_v28  ;;  %v2415_v17 = vrot.slane %v2413_v43, 5  ;;  %v7337_v22 = vld [vmem:[%s10339_s1 + $0x2c0] sm:$0xff]  ;;  %v1704_v28 = vshrl.u32 %v8548_v62, 16 }
 0x15d   : > { %v1520_v60 = vpop.f32.mrf.mxu1  ;;  %2791 = vmatpush.bf16.msrb.mxu3 %v7337_v22 }
 0x15e   : > { %v1544_v34 = vadd.f32 %v1517_v58, %v1386_v63  ;;  %1821 = vmatmul.bf16.gmra.mxu3 %v8220_v13  ;;  %1967 = vmatmul.bf16.gmra.mxu0 %v8226_v31  ;;  %v8942_v13 = vld [vmem:[%s7681_s26 + $0xd8] sm:$0xf] }
 0x15f   : > { %v2435_v16 = vshll.u32 %v8942_v13, 16 }
 0x160   : > { %2575 = vmatmul.bf16.gmra.mxu2 %v8919_v30  ;;  %2189 = vmatmul.bf16.gmra.mxu1 %v8925_v41  ;;  %v8933_v45 = vadd.f32 %v1655_v3, %v1544_v34  ;;  %v2402_v34 = vsel %vm7731_vm4, %v2397_v33, %v2401_v44  ;;  %v2416_v3 = vsel %vm7731_vm4, %v2411_v35, %v2415_v17  ;;  %v1706_v30 = vrot.slane %v1704_v28, 4  ;;  %v7361_v28 = vld [vmem:[%s10339_s1 + $0x380] sm:$0xff] }
 0x161   : > { %v1186_v58 = vpop.f32.mrf.mxu3  ;;  %v8955_v48 = vunpack.c.l.b16 %v2402_v34  ;;  %v1709_v33 = vrot.slane %v1707_v47, 5  ;;  %v8957_v44 = vunpack.c.l.b16 %v2416_v3  ;;  %v10413_v35 = vunpack.c.l.b16 %v8874_v20  ;;  %v7345_v47 = vld [vmem:[%s10339_s1 + $0x300] sm:$0xff]  ;;  %3275 = vmatpush.bf16.msrb.mxu2 %v7361_v28 }
 0x162   : > { %10535 = vst [vmem:[#allocation32_spill] sm:$0xff] %v8933_v45  ;;  %v1211_v31 = vadd.f32 %v1186_v58, %v8493_v32  ;;  %v2421_v32 = vshll.u32 %v8936_v26, 16  ;;  %v2432_v58 = vshrl.u32 %v8942_v13, 16  ;;  %v10412_v17 = vunpack.c.l.b16 %v8879_v19  ;;  %v7353_v34 = vld [vmem:[%s10339_s1 + $0x340] sm:$0xff]  ;;  %2941 = vmatpush.bf16.msrb.mxu0 %v7345_v47 }
 0x163   : > { %v1658_v55 = vpop.f32.mrf.mxu2  ;;  %v1364_v40 = vpop.f32.mrf.mxu0  ;;  %10536 = vst [vmem:[#allocation33_spill] sm:$0xff] %v8957_v44  ;;  %v2420_v41 = vrot.slane %v2418_v49, 4  ;;  %3117 = vmatpush.bf16.msrb.mxu1 %v7353_v34 }
 0x164   : > { %v1387_v43 = vadd.f32 %v1362_v29, %v1211_v31  ;;  %v287_v29 = vld [vmem:[%s7681_s26 + $0x9c] sm:$0x1]  ;;  %v8963_v31 = vld [vmem:[%s7681_s26 + $0xd4] sm:$0x1]  ;;  %v2423_v45 = vrot.slane %v2421_v32, 5  ;;  %v2434_v25 = vrot.slane %v2432_v58, 4  ;;  %v1710_v32 = vor.u32 %v1709_v33, %v1706_v30 }
 0x165   : > { %v1522_v63 = vpop.f32.mrf.mxu1  ;;  %v8982_v58 = vpack.c.b16 %v8957_v44, %v8955_v48  ;;  %v2427_v14 = vshll.u32 %v8963_v31, 16  ;;  %v1861_v34 = vrot.slane %v287_v29, 5 }
 0x166   : > { %v1545_v22 = vadd.f32 %v1520_v60, %v1387_v43  ;;  %v2437_v60 = vrot.slane %v2435_v16, 5  ;;  %v8977_v43 = vld [vmem:[%s7681_s26 + $0xdc] sm:$0x1]  ;;  %v2424_v30 = vor.u32 %v2423_v45, %v2420_v41  ;;  %v1711_v44 = vrot.slane %v1710_v32, 4 }
 0x167   : > { %v2441_v28 = vshll.u32 %v8977_v43, 16 }
 0x168   : > { %v8965_v46 = vadd.f32 %v1658_v55, %v1545_v22  ;;  %v8988_v22 = vpack.c.b16 %v10412_v17, %v10413_v35  ;;  %v2438_v33 = vor.u32 %v2437_v60, %v2434_v25  ;;  %v6209_v35 = vrot.slane %v8548_v62, 9 }
 0x169   : > { %v1188_v3 = vpop.f32.mrf.mxu3  ;;  %v2425_v25 = vrot.slane %v2424_v30, 4  ;;  %v2443_v45 = vrot.slane %v2441_v28, 5 }
 0x16a   : > { %10537 = vst [vmem:[#allocation34_spill] sm:$0xff] %v8965_v46  ;;  %v1212_v55 = vadd.f32 %v1188_v3, %v8522_v8  ;;  %v1713_v46 = vshll.u32 %v287_v29, 16  ;;  %v2439_v41 = vrot.slane %v2438_v33, 4 }
 0x16b   : > { %v1660_v49 = vpop.f32.mrf.mxu2  ;;  %v1367_v16 = vpop.f32.mrf.mxu0 }
 0x16c   : > { %v1388_v8 = vadd.f32 %v1364_v40, %v1212_v55  ;;  %v1715_v17 = vrot.slane %v1713_v46, 5  ;;  %v2429_v40 = vrot.slane %v2427_v14, 5  ;;  %v1862_v14 = vsel %vm7751_vm5, %v6209_v35, %v1861_v34  ;;  %v7392_v34 = vld [vmem:[%s10339_s1 + $0x478] sm:$0xff] }
 0x16d   : > { %v1525_v3 = vpop.f32.mrf.mxu1  ;;  %3716 = vmatpush.bf16.msra.mxu1 %v7392_v34 }
 0x16e   : > { %v1546_v47 = vadd.f32 %v1522_v63, %v1388_v8  ;;  %1826 = vmatmul.bf16.gmra.mxu3 %v8287_v36  ;;  %1972 = vmatmul.bf16.gmra.mxu0 %v8293_v5  ;;  %v7376_v36 = vld [vmem:[%s10339_s1 + $0x3f8] sm:$0xff]  ;;  %v1716_v62 = vsel %vm7731_vm4, %v1711_v44, %v1715_v17  ;;  %v2444_v8 = vsel %vm7731_vm4, %v2439_v41, %v2443_v45  ;;  %v2090_v44 = vunpack.c.l.b16 %v8936_v26 }
 0x16f   : > { %3406 = vmatpush.bf16.msra.mxu3 %v7376_v36  ;;  %v1735_v33 = vunpack.c.l.b16 %v1716_v62  ;;  %v10414_v17 = vunpack.c.l.b16 %v8942_v13  ;;  %v10538_v36 = vunpack.c.l.b16 %v8543_v54 }
 0x170   : > { %2580 = vmatmul.bf16.gmra.mxu2 %v8982_v58  ;;  %2194 = vmatmul.bf16.gmra.mxu1 %v8988_v22  ;;  %v8997_v55 = vadd.f32 %v1660_v49, %v1546_v47  ;;  %v2430_v49 = vsel %vm7731_vm4, %v2425_v25, %v2429_v40  ;;  %v9013_v47 = vunpack.c.l.b16 %v2444_v8 }
 0x171   : > { %v1191_v5 = vpop.f32.mrf.mxu3  ;;  %v9011_v28 = vunpack.c.l.b16 %v2430_v49  ;;  %v1737_v45 = vpack.c.b16 %v1735_v33, %v8561_v59  ;;  %v7531_v49 = vld [vmem:[%s7681_s26 + $0x58] sm:$0xf] }
 0x172   : > { %v1213_v63 = vadd.f32 %v1191_v5, %v8552_v56  ;;  %v1881_v56 = vunpack.c.l.b16 %v1862_v14  ;;  %v6396_v14 = vrot.slane %v8533_v10, 9  ;;  %v6397_v8 = vrot.slane %v7531_v49, 9 }
 0x173   : > { %v1663_v60 = vpop.f32.mrf.mxu2  ;;  %v1369_v32 = vpop.f32.mrf.mxu0 }
 0x174   : > { %v1389_v46 = vadd.f32 %v1367_v16, %v1213_v63  ;;  %v7400_v16 = vld [vmem:[%s10339_s1 + $0x4b8] sm:$0xff]  ;;  %v1883_v5 = vpack.c.b16 %v1881_v56, %v10538_v36  ;;  %v2633_v56 = vrot.slane %v8559_v4, 5 }
 0x175   : > { %v1527_v29 = vpop.f32.mrf.mxu1  ;;  %3938 = vmatpush.bf16.msra.mxu2 %v7400_v16 }
 0x176   : > { %v1547_v30 = vadd.f32 %v1525_v3, %v1389_v46  ;;  %v7384_v3 = vld [vmem:[%s10339_s1 + $0x438] sm:$0xff]  ;;  %v2625_v46 = vrot.slane %v8576_v15, 5 }
 0x177   : > { %3570 = vmatpush.bf16.msra.mxu0 %v7384_v3  ;;  %v7375_v3 = vld [vmem:[%s10339_s1 + $0x3f0] sm:$0xff] }
 0x178   : > { %v9017_v35 = vadd.f32 %v1663_v60, %v1547_v30  ;;  %v9034_v60 = vpack.c.b16 %v9013_v47, %v9011_v28  ;;  %v7532_v30 = vld [vmem:[%s7681_s26 + $0x5c] sm:$0x1]  ;;  %3407 = vmatpush.bf16.msra.mxu3 %v7375_v3 }
 0x179   : > { %v1193_v40 = vpop.f32.mrf.mxu3  ;;  %v2629_v33 = vrot.slane %v7532_v30, 5 }
 0x17a   : > { %v1214_v25 = vadd.f32 %v1193_v40, %v8590_v24  ;;  %v9040_v24 = vpack.c.b16 %v10414_v17, %v2090_v44 }
 0x17b   : > { %v1665_v41 = vpop.f32.mrf.mxu2  ;;  %v1372_v63 = vpop.f32.mrf.mxu0  ;;  %v2630_v4 = vsel %vm7751_vm5, %v6397_v8, %v2629_v33 }
 0x17c   : > { %v1390_v59 = vadd.f32 %v1369_v32, %v1214_v25  ;;  %v7533_v32 = vld [vmem:[%s7681_s26 + $0x60] sm:$0xf]  ;;  %v2626_v25 = vsel %vm7751_vm5, %v6396_v14, %v2625_v46  ;;  %v7383_v14 = vld [vmem:[%s10339_s1 + $0x430] sm:$0xff] }
 0x17d   : > { %v1530_v54 = vpop.f32.mrf.mxu1  ;;  %3571 = vmatpush.bf16.msra.mxu0 %v7383_v14 }
 0x17e   : > { %v1548_v62 = vadd.f32 %v1527_v29, %v1390_v59  ;;  %1831 = vmatmul.bf16.gmra.mxu3 %v1737_v45  ;;  %1977 = vmatmul.bf16.gmra.mxu0 %v1883_v5  ;;  %v6398_v29 = vrot.slane %v7533_v32, 9  ;;  %v2704_v59 = vunpack.c.l.b16 %v2626_v25 }
 0x180   : > { %2585 = vmatmul.bf16.gmra.mxu2 %v9034_v60  ;;  %2199 = vmatmul.bf16.gmra.mxu1 %v9040_v24  ;;  %v9049_v16 = vadd.f32 %v1665_v41, %v1548_v62  ;;  %v2634_v36 = vsel %vm7751_vm5, %v6398_v29, %v2633_v56  ;;  %v2705_v62 = vunpack.c.l.b16 %v2630_v4 }
 0x181   : > { %v1196_v34 = vpop.f32.mrf.mxu3  ;;  %v2706_v49 = vunpack.c.l.b16 %v2634_v36  ;;  %v10541_v36 = vld [vmem:[#allocation11_spill] sm:$0xff] }
 0x182   : > { %v1215_v40 = vadd.f32 %v1196_v34, %v8616_v21  ;;  %v7399_v21 = vld [vmem:[%s10339_s1 + $0x4b0] sm:$0xff]  ;;  %v2720_v33 = vpack.c.b16 %v2705_v62, %v2704_v59 }
 0x183   : > { %v1668_v10 = vpop.f32.mrf.mxu2  ;;  %v1374_v15 = vpop.f32.mrf.mxu0  ;;  %3939 = vmatpush.bf16.msra.mxu2 %v7399_v21  ;;  %v3204_v32 = vpack.c.b16 %v2706_v49, %v2705_v62 }
 0x184   : > { %v1391_v41 = vadd.f32 %v1372_v63, %v1215_v40  ;;  %v7391_v63 = vld [vmem:[%s10339_s1 + $0x470] sm:$0xff]  ;;  %v10539_v40 = vpack.c.b16 %v8599_v12, %v8596_v27 }
 0x185   : > { %v1532_v45 = vpop.f32.mrf.mxu1  ;;  %3717 = vmatpush.bf16.msra.mxu1 %v7391_v63 }
 0x186   : > { %v1549_v5 = vadd.f32 %v1530_v54, %v1391_v41  ;;  %v6400_v41 = vrot.slane %v8643_v53, 9 }
 0x188   : > { %v9062_v30 = vadd.f32 %v1668_v10, %v1549_v5  ;;  %v10540_v10 = vld [vmem:[#allocation9_spill] sm:$0xff] }
 0x189   : > { %v1198_v46 = vpop.f32.mrf.mxu3  ;;  %v2637_v25 = vrot.slane %v10540_v10, 5  ;;  %v10542_v5 = vld [vmem:[#allocation13_spill] sm:$0xff] }
 0x18a   : > { %v1216_v54 = vadd.f32 %v1198_v46, %v8638_v39  ;;  %v6399_v39 = vrot.slane %v8603_v18, 9 }
 0x18b   : > { %v1670_v8 = vpop.f32.mrf.mxu2  ;;  %v1943_v56 = vpop.f32.mrf.mxu0 }
 0x18c   : > { %v1392_v29 = vadd.f32 %v1374_v15, %v1216_v54  ;;  %v2641_v15 = vrot.slane %v10541_v36, 5  ;;  %v2638_v12 = vsel %vm7751_vm5, %v6399_v39, %v2637_v25  ;;  %v10544_v25 = vunpack.c.l.b16 %v8603_v18  ;;  %v10548_v18 = vld [vmem:[#allocation4_spill] sm:$0xff] }
 0x18d   : > { %v2165_v3 = vpop.f32.mrf.mxu1  ;;  %v2707_v54 = vunpack.c.l.b16 %v2638_v12 }
 0x18e   : > { %v1550_v34 = vadd.f32 %v1532_v45, %v1392_v29  ;;  %2792 = vmatmul.bf16.vlgmr.msrb.gmra.mxu3 %v2720_v33  ;;  %2942 = vmatmul.bf16.vlgmr.msrb.gmra.mxu0 %v8612_v23  ;;  %v7374_v45 = vld [vmem:[%s10339_s1 + $0x3e8] sm:$0xff]  ;;  %v2642_v63 = vsel %vm7751_vm5, %v6400_v41, %v2641_v15  ;;  %v10545_v41 = vunpack.c.l.b16 %v8643_v53  ;;  %v6401_v53 = vrot.slane %v10548_v18, 9 }
 0x18f   : > { %3408 = vmatpush.bf16.msra.mxu3 %v7374_v45  ;;  %v7382_v29 = vld [vmem:[%s10339_s1 + $0x428] sm:$0xff]  ;;  %v9104_v10 = vpack.c.b16 %v2707_v54, %v2706_v49  ;;  %v10549_v49 = vld [vmem:[#allocation12_spill] sm:$0xff] }
 0x190   : > { %3276 = vmatmul.bf16.vlgmr.msrb.gmra.mxu2 %v3204_v32  ;;  %3118 = vmatmul.bf16.vlgmr.msrb.gmra.mxu1 %v10539_v40  ;;  %v9080_v4 = vadd.f32 %v1670_v8, %v1550_v34  ;;  %v2708_v8 = vunpack.c.l.b16 %v2642_v63  ;;  %v7398_v32 = vld [vmem:[%s10339_s1 + $0x4a8] sm:$0xff]  ;;  %v10543_v40 = vld [vmem:[#allocation2_spill] sm:$0xff]  ;;  %v2871_v36 = vpack.c.b16 %v10545_v41, %v10544_v25  ;;  %v2645_v63 = vrot.slane %v10549_v49, 5 }
 0x191   : > { %v1797_v23 = vpop.f32.mrf.mxu3  ;;  %3940 = vmatpush.bf16.msra.mxu2 %v7398_v32  ;;  %3572 = vmatpush.bf16.msra.mxu0 %v7382_v29  ;;  %v2649_v32 = vrot.slane %v8725_v11, 5  ;;  %v9123_v29 = vld [vmem:[%s7681_s26 + $0x90] sm:$0xf] }
 0x192   : > { %v1837_v59 = vadd.f32 %v1797_v23, %v10542_v5  ;;  %v3205_v45 = vpack.c.b16 %v2708_v8, %v2707_v54  ;;  %v10546_v23 = vld [vmem:[#allocation10_spill] sm:$0xff]  ;;  %v10547_v5 = vld [vmem:[#allocation3_spill] sm:$0xff]  ;;  %v6402_v54 = vrot.slane %v8698_v7, 9 }
 0x193   : > { %v2551_v62 = vpop.f32.mrf.mxu2  ;;  %v1945_v27 = vpop.f32.mrf.mxu0 }
 0x194   : > { %v1983_v21 = vadd.f32 %v1943_v56, %v1837_v59  ;;  %v7390_v56 = vld [vmem:[%s10339_s1 + $0x468] sm:$0xff]  ;;  %v3047_v59 = vpack.c.b16 %v10547_v5, %v10546_v23  ;;  %v9130_v11 = vsel %vm7751_vm5, %v6402_v54, %v2649_v32  ;;  %v6277_v54 = vld [vmem:[%s7681_s26 + $0x94] sm:$0x1] }
 0x195   : > { %v2167_v14 = vpop.f32.mrf.mxu1  ;;  %3718 = vmatpush.bf16.msra.mxu1 %v7390_v56  ;;  %v10550_v56 = vld [vmem:[#allocation17_spill] sm:$0xff] }
 0x196   : > { %v2205_v46 = vadd.f32 %v2165_v3, %v1983_v21 }
 0x198   : > { %v9092_v33 = vadd.f32 %v2551_v62, %v2205_v46 }
 0x199   : > { %v1799_v34 = vpop.f32.mrf.mxu3 }
 0x19a   : > { %v1838_v39 = vadd.f32 %v1799_v34, %v10543_v40 }
 0x19b   : > { %v2553_v3 = vpop.f32.mrf.mxu2  ;;  %v1948_v15 = vpop.f32.mrf.mxu0 }
 0x19c   : > { %v1984_v62 = vadd.f32 %v1945_v27, %v1838_v39  ;;  %v7373_v27 = vld [vmem:[%s10339_s1 + $0x3e0] sm:$0xff] }
 0x19d   : > { %v2170_v12 = vpop.f32.mrf.mxu1  ;;  %3409 = vmatpush.bf16.msra.mxu3 %v7373_v27 }
 0x19e   : > { %v2206_v21 = vadd.f32 %v2167_v14, %v1984_v62  ;;  %2797 = vmatmul.bf16.gmra.mxu3 %v9104_v10  ;;  %2947 = vmatmul.bf16.gmra.mxu0 %v2871_v36  ;;  %v3000_v36 = vshrl.u32 %v9123_v29, 16 }
 0x1a0   : > { %3281 = vmatmul.bf16.gmra.mxu2 %v3205_v45  ;;  %3123 = vmatmul.bf16.gmra.mxu1 %v3047_v59  ;;  %v9115_v46 = vadd.f32 %v2553_v3, %v2206_v21  ;;  %v2646_v3 = vsel %vm7751_vm5, %v6401_v53, %v2645_v63  ;;  %v3003_v45 = vshll.u32 %v9123_v29, 16  ;;  %v2710_v59 = vunpack.c.l.b16 %v9130_v11  ;;  %v7381_v53 = vld [vmem:[%s10339_s1 + $0x420] sm:$0xff]  ;;  %v10553_v11 = vld [vmem:[#allocation16_spill] sm:$0xff] }
 0x1a1   : > { %v1802_v14 = vpop.f32.mrf.mxu3  ;;  %v2709_v5 = vunpack.c.l.b16 %v2646_v3  ;;  %v3002_v21 = vrot.slane %v3000_v36, 4  ;;  %v7389_v63 = vld [vmem:[%s10339_s1 + $0x460] sm:$0xff]  ;;  %3573 = vmatpush.bf16.msra.mxu0 %v7381_v53  ;;  %v3048_v36 = vpack.c.b16 %v8783_v50, %v10553_v11  ;;  %v3179_v50 = vrot.slane %v6277_v54, 5 }
 0x1a2   : > { %v1839_v34 = vadd.f32 %v1802_v14, %v10550_v56  ;;  %v3005_v49 = vrot.slane %v3003_v45, 5  ;;  %v10551_v56 = vunpack.c.l.b16 %v10548_v18  ;;  %3719 = vmatpush.bf16.msra.mxu1 %v7389_v63  ;;  %v6556_v18 = vrot.slane %v9123_v29, 9 }
 0x1a3   : > { %v2556_v40 = vpop.f32.mrf.mxu2  ;;  %v1950_v39 = vpop.f32.mrf.mxu0  ;;  %v9148_v14 = vpack.c.b16 %v2709_v5, %v2708_v8  ;;  %v2653_v8 = vrot.slane %v8739_v42, 5 }
 0x1a4   : > { %v1985_v25 = vadd.f32 %v1948_v15, %v1839_v34  ;;  %v7397_v15 = vld [vmem:[%s10339_s1 + $0x4a0] sm:$0xff]  ;;  %v10552_v34 = vunpack.c.l.b16 %v8698_v7  ;;  %v3006_v17 = vor.u32 %v3005_v49, %v3002_v21  ;;  %v6403_v7 = vrot.slane %v8705_v6, 9 }
 0x1a5   : > { %v2172_v41 = vpop.f32.mrf.mxu1  ;;  %3941 = vmatpush.bf16.msra.mxu2 %v7397_v15 }
 0x1a6   : > { %v2207_v23 = vadd.f32 %v2170_v12, %v1985_v25  ;;  %v3206_v25 = vpack.c.b16 %v2710_v59, %v2709_v5  ;;  %v3007_v15 = vrot.slane %v3006_v17, 4  ;;  %v2654_v42 = vsel %vm7751_vm5, %v6403_v7, %v2653_v8 }
 0x1a7   : > { %v10554_v8 = vunpack.c.l.b16 %v8705_v6  ;;  %v6404_v6 = vrot.slane %v8762_v2, 9 }
 0x1a8   : > { %v9135_v62 = vadd.f32 %v2556_v40, %v2207_v23  ;;  %v2872_v40 = vpack.c.b16 %v10552_v34, %v10551_v56  ;;  %v2711_v34 = vunpack.c.l.b16 %v2654_v42  ;;  %v6405_v42 = vrot.slane %v8768_v0, 9 }
 0x1a9   : > { %v1804_v12 = vpop.f32.mrf.mxu3 }
 0x1aa   : > { %v1840_v32 = vadd.f32 %v1804_v12, %v8759_v9  ;;  %v3009_v9 = vshll.u32 %v6277_v54, 16  ;;  %v9170_v54 = vsel %vm7751_vm5, %v6556_v18, %v3179_v50  ;;  %v9190_v7 = vpack.c.b16 %v2711_v34, %v2710_v59  ;;  %v10556_v59 = vld [vmem:[#allocation6_spill] sm:$0xff] }
 0x1ab   : > { %v2558_v27 = vpop.f32.mrf.mxu2  ;;  %v1953_v3 = vpop.f32.mrf.mxu0 }
 0x1ac   : > { %v1986_v45 = vadd.f32 %v1950_v39, %v1840_v32  ;;  %v3011_v39 = vrot.slane %v3009_v9, 5 }
 0x1ad   : > { %v2175_v23 = vpop.f32.mrf.mxu1 }
 0x1ae   : > { %v2208_v12 = vadd.f32 %v2172_v41, %v1986_v45  ;;  %2802 = vmatmul.bf16.gmra.mxu3 %v9148_v14  ;;  %2952 = vmatmul.bf16.gmra.mxu0 %v2872_v40  ;;  %v7372_v41 = vld [vmem:[%s10339_s1 + $0x3d8] sm:$0xff]  ;;  %v3012_v17 = vsel %vm7731_vm4, %v3007_v15, %v3011_v39  ;;  %v2868_v40 = vunpack.c.l.b16 %v9123_v29 }
 0x1af   : > { %3410 = vmatpush.bf16.msra.mxu3 %v7372_v41  ;;  %v7388_v45 = vld [vmem:[%s10339_s1 + $0x458] sm:$0xff] }
 0x1b0   : > { %3286 = vmatmul.bf16.gmra.mxu2 %v3206_v25  ;;  %3128 = vmatmul.bf16.gmra.mxu1 %v3048_v36  ;;  %v9160_v5 = vadd.f32 %v2558_v27, %v2208_v12  ;;  %v9176_v25 = vunpack.c.l.b16 %v3012_v17  ;;  %v7380_v36 = vld [vmem:[%s10339_s1 + $0x418] sm:$0xff]  ;;  %v2873_v18 = vpack.c.b16 %v2868_v40, %v10554_v8 }
 0x1b1   : > { %v1807_v21 = vpop.f32.mrf.mxu3  ;;  %3574 = vmatpush.bf16.msra.mxu0 %v7380_v36  ;;  %v10555_v39 = vld [vmem:[#allocation5_spill] sm:$0xff]  ;;  %3720 = vmatpush.bf16.msra.mxu1 %v7388_v45  ;;  %v10559_v45 = vld [vmem:[#allocation27_spill] sm:$0xff] }
 0x1b2   : > { %v1841_v49 = vadd.f32 %v1807_v21, %v8789_v57  ;;  %v10418_v57 = vunpack.c.l.b16 %v9170_v54  ;;  %v3049_v41 = vpack.c.b16 %v9176_v25, %v10555_v39 }
 0x1b3   : > { %v2561_v53 = vpop.f32.mrf.mxu2  ;;  %v1955_v63 = vpop.f32.mrf.mxu0 }
 0x1b4   : > { %v1987_v32 = vadd.f32 %v1953_v3, %v1841_v49  ;;  %v7396_v3 = vld [vmem:[%s10339_s1 + $0x498] sm:$0xff]  ;;  %v3207_v15 = vpack.c.b16 %v10418_v57, %v2711_v34  ;;  %v6406_v34 = vrot.slane %v8823_v38, 9 }
 0x1b5   : > { %v2177_v56 = vpop.f32.mrf.mxu1  ;;  %3942 = vmatpush.bf16.msra.mxu2 %v7396_v3  ;;  %v10583_v57 = vld [vmem:[#allocation21_spill] sm:$0xff] }
 0x1b6   : > { %v2209_v27 = vadd.f32 %v2175_v23, %v1987_v32  ;;  %v10557_v32 = vld [vmem:[#allocation20_spill] sm:$0xff] }
 0x1b7   : > { %v2661_v17 = vrot.slane %v10557_v32, 5 }
 0x1b8   : > { %v9178_v11 = vadd.f32 %v2561_v53, %v2209_v27  ;;  %v2657_v53 = vrot.slane %v10556_v59, 5 }
 0x1b9   : > { %v1809_v23 = vpop.f32.mrf.mxu3 }
 0x1ba   : > { %v1842_v9 = vadd.f32 %v1809_v23, %v8830_v51  ;;  %v2658_v8 = vsel %vm7751_vm5, %v6404_v6, %v2657_v53  ;;  %v7379_v6 = vld [vmem:[%s10339_s1 + $0x410] sm:$0xff] }
 0x1bb   : > { %v2563_v12 = vpop.f32.mrf.mxu2  ;;  %v1958_v50 = vpop.f32.mrf.mxu0  ;;  %3575 = vmatpush.bf16.msra.mxu0 %v7379_v6 }
 0x1bc   : > { %v1988_v21 = vadd.f32 %v1955_v63, %v1842_v9  ;;  %v10558_v63 = vld [vmem:[#allocation24_spill] sm:$0xff] }
 0x1bd   : > { %v2180_v51 = vpop.f32.mrf.mxu1  ;;  %v2665_v3 = vrot.slane %v10558_v63, 5  ;;  %v7395_v63 = vld [vmem:[%s10339_s1 + $0x490] sm:$0xff] }
 0x1be   : > { %v2210_v49 = vadd.f32 %v2177_v56, %v1988_v21  ;;  %2807 = vmatmul.bf16.gmra.mxu3 %v9190_v7  ;;  %2957 = vmatmul.bf16.gmra.mxu0 %v2873_v18  ;;  %v7371_v56 = vld [vmem:[%s10339_s1 + $0x3d0] sm:$0xff]  ;;  %v2712_v21 = vunpack.c.l.b16 %v2658_v8 }
 0x1bf   : > { %3411 = vmatpush.bf16.msra.mxu3 %v7371_v56  ;;  %v2666_v39 = vsel %vm7751_vm5, %v6406_v34, %v2665_v3  ;;  %v10560_v34 = vunpack.c.l.b16 %v8768_v0  ;;  %v10561_v3 = vunpack.c.l.b16 %v8823_v38  ;;  %3943 = vmatpush.bf16.msra.mxu2 %v7395_v63 }
 0x1c0   : > { %3291 = vmatmul.bf16.gmra.mxu2 %v3207_v15  ;;  %3133 = vmatmul.bf16.gmra.mxu1 %v3049_v41  ;;  %v9205_v27 = vadd.f32 %v2563_v12, %v2210_v49  ;;  %v2662_v12 = vsel %vm7751_vm5, %v6405_v42, %v2661_v17  ;;  %v2714_v59 = vunpack.c.l.b16 %v2666_v39  ;;  %v10564_v39 = vld [vmem:[#allocation26_spill] sm:$0xff] }
 0x1c1   : > { %v1812_v36 = vpop.f32.mrf.mxu3  ;;  %v2713_v49 = vunpack.c.l.b16 %v2662_v12  ;;  %v2874_v56 = vpack.c.b16 %v10561_v3, %v10560_v34  ;;  %v2669_v38 = vrot.slane %v10564_v39, 5 }
 0x1c2   : > { %v1843_v23 = vadd.f32 %v1812_v36, %v10559_v45 }
 0x1c3   : > { %v2566_v2 = vpop.f32.mrf.mxu2  ;;  %v1960_v9 = vpop.f32.mrf.mxu0  ;;  %v2724_v17 = vpack.c.b16 %v2713_v49, %v2712_v21  ;;  %v3208_v45 = vpack.c.b16 %v2714_v59, %v2713_v49  ;;  %v6408_v21 = vrot.slane %v8874_v20, 9  ;;  %v10565_v49 = vld [vmem:[#allocation8_spill] sm:$0xff] }
 0x1c4   : > { %v1989_v18 = vadd.f32 %v1958_v50, %v1843_v23  ;;  %v7387_v50 = vld [vmem:[%s10339_s1 + $0x450] sm:$0xff]  ;;  %v10562_v23 = vld [vmem:[#allocation25_spill] sm:$0xff]  ;;  %v2673_v63 = vrot.slane %v10565_v49, 5  ;;  %v10569_v49 = vunpack.c.l.b16 %v8874_v20  ;;  %v6409_v20 = vrot.slane %v8879_v19, 9 }
 0x1c5   : > { %v2182_v15 = vpop.f32.mrf.mxu1  ;;  %3721 = vmatpush.bf16.msra.mxu1 %v7387_v50 }
 0x1c6   : > { %v2211_v41 = vadd.f32 %v2180_v51, %v1989_v18  ;;  %v2674_v34 = vsel %vm7751_vm5, %v6408_v21, %v2673_v63 }
 0x1c8   : > { %v9219_v32 = vadd.f32 %v2566_v2, %v2211_v41  ;;  %v3050_v2 = vpack.c.b16 %v8893_v1, %v10562_v23  ;;  %v7370_v1 = vld [vmem:[%s10339_s1 + $0x3c8] sm:$0xff] }
 0x1c9   : > { %v1814_v53 = vpop.f32.mrf.mxu3  ;;  %3412 = vmatpush.bf16.msra.mxu3 %v7370_v1 }
 0x1ca   : > { %v1844_v51 = vadd.f32 %v1814_v53, %v8876_v61  ;;  %v10563_v61 = vld [vmem:[#allocation23_spill] sm:$0xff] }
 0x1cb   : > { %v2568_v42 = vpop.f32.mrf.mxu2  ;;  %v1963_v36 = vpop.f32.mrf.mxu0  ;;  %v6407_v0 = vrot.slane %v10563_v61, 9  ;;  %v10568_v21 = vunpack.c.l.b16 %v10563_v61 }
 0x1cc   : > { %v1990_v8 = vadd.f32 %v1960_v9, %v1844_v51 }
 0x1cd   : > { %v2185_v12 = vpop.f32.mrf.mxu1  ;;  %v2670_v51 = vsel %vm7751_vm5, %v6407_v0, %v2669_v38  ;;  %v10567_v0 = vld [vmem:[#allocation32_spill] sm:$0xff]  ;;  %v2875_v63 = vpack.c.b16 %v10569_v49, %v10568_v21 }
 0x1ce   : > { %v2212_v18 = vadd.f32 %v2182_v15, %v1990_v8  ;;  %2812 = vmatmul.bf16.gmra.mxu3 %v2724_v17  ;;  %2962 = vmatmul.bf16.gmra.mxu0 %v2874_v56  ;;  %v10566_v15 = vld [vmem:[#allocation29_spill] sm:$0xff]  ;;  %v2715_v56 = vunpack.c.l.b16 %v2670_v51  ;;  %v7378_v8 = vld [vmem:[%s10339_s1 + $0x408] sm:$0xff] }
 0x1cf   : > { %3576 = vmatpush.bf16.msra.mxu0 %v7378_v8 }
 0x1d0   : > { %3296 = vmatmul.bf16.gmra.mxu2 %v3208_v45  ;;  %3138 = vmatmul.bf16.gmra.mxu1 %v3050_v2  ;;  %v9239_v41 = vadd.f32 %v2568_v42, %v2212_v18  ;;  %v2716_v45 = vunpack.c.l.b16 %v2674_v34  ;;  %v7394_v2 = vld [vmem:[%s10339_s1 + $0x488] sm:$0xff]  ;;  %v9263_v38 = vpack.c.b16 %v2715_v56, %v2714_v59  ;;  %v10571_v59 = vld [vmem:[#allocation28_spill] sm:$0xff] }
 0x1d1   : > { %v1817_v9 = vpop.f32.mrf.mxu3  ;;  %3944 = vmatpush.bf16.msra.mxu2 %v7394_v2  ;;  %v2677_v61 = vrot.slane %v10571_v59, 5  ;;  %v10572_v2 = vld [vmem:[#allocation34_spill] sm:$0xff] }
 0x1d2   : > { %v1845_v6 = vadd.f32 %v1817_v9, %v10566_v15  ;;  %v3209_v9 = vpack.c.b16 %v2716_v45, %v2715_v56  ;;  %v10570_v15 = vld [vmem:[#allocation7_spill] sm:$0xff]  ;;  %v9282_v56 = vld [vmem:[%s7681_s26 + $0xe0] sm:$0xf] }
 0x1d3   : > { %v2571_v50 = vpop.f32.mrf.mxu2  ;;  %v1965_v53 = vpop.f32.mrf.mxu0  ;;  %v3014_v21 = vshrl.u32 %v9282_v56, 16  ;;  %v3017_v49 = vshll.u32 %v9282_v56, 16  ;;  %v7385_v59 = vld [vmem:[%s10339_s1 + $0x440] sm:$0xff] }
 0x1d4   : > { %v1991_v17 = vadd.f32 %v1963_v36, %v1845_v6  ;;  %v7386_v36 = vld [vmem:[%s10339_s1 + $0x448] sm:$0xff]  ;;  %v3051_v6 = vpack.c.b16 %v8955_v48, %v10570_v15  ;;  %v2681_v48 = vrot.slane %v8963_v31, 5 }
 0x1d5   : > { %v2187_v42 = vpop.f32.mrf.mxu1  ;;  %3722 = vmatpush.bf16.msra.mxu1 %v7386_v36 }
 0x1d6   : > { %v2213_v3 = vadd.f32 %v2185_v12, %v1991_v17 }
 0x1d8   : > { %v9251_v23 = vadd.f32 %v2571_v50, %v2213_v3  ;;  %v6410_v3 = vrot.slane %v8936_v26, 9  ;;  %v2685_v26 = vrot.slane %v8977_v43, 5 }
 0x1d9   : > { %v1819_v18 = vpop.f32.mrf.mxu3  ;;  %3723 = vmatpush.bf16.msra.mxu1 %v7385_v59 }
 0x1da   : > { %v1846_v39 = vadd.f32 %v1819_v18, %v10567_v0  ;;  %v2678_v0 = vsel %vm7751_vm5, %v6409_v20, %v2677_v61  ;;  %v9289_v31 = vsel %vm7751_vm5, %v6410_v3, %v2681_v48  ;;  %v7377_v20 = vld [vmem:[%s10339_s1 + $0x400] sm:$0xff] }
 0x1db   : > { %v2573_v12 = vpop.f32.mrf.mxu2  ;;  %v1968_v1 = vpop.f32.mrf.mxu0  ;;  %v2718_v15 = vunpack.c.l.b16 %v9289_v31  ;;  %v6297_v61 = vld [vmem:[%s7681_s26 + $0xe4] sm:$0x1]  ;;  %3577 = vmatpush.bf16.msra.mxu0 %v7377_v20 }
 0x1dc   : > { %v1992_v50 = vadd.f32 %v1965_v53, %v1846_v39  ;;  %v7369_v53 = vld [vmem:[%s10339_s1 + $0x3c0] sm:$0xff] }
 0x1dd   : > { %v2190_v51 = vpop.f32.mrf.mxu1  ;;  %3413 = vmatpush.bf16.msra.mxu3 %v7369_v53 }
 0x1de   : > { %v2214_v17 = vadd.f32 %v2187_v42, %v1992_v50  ;;  %2817 = vmatmul.bf16.gmra.mxu3 %v9263_v38  ;;  %2967 = vmatmul.bf16.gmra.mxu0 %v2875_v63  ;;  %v3016_v50 = vrot.slane %v3014_v21, 4 }
 0x1e0   : > { %3301 = vmatmul.bf16.gmra.mxu2 %v3209_v9  ;;  %3143 = vmatmul.bf16.gmra.mxu1 %v3051_v6  ;;  %v9274_v34 = vadd.f32 %v2573_v12, %v2214_v17  ;;  %v2717_v9 = vunpack.c.l.b16 %v2678_v0  ;;  %v3019_v17 = vrot.slane %v3017_v49, 5  ;;  %v10574_v0 = vld [vmem:[#allocation33_spill] sm:$0xff] }
 0x1e1   : > { %v1822_v42 = vpop.f32.mrf.mxu3 }
 0x1e2   : > { %v1847_v8 = vadd.f32 %v1822_v42, %v10572_v2  ;;  %v9307_v53 = vpack.c.b16 %v2717_v9, %v2716_v45  ;;  %v10573_v42 = vunpack.c.l.b16 %v8879_v19  ;;  %v3020_v49 = vor.u32 %v3019_v17, %v3016_v50 }
 0x1e3   : > { %v2576_v36 = vpop.f32.mrf.mxu2  ;;  %v1970_v18 = vpop.f32.mrf.mxu0  ;;  %v6411_v19 = vrot.slane %v8942_v13, 9 }
 0x1e4   : > { %v1993_v39 = vadd.f32 %v1968_v1, %v1847_v8  ;;  %v7393_v1 = vld [vmem:[%s10339_s1 + $0x480] sm:$0xff]  ;;  %v2876_v2 = vpack.c.b16 %v2090_v44, %v10573_v42  ;;  %v6557_v44 = vrot.slane %v9282_v56, 9 }
 0x1e5   : > { %v2192_v12 = vpop.f32.mrf.mxu1  ;;  %3945 = vmatpush.bf16.msra.mxu2 %v7393_v1  ;;  %v2686_v43 = vsel %vm7751_vm5, %v6411_v19, %v2685_v26  ;;  %v10575_v19 = vunpack.c.l.b16 %v8942_v13 }
 0x1e6   : > { %v2215_v63 = vadd.f32 %v2190_v51, %v1993_v39  ;;  %v3052_v39 = vpack.c.b16 %v9011_v28, %v10574_v0  ;;  %v3183_v28 = vrot.slane %v6297_v61, 5  ;;  %v2719_v42 = vunpack.c.l.b16 %v2686_v43 }
 0x1e8   : > { %v9294_v6 = vadd.f32 %v2576_v36, %v2215_v63  ;;  %v3210_v36 = vpack.c.b16 %v2718_v15, %v2717_v9  ;;  %v3021_v9 = vrot.slane %v3020_v49, 4 }
 0x1e9   : > { %v1824_v51 = vpop.f32.mrf.mxu3 }
 0x1ea   : > { %v1848_v3 = vadd.f32 %v1824_v51, %v8997_v55  ;;  %v3023_v55 = vshll.u32 %v6297_v61, 16  ;;  %v9329_v61 = vsel %vm7751_vm5, %v6557_v44, %v3183_v28 }
 0x1eb   : > { %v2578_v48 = vpop.f32.mrf.mxu2  ;;  %v1973_v8 = vpop.f32.mrf.mxu0 }
 0x1ec   : > { %v1994_v31 = vadd.f32 %v1970_v18, %v1848_v3  ;;  %v3025_v18 = vrot.slane %v3023_v55, 5 }
 0x1ed   : > { %v2195_v21 = vpop.f32.mrf.mxu1 }
 0x1ee   : > { %v2216_v63 = vadd.f32 %v2192_v12, %v1994_v31  ;;  %2822 = vmatmul.bf16.gmra.mxu3 %v9307_v53  ;;  %2972 = vmatmul.bf16.gmra.mxu0 %v2876_v2  ;;  %v7408_v12 = vld [vmem:[%s10339_s1 + $0x4f8] sm:$0xff]  ;;  %v3026_v3 = vsel %vm7731_vm4, %v3021_v9, %v3025_v18  ;;  %v10417_v2 = vunpack.c.l.b16 %v9282_v56  ;;  %v9360_v18 = vld [vmem:[%s7681_s26 + $0xa8] sm:$0xf] }
 0x1ef   : > { %4324 = vmatpush.bf16.msrb.mxu3 %v7408_v12  ;;  %v7424_v31 = vld [vmem:[%s10339_s1 + $0x578] sm:$0xff] }
 0x1f0   : > { %3306 = vmatmul.bf16.gmra.mxu2 %v3210_v36  ;;  %3148 = vmatmul.bf16.gmra.mxu1 %v3052_v39  ;;  %v9319_v45 = vadd.f32 %v2578_v48, %v2216_v63  ;;  %v9335_v36 = vunpack.c.l.b16 %v3026_v3  ;;  %v7416_v39 = vld [vmem:[%s10339_s1 + $0x538] sm:$0xff]  ;;  %v9349_v63 = vpack.c.b16 %v2719_v42, %v2718_v15  ;;  %v2877_v26 = vpack.c.b16 %v10417_v2, %v10575_v19  ;;  %v10582_v2 = vld [vmem:[#allocation22_spill] sm:$0xff] }
 0x1f1   : > { %v1827_v50 = vpop.f32.mrf.mxu3  ;;  %4566 = vmatpush.bf16.msrb.mxu0 %v7416_v39  ;;  %4716 = vmatpush.bf16.msrb.mxu1 %v7424_v31 }
 0x1f2   : > { %v1849_v17 = vadd.f32 %v1827_v50, %v9017_v35  ;;  %v10416_v35 = vunpack.c.l.b16 %v9329_v61  ;;  %v3053_v9 = vpack.c.b16 %v9335_v36, %v9013_v47  ;;  %v3859_v50 = vunpack.c.l.b16 %v9360_v18 }
 0x1f3   : > { %v2581_v1 = vpop.f32.mrf.mxu2  ;;  %v1975_v20 = vpop.f32.mrf.mxu0 }
 0x1f4   : > { %v1995_v59 = vadd.f32 %v1973_v8, %v1849_v17  ;;  %v7432_v8 = vld [vmem:[%s10339_s1 + $0x5b8] sm:$0xff]  ;;  %v3211_v28 = vpack.c.b16 %v10416_v35, %v2719_v42 }
 0x1f5   : > { %v2197_v51 = vpop.f32.mrf.mxu1  ;;  %4892 = vmatpush.bf16.msrb.mxu2 %v7432_v8  ;;  %v9377_v8 = vld [vmem:[%s7681_s26 + $0xa0] sm:$0xf] }
 0x1f6   : > { %v2217_v48 = vadd.f32 %v2195_v21, %v1995_v59  ;;  %v3858_v31 = vunpack.c.l.b16 %v9377_v8 }
 0x1f8   : > { %v9337_v0 = vadd.f32 %v2581_v1, %v2217_v48 }
 0x1f9   : > { %v1829_v21 = vpop.f32.mrf.mxu3 }
 0x1fa   : > { %v1850_v49 = vadd.f32 %v1829_v21, %v9049_v16  ;;  %v9363_v16 = vld [vmem:[%s7681_s26 + $0xb0] sm:$0xf] }
 0x1fb   : > { %v2583_v55 = vpop.f32.mrf.mxu2  ;;  %v1978_v44 = vpop.f32.mrf.mxu0  ;;  %v3860_v17 = vunpack.c.l.b16 %v9363_v16 }
 0x1fc   : > { %v1996_v15 = vadd.f32 %v1975_v20, %v1850_v49  ;;  %v7407_v20 = vld [vmem:[%s10339_s1 + $0x4f0] sm:$0xff] }
 0x1fd   : > { %v2200_v12 = vpop.f32.mrf.mxu1  ;;  %v9370_v47 = vpack.c.b16 %v3860_v17, %v3859_v50  ;;  %4325 = vmatpush.bf16.msrb.mxu3 %v7407_v20  ;;  %v7431_v49 = vld [vmem:[%s10339_s1 + $0x5b0] sm:$0xff]  ;;  %v10576_v20 = vld [vmem:[#allocation15_spill] sm:$0xff] }
 0x1fe   : > { %v2218_v13 = vadd.f32 %v2197_v51, %v1996_v15  ;;  %2827 = vmatmul.bf16.gmra.mxu3 %v9349_v63  ;;  %2977 = vmatmul.bf16.gmra.mxu0 %v2877_v26 }
 0x1ff   : > { %4893 = vmatpush.bf16.msrb.mxu2 %v7431_v49 }
 0x200   : > { %3311 = vmatmul.bf16.gmra.mxu2 %v3211_v28  ;;  %3153 = vmatmul.bf16.gmra.mxu1 %v3053_v9  ;;  %v9368_v1 = vadd.f32 %v2583_v55, %v2218_v13  ;;  %v7423_v55 = vld [vmem:[%s10339_s1 + $0x570] sm:$0xff]  ;;  %v3874_v9 = vpack.c.b16 %v3859_v50, %v3858_v31  ;;  %v9402_v31 = vld [vmem:[%s7681_s26 + $0xb8] sm:$0xf] }
 0x201   : > { %v1832_v43 = vpop.f32.mrf.mxu3  ;;  %4717 = vmatpush.bf16.msrb.mxu1 %v7423_v55  ;;  %v7430_v55 = vld [vmem:[%s10339_s1 + $0x5a8] sm:$0xff] }
 0x202   : > { %v1851_v59 = vadd.f32 %v1832_v43, %v9062_v30  ;;  %v7415_v30 = vld [vmem:[%s10339_s1 + $0x530] sm:$0xff]  ;;  %v10577_v43 = vld [vmem:[#allocation14_spill] sm:$0xff] }
 0x203   : > { %v2586_v51 = vpop.f32.mrf.mxu2  ;;  %v1980_v3 = vpop.f32.mrf.mxu0  ;;  %4567 = vmatpush.bf16.msrb.mxu0 %v7415_v30  ;;  %v10415_v30 = vunpack.c.l.b16 %v9402_v31  ;;  %4894 = vmatpush.bf16.msrb.mxu2 %v7430_v55 }
 0x204   : > { %v1997_v48 = vadd.f32 %v1978_v44, %v1851_v59 }
 0x205   : > { %v2202_v42 = vpop.f32.mrf.mxu1 }
 0x206   : > { %v2219_v39 = vadd.f32 %v2200_v12, %v1997_v48 }
 0x208   : > { %v9380_v21 = vadd.f32 %v2586_v51, %v2219_v39 }
 0x209   : > { %v1834_v19 = vpop.f32.mrf.mxu3 }
 0x20a   : > { %v1852_v26 = vadd.f32 %v1834_v19, %v9080_v4  ;;  %v7406_v4 = vld [vmem:[%s10339_s1 + $0x4e8] sm:$0xff] }
 0x20b   : > { %v2588_v44 = vpop.f32.mrf.mxu2  ;;  %v2943_v28 = vpop.f32.mrf.mxu0  ;;  %4326 = vmatpush.bf16.msrb.mxu3 %v7406_v4  ;;  %v7422_v19 = vld [vmem:[%s10339_s1 + $0x568] sm:$0xff]  ;;  %v10580_v4 = vld [vmem:[#allocation18_spill] sm:$0xff] }
 0x20c   : > { %v1998_v15 = vadd.f32 %v1980_v3, %v1852_v26  ;;  %4718 = vmatpush.bf16.msrb.mxu1 %v7422_v19  ;;  %v9440_v19 = vld [vmem:[%s7681_s26 + $0xc8] sm:$0xf] }
 0x20d   : > { %v3119_v12 = vpop.f32.mrf.mxu1 }
 0x20e   : > { %v2220_v13 = vadd.f32 %v2202_v42, %v1998_v15  ;;  %3414 = vmatmul.bf16.vlgmr.msra.gmra.mxu3 %v10576_v20  ;;  %3578 = vmatmul.bf16.vlgmr.msra.gmra.mxu0 %v10577_v43  ;;  %v9419_v15 = vpack.c.b16 %v10415_v30, %v3860_v17  ;;  %v10579_v43 = vld [vmem:[#allocation19_spill] sm:$0xff]  ;;  %v7405_v17 = vld [vmem:[%s10339_s1 + $0x4e0] sm:$0xff] }
 0x20f   : > { %4327 = vmatpush.bf16.msrb.mxu3 %v7405_v17 }
 0x210   : > { %3946 = vmatmul.bf16.vlgmr.msra.gmra.mxu2 %v3874_v9  ;;  %3724 = vmatmul.bf16.vlgmr.msra.gmra.mxu1 %v9104_v10  ;;  %v9395_v59 = vadd.f32 %v2588_v44, %v2220_v13  ;;  %10578 = vst [vmem:[#allocation9_spill] sm:$0xff] %v9419_v15 }
 0x211   : > { %v2793_v51 = vpop.f32.mrf.mxu3 }
 0x212   : > { %v2833_v50 = vadd.f32 %v2793_v51, %v9092_v33  ;;  %v7414_v33 = vld [vmem:[%s10339_s1 + $0x528] sm:$0xff]  ;;  %v9428_v51 = vld [vmem:[%s7681_s26 + $0x98] sm:$0xf] }
 0x213   : > { %v3277_v3 = vpop.f32.mrf.mxu2  ;;  %v2945_v48 = vpop.f32.mrf.mxu0  ;;  %4568 = vmatpush.bf16.msrb.mxu0 %v7414_v33  ;;  %v9437_v33 = vld [vmem:[%s7681_s26 + $0xc0] sm:$0xf] }
 0x214   : > { %v2983_v42 = vadd.f32 %v2943_v28, %v2833_v50 }
 0x215   : > { %v3121_v39 = vpop.f32.mrf.mxu1 }
 0x216   : > { %v3159_v49 = vadd.f32 %v3119_v12, %v2983_v42 }
 0x218   : > { %v9405_v10 = vadd.f32 %v3277_v3, %v3159_v49  ;;  %v3475_v49 = vshll.u32 %v9428_v51, 16 }
 0x219   : > { %v2795_v26 = vpop.f32.mrf.mxu3 }
 0x21a   : > { %v2834_v44 = vadd.f32 %v2795_v26, %v9115_v46 }
 0x21b   : > { %v3279_v28 = vpop.f32.mrf.mxu2  ;;  %v2948_v9 = vpop.f32.mrf.mxu0 }
 0x21c   : > { %v2984_v12 = vadd.f32 %v2945_v48, %v2834_v44  ;;  %v10425_v44 = vunpack.c.l.b16 %v9437_v33 }
 0x21d   : > { %v3124_v13 = vpop.f32.mrf.mxu1 }
 0x21e   : > { %v3160_v20 = vadd.f32 %v3121_v39, %v2984_v12  ;;  %3419 = vmatmul.bf16.gmra.mxu3 %v10579_v43  ;;  %3583 = vmatmul.bf16.gmra.mxu0 %v10580_v4  ;;  %v3472_v39 = vshrl.u32 %v9428_v51, 16  ;;  %v6279_v12 = vld [vmem:[%s7681_s26 + $0x9c] sm:$0x1]  ;;  %v7429_v4 = vld [vmem:[%s10339_s1 + $0x5a0] sm:$0xff] }
 0x21f   : > { %4895 = vmatpush.bf16.msrb.mxu2 %v7429_v4 }
 0x220   : > { %3951 = vmatmul.bf16.gmra.mxu2 %v9419_v15  ;;  %3729 = vmatmul.bf16.gmra.mxu1 %v9148_v14  ;;  %v9425_v46 = vadd.f32 %v3279_v28, %v3160_v20  ;;  %v10419_v28 = vunpack.c.l.b16 %v9440_v19  ;;  %v3477_v20 = vrot.slane %v3475_v49, 5 }
 0x221   : > { %v2798_v50 = vpop.f32.mrf.mxu3 }
 0x222   : > { %v2835_v3 = vadd.f32 %v2798_v50, %v9135_v62  ;;  %v3474_v62 = vrot.slane %v3472_v39, 4  ;;  %v9461_v39 = vpack.c.b16 %v10419_v28, %v10425_v44 }
 0x223   : > { %v3282_v48 = vpop.f32.mrf.mxu2  ;;  %v2950_v42 = vpop.f32.mrf.mxu0 }
 0x224   : > { %v2985_v14 = vadd.f32 %v2948_v9, %v2835_v3  ;;  %v7413_v9 = vld [vmem:[%s10339_s1 + $0x520] sm:$0xff]  ;;  %10581 = vst [vmem:[#allocation11_spill] sm:$0xff] %v9461_v39  ;;  %v3478_v49 = vor.u32 %v3477_v20, %v3474_v62  ;;  %v6702_v62 = vrot.slane %v9428_v51, 9  ;;  %v3639_v20 = vrot.slane %v6279_v12, 5 }
 0x225   : > { %v3126_v55 = vpop.f32.mrf.mxu1  ;;  %4569 = vmatpush.bf16.msrb.mxu0 %v7413_v9 }
 0x226   : > { %v3161_v26 = vadd.f32 %v3124_v13, %v2985_v14  ;;  %v7421_v13 = vld [vmem:[%s10339_s1 + $0x560] sm:$0xff]  ;;  %v3481_v14 = vshll.u32 %v6279_v12, 16  ;;  %v3640_v12 = vsel %vm7751_vm5, %v6702_v62, %v3639_v20 }
 0x227   : > { %4719 = vmatpush.bf16.msrb.mxu1 %v7421_v13 }
 0x228   : > { %v9445_v43 = vadd.f32 %v3282_v48, %v3161_v26  ;;  %v3483_v4 = vrot.slane %v3481_v14, 5  ;;  %v3352_v14 = vunpack.c.l.b16 %v9428_v51 }
 0x229   : > { %v2800_v17 = vpop.f32.mrf.mxu3 }
 0x22a   : > { %v2836_v50 = vadd.f32 %v2800_v17, %v9160_v5  ;;  %v3479_v5 = vrot.slane %v3478_v49, 4  ;;  %v3354_v20 = vpack.c.b16 %v3352_v14, %v2868_v40 }
 0x22b   : > { %v3284_v3 = vpop.f32.mrf.mxu2  ;;  %v2953_v48 = vpop.f32.mrf.mxu0 }
 0x22c   : > { %v2986_v26 = vadd.f32 %v2950_v42, %v2836_v50  ;;  %v7404_v42 = vld [vmem:[%s10339_s1 + $0x4d8] sm:$0xff] }
 0x22d   : > { %v3129_v30 = vpop.f32.mrf.mxu1  ;;  %4328 = vmatpush.bf16.msrb.mxu3 %v7404_v42 }
 0x22e   : > { %v3162_v35 = vadd.f32 %v3126_v55, %v2986_v26  ;;  %3424 = vmatmul.bf16.gmra.mxu3 %v10582_v2  ;;  %3588 = vmatmul.bf16.gmra.mxu0 %v10583_v57 }
 0x230   : > { %3956 = vmatmul.bf16.gmra.mxu2 %v9461_v39  ;;  %3734 = vmatmul.bf16.gmra.mxu1 %v9190_v7  ;;  %v9467_v9 = vadd.f32 %v3284_v3, %v3162_v35  ;;  %v3484_v7 = vsel %vm7731_vm4, %v3479_v5, %v3483_v4  ;;  %v9477_v35 = vld [vmem:[%s7681_s26 + $0xd0] sm:$0xf]  ;;  %v9480_v3 = vld [vmem:[%s7681_s26 + $0xd8] sm:$0xf]  ;;  %v6757_v39 = vld [vmem:[%s7681_s26 + $0xac] sm:$0x1] }
 0x231   : > { %v2803_v2 = vpop.f32.mrf.mxu3  ;;  %v3516_v26 = vunpack.c.l.b16 %v3484_v7  ;;  %v10423_v42 = vunpack.c.l.b16 %v9480_v3  ;;  %v7412_v5 = vld [vmem:[%s10339_s1 + $0x518] sm:$0xff] }
 0x232   : > { %v2837_v57 = vadd.f32 %v2803_v2, %v9178_v11  ;;  %v10424_v11 = vunpack.c.l.b16 %v9477_v35  ;;  %v3662_v2 = vunpack.c.l.b16 %v3640_v12  ;;  %4570 = vmatpush.bf16.msrb.mxu0 %v7412_v5  ;;  %v9521_v5 = vld [vmem:[%s7681_s26 + $0xf8] sm:$0xf] }
 0x233   : > { %v3287_v55 = vpop.f32.mrf.mxu2  ;;  %v2955_v13 = vpop.f32.mrf.mxu0 }
 0x234   : > { %v2987_v17 = vadd.f32 %v2953_v48, %v2837_v57  ;;  %v7428_v48 = vld [vmem:[%s10339_s1 + $0x598] sm:$0xff]  ;;  %v3518_v57 = vpack.c.b16 %v3516_v26, %v9176_v25  ;;  %v9506_v7 = vpack.c.b16 %v10423_v42, %v10424_v11  ;;  %v7403_v25 = vld [vmem:[%s10339_s1 + $0x4d0] sm:$0xff] }
 0x235   : > { %v3131_v50 = vpop.f32.mrf.mxu1  ;;  %4896 = vmatpush.bf16.msrb.mxu2 %v7428_v48  ;;  %4329 = vmatpush.bf16.msrb.mxu3 %v7403_v25 }
 0x236   : > { %v3163_v49 = vadd.f32 %v3129_v30, %v2987_v17  ;;  %v7420_v30 = vld [vmem:[%s10339_s1 + $0x558] sm:$0xff]  ;;  %10584 = vst [vmem:[#allocation13_spill] sm:$0xff] %v9506_v7  ;;  %v10585_v17 = vunpack.c.l.b16 %v9170_v54 }
 0x237   : > { %4720 = vmatpush.bf16.msrb.mxu1 %v7420_v30 }
 0x238   : > { %v9487_v28 = vadd.f32 %v3287_v55, %v3163_v49  ;;  %v3664_v12 = vpack.c.b16 %v3662_v2, %v10585_v17 }
 0x239   : > { %v2805_v51 = vpop.f32.mrf.mxu3 }
 0x23a   : > { %v2838_v4 = vadd.f32 %v2805_v51, %v9205_v27 }
 0x23b   : > { %v3289_v62 = vpop.f32.mrf.mxu2  ;;  %v2958_v55 = vpop.f32.mrf.mxu0 }
 0x23c   : > { %v2988_v27 = vadd.f32 %v2955_v13, %v2838_v4  ;;  %v10422_v4 = vunpack.c.l.b16 %v9521_v5 }
 0x23d   : > { %v3134_v49 = vpop.f32.mrf.mxu1 }
 0x23e   : > { %v3164_v29 = vadd.f32 %v3131_v50, %v2988_v27  ;;  %3429 = vmatmul.bf16.gmra.mxu3 %v3354_v20  ;;  %3593 = vmatmul.bf16.gmra.mxu0 %v3518_v57  ;;  %v9518_v50 = vld [vmem:[%s7681_s26 + $0xf0] sm:$0xf] }
 0x23f   : > { %v3866_v51 = vunpack.c.l.b16 %v9518_v50  ;;  %v7411_v20 = vld [vmem:[%s10339_s1 + $0x510] sm:$0xff] }
 0x240   : > { %3961 = vmatmul.bf16.gmra.mxu2 %v9506_v7  ;;  %3739 = vmatmul.bf16.gmra.mxu1 %v3664_v12  ;;  %v9511_v40 = vadd.f32 %v3289_v62, %v3164_v29  ;;  %v7419_v57 = vld [vmem:[%s10339_s1 + $0x550] sm:$0xff]  ;;  %v9647_v7 = vld [vmem:[%s7681_s26 + $0xa4] sm:$0x1] }
 0x241   : > { %v2808_v14 = vpop.f32.mrf.mxu3  ;;  %4571 = vmatpush.bf16.msrb.mxu0 %v7411_v20  ;;  %4721 = vmatpush.bf16.msrb.mxu1 %v7419_v57  ;;  %v9549_v57 = vld [vmem:[%s7681_s26 + $0x100] sm:$0xf] }
 0x242   : > { %v2839_v54 = vadd.f32 %v2808_v14, %v9219_v32  ;;  %v7427_v32 = vld [vmem:[%s10339_s1 + $0x590] sm:$0xff] }
 0x243   : > { %v3292_v26 = vpop.f32.mrf.mxu2  ;;  %v2960_v13 = vpop.f32.mrf.mxu0  ;;  %4897 = vmatpush.bf16.msrb.mxu2 %v7427_v32 }
 0x244   : > { %v2989_v2 = vadd.f32 %v2958_v55, %v2839_v54  ;;  %v10586_v54 = vld [vmem:[#allocation31_spill] sm:$0xff] }
 0x245   : > { %v3136_v48 = vpop.f32.mrf.mxu1 }
 0x246   : > { %v3165_v30 = vadd.f32 %v3134_v49, %v2989_v2  ;;  %v3878_v49 = vpack.c.b16 %v10422_v4, %v3866_v51  ;;  %v7402_v2 = vld [vmem:[%s10339_s1 + $0x4c8] sm:$0xff] }
 0x247   : > { %4330 = vmatpush.bf16.msrb.mxu3 %v7402_v2 }
 0x248   : > { %v9525_v62 = vadd.f32 %v3292_v26, %v3165_v30  ;;  %v10587_v26 = vld [vmem:[#allocation30_spill] sm:$0xff] }
 0x249   : > { %v2810_v55 = vpop.f32.mrf.mxu3 }
 0x24a   : > { %v2840_v17 = vadd.f32 %v2810_v55, %v9239_v41  ;;  %v9552_v55 = vld [vmem:[%s7681_s26 + $0x108] sm:$0xf] }
 0x24b   : > { %v3294_v12 = vpop.f32.mrf.mxu2  ;;  %v2963_v27 = vpop.f32.mrf.mxu0 }
 0x24c   : > { %v2990_v29 = vadd.f32 %v2960_v13, %v2840_v17 }
 0x24d   : > { %v3139_v25 = vpop.f32.mrf.mxu1 }
 0x24e   : > { %v3166_v14 = vadd.f32 %v3136_v48, %v2990_v29  ;;  %3434 = vmatmul.bf16.gmra.mxu3 %v10586_v54  ;;  %3598 = vmatmul.bf16.gmra.mxu0 %v10587_v26  ;;  %v7418_v29 = vld [vmem:[%s10339_s1 + $0x548] sm:$0xff] }
 0x24f   : > { %4722 = vmatpush.bf16.msrb.mxu1 %v7418_v29 }
 0x250   : > { %3966 = vmatmul.bf16.gmra.mxu2 %v3878_v49  ;;  %3744 = vmatmul.bf16.gmra.mxu1 %v9263_v38  ;;  %v9542_v41 = vadd.f32 %v3294_v12, %v3166_v14  ;;  %v10421_v38 = vunpack.c.l.b16 %v9549_v57  ;;  %v10420_v12 = vunpack.c.l.b16 %v9552_v55 }
 0x251   : > { %v2813_v30 = vpop.f32.mrf.mxu3 }
 0x252   : > { %v2841_v13 = vadd.f32 %v2813_v30, %v9251_v23  ;;  %v7426_v23 = vld [vmem:[%s10339_s1 + $0x588] sm:$0xff]  ;;  %v9572_v2 = vpack.c.b16 %v10420_v12, %v10421_v38 }
 0x253   : > { %v3297_v51 = vpop.f32.mrf.mxu2  ;;  %v2965_v32 = vpop.f32.mrf.mxu0  ;;  %4898 = vmatpush.bf16.msrb.mxu2 %v7426_v23 }
 0x254   : > { %v2991_v48 = vadd.f32 %v2963_v27, %v2841_v13  ;;  %v7410_v27 = vld [vmem:[%s10339_s1 + $0x508] sm:$0xff]  ;;  %10589 = vst [vmem:[#allocation10_spill] sm:$0xff] %v9572_v2 }
 0x255   : > { %v3141_v20 = vpop.f32.mrf.mxu1  ;;  %4572 = vmatpush.bf16.msrb.mxu0 %v7410_v27 }
 0x256   : > { %v3167_v17 = vadd.f32 %v3139_v25, %v2991_v48 }
 0x258   : > { %v9556_v49 = vadd.f32 %v3297_v51, %v3167_v17 }
 0x259   : > { %v2815_v25 = vpop.f32.mrf.mxu3 }
 0x25a   : > { %10588 = vst [vmem:[#allocation2_spill] sm:$0xff] %v9556_v49  ;;  %v2842_v14 = vadd.f32 %v2815_v25, %v9274_v34  ;;  %v9579_v34 = vld [vmem:[%s7681_s26 + $0xe8] sm:$0xf]  ;;  %v9590_v25 = vld [vmem:[%s7681_s26 + $0x110] sm:$0xf]  ;;  %v10598_v49 = vunpack.c.l.b16 %v9329_v61 }
 0x25b   : > { %v3299_v54 = vpop.f32.mrf.mxu2  ;;  %v2968_v26 = vpop.f32.mrf.mxu0  ;;  %v3489_v23 = vshll.u32 %v9579_v34, 16  ;;  %v10427_v12 = vunpack.c.l.b16 %v9590_v25 }
 0x25c   : > { %v2992_v30 = vadd.f32 %v2965_v32, %v2842_v14  ;;  %v7401_v32 = vld [vmem:[%s10339_s1 + $0x4c0] sm:$0xff]  ;;  %v9593_v14 = vld [vmem:[%s7681_s26 + $0x118] sm:$0xf] }
 0x25d   : > { %v3144_v13 = vpop.f32.mrf.mxu1  ;;  %4331 = vmatpush.bf16.msrb.mxu3 %v7401_v32  ;;  %10591 = vst [vmem:[#allocation4_spill] sm:$0xff] %v9593_v14  ;;  %v7425_v32 = vld [vmem:[%s10339_s1 + $0x580] sm:$0xff] }
 0x25e   : > { %v3168_v51 = vadd.f32 %v3141_v20, %v2992_v30  ;;  %3439 = vmatmul.bf16.gmra.mxu3 %v8988_v22  ;;  %3603 = vmatmul.bf16.gmra.mxu0 %v8982_v58  ;;  %v3486_v58 = vshrl.u32 %v9579_v34, 16 }
 0x25f   : > { %4899 = vmatpush.bf16.msrb.mxu2 %v7425_v32 }
 0x260   : > { %3971 = vmatmul.bf16.gmra.mxu2 %v9572_v2  ;;  %3749 = vmatmul.bf16.gmra.mxu1 %v9307_v53  ;;  %v9581_v48 = vadd.f32 %v3299_v54, %v3168_v51  ;;  %v3488_v30 = vrot.slane %v3486_v58, 4  ;;  %v3491_v51 = vrot.slane %v3489_v23, 5 }
 0x261   : > { %v2818_v17 = vpop.f32.mrf.mxu3 }
 0x262   : > { %10590 = vst [vmem:[#allocation3_spill] sm:$0xff] %v9581_v48  ;;  %v2843_v22 = vadd.f32 %v2818_v17, %v9294_v6  ;;  %v10426_v6 = vunpack.c.l.b16 %v9593_v14  ;;  %v6299_v17 = vld [vmem:[%s7681_s26 + $0xec] sm:$0x1]  ;;  %v4013_v14 = vshll.u32 %v9647_v7, 16 }
 0x263   : > { %v3302_v20 = vpop.f32.mrf.mxu2  ;;  %v2970_v27 = vpop.f32.mrf.mxu0  ;;  %v3495_v4 = vshll.u32 %v6299_v17, 16  ;;  %v3643_v32 = vrot.slane %v6299_v17, 5  ;;  %v9632_v17 = vld [vmem:[%s7681_s26 + $0x120] sm:$0xf] }
 0x264   : > { %v2993_v53 = vadd.f32 %v2968_v26, %v2843_v22  ;;  %v7409_v26 = vld [vmem:[%s10339_s1 + $0x500] sm:$0xff] }
 0x265   : > { %v3146_v29 = vpop.f32.mrf.mxu1  ;;  %4573 = vmatpush.bf16.msrb.mxu0 %v7409_v26 }
 0x266   : > { %v3169_v54 = vadd.f32 %v3144_v13, %v2993_v53  ;;  %v7417_v13 = vld [vmem:[%s10339_s1 + $0x540] sm:$0xff]  ;;  %v3492_v53 = vor.u32 %v3491_v51, %v3488_v30  ;;  %v3497_v30 = vrot.slane %v3495_v4, 5  ;;  %v6703_v51 = vrot.slane %v9579_v34, 9 }
 0x267   : > { %4723 = vmatpush.bf16.msrb.mxu1 %v7417_v13 }
 0x268   : > { %v9598_v38 = vadd.f32 %v3302_v20, %v3169_v54  ;;  %v9614_v54 = vpack.c.b16 %v10426_v6, %v10427_v12 }
 0x269   : > { %v2820_v22 = vpop.f32.mrf.mxu3 }
 0x26a   : > { %10592 = vst [vmem:[#allocation12_spill] sm:$0xff] %v9598_v38  ;;  %v2844_v58 = vadd.f32 %v2820_v22, %v9319_v45  ;;  %v3493_v45 = vrot.slane %v3492_v53, 4  ;;  %v3644_v22 = vsel %vm7751_vm5, %v6703_v51, %v3643_v32  ;;  %v4035_v53 = vshll.u32 %v9363_v16, 16  ;;  %v6759_v38 = vld [vmem:[%s7681_s26 + $0xb4] sm:$0x1] }
 0x26b   : > { %v3304_v23 = vpop.f32.mrf.mxu2  ;;  %v2973_v20 = vpop.f32.mrf.mxu0  ;;  %10593 = vst [vmem:[#allocation17_spill] sm:$0xff] %v9614_v54  ;;  %v10439_v51 = vunpack.c.l.b16 %v9632_v17  ;;  %v3663_v2 = vunpack.c.l.b16 %v3644_v22  ;;  %v4041_v61 = vshll.u32 %v6759_v38, 16 }
 0x26c   : > { %v2994_v42 = vadd.f32 %v2970_v27, %v2844_v58  ;;  %v4007_v27 = vshll.u32 %v9377_v8, 16  ;;  %v4018_v58 = vshrl.u32 %v9360_v18, 16 }
 0x26d   : > { %v3149_v11 = vpop.f32.mrf.mxu1 }
 0x26e   : > { %v3170_v44 = vadd.f32 %v3146_v29, %v2994_v42  ;;  %3444 = vmatmul.bf16.gmra.mxu3 %v9040_v24  ;;  %3608 = vmatmul.bf16.gmra.mxu0 %v9034_v60  ;;  %v7440_v42 = vld [vmem:[%s10339_s1 + $0x5f8] sm:$0xff]  ;;  %v4004_v60 = vshrl.u32 %v9377_v8, 16  ;;  %v4009_v12 = vrot.slane %v4007_v27, 5  ;;  %v4020_v15 = vrot.slane %v4018_v58, 4 }
 0x26f   : > { %5050 = vmatpush.bf16.msra.mxu3 %v7440_v42  ;;  %v3353_v42 = vunpack.c.l.b16 %v9579_v34  ;;  %v4037_v34 = vrot.slane %v4035_v53, 5  ;;  %v7456_v27 = vld [vmem:[%s10339_s1 + $0x678] sm:$0xff]  ;;  %v10596_v58 = vunpack.c.l.b16 %v9282_v56 }
 0x270   : > { %3976 = vmatmul.bf16.gmra.mxu2 %v9614_v54  ;;  %3754 = vmatmul.bf16.gmra.mxu1 %v9349_v63  ;;  %v9621_v26 = vadd.f32 %v3304_v23, %v3170_v44  ;;  %v3498_v63 = vsel %vm7731_vm4, %v3493_v45, %v3497_v30  ;;  %v9635_v44 = vld [vmem:[%s7681_s26 + $0x128] sm:$0xf]  ;;  %v4021_v23 = vshll.u32 %v9360_v18, 16  ;;  %v4006_v6 = vrot.slane %v4004_v60, 4  ;;  %v7448_v60 = vld [vmem:[%s10339_s1 + $0x638] sm:$0xff] }
 0x271   : > { %v2823_v24 = vpop.f32.mrf.mxu3  ;;  %v10438_v32 = vunpack.c.l.b16 %v9635_v44  ;;  %5188 = vmatpush.bf16.msra.mxu0 %v7448_v60  ;;  %5352 = vmatpush.bf16.msra.mxu1 %v7456_v27 }
 0x272   : > { %10594 = vst [vmem:[#allocation16_spill] sm:$0xff] %v9621_v26  ;;  %v2845_v4 = vadd.f32 %v2823_v24, %v9337_v0  ;;  %v4032_v0 = vshrl.u32 %v9363_v16, 16  ;;  %v3517_v24 = vunpack.c.l.b16 %v3498_v63  ;;  %v4023_v26 = vrot.slane %v4021_v23, 5 }
 0x273   : > { %v3307_v29 = vpop.f32.mrf.mxu2  ;;  %v2975_v13 = vpop.f32.mrf.mxu0  ;;  %v3355_v23 = vpack.c.b16 %v3353_v42, %v10596_v58 }
 0x274   : > { %v2995_v45 = vadd.f32 %v2973_v20, %v2845_v4  ;;  %v6891_v20 = vrot.slane %v9360_v18, 9  ;;  %v4411_v4 = vrot.slane %v6757_v39, 5  ;;  %v4034_v48 = vrot.slane %v4032_v0, 4 }
 0x275   : > { %v3151_v30 = vpop.f32.mrf.mxu1  ;;  %v6892_v18 = vrot.slane %v9363_v16, 9  ;;  %v4415_v0 = vrot.slane %v6759_v38, 5  ;;  %v3665_v16 = vpack.c.b16 %v3663_v2, %v10598_v49  ;;  %v4043_v38 = vrot.slane %v4041_v61, 5  ;;  %v6761_v61 = vld [vmem:[%s7681_s26 + $0xbc] sm:$0x1] }
 0x276   : > { %v3171_v54 = vadd.f32 %v3149_v11, %v2995_v45  ;;  %v7464_v11 = vld [vmem:[%s10339_s1 + $0x6b8] sm:$0xff]  ;;  %v4038_v42 = vor.u32 %v4037_v34, %v4034_v48  ;;  %v4407_v48 = vrot.slane %v9647_v7, 5 }
 0x277   : > { %5498 = vmatpush.bf16.msra.mxu2 %v7464_v11  ;;  %v4015_v11 = vrot.slane %v4013_v14, 5  ;;  %v7439_v14 = vld [vmem:[%s10339_s1 + $0x5f0] sm:$0xff] }
 0x278   : > { %v9652_v63 = vadd.f32 %v3307_v29, %v3171_v54  ;;  %v3519_v54 = vpack.c.b16 %v3517_v24, %v9335_v36  ;;  %v4010_v29 = vor.u32 %v4009_v12, %v4006_v6  ;;  %v4024_v36 = vor.u32 %v4023_v26, %v4020_v15  ;;  %5051 = vmatpush.bf16.msra.mxu3 %v7439_v14 }
 0x279   : > { %v2825_v22 = vpop.f32.mrf.mxu3  ;;  %v4027_v12 = vshll.u32 %v6757_v39, 16  ;;  %v9681_v6 = vsel %vm7751_vm5, %v6892_v18, %v4415_v0 }
 0x27a   : > { %10595 = vst [vmem:[#allocation5_spill] sm:$0xff] %v9652_v63  ;;  %v2846_v53 = vadd.f32 %v2825_v22, %v9368_v1  ;;  %v9672_v63 = vpack.c.b16 %v10438_v32, %v10439_v51  ;;  %v4412_v1 = vsel %vm7751_vm5, %v6891_v20, %v4411_v4  ;;  %v4011_v49 = vrot.slane %v4010_v29, 4 }
 0x27b   : > { %v3309_v45 = vpop.f32.mrf.mxu2  ;;  %v2978_v56 = vpop.f32.mrf.mxu0  ;;  %v4487_v60 = vunpack.c.l.b16 %v4412_v1  ;;  %v4488_v15 = vunpack.c.l.b16 %v9681_v6  ;;  %v4025_v39 = vrot.slane %v4024_v36, 4  ;;  %v4029_v26 = vrot.slane %v4027_v12, 5 }
 0x27c   : > { %10597 = vst [vmem:[#allocation6_spill] sm:$0xff] %v9672_v63  ;;  %v2996_v24 = vadd.f32 %v2975_v13, %v2846_v53  ;;  %v6890_v20 = vrot.slane %v9377_v8, 9  ;;  %v4039_v13 = vrot.slane %v4038_v42, 4  ;;  %v4016_v8 = vsel %vm7731_vm4, %v4011_v49, %v4015_v11 }
 0x27d   : > { %v3154_v22 = vpop.f32.mrf.mxu1  ;;  %v4030_v58 = vsel %vm7731_vm4, %v4025_v39, %v4029_v26  ;;  %v4049_v29 = vshll.u32 %v9402_v31, 16  ;;  %v4244_v12 = vunpack.c.l.b16 %v4016_v8  ;;  %v7463_v26 = vld [vmem:[%s10339_s1 + $0x6b0] sm:$0xff] }
 0x27e   : > { %v3172_v2 = vadd.f32 %v3151_v30, %v2996_v24  ;;  %3449 = vmatmul.bf16.gmra.mxu3 %v3355_v23  ;;  %3613 = vmatmul.bf16.gmra.mxu0 %v3519_v54  ;;  %v9691_v30 = vpack.c.b16 %v4488_v15, %v4487_v60  ;;  %v4408_v23 = vsel %vm7751_vm5, %v6890_v20, %v4407_v48  ;;  %v4046_v54 = vshrl.u32 %v9402_v31, 16  ;;  %v7455_v20 = vld [vmem:[%s10339_s1 + $0x670] sm:$0xff] }
 0x27f   : > { %v4245_v1 = vunpack.c.l.b16 %v4030_v58  ;;  %v4486_v42 = vunpack.c.l.b16 %v4408_v23  ;;  %5499 = vmatpush.bf16.msra.mxu2 %v7463_v26  ;;  %v4055_v23 = vshll.u32 %v6761_v61, 16  ;;  %5353 = vmatpush.bf16.msra.mxu1 %v7455_v20 }
 0x280   : > { %3981 = vmatmul.bf16.gmra.mxu2 %v9672_v63  ;;  %3759 = vmatmul.bf16.gmra.mxu1 %v3665_v16  ;;  %v9687_v4 = vadd.f32 %v3309_v45, %v3172_v2  ;;  %v4060_v45 = vshrl.u32 %v9437_v33, 16  ;;  %v4063_v16 = vshll.u32 %v9437_v33, 16  ;;  %v4048_v49 = vrot.slane %v4046_v54, 4 }
 0x281   : > { %v2828_v34 = vpop.f32.mrf.mxu3  ;;  %v4051_v2 = vrot.slane %v4049_v29, 5 }
 0x282   : > { %v2847_v27 = vadd.f32 %v2828_v34, %v9380_v21  ;;  %v4044_v21 = vsel %vm7731_vm4, %v4039_v13, %v4043_v38  ;;  %v4065_v39 = vrot.slane %v4063_v16, 5  ;;  %v9724_v13 = vld [vmem:[%s7681_s26 + $0xc4] sm:$0x1]  ;;  %v4260_v34 = vpack.c.b16 %v4245_v1, %v4244_v12 }
 0x283   : > { %v3312_v18 = vpop.f32.mrf.mxu2  ;;  %v2980_v7 = vpop.f32.mrf.mxu0  ;;  %v9709_v24 = vunpack.c.l.b16 %v4044_v21  ;;  %v4052_v58 = vor.u32 %v4051_v2, %v4048_v49  ;;  %v4069_v21 = vshll.u32 %v9724_v13, 16  ;;  %v6893_v16 = vrot.slane %v9402_v31, 9 }
 0x284   : > { %v2997_v0 = vadd.f32 %v2978_v56, %v2847_v27  ;;  %v4062_v56 = vrot.slane %v4060_v45, 4  ;;  %v4502_v27 = vpack.c.b16 %v4487_v60, %v4486_v42  ;;  %v4057_v60 = vrot.slane %v4055_v23, 5  ;;  %v6765_v23 = vld [vmem:[%s7681_s26 + $0xcc] sm:$0x1] }
 0x285   : > { %v3156_v53 = vpop.f32.mrf.mxu1  ;;  %v4828_v8 = vpack.c.b16 %v9709_v24, %v4245_v1  ;;  %v4071_v42 = vrot.slane %v4069_v21, 5  ;;  %v4077_v2 = vshll.u32 %v9440_v19, 16 }
 0x286   : > { %v3173_v36 = vadd.f32 %v3154_v22, %v2997_v0  ;;  %v7447_v22 = vld [vmem:[%s10339_s1 + $0x630] sm:$0xff]  ;;  %v4066_v0 = vor.u32 %v4065_v39, %v4062_v56 }
 0x287   : > { %5189 = vmatpush.bf16.msra.mxu0 %v7447_v22 }
 0x288   : > { %v9712_v11 = vadd.f32 %v3312_v18, %v3173_v36  ;;  %v4419_v36 = vrot.slane %v6761_v61, 5  ;;  %v4067_v1 = vrot.slane %v4066_v0, 4 }
 0x289   : > { %v2830_v48 = vpop.f32.mrf.mxu3 }
 0x28a   : > { %v2848_v38 = vadd.f32 %v2830_v48, %v9395_v59  ;;  %v4053_v59 = vrot.slane %v4052_v58, 4  ;;  %v9743_v26 = vsel %vm7751_vm5, %v6893_v16, %v4419_v36  ;;  %v4072_v48 = vsel %vm7731_vm4, %v4067_v1, %v4071_v42  ;;  %v9765_v1 = vld [vmem:[%s7681_s26 + $0xd4] sm:$0x1] }
 0x28b   : > { %v3314_v14 = vpop.f32.mrf.mxu2  ;;  %v3579_v18 = vpop.f32.mrf.mxu0  ;;  %v10437_v58 = vunpack.c.l.b16 %v9743_v26  ;;  %v4083_v36 = vshll.u32 %v6765_v23, 16  ;;  %v4097_v6 = vshll.u32 %v9765_v1, 16 }
 0x28c   : > { %v2998_v54 = vadd.f32 %v2980_v7, %v2848_v38  ;;  %v7438_v7 = vld [vmem:[%s10339_s1 + $0x5e8] sm:$0xff]  ;;  %v4058_v61 = vsel %vm7731_vm4, %v4053_v59, %v4057_v60  ;;  %v4088_v38 = vshrl.u32 %v9477_v35, 16 }
 0x28d   : > { %v3725_v29 = vpop.f32.mrf.mxu1  ;;  %5052 = vmatpush.bf16.msra.mxu3 %v7438_v7  ;;  %v7446_v59 = vld [vmem:[%s10339_s1 + $0x628] sm:$0xff] }
 0x28e   : > { %v3174_v45 = vadd.f32 %v3156_v53, %v2998_v54  ;;  %4332 = vmatmul.bf16.vlgmr.msrb.gmra.mxu3 %v4260_v34  ;;  %4574 = vmatmul.bf16.vlgmr.msrb.gmra.mxu0 %v4502_v27  ;;  %v4074_v53 = vshrl.u32 %v9440_v19, 16  ;;  %v4079_v34 = vrot.slane %v4077_v2, 5  ;;  %v9751_v54 = vunpack.c.l.b16 %v4072_v48 }
 0x28f   : > { %5190 = vmatpush.bf16.msra.mxu0 %v7446_v59 }
 0x290   : > { %4900 = vmatmul.bf16.vlgmr.msrb.gmra.mxu2 %v4828_v8  ;;  %4724 = vmatmul.bf16.vlgmr.msrb.gmra.mxu1 %v9370_v47  ;;  %v9731_v12 = vadd.f32 %v3314_v14, %v3174_v45  ;;  %v4076_v14 = vrot.slane %v4074_v53, 4  ;;  %v4247_v8 = vunpack.c.l.b16 %v4058_v61  ;;  %v7462_v45 = vld [vmem:[%s10339_s1 + $0x6a8] sm:$0xff]  ;;  %v9775_v53 = vpack.c.b16 %v10437_v58, %v4488_v15 }
 0x291   : > { %v3415_v49 = vpop.f32.mrf.mxu3  ;;  %5500 = vmatpush.bf16.msra.mxu2 %v7462_v45  ;;  %v10600_v61 = vunpack.c.l.b16 %v9437_v33 }
 0x292   : > { %v3455_v47 = vadd.f32 %v3415_v49, %v9405_v10  ;;  %v4091_v10 = vshll.u32 %v9477_v35, 16  ;;  %v4080_v16 = vor.u32 %v4079_v34, %v4076_v14  ;;  %v9769_v49 = vpack.c.b16 %v4247_v8, %v9709_v24 }
 0x293   : > { %v3947_v56 = vpop.f32.mrf.mxu2  ;;  %v3581_v39 = vpop.f32.mrf.mxu0  ;;  %v6894_v14 = vrot.slane %v9437_v33, 9  ;;  %v4427_v34 = vrot.slane %v6765_v23, 5  ;;  %v9796_v33 = vld [vmem:[%s7681_s26 + $0xe0] sm:$0xf] }
 0x294   : > { %v3619_v22 = vadd.f32 %v3579_v18, %v3455_v47  ;;  %v4090_v18 = vrot.slane %v4088_v38, 4  ;;  %v4093_v21 = vrot.slane %v4091_v10, 5  ;;  %v4829_v47 = vpack.c.b16 %v9751_v54, %v4247_v8 }
 0x295   : > { %v3727_v20 = vpop.f32.mrf.mxu1  ;;  %v4081_v38 = vrot.slane %v4080_v16, 4  ;;  %v4085_v10 = vrot.slane %v4083_v36, 5 }
 0x296   : > { %v3765_v27 = vadd.f32 %v3725_v29, %v3619_v22  ;;  %v7454_v29 = vld [vmem:[%s10339_s1 + $0x668] sm:$0xff]  ;;  %v4094_v48 = vor.u32 %v4093_v21, %v4090_v18  ;;  %v4099_v18 = vrot.slane %v4097_v6, 5 }
 0x297   : > { %5354 = vmatpush.bf16.msra.mxu1 %v7454_v29  ;;  %v4086_v45 = vsel %vm7731_vm4, %v4081_v38, %v4085_v10  ;;  %v4102_v29 = vshrl.u32 %v9480_v3, 16 }
 0x298   : > { %v9753_v0 = vadd.f32 %v3947_v56, %v3765_v27  ;;  %v10599_v56 = vunpack.c.l.b16 %v9402_v31  ;;  %v4423_v31 = vrot.slane %v9724_v13, 5  ;;  %v4095_v8 = vrot.slane %v4094_v48, 4 }
 0x299   : > { %v3417_v60 = vpop.f32.mrf.mxu3  ;;  %v4104_v6 = vrot.slane %v4102_v29, 4 }
 0x29a   : > { %v3456_v42 = vadd.f32 %v3417_v60, %v9425_v46  ;;  %v4653_v46 = vpack.c.b16 %v10600_v61, %v10599_v56  ;;  %v9801_v23 = vsel %vm7751_vm5, %v6894_v14, %v4423_v31  ;;  %v4105_v60 = vshll.u32 %v9480_v3, 16 }
 0x29b   : > { %v3949_v7 = vpop.f32.mrf.mxu2  ;;  %v3584_v2 = vpop.f32.mrf.mxu0  ;;  %v4785_v56 = vshll.u32 %v9796_v33, 16  ;;  %v4249_v61 = vunpack.c.l.b16 %v4086_v45 }
 0x29c   : > { %v3620_v22 = vadd.f32 %v3581_v39, %v3456_v42  ;;  %v6895_v39 = vrot.slane %v9440_v19, 9  ;;  %v4107_v38 = vrot.slane %v4105_v60, 5 }
 0x29d   : > { %v3730_v24 = vpop.f32.mrf.mxu1  ;;  %v4787_v31 = vrot.slane %v4785_v56, 5 }
 0x29e   : > { %v3766_v15 = vadd.f32 %v3727_v20, %v3620_v22  ;;  %4337 = vmatmul.bf16.gmra.mxu3 %v9769_v49  ;;  %4579 = vmatmul.bf16.gmra.mxu0 %v9775_v53  ;;  %v7437_v20 = vld [vmem:[%s10339_s1 + $0x5e0] sm:$0xff]  ;;  %v9807_v36 = vsel %vm7751_vm5, %v6895_v39, %v4427_v34 }
 0x29f   : > { %5053 = vmatpush.bf16.msra.mxu3 %v7437_v20  ;;  %v10435_v48 = vunpack.c.l.b16 %v9807_v36  ;;  %v7461_v39 = vld [vmem:[%s10339_s1 + $0x6a0] sm:$0xff] }
 0x2a0   : > { %4905 = vmatmul.bf16.gmra.mxu2 %v4829_v47  ;;  %4729 = vmatmul.bf16.gmra.mxu1 %v4653_v46  ;;  %v9788_v27 = vadd.f32 %v3949_v7, %v3766_v15  ;;  %v4782_v47 = vshrl.u32 %v9796_v33, 16  ;;  %v10436_v46 = vunpack.c.l.b16 %v9801_v23  ;;  %v7445_v34 = vld [vmem:[%s10339_s1 + $0x620] sm:$0xff] }
 0x2a1   : > { %v3420_v21 = vpop.f32.mrf.mxu3  ;;  %v9833_v20 = vld [vmem:[%s7681_s26 + $0xe4] sm:$0x1]  ;;  %5501 = vmatpush.bf16.msra.mxu2 %v7461_v39  ;;  %5191 = vmatpush.bf16.msra.mxu0 %v7445_v34  ;;  %v6897_v39 = vrot.slane %v9480_v3, 9 }
 0x2a2   : > { %v3457_v13 = vadd.f32 %v3420_v21, %v9445_v43  ;;  %v4100_v43 = vsel %vm7731_vm4, %v4095_v8, %v4099_v18  ;;  %v4784_v14 = vrot.slane %v4782_v47, 4  ;;  %v9830_v18 = vpack.c.b16 %v4249_v61, %v9751_v54 }
 0x2a3   : > { %v3952_v59 = vpop.f32.mrf.mxu2  ;;  %v3586_v16 = vpop.f32.mrf.mxu0  ;;  %v9815_v10 = vunpack.c.l.b16 %v4100_v43  ;;  %v10601_v54 = vunpack.c.l.b16 %v9440_v19  ;;  %v10602_v43 = vunpack.c.l.b16 %v9477_v35  ;;  %v6896_v19 = vrot.slane %v9477_v35, 9 }
 0x2a4   : > { %v3621_v42 = vadd.f32 %v3584_v2, %v3457_v13  ;;  %v6769_v2 = vld [vmem:[%s7681_s26 + $0xdc] sm:$0x1]  ;;  %v9840_v13 = vpack.c.b16 %v10435_v48, %v10436_v46  ;;  %v4130_v35 = vshrl.u32 %v9521_v5, 16 }
 0x2a5   : > { %v3732_v7 = vpop.f32.mrf.mxu1  ;;  %v4111_v29 = vshll.u32 %v6769_v2, 16  ;;  %v4654_v47 = vpack.c.b16 %v10602_v43, %v10601_v54 }
 0x2a6   : > { %v3767_v22 = vadd.f32 %v3730_v24, %v3621_v42  ;;  %v7453_v24 = vld [vmem:[%s10339_s1 + $0x660] sm:$0xff]  ;;  %v4830_v42 = vpack.c.b16 %v9815_v10, %v4249_v61  ;;  %v4431_v61 = vrot.slane %v9765_v1, 5  ;;  %v4133_v1 = vshll.u32 %v9521_v5, 16 }
 0x2a7   : > { %5355 = vmatpush.bf16.msra.mxu1 %v7453_v24 }
 0x2a8   : > { %v9818_v15 = vadd.f32 %v3952_v59, %v3767_v22  ;;  %v4108_v59 = vor.u32 %v4107_v38, %v4104_v6  ;;  %v4788_v22 = vor.u32 %v4787_v31, %v4784_v14  ;;  %v4113_v38 = vrot.slane %v4111_v29, 5 }
 0x2a9   : > { %v3422_v8 = vpop.f32.mrf.mxu3 }
 0x2aa   : > { %v3458_v21 = vadd.f32 %v3422_v8, %v9467_v9  ;;  %v4791_v8 = vshll.u32 %v9833_v20, 16  ;;  %v4109_v6 = vrot.slane %v4108_v59, 4  ;;  %v4789_v14 = vrot.slane %v4788_v22, 4 }
 0x2ab   : > { %v3954_v45 = vpop.f32.mrf.mxu2  ;;  %v3589_v60 = vpop.f32.mrf.mxu0  ;;  %v4119_v59 = vshll.u32 %v9518_v50, 16  ;;  %v4147_v22 = vshll.u32 %v9549_v57, 16 }
 0x2ac   : > { %v3622_v9 = vadd.f32 %v3586_v16, %v3458_v21  ;;  %v4435_v16 = vrot.slane %v6769_v2, 5  ;;  %v4793_v31 = vrot.slane %v4791_v8, 5  ;;  %v4116_v21 = vshrl.u32 %v9518_v50, 16 }
 0x2ad   : > { %v3735_v56 = vpop.f32.mrf.mxu1 }
 0x2ae   : > { %v3768_v48 = vadd.f32 %v3732_v7, %v3622_v9  ;;  %4342 = vmatmul.bf16.gmra.mxu3 %v9830_v18  ;;  %4584 = vmatmul.bf16.gmra.mxu0 %v9840_v13  ;;  %v7436_v7 = vld [vmem:[%s10339_s1 + $0x5d8] sm:$0xff]  ;;  %v9871_v54 = vsel %vm7751_vm5, %v6897_v39, %v4435_v16  ;;  %v4144_v9 = vshrl.u32 %v9549_v57, 16  ;;  %v4118_v8 = vrot.slane %v4116_v21, 4 }
 0x2af   : > { %5054 = vmatpush.bf16.msra.mxu3 %v7436_v7  ;;  %10603 = vst [vmem:[#allocation20_spill] sm:$0xff] %v9871_v54  ;;  %v4135_v7 = vrot.slane %v4133_v1, 5  ;;  %v10442_v39 = vunpack.c.l.b16 %v9871_v54  ;;  %v6777_v16 = vld [vmem:[%s7681_s26 + $0xfc] sm:$0x1]  ;;  %v4149_v21 = vrot.slane %v4147_v22, 5 }
 0x2b0   : > { %4910 = vmatmul.bf16.gmra.mxu2 %v4830_v42  ;;  %4734 = vmatmul.bf16.gmra.mxu1 %v4654_v47  ;;  %v9853_v34 = vadd.f32 %v3954_v45, %v3768_v48  ;;  %v4114_v45 = vsel %vm7731_vm4, %v4109_v6, %v4113_v38  ;;  %v9867_v42 = vsel %vm7751_vm5, %v6896_v19, %v4431_v61  ;;  %v4121_v6 = vrot.slane %v4119_v59, 5  ;;  %v7444_v59 = vld [vmem:[%s10339_s1 + $0x618] sm:$0xff] }
 0x2b1   : > { %v3425_v24 = vpop.f32.mrf.mxu3  ;;  %v4132_v38 = vrot.slane %v4130_v35, 4  ;;  %v4251_v61 = vunpack.c.l.b16 %v4114_v45  ;;  %v4146_v46 = vrot.slane %v4144_v9, 4  ;;  %v7452_v35 = vld [vmem:[%s10339_s1 + $0x658] sm:$0xff]  ;;  %5192 = vmatpush.bf16.msra.mxu0 %v7444_v59  ;;  %v4443_v59 = vrot.slane %v6777_v16, 5 }
 0x2b2   : > { %v3459_v29 = vadd.f32 %v3425_v24, %v9487_v28  ;;  %v4794_v28 = vsel %vm7731_vm4, %v4789_v14, %v4793_v31  ;;  %v10443_v24 = vunpack.c.l.b16 %v9867_v42  ;;  %v10444_v14 = vunpack.c.l.b16 %v9796_v33  ;;  %5356 = vmatpush.bf16.msra.mxu1 %v7452_v35 }
 0x2b3   : > { %v3957_v2 = vpop.f32.mrf.mxu2  ;;  %v3591_v48 = vpop.f32.mrf.mxu0  ;;  %v4122_v45 = vor.u32 %v4121_v6, %v4118_v8  ;;  %v9900_v58 = vpack.c.b16 %v4251_v61, %v9815_v10 }
 0x2b4   : > { %v3623_v43 = vadd.f32 %v3589_v60, %v3459_v29  ;;  %v6775_v60 = vld [vmem:[%s7681_s26 + $0xf4] sm:$0x1]  ;;  %v9881_v29 = vunpack.c.l.b16 %v4794_v28  ;;  %v4136_v28 = vor.u32 %v4135_v7, %v4132_v38  ;;  %v9906_v32 = vpack.c.b16 %v10442_v39, %v10443_v24 }
 0x2b5   : > { %v3737_v47 = vpop.f32.mrf.mxu1  ;;  %v10604_v38 = vunpack.c.l.b16 %v9480_v3  ;;  %v4123_v63 = vrot.slane %v4122_v45, 4  ;;  %v6898_v3 = vrot.slane %v9518_v50, 9 }
 0x2b6   : > { %v3769_v19 = vadd.f32 %v3735_v56, %v3623_v43  ;;  %v7460_v56 = vld [vmem:[%s10339_s1 + $0x698] sm:$0xff]  ;;  %v4125_v43 = vshll.u32 %v6775_v60, 16  ;;  %v4831_v6 = vpack.c.b16 %v9881_v29, %v4251_v61  ;;  %v4137_v39 = vrot.slane %v4136_v28, 4 }
 0x2b7   : > { %5502 = vmatpush.bf16.msra.mxu2 %v7460_v56  ;;  %v4439_v61 = vrot.slane %v6775_v60, 5 }
 0x2b8   : > { %v9884_v31 = vadd.f32 %v3957_v2, %v3769_v19  ;;  %v4139_v2 = vshll.u32 %v6777_v16, 16  ;;  %v9896_v19 = vld [vmem:[%s7681_s26 + $0x104] sm:$0x1]  ;;  %v4127_v54 = vrot.slane %v4125_v43, 5 }
 0x2b9   : > { %v3427_v1 = vpop.f32.mrf.mxu3  ;;  %v4153_v51 = vshll.u32 %v9896_v19, 16  ;;  %v4440_v16 = vsel %vm7751_vm5, %v6898_v3, %v4439_v61 }
 0x2ba   : > { %v3460_v9 = vadd.f32 %v3427_v1, %v9511_v40  ;;  %v4655_v40 = vpack.c.b16 %v10444_v14, %v10604_v38  ;;  %v4150_v1 = vor.u32 %v4149_v21, %v4146_v46  ;;  %v4141_v24 = vrot.slane %v4139_v2, 5 }
 0x2bb   : > { %v3959_v22 = vpop.f32.mrf.mxu2  ;;  %v3594_v8 = vpop.f32.mrf.mxu0  ;;  %v4155_v35 = vrot.slane %v4153_v51, 5  ;;  %v4128_v43 = vsel %vm7731_vm4, %v4123_v63, %v4127_v54  ;;  %v4158_v2 = vshrl.u32 %v9552_v55, 16  ;;  %v4161_v51 = vshll.u32 %v9552_v55, 16 }
 0x2bc   : > { %v3624_v7 = vadd.f32 %v3591_v48, %v3460_v9  ;;  %v6899_v48 = vrot.slane %v9521_v5, 9  ;;  %v4151_v21 = vrot.slane %v4150_v1, 4  ;;  %v4142_v50 = vsel %vm7731_vm4, %v4137_v39, %v4141_v24 }
 0x2bd   : > { %v3740_v10 = vpop.f32.mrf.mxu1  ;;  %v4172_v24 = vshrl.u32 %v9590_v25, 16  ;;  %v4175_v39 = vshll.u32 %v9590_v25, 16  ;;  %v4253_v38 = vunpack.c.l.b16 %v4142_v50  ;;  %v4163_v3 = vrot.slane %v4161_v51, 5  ;;  %v9956_v50 = vld [vmem:[%s7681_s26 + $0x114] sm:$0x1] }
 0x2be   : > { %v3770_v56 = vadd.f32 %v3737_v47, %v3624_v7  ;;  %4347 = vmatmul.bf16.gmra.mxu3 %v9900_v58  ;;  %4589 = vmatmul.bf16.gmra.mxu0 %v9906_v32  ;;  %v7435_v47 = vld [vmem:[%s10339_s1 + $0x5d0] sm:$0xff] }
 0x2bf   : > { %5055 = vmatpush.bf16.msra.mxu3 %v7435_v47  ;;  %v7443_v47 = vld [vmem:[%s10339_s1 + $0x610] sm:$0xff] }
 0x2c0   : > { %4915 = vmatmul.bf16.gmra.mxu2 %v4831_v6  ;;  %4739 = vmatmul.bf16.gmra.mxu1 %v4655_v40  ;;  %v9918_v46 = vadd.f32 %v3959_v22, %v3770_v56  ;;  %v9934_v22 = vsel %vm7751_vm5, %v6899_v48, %v4443_v59  ;;  %v4252_v6 = vunpack.c.l.b16 %v4128_v43  ;;  %v4494_v40 = vunpack.c.l.b16 %v4440_v16 }
 0x2c1   : > { %v3430_v45 = vpop.f32.mrf.mxu3  ;;  %10605 = vst [vmem:[#allocation24_spill] sm:$0xff] %v9934_v22  ;;  %v10446_v1 = vunpack.c.l.b16 %v9934_v22  ;;  %v4160_v56 = vrot.slane %v4158_v2, 4  ;;  %v4174_v59 = vrot.slane %v4172_v24, 4  ;;  %5193 = vmatpush.bf16.msra.mxu0 %v7443_v47  ;;  %v10606_v24 = vunpack.c.l.b16 %v9521_v5 }
 0x2c2   : > { %v3461_v60 = vadd.f32 %v3430_v45, %v9525_v62  ;;  %v4156_v62 = vsel %vm7731_vm4, %v4151_v21, %v4155_v35  ;;  %v4177_v21 = vrot.slane %v4175_v39, 5  ;;  %v7459_v35 = vld [vmem:[%s10339_s1 + $0x690] sm:$0xff]  ;;  %v4264_v43 = vpack.c.b16 %v4253_v38, %v4252_v6 }
 0x2c3   : > { %v3962_v28 = vpop.f32.mrf.mxu2  ;;  %v3596_v9 = vpop.f32.mrf.mxu0  ;;  %v9941_v61 = vunpack.c.l.b16 %v4156_v62  ;;  %v4506_v16 = vpack.c.b16 %v10446_v1, %v4494_v40  ;;  %v4164_v2 = vor.u32 %v4163_v3, %v4160_v56  ;;  %5503 = vmatpush.bf16.msra.mxu2 %v7459_v35  ;;  %v10607_v39 = vunpack.c.l.b16 %v9549_v57 }
 0x2c4   : > { %v3625_v63 = vadd.f32 %v3594_v8, %v3461_v60  ;;  %v6781_v8 = vld [vmem:[%s7681_s26 + $0x10c] sm:$0x1]  ;;  %v4447_v5 = vrot.slane %v9896_v19, 5  ;;  %v6901_v3 = vrot.slane %v9552_v55, 9 }
 0x2c5   : > { %v3742_v54 = vpop.f32.mrf.mxu1  ;;  %v4167_v51 = vshll.u32 %v6781_v8, 16  ;;  %v4832_v62 = vpack.c.b16 %v9941_v61, %v4253_v38  ;;  %v4656_v6 = vpack.c.b16 %v10607_v39, %v10606_v24  ;;  %v4165_v40 = vrot.slane %v4164_v2, 4 }
 0x2c6   : > { %v3771_v7 = vadd.f32 %v3740_v10, %v3625_v63  ;;  %v7451_v10 = vld [vmem:[%s10339_s1 + $0x650] sm:$0xff]  ;;  %v6900_v38 = vrot.slane %v9549_v57, 9  ;;  %v4451_v35 = vrot.slane %v6781_v8, 5  ;;  %v4200_v39 = vshrl.u32 %v9632_v17, 16 }
 0x2c7   : > { %5357 = vmatpush.bf16.msra.mxu1 %v7451_v10  ;;  %v4169_v56 = vrot.slane %v4167_v51, 5  ;;  %v10608_v10 = vld [vmem:[#allocation4_spill] sm:$0xff] }
 0x2c8   : > { %v9944_v48 = vadd.f32 %v3962_v28, %v3771_v7  ;;  %v9982_v8 = vsel %vm7751_vm5, %v6900_v38, %v4447_v5  ;;  %v6785_v5 = vld [vmem:[%s7681_s26 + $0x11c] sm:$0x1] }
 0x2c9   : > { %v3432_v45 = vpop.f32.mrf.mxu3 }
 0x2ca   : > { %v3462_v60 = vadd.f32 %v3432_v45, %v9542_v41  ;;  %v4178_v41 = vor.u32 %v4177_v21, %v4174_v59  ;;  %v4181_v45 = vshll.u32 %v9956_v50, 16 }
 0x2cb   : > { %v3964_v28 = vpop.f32.mrf.mxu2  ;;  %v3599_v63 = vpop.f32.mrf.mxu0 }
 0x2cc   : > { %v3626_v7 = vadd.f32 %v3596_v9, %v3462_v60  ;;  %v4179_v9 = vrot.slane %v4178_v41, 4  ;;  %v4183_v59 = vrot.slane %v4181_v45, 5  ;;  %v4189_v60 = vshll.u32 %v10608_v10, 16 }
 0x2cd   : > { %v3745_v14 = vpop.f32.mrf.mxu1 }
 0x2ce   : > { %v3772_v22 = vadd.f32 %v3742_v54, %v3626_v7  ;;  %4352 = vmatmul.bf16.gmra.mxu3 %v4264_v43  ;;  %4594 = vmatmul.bf16.gmra.mxu0 %v4506_v16  ;;  %v7434_v54 = vld [vmem:[%s10339_s1 + $0x5c8] sm:$0xff]  ;;  %v4186_v43 = vshrl.u32 %v10608_v10, 16  ;;  %v10609_v16 = vld [vmem:[#allocation2_spill] sm:$0xff]  ;;  %v4184_v24 = vsel %vm7731_vm4, %v4179_v9, %v4183_v59  ;;  %v4191_v41 = vrot.slane %v4189_v60, 5 }
 0x2cf   : > { %5056 = vmatpush.bf16.msra.mxu3 %v7434_v54  ;;  %v7458_v59 = vld [vmem:[%s10339_s1 + $0x688] sm:$0xff]  ;;  %v4195_v60 = vshll.u32 %v6785_v5, 16 }
 0x2d0   : > { %4920 = vmatmul.bf16.gmra.mxu2 %v4832_v62  ;;  %4744 = vmatmul.bf16.gmra.mxu1 %v4656_v6  ;;  %v9970_v47 = vadd.f32 %v3964_v28, %v3772_v22  ;;  %v4170_v22 = vsel %vm7731_vm4, %v4165_v40, %v4169_v56  ;;  %v9986_v28 = vsel %vm7751_vm5, %v6901_v3, %v4451_v35  ;;  %v4203_v6 = vshll.u32 %v9632_v17, 16  ;;  %v7450_v54 = vld [vmem:[%s10339_s1 + $0x648] sm:$0xff] }
 0x2d1   : > { %v3435_v21 = vpop.f32.mrf.mxu3  ;;  %10610 = vst [vmem:[#allocation27_spill] sm:$0xff] %v9986_v28  ;;  %v4188_v7 = vrot.slane %v4186_v43, 4  ;;  %v4255_v40 = vunpack.c.l.b16 %v4170_v22  ;;  %v10449_v56 = vunpack.c.l.b16 %v9982_v8  ;;  %v10448_v38 = vunpack.c.l.b16 %v9986_v28  ;;  %5504 = vmatpush.bf16.msra.mxu2 %v7458_v59  ;;  %5358 = vmatpush.bf16.msra.mxu1 %v7450_v54 }
 0x2d2   : > { %v3463_v57 = vadd.f32 %v3435_v21, %v10609_v16  ;;  %v9995_v3 = vunpack.c.l.b16 %v4184_v24  ;;  %v4202_v35 = vrot.slane %v4200_v39, 4  ;;  %v4205_v9 = vrot.slane %v4203_v6, 5  ;;  %v10009_v16 = vld [vmem:[%s7681_s26 + $0x124] sm:$0x1] }
 0x2d3   : > { %v3967_v2 = vpop.f32.mrf.mxu2  ;;  %v3601_v19 = vpop.f32.mrf.mxu0  ;;  %v4192_v43 = vor.u32 %v4191_v41, %v4188_v7  ;;  %v10019_v24 = vpack.c.b16 %v10448_v38, %v10449_v56  ;;  %v10615_v7 = vunpack.c.l.b16 %v9552_v55  ;;  %v10616_v41 = vunpack.c.l.b16 %v9590_v25 }
 0x2d4   : > { %v3627_v51 = vadd.f32 %v3599_v63, %v3463_v57  ;;  %v10612_v57 = vld [vmem:[#allocation3_spill] sm:$0xff]  ;;  %v4833_v6 = vpack.c.b16 %v9995_v3, %v4255_v40  ;;  %v4209_v1 = vshll.u32 %v10009_v16, 16  ;;  %v4197_v28 = vrot.slane %v4195_v60, 5 }
 0x2d5   : > { %v3747_v62 = vpop.f32.mrf.mxu1  ;;  %10614 = vst [vmem:[#allocation26_spill] sm:$0xff] %v10019_v24  ;;  %v4455_v55 = vrot.slane %v9956_v50, 5  ;;  %v4459_v59 = vrot.slane %v6785_v5, 5  ;;  %v10618_v50 = vld [vmem:[#allocation12_spill] sm:$0xff] }
 0x2d6   : > { %v3773_v45 = vadd.f32 %v3745_v14, %v3627_v51  ;;  %v7442_v14 = vld [vmem:[%s10339_s1 + $0x608] sm:$0xff]  ;;  %v10013_v51 = vpack.c.b16 %v4255_v40, %v9941_v61  ;;  %v6902_v40 = vrot.slane %v9590_v25, 9  ;;  %v10040_v25 = vld [vmem:[%s7681_s26 + $0x130] sm:$0xf] }
 0x2d7   : > { %5194 = vmatpush.bf16.msra.mxu0 %v7442_v14  ;;  %v4211_v14 = vrot.slane %v4209_v1, 5  ;;  %v4217_v1 = vshll.u32 %v9635_v44, 16 }
 0x2d8   : > { %v9997_v63 = vadd.f32 %v3967_v2, %v3773_v45  ;;  %10613 = vst [vmem:[#allocation23_spill] sm:$0xff] %v10013_v51  ;;  %v4657_v45 = vpack.c.b16 %v10616_v41, %v10615_v7  ;;  %v10045_v5 = vsel %vm7751_vm5, %v6902_v40, %v4455_v55  ;;  %v4796_v41 = vshrl.u32 %v10040_v25, 16 }
 0x2d9   : > { %v3437_v21 = vpop.f32.mrf.mxu3  ;;  %10619 = vst [vmem:[#allocation29_spill] sm:$0xff] %v10045_v5 }
 0x2da   : > { %10611 = vst [vmem:[#allocation25_spill] sm:$0xff] %v9997_v63  ;;  %v3464_v2 = vadd.f32 %v3437_v21, %v10612_v57  ;;  %v4206_v57 = vor.u32 %v4205_v9, %v4202_v35  ;;  %v4193_v63 = vrot.slane %v4192_v43, 4 }
 0x2db   : > { %v3969_v22 = vpop.f32.mrf.mxu2  ;;  %v3604_v39 = vpop.f32.mrf.mxu0 }
 0x2dc   : > { %v3628_v21 = vadd.f32 %v3601_v19, %v3464_v2  ;;  %v6903_v19 = vrot.slane %v10608_v10, 9  ;;  %v4207_v9 = vrot.slane %v4206_v57, 4  ;;  %v4198_v43 = vsel %vm7731_vm4, %v4193_v63, %v4197_v28 }
 0x2dd   : > { %v3750_v61 = vpop.f32.mrf.mxu1  ;;  %v4498_v57 = vunpack.c.l.b16 %v10045_v5 }
 0x2de   : > { %v3774_v38 = vadd.f32 %v3747_v62, %v3628_v21  ;;  %4357 = vmatmul.bf16.gmra.mxu3 %v10013_v51  ;;  %4599 = vmatmul.bf16.gmra.mxu0 %v10019_v24  ;;  %v7433_v62 = vld [vmem:[%s10339_s1 + $0x5c0] sm:$0xff]  ;;  %v4212_v7 = vsel %vm7731_vm4, %v4207_v9, %v4211_v14  ;;  %v4257_v21 = vunpack.c.l.b16 %v4198_v43 }
 0x2df   : > { %5057 = vmatpush.bf16.msra.mxu3 %v7433_v62  ;;  %v7457_v9 = vld [vmem:[%s10339_s1 + $0x680] sm:$0xff] }
 0x2e0   : > { %4925 = vmatmul.bf16.gmra.mxu2 %v4833_v6  ;;  %4749 = vmatmul.bf16.gmra.mxu1 %v4657_v45  ;;  %v10032_v35 = vadd.f32 %v3969_v22, %v3774_v38  ;;  %v4214_v38 = vshrl.u32 %v9635_v44, 16  ;;  %v10051_v6 = vsel %vm7751_vm5, %v6903_v19, %v4459_v59  ;;  %v4799_v45 = vshll.u32 %v10040_v25, 16  ;;  %v6789_v59 = vld [vmem:[%s7681_s26 + $0x12c] sm:$0x1]  ;;  %v7441_v14 = vld [vmem:[%s10339_s1 + $0x600] sm:$0xff] }
 0x2e1   : > { %v3440_v54 = vpop.f32.mrf.mxu3  ;;  %10620 = vst [vmem:[#allocation32_spill] sm:$0xff] %v10051_v6  ;;  %v4499_v55 = vunpack.c.l.b16 %v10051_v6  ;;  %v4258_v19 = vunpack.c.l.b16 %v4212_v7  ;;  %5505 = vmatpush.bf16.msra.mxu2 %v7457_v9  ;;  %5195 = vmatpush.bf16.msra.mxu0 %v7441_v14  ;;  %v10625_v14 = vld [vmem:[#allocation5_spill] sm:$0xff] }
 0x2e2   : > { %10617 = vst [vmem:[#allocation8_spill] sm:$0xff] %v10032_v35  ;;  %v3465_v60 = vadd.f32 %v3440_v54, %v10618_v50  ;;  %v4216_v62 = vrot.slane %v4214_v38, 4  ;;  %v4219_v54 = vrot.slane %v4217_v1, 5  ;;  %v4798_v50 = vrot.slane %v4796_v41, 4  ;;  %v10622_v1 = vld [vmem:[#allocation16_spill] sm:$0xff] }
 0x2e3   : > { %v3972_v2 = vpop.f32.mrf.mxu2  ;;  %v3606_v22 = vpop.f32.mrf.mxu0  ;;  %v10072_v38 = vpack.c.b16 %v4257_v21, %v9995_v3  ;;  %v10082_v41 = vpack.c.b16 %v4499_v55, %v4498_v57  ;;  %v10623_v3 = vunpack.c.l.b16 %v10608_v10  ;;  %v10624_v35 = vunpack.c.l.b16 %v9632_v17 }
 0x2e4   : > { %v3629_v28 = vadd.f32 %v3604_v39, %v3465_v60  ;;  %v4801_v60 = vrot.slane %v4799_v45, 5  ;;  %v4220_v45 = vor.u32 %v4219_v54, %v4216_v62  ;;  %v6904_v10 = vrot.slane %v9632_v17, 9 }
 0x2e5   : > { %v3752_v63 = vpop.f32.mrf.mxu1  ;;  %v4658_v51 = vpack.c.b16 %v10624_v35, %v10623_v3  ;;  %v6905_v35 = vrot.slane %v9635_v44, 9 }
 0x2e6   : > { %v3775_v40 = vadd.f32 %v3750_v61, %v3629_v28  ;;  %v7449_v61 = vld [vmem:[%s10339_s1 + $0x640] sm:$0xff]  ;;  %v4802_v24 = vor.u32 %v4801_v60, %v4798_v50  ;;  %v4221_v62 = vrot.slane %v4220_v45, 4 }
 0x2e7   : > { %5359 = vmatpush.bf16.msra.mxu1 %v7449_v61 }
 0x2e8   : > { %v10060_v39 = vadd.f32 %v3972_v2, %v3775_v40  ;;  %v10075_v2 = vld [vmem:[%s7681_s26 + $0x134] sm:$0x1]  ;;  %v4223_v40 = vshll.u32 %v6789_v59, 16  ;;  %v4803_v50 = vrot.slane %v4802_v24, 4 }
 0x2e9   : > { %v3442_v43 = vpop.f32.mrf.mxu3  ;;  %v4805_v5 = vshll.u32 %v10075_v2, 16 }
 0x2ea   : > { %10621 = vst [vmem:[#allocation7_spill] sm:$0xff] %v10060_v39  ;;  %v3466_v28 = vadd.f32 %v3442_v43, %v10622_v1  ;;  %v4834_v39 = vpack.c.b16 %v4258_v19, %v4257_v21  ;;  %v4225_v54 = vrot.slane %v4223_v40, 5  ;;  %v4463_v21 = vrot.slane %v10009_v16, 5 }
 0x2eb   : > { %v3974_v7 = vpop.f32.mrf.mxu2  ;;  %v3609_v56 = vpop.f32.mrf.mxu0  ;;  %v4807_v60 = vrot.slane %v4805_v5, 5 }
 0x2ec   : > { %v3630_v43 = vadd.f32 %v3606_v22, %v3466_v28  ;;  %v4467_v22 = vrot.slane %v6789_v59, 5  ;;  %v10101_v17 = vsel %vm7751_vm5, %v6904_v10, %v4463_v21 }
 0x2ed   : > { %v3755_v1 = vpop.f32.mrf.mxu1  ;;  %v4808_v24 = vsel %vm7731_vm4, %v4803_v50, %v4807_v60  ;;  %v10626_v50 = vunpack.c.l.b16 %v9635_v44 }
 0x2ee   : > { %v3776_v6 = vadd.f32 %v3752_v63, %v3630_v43  ;;  %4362 = vmatmul.bf16.gmra.mxu3 %v10072_v38  ;;  %4604 = vmatmul.bf16.gmra.mxu0 %v10082_v41  ;;  %v10105_v16 = vsel %vm7751_vm5, %v6905_v35, %v4467_v22  ;;  %v10111_v40 = vunpack.c.l.b16 %v4808_v24  ;;  %v4651_v43 = vunpack.c.l.b16 %v10040_v25 }
 0x2ef   : > { %v4501_v45 = vunpack.c.l.b16 %v10105_v16 }
 0x2f0   : > { %4930 = vmatmul.bf16.gmra.mxu2 %v4834_v39  ;;  %4754 = vmatmul.bf16.gmra.mxu1 %v4658_v51  ;;  %v10094_v9 = vadd.f32 %v3974_v7, %v3776_v6  ;;  %v4226_v39 = vsel %vm7731_vm4, %v4221_v62, %v4225_v54  ;;  %v4500_v7 = vunpack.c.l.b16 %v10101_v17  ;;  %v4659_v60 = vpack.c.b16 %v4651_v43, %v10626_v50 }
 0x2f1   : > { %v3445_v63 = vpop.f32.mrf.mxu3  ;;  %v4259_v59 = vunpack.c.l.b16 %v4226_v39 }
 0x2f2   : > { %v3467_v61 = vadd.f32 %v3445_v63, %v10625_v14 }
 0x2f3   : > { %v3977_v28 = vpop.f32.mrf.mxu2  ;;  %v3611_v3 = vpop.f32.mrf.mxu0  ;;  %v10117_v21 = vpack.c.b16 %v4259_v59, %v4258_v19  ;;  %v4835_v22 = vpack.c.b16 %v10111_v40, %v4259_v59 }
 0x2f4   : > { %v3631_v51 = vadd.f32 %v3609_v56, %v3467_v61 }
 0x2f5   : > { %v3757_v6 = vpop.f32.mrf.mxu1 }
 0x2f6   : > { %v3777_v5 = vadd.f32 %v3755_v1, %v3631_v51  ;;  %v10123_v1 = vpack.c.b16 %v4501_v45, %v4500_v7 }
 0x2f8   : > { %v10114_v62 = vadd.f32 %v3977_v28, %v3777_v5 }
 0x2f9   : > { %v3447_v54 = vpop.f32.mrf.mxu3 }
 0x2fa   : > { %v3468_v10 = vadd.f32 %v3447_v54, %v9687_v4 }
 0x2fb   : > { %v3979_v56 = vpop.f32.mrf.mxu2  ;;  %v3614_v35 = vpop.f32.mrf.mxu0 }
 0x2fc   : > { %v3632_v63 = vadd.f32 %v3611_v3, %v3468_v10 }
 0x2fd   : > { %v3760_v14 = vpop.f32.mrf.mxu1 }
 0x2fe   : > { %v3778_v4 = vadd.f32 %v3757_v6, %v3632_v63  ;;  %4367 = vmatmul.bf16.gmra.mxu3 %v10117_v21  ;;  %4609 = vmatmul.bf16.gmra.mxu0 %v10123_v1 }
 0x300   : > { %4935 = vmatmul.bf16.gmra.mxu2 %v4835_v22  ;;  %4759 = vmatmul.bf16.gmra.mxu1 %v4659_v60  ;;  %v10132_v19 = vadd.f32 %v3979_v56, %v3778_v4  ;;  %v10627_v56 = vld [vmem:[#allocation9_spill] sm:$0xff] }
 0x301   : > { %v3450_v61 = vpop.f32.mrf.mxu3 }
 0x302   : > { %v3469_v28 = vadd.f32 %v3450_v61, %v9712_v11 }
 0x303   : > { %v3982_v39 = vpop.f32.mrf.mxu2  ;;  %v3616_v51 = vpop.f32.mrf.mxu0 }
 0x304   : > { %v3633_v44 = vadd.f32 %v3614_v35, %v3469_v28 }
 0x305   : > { %v3762_v24 = vpop.f32.mrf.mxu1 }
 0x306   : > { %v3779_v5 = vadd.f32 %v3760_v14, %v3633_v44 }
 0x308   : > { %v10135_v59 = vadd.f32 %v3982_v39, %v3779_v5 }
 0x309   : > { %v3452_v3 = vpop.f32.mrf.mxu3 }
 0x30a   : > { %v3470_v6 = vadd.f32 %v3452_v3, %v9731_v12 }
 0x30b   : > { %v3984_v54 = vpop.f32.mrf.mxu2  ;;  %v4575_v10 = vpop.f32.mrf.mxu0 }
 0x30c   : > { %v3634_v50 = vadd.f32 %v3616_v51, %v3470_v6 }
 0x30d   : > { %v4725_v22 = vpop.f32.mrf.mxu1 }
 0x30e   : > { %v3780_v60 = vadd.f32 %v3762_v24, %v3634_v50  ;;  %5058 = vmatmul.bf16.vlgmr.msra.gmra.mxu3 %v9691_v30  ;;  %5196 = vmatmul.bf16.vlgmr.msra.gmra.mxu0 %v10627_v56  ;;  %v6772_v50 = vld [vmem:[%s7681_s26 + $0xe8] sm:$0xf] }
 0x310   : > { %5506 = vmatmul.bf16.vlgmr.msra.gmra.mxu2 %v9775_v53  ;;  %5360 = vmatmul.bf16.vlgmr.msra.gmra.mxu1 %v9769_v49  ;;  %v10142_v11 = vadd.f32 %v3984_v54, %v3780_v60  ;;  %v10628_v53 = vunpack.c.l.b16 %v9743_v26  ;;  %v10629_v49 = vunpack.c.l.b16 %v9801_v23  ;;  %v10630_v54 = vld [vmem:[#allocation11_spill] sm:$0xff] }
 0x311   : > { %v4333_v35 = vpop.f32.mrf.mxu3 }
 0x312   : > { %v4373_v63 = vadd.f32 %v4333_v35, %v9753_v0  ;;  %v4987_v24 = vpack.c.b16 %v10629_v49, %v10628_v53  ;;  %v5254_v35 = vshrl.u32 %v6772_v50, 16 }
 0x313   : > { %v4901_v14 = vpop.f32.mrf.mxu2  ;;  %v4577_v12 = vpop.f32.mrf.mxu0 }
 0x314   : > { %v4615_v4 = vadd.f32 %v4575_v10, %v4373_v63  ;;  %v5257_v63 = vshll.u32 %v6772_v50, 16 }
 0x315   : > { %v4727_v61 = vpop.f32.mrf.mxu1 }
 0x316   : > { %v4765_v28 = vadd.f32 %v4725_v22, %v4615_v4  ;;  %v5256_v4 = vrot.slane %v5254_v35, 4 }
 0x318   : > { %v10145_v39 = vadd.f32 %v4901_v14, %v4765_v28 }
 0x319   : > { %v4335_v30 = vpop.f32.mrf.mxu3 }
 0x31a   : > { %v4374_v51 = vadd.f32 %v4335_v30, %v9788_v27 }
 0x31b   : > { %v4903_v44 = vpop.f32.mrf.mxu2  ;;  %v4580_v5 = vpop.f32.mrf.mxu0 }
 0x31c   : > { %v4616_v3 = vadd.f32 %v4577_v12, %v4374_v51  ;;  %v10631_v51 = vunpack.c.l.b16 %v9807_v36  ;;  %v4961_v36 = vrot.slane %v9833_v20, 5 }
 0x31d   : > { %v4730_v0 = vpop.f32.mrf.mxu1 }
 0x31e   : > { %v4766_v6 = vadd.f32 %v4727_v61, %v4616_v3  ;;  %5063 = vmatmul.bf16.gmra.mxu3 %v4987_v24  ;;  %5201 = vmatmul.bf16.gmra.mxu0 %v10630_v54  ;;  %v7196_v54 = vrot.slane %v6772_v50, 9 }
 0x320   : > { %5511 = vmatmul.bf16.gmra.mxu2 %v9840_v13  ;;  %5365 = vmatmul.bf16.gmra.mxu1 %v9830_v18  ;;  %v10155_v10 = vadd.f32 %v4903_v44, %v4766_v6  ;;  %v5259_v13 = vrot.slane %v5257_v63, 5  ;;  %v6773_v18 = vld [vmem:[%s7681_s26 + $0xec] sm:$0x1]  ;;  %v10633_v6 = vld [vmem:[#allocation13_spill] sm:$0xff] }
 0x321   : > { %v4338_v27 = vpop.f32.mrf.mxu3  ;;  %v5263_v3 = vshll.u32 %v6773_v18, 16 }
 0x322   : > { %v4375_v26 = vadd.f32 %v4338_v27, %v9818_v15  ;;  %v10632_v15 = vunpack.c.l.b16 %v9867_v42  ;;  %v5421_v27 = vrot.slane %v6773_v18, 5 }
 0x323   : > { %v4906_v23 = vpop.f32.mrf.mxu2  ;;  %v4582_v22 = vpop.f32.mrf.mxu0 }
 0x324   : > { %v4617_v60 = vadd.f32 %v4580_v5, %v4375_v26  ;;  %v4988_v44 = vpack.c.b16 %v10632_v15, %v10631_v51  ;;  %v5260_v5 = vor.u32 %v5259_v13, %v5256_v4 }
 0x325   : > { %v4732_v56 = vpop.f32.mrf.mxu1 }
 0x326   : > { %v4767_v14 = vadd.f32 %v4730_v0, %v4617_v60  ;;  %v5261_v26 = vrot.slane %v5260_v5, 4  ;;  %v10636_v5 = vunpack.c.l.b16 %v9796_v33 }
 0x328   : > { %v10159_v12 = vadd.f32 %v4906_v23, %v4767_v14  ;;  %v5265_v23 = vrot.slane %v5263_v3, 5  ;;  %v5422_v14 = vsel %vm7751_vm5, %v7196_v54, %v5421_v27 }
 0x329   : > { %v4340_v61 = vpop.f32.mrf.mxu3  ;;  %v5444_v18 = vunpack.c.l.b16 %v5422_v14  ;;  %v10639_v14 = vunpack.c.l.b16 %v9982_v8 }
 0x32a   : > { %v4376_v28 = vadd.f32 %v4340_v61, %v9853_v34  ;;  %v7050_v34 = vrot.slane %v9796_v33, 9  ;;  %v5266_v20 = vsel %vm7731_vm4, %v5261_v26, %v5265_v23  ;;  %v5134_v61 = vunpack.c.l.b16 %v6772_v50 }
 0x32b   : > { %v4908_v30 = vpop.f32.mrf.mxu2  ;;  %v4585_v53 = vpop.f32.mrf.mxu0 }
 0x32c   : > { %v4618_v49 = vadd.f32 %v4582_v22, %v4376_v28  ;;  %v5298_v28 = vunpack.c.l.b16 %v5266_v20  ;;  %v5136_v3 = vpack.c.b16 %v5134_v61, %v10636_v5 }
 0x32d   : > { %v4735_v24 = vpop.f32.mrf.mxu1 }
 0x32e   : > { %v4768_v0 = vadd.f32 %v4732_v56, %v4618_v49  ;;  %5068 = vmatmul.bf16.gmra.mxu3 %v4988_v44  ;;  %5206 = vmatmul.bf16.gmra.mxu0 %v10633_v6  ;;  %v10634_v44 = vld [vmem:[#allocation20_spill] sm:$0xff] }
 0x330   : > { %5516 = vmatmul.bf16.gmra.mxu2 %v9906_v32  ;;  %5370 = vmatmul.bf16.gmra.mxu1 %v9900_v58  ;;  %v10172_v42 = vadd.f32 %v4908_v30, %v4768_v0  ;;  %v4962_v32 = vsel %vm7751_vm5, %v7050_v34, %v4961_v36 }
 0x331   : > { %v4343_v22 = vpop.f32.mrf.mxu3  ;;  %v4984_v13 = vunpack.c.l.b16 %v4962_v32 }
 0x332   : > { %v4377_v60 = vadd.f32 %v4343_v22, %v9884_v31 }
 0x333   : > { %v4911_v56 = vpop.f32.mrf.mxu2  ;;  %v4587_v35 = vpop.f32.mrf.mxu0  ;;  %v5446_v6 = vpack.c.b16 %v5444_v18, %v4984_v13  ;;  %v10640_v18 = vld [vmem:[#allocation10_spill] sm:$0xff] }
 0x334   : > { %v4619_v63 = vadd.f32 %v4585_v53, %v4377_v60  ;;  %v10635_v53 = vunpack.c.l.b16 %v10634_v44 }
 0x335   : > { %v4737_v58 = vpop.f32.mrf.mxu1 }
 0x336   : > { %v4769_v4 = vadd.f32 %v4735_v24, %v4619_v63  ;;  %v4989_v49 = vpack.c.b16 %v4984_v13, %v10635_v53  ;;  %v5300_v24 = vpack.c.b16 %v5298_v28, %v9881_v29  ;;  %v10637_v63 = vld [vmem:[#allocation24_spill] sm:$0xff]  ;;  %v10641_v28 = vld [vmem:[#allocation26_spill] sm:$0xff] }
 0x338   : > { %v10181_v30 = vadd.f32 %v4911_v56, %v4769_v4 }
 0x339   : > { %v4345_v31 = vpop.f32.mrf.mxu3 }
 0x33a   : > { %v4378_v51 = vadd.f32 %v4345_v31, %v9918_v46  ;;  %v10642_v31 = vld [vmem:[#allocation23_spill] sm:$0xff] }
 0x33b   : > { %v4913_v15 = vpop.f32.mrf.mxu2  ;;  %v4590_v0 = vpop.f32.mrf.mxu0 }
 0x33c   : > { %v4620_v34 = vadd.f32 %v4587_v35, %v4378_v51 }
 0x33d   : > { %v4740_v50 = vpop.f32.mrf.mxu1 }
 0x33e   : > { %v4770_v36 = vadd.f32 %v4737_v58, %v4620_v34  ;;  %5073 = vmatmul.bf16.gmra.mxu3 %v4989_v49  ;;  %5211 = vmatmul.bf16.gmra.mxu0 %v5136_v3  ;;  %v10638_v58 = vunpack.c.l.b16 %v10637_v63  ;;  %v6792_v63 = vld [vmem:[%s7681_s26 + $0x138] sm:$0xf] }
 0x340   : > { %5521 = vmatmul.bf16.gmra.mxu2 %v5446_v6  ;;  %5375 = vmatmul.bf16.gmra.mxu1 %v5300_v24  ;;  %v10189_v54 = vadd.f32 %v4913_v15, %v4770_v36  ;;  %v4990_v20 = vpack.c.b16 %v10639_v14, %v10638_v58  ;;  %v10643_v15 = vld [vmem:[#allocation25_spill] sm:$0xff]  ;;  %v10644_v24 = vld [vmem:[#allocation8_spill] sm:$0xff]  ;;  %v10645_v36 = vld [vmem:[#allocation27_spill] sm:$0xff] }
 0x341   : > { %v4348_v46 = vpop.f32.mrf.mxu3  ;;  %v10649_v58 = vld [vmem:[#allocation7_spill] sm:$0xff] }
 0x342   : > { %v4379_v27 = vadd.f32 %v4348_v46, %v9944_v48  ;;  %v10646_v46 = vunpack.c.l.b16 %v10645_v36  ;;  %v4965_v36 = vrot.slane %v10075_v2, 5 }
 0x343   : > { %v4916_v26 = vpop.f32.mrf.mxu2  ;;  %v4592_v23 = vpop.f32.mrf.mxu0 }
 0x344   : > { %v4621_v33 = vadd.f32 %v4590_v0, %v4379_v27 }
 0x345   : > { %v4742_v22 = vpop.f32.mrf.mxu1 }
 0x346   : > { %v4771_v60 = vadd.f32 %v4740_v50, %v4621_v33 }
 0x348   : > { %v10192_v56 = vadd.f32 %v4916_v26, %v4771_v60  ;;  %v4991_v26 = vpack.c.b16 %v4498_v57, %v10646_v46  ;;  %v7197_v46 = vrot.slane %v6792_v63, 9 }
 0x349   : > { %v4350_v29 = vpop.f32.mrf.mxu3 }
 0x34a   : > { %v4380_v35 = vadd.f32 %v4350_v29, %v9970_v47  ;;  %v10648_v29 = vld [vmem:[#allocation17_spill] sm:$0xff] }
 0x34b   : > { %v4918_v32 = vpop.f32.mrf.mxu2  ;;  %v4595_v4 = vpop.f32.mrf.mxu0 }
 0x34c   : > { %v4622_v13 = vadd.f32 %v4592_v23, %v4380_v35 }
 0x34d   : > { %v4745_v61 = vpop.f32.mrf.mxu1 }
 0x34e   : > { %v4772_v48 = vadd.f32 %v4742_v22, %v4622_v13  ;;  %5078 = vmatmul.bf16.gmra.mxu3 %v4990_v20  ;;  %5216 = vmatmul.bf16.gmra.mxu0 %v10640_v18 }
 0x350   : > { %5526 = vmatmul.bf16.gmra.mxu2 %v10641_v28  ;;  %5380 = vmatmul.bf16.gmra.mxu1 %v10642_v31  ;;  %v10202_v51 = vadd.f32 %v4918_v32, %v4772_v48  ;;  %v5271_v48 = vshll.u32 %v6792_v63, 16 }
 0x351   : > { %v4353_v47 = vpop.f32.mrf.mxu3 }
 0x352   : > { %v4381_v44 = vadd.f32 %v4353_v47, %v10643_v15 }
 0x353   : > { %v4921_v53 = vpop.f32.mrf.mxu2  ;;  %v4597_v49 = vpop.f32.mrf.mxu0 }
 0x354   : > { %v4623_v8 = vadd.f32 %v4595_v4, %v4381_v44 }
 0x355   : > { %v4747_v5 = vpop.f32.mrf.mxu1 }
 0x356   : > { %v4773_v3 = vadd.f32 %v4745_v61, %v4623_v8  ;;  %v5268_v61 = vshrl.u32 %v6792_v63, 16 }
 0x358   : > { %v10205_v0 = vadd.f32 %v4921_v53, %v4773_v3  ;;  %v5270_v31 = vrot.slane %v5268_v61, 4 }
 0x359   : > { %v4355_v6 = vpop.f32.mrf.mxu3 }
 0x35a   : > { %v4382_v34 = vadd.f32 %v4355_v6, %v10644_v24 }
 0x35b   : > { %v4923_v50 = vpop.f32.mrf.mxu2  ;;  %v4600_v23 = vpop.f32.mrf.mxu0 }
 0x35c   : > { %v4624_v33 = vadd.f32 %v4597_v49, %v4382_v34  ;;  %v4992_v49 = vpack.c.b16 %v4500_v7, %v4499_v55 }
 0x35d   : > { %v4750_v22 = vpop.f32.mrf.mxu1 }
 0x35e   : > { %v4774_v60 = vadd.f32 %v4747_v5, %v4624_v33  ;;  %5083 = vmatmul.bf16.gmra.mxu3 %v4991_v26  ;;  %5221 = vmatmul.bf16.gmra.mxu0 %v10648_v29 }
 0x360   : > { %5531 = vmatmul.bf16.gmra.mxu2 %v10082_v41  ;;  %5385 = vmatmul.bf16.gmra.mxu1 %v10072_v38  ;;  %v10215_v35 = vadd.f32 %v4923_v50, %v4774_v60  ;;  %v5273_v41 = vrot.slane %v5271_v48, 5  ;;  %v6793_v38 = vld [vmem:[%s7681_s26 + $0x13c] sm:$0x1]  ;;  %v10651_v50 = vld [vmem:[#allocation6_spill] sm:$0xff]  ;;  %s5813_s26 = sshll.u32 %s7556_s15, 1  ;;  %s10667_s15 = smov (!%p238_p7, %s7556_s15), 3 }
 0x361   : > { %v4358_v32 = vpop.f32.mrf.mxu3  ;;  %v5277_v24 = vshll.u32 %v6793_v38, 16  ;;  %v5425_v55 = vrot.slane %v6793_v38, 5  ;;  %p228_p6 = scmp.lt.s32.totalorder %s5813_s26, 7  ;;  %s241_s11 = sadd.s32 %s5817_s10, %s10667_s15 }
 0x362   : > { %v4383_v14 = vadd.f32 %v4358_v32, %v10649_v58  ;;  %v5274_v6 = vor.u32 %v5273_v41, %v5270_v31  ;;  %s5818_s12 = sshll.u32 %s241_s11, 1 }
 0x363   : > { %v4926_v20 = vpop.f32.mrf.mxu2  ;;  %v4602_v57 = vpop.f32.mrf.mxu0  ;;  %v5279_v27 = vrot.slane %v5277_v24, 5  ;;  %v5426_v29 = vsel %vm7751_vm5, %v7197_v46, %v5425_v55  ;;  %s10665_s26 = smov (!%p228_p6, %s5813_s26), 7  ;;  %s243_s22 = scalar_lea.vmem %s10342_s4, %s5818_s12 }
 0x364   : > { %v4625_v4 = vadd.f32 %v4600_v23, %v4383_v14  ;;  %v5275_v7 = vrot.slane %v5274_v6, 4  ;;  %v5135_v14 = vunpack.c.l.b16 %v6792_v63  ;;  %s5814_s27 = sshll.u32 %s10665_s26, 3 }
 0x365   : > { %v4752_v13 = vpop.f32.mrf.mxu1  ;;  %s232_s29 = sadd.s32 %s5815_s28, %s5814_s27 }
 0x366   : > { %v4775_v18 = vadd.f32 %v4750_v22, %v4625_v4  ;;  %v5280_v2 = vsel %vm7731_vm4, %v5275_v7, %v5279_v27  ;;  %v5137_v52 = vpack.c.b16 %v5135_v14, %v4651_v43  ;;  %s5816_s30 = sshll.u32 %s232_s29, 3  ;;  %v10263_v7 = vld [vmem:[%s10340_s2] ss:$0 sm:$0xff] }
 0x367   : > { %s10268_s9 = scalar_lea.vmem %s10341_s3, %s5816_s30 }
 0x368   : > { %v10219_v28 = vadd.f32 %v4926_v20, %v4775_v18  ;;  %v5445_v20 = vunpack.c.l.b16 %v5426_v29 }
 0x369   : > { %v4360_v47 = vpop.f32.mrf.mxu3 }
 0x36a   : > { %v4384_v15 = vadd.f32 %v4360_v47, %v10094_v9  ;;  %v7051_v9 = vrot.slane %v10040_v25, 9 }
 0x36b   : > { %v4928_v44 = vpop.f32.mrf.mxu2  ;;  %v4605_v8 = vpop.f32.mrf.mxu0 }
 0x36c   : > { %v4626_v5 = vadd.f32 %v4602_v57, %v4384_v15  ;;  %v5299_v57 = vunpack.c.l.b16 %v5280_v2 }
 0x36d   : > { %v4755_v3 = vpop.f32.mrf.mxu1 }
 0x36e   : > { %v4776_v34 = vadd.f32 %v4752_v13, %v4626_v5  ;;  %5088 = vmatmul.bf16.gmra.mxu3 %v4992_v49  ;;  %5226 = vmatmul.bf16.gmra.mxu0 %v10651_v50  ;;  %v5301_v31 = vpack.c.b16 %v5299_v57, %v10111_v40 }
 0x370   : > { %5536 = vmatmul.bf16.gmra.mxu2 %v10123_v1  ;;  %5390 = vmatmul.bf16.gmra.mxu1 %v10117_v21  ;;  %v10232_v17 = vadd.f32 %v4928_v44, %v4776_v34  ;;  %v4966_v1 = vsel %vm7751_vm5, %v7051_v9, %v4965_v36 }
 0x371   : > { %v4363_v26 = vpop.f32.mrf.mxu3  ;;  %v4985_v58 = vunpack.c.l.b16 %v4966_v1 }
 0x372   : > { %v4385_v23 = vadd.f32 %v4363_v26, %v10114_v62 }
 0x373   : > { %v4931_v33 = vpop.f32.mrf.mxu2  ;;  %v4607_v22 = vpop.f32.mrf.mxu0  ;;  %v4993_v48 = vpack.c.b16 %v4985_v58, %v4501_v45  ;;  %v5447_v37 = vpack.c.b16 %v5445_v20, %v4985_v58 }
 0x374   : > { %v4627_v60 = vadd.f32 %v4605_v8, %v4385_v23 }
 0x375   : > { %v4757_v21 = vpop.f32.mrf.mxu1 }
 0x376   : > { %v4777_v32 = vadd.f32 %v4755_v3, %v4627_v60 }
 0x378   : > { %v10241_v4 = vadd.f32 %v4931_v33, %v4777_v32 }
 0x379   : > { %v4365_v62 = vpop.f32.mrf.mxu3 }
 0x37a   : > { %v4386_v13 = vadd.f32 %v4365_v62, %v10132_v19 }
 0x37b   : > { %v4933_v61 = vpop.f32.mrf.mxu2  ;;  %v4610_v18 = vpop.f32.mrf.mxu0 }
 0x37c   : > { %v4628_v63 = vadd.f32 %v4607_v22, %v4386_v13 }
 0x37d   : > { %v4760_v41 = vpop.f32.mrf.mxu1 }
 0x37e   : > { %v4778_v47 = vadd.f32 %v4757_v21, %v4628_v63  ;;  %5093 = vmatmul.bf16.gmra.mxu3 %v4993_v48  ;;  %5231 = vmatmul.bf16.gmra.mxu0 %v5137_v52 }
 0x380   : > { %5541 = vmatmul.bf16.gmra.mxu2 %v5447_v37  ;;  %5395 = vmatmul.bf16.gmra.mxu1 %v5301_v31  ;;  %v10249_v19 = vadd.f32 %v4933_v61, %v4778_v47 }
 0x381   : > { %v4368_v38 = vpop.f32.mrf.mxu3 }
 0x382   : > { %v4387_v16 = vadd.f32 %v4368_v38, %v10135_v59 }
 0x383   : > { %v4936_v45 = vpop.f32.mrf.mxu2  ;;  %v4612_v25 = vpop.f32.mrf.mxu0 }
 0x384   : > { %v4629_v43 = vadd.f32 %v4610_v18, %v4387_v16 }
 0x385   : > { %v4762_v15 = vpop.f32.mrf.mxu1 }
 0x386   : > { %v4779_v44 = vadd.f32 %v4760_v41, %v4629_v43 }
 0x388   : > { %v10253_v40 = vadd.f32 %v4936_v45, %v4779_v44 }
 0x389   : > { %v4370_v53 = vpop.f32.mrf.mxu3 }
 0x38a   : > { %v4388_v49 = vadd.f32 %v4370_v53, %v10142_v11 }
 0x38b   : > { %v4938_v8 = vpop.f32.mrf.mxu2  ;;  %v5197_v5 = vpop.f32.mrf.mxu0 }
 0x38c   : > { %v4630_v3 = vadd.f32 %v4612_v25, %v4388_v49 }
 0x38d   : > { %v5361_v6 = vpop.f32.mrf.mxu1 }
 0x38e   : > { %v4780_v24 = vadd.f32 %v4762_v15, %v4630_v3 }
 0x390   : > { %v10256_v59 = vadd.f32 %v4938_v8, %v4780_v24 }
 0x391   : > { %v5059_v34 = vpop.f32.mrf.mxu3 }
 0x392   : > { %v5099_v50 = vadd.f32 %v5059_v34, %v10145_v39 }
 0x393   : > { %v5507_v9 = vpop.f32.mrf.mxu2  ;;  %v5199_v36 = vpop.f32.mrf.mxu0 }
 0x394   : > { %v5237_v46 = vadd.f32 %v5197_v5, %v5099_v50 }
 0x395   : > { %v5363_v55 = vpop.f32.mrf.mxu1 }
 0x396   : > { %v5401_v11 = vadd.f32 %v5361_v6, %v5237_v46 }
 0x398   : > { %v5547_v27 = vadd.f32 %v5507_v9, %v5401_v11 }
 0x399   : > { %v5061_v39 = vpop.f32.mrf.mxu3 }
 0x39a   : > { %v5567_v26 = vadd.f32 %v10263_v7, %v5547_v27  ;;  %v5100_v23 = vadd.f32 %v5061_v39, %v10155_v10 }
 0x39b   : > { %v5509_v33 = vpop.f32.mrf.mxu2  ;;  %v5202_v22 = vpop.f32.mrf.mxu0 }
 0x39c   : > { %5583 = vst [vmem:[%s10268_s9] sm:$0xff] %v5567_v26  ;;  %v5238_v1 = vadd.f32 %v5199_v36, %v5100_v23  ;;  %v5620_v57 = vmul.f32 %v5567_v26, %v5567_v26 }
 0x39d   : > { %v5366_v60 = vpop.f32.mrf.mxu1 }
 0x39e   : > { %v5402_v21 = vadd.f32 %v5363_v55, %v5238_v1 }
 0x3a0   : > { %v5548_v29 = vadd.f32 %v5509_v33, %v5402_v21 }
 0x3a1   : > { %v5064_v2 = vpop.f32.mrf.mxu3 }
 0x3a2   : > { %v5568_v32 = vadd.f32 %v10263_v7, %v5548_v29  ;;  %v5101_v58 = vadd.f32 %v5064_v2, %v10159_v12 }
 0x3a3   : > { %v5512_v14 = vpop.f32.mrf.mxu2  ;;  %v5204_v20 = vpop.f32.mrf.mxu0 }
 0x3a4   : > { %5584 = vst [vmem:[%s10268_s9 + $0x8] sm:$0xff] %v5568_v32  ;;  %v5599_v62 = vadd.f32 %v5568_v32, %v5567_v26  ;;  %v5621_v13 = vmul.f32 %v5568_v32, %v5568_v32  ;;  %v5239_v10 = vadd.f32 %v5202_v22, %v5101_v58 }
 0x3a5   : > { %v5368_v61 = vpop.f32.mrf.mxu1 }
 0x3a6   : > { %v5636_v48 = vadd.f32 %v5621_v13, %v5620_v57  ;;  %v5403_v52 = vadd.f32 %v5366_v60, %v5239_v10 }
 0x3a8   : > { %v5549_v18 = vadd.f32 %v5512_v14, %v5403_v52 }
 0x3a9   : > { %v5066_v37 = vpop.f32.mrf.mxu3 }
 0x3aa   : > { %v5569_v31 = vadd.f32 %v10263_v7, %v5549_v18  ;;  %v5102_v63 = vadd.f32 %v5066_v37, %v10172_v42 }
 0x3ab   : > { %v5514_v41 = vpop.f32.mrf.mxu2  ;;  %v5207_v12 = vpop.f32.mrf.mxu0 }
 0x3ac   : > { %5585 = vst [vmem:[%s10268_s9 + $0x10] sm:$0xff] %v5569_v31  ;;  %v5600_v47 = vadd.f32 %v5599_v62, %v5569_v31  ;;  %v5622_v38 = vmul.f32 %v5569_v31, %v5569_v31  ;;  %v5240_v16 = vadd.f32 %v5204_v20, %v5102_v63 }
 0x3ad   : > { %v5371_v45 = vpop.f32.mrf.mxu1 }
 0x3ae   : > { %v5637_v25 = vadd.f32 %v5636_v48, %v5622_v38  ;;  %v5404_v43 = vadd.f32 %v5368_v61, %v5240_v16 }
 0x3b0   : > { %v5550_v15 = vadd.f32 %v5514_v41, %v5404_v43 }
 0x3b1   : > { %v5069_v44 = vpop.f32.mrf.mxu3 }
 0x3b2   : > { %v5570_v53 = vadd.f32 %v10263_v7, %v5550_v15  ;;  %v5103_v49 = vadd.f32 %v5069_v44, %v10181_v30 }
 0x3b3   : > { %v5517_v8 = vpop.f32.mrf.mxu2  ;;  %v5209_v5 = vpop.f32.mrf.mxu0 }
 0x3b4   : > { %5586 = vst [vmem:[%s10268_s9 + $0x18] sm:$0xff] %v5570_v53  ;;  %v5601_v42 = vadd.f32 %v5600_v47, %v5570_v53  ;;  %v5623_v3 = vmul.f32 %v5570_v53, %v5570_v53  ;;  %v5241_v6 = vadd.f32 %v5207_v12, %v5103_v49 }
 0x3b5   : > { %v5373_v24 = vpop.f32.mrf.mxu1 }
 0x3b6   : > { %v5638_v34 = vadd.f32 %v5637_v25, %v5623_v3  ;;  %v5405_v50 = vadd.f32 %v5371_v45, %v5241_v6 }
 0x3b8   : > { %v5551_v9 = vadd.f32 %v5517_v8, %v5405_v50 }
 0x3b9   : > { %v5071_v36 = vpop.f32.mrf.mxu3 }
 0x3ba   : > { %v5571_v46 = vadd.f32 %v10263_v7, %v5551_v9  ;;  %v5104_v55 = vadd.f32 %v5071_v36, %v10189_v54 }
 0x3bb   : > { %v5519_v11 = vpop.f32.mrf.mxu2  ;;  %v5212_v27 = vpop.f32.mrf.mxu0 }
 0x3bc   : > { %5587 = vst [vmem:[%s10268_s9 + $0x20] sm:$0xff] %v5571_v46  ;;  %v5602_v30 = vadd.f32 %v5601_v42, %v5571_v46  ;;  %v5624_v39 = vmul.f32 %v5571_v46, %v5571_v46  ;;  %v5242_v26 = vadd.f32 %v5209_v5, %v5104_v55 }
 0x3bd   : > { %v5376_v23 = vpop.f32.mrf.mxu1 }
 0x3be   : > { %v5639_v33 = vadd.f32 %v5638_v34, %v5624_v39  ;;  %v5406_v22 = vadd.f32 %v5373_v24, %v5242_v26 }
 0x3c0   : > { %v5552_v1 = vadd.f32 %v5519_v11, %v5406_v22 }
 0x3c1   : > { %v5074_v60 = vpop.f32.mrf.mxu3 }
 0x3c2   : > { %v5572_v21 = vadd.f32 %v10263_v7, %v5552_v1  ;;  %v5105_v29 = vadd.f32 %v5074_v60, %v10192_v56 }
 0x3c3   : > { %v5522_v2 = vpop.f32.mrf.mxu2  ;;  %v5214_v32 = vpop.f32.mrf.mxu0 }
 0x3c4   : > { %5588 = vst [vmem:[%s10268_s9 + $0x28] sm:$0xff] %v5572_v21  ;;  %v5603_v54 = vadd.f32 %v5602_v30, %v5572_v21  ;;  %v5625_v58 = vmul.f32 %v5572_v21, %v5572_v21  ;;  %v5243_v14 = vadd.f32 %v5212_v27, %v5105_v29 }
 0x3c5   : > { %v5378_v20 = vpop.f32.mrf.mxu1 }
 0x3c6   : > { %v5640_v57 = vadd.f32 %v5639_v33, %v5625_v58  ;;  %v5407_v62 = vadd.f32 %v5376_v23, %v5243_v14 }
 0x3c8   : > { %v5553_v13 = vadd.f32 %v5522_v2, %v5407_v62 }
 0x3c9   : > { %v5076_v10 = vpop.f32.mrf.mxu3 }
 0x3ca   : > { %v5573_v61 = vadd.f32 %v10263_v7, %v5553_v13  ;;  %v5106_v48 = vadd.f32 %v5076_v10, %v10202_v51 }
 0x3cb   : > { %v5524_v52 = vpop.f32.mrf.mxu2  ;;  %v5217_v18 = vpop.f32.mrf.mxu0 }
 0x3cc   : > { %5589 = vst [vmem:[%s10268_s9 + $0x30] sm:$0xff] %v5573_v61  ;;  %v5604_v56 = vadd.f32 %v5603_v54, %v5573_v61  ;;  %v5626_v37 = vmul.f32 %v5573_v61, %v5573_v61  ;;  %v5244_v31 = vadd.f32 %v5214_v32, %v5106_v48 }
 0x3cd   : > { %v5381_v63 = vpop.f32.mrf.mxu1 }
 0x3ce   : > { %v5641_v41 = vadd.f32 %v5640_v57, %v5626_v37  ;;  %v5408_v12 = vadd.f32 %v5378_v20, %v5244_v31 }
 0x3d0   : > { %v5554_v47 = vadd.f32 %v5524_v52, %v5408_v12 }
 0x3d1   : > { %v5079_v38 = vpop.f32.mrf.mxu3 }
 0x3d2   : > { %v5574_v16 = vadd.f32 %v10263_v7, %v5554_v47  ;;  %v5107_v45 = vadd.f32 %v5079_v38, %v10205_v0 }
 0x3d3   : > { %v5527_v25 = vpop.f32.mrf.mxu2  ;;  %v5219_v43 = vpop.f32.mrf.mxu0 }
 0x3d4   : > { %5590 = vst [vmem:[%s10268_s9 + $0x38] sm:$0xff] %v5574_v16  ;;  %v5605_v51 = vadd.f32 %v5604_v56, %v5574_v16  ;;  %v5627_v15 = vmul.f32 %v5574_v16, %v5574_v16  ;;  %v5245_v44 = vadd.f32 %v5217_v18, %v5107_v45 }
 0x3d5   : > { %v5383_v53 = vpop.f32.mrf.mxu1 }
 0x3d6   : > { %v5642_v49 = vadd.f32 %v5641_v41, %v5627_v15  ;;  %v5409_v8 = vadd.f32 %v5381_v63, %v5245_v44 }
 0x3d8   : > { %v5555_v5 = vadd.f32 %v5527_v25, %v5409_v8 }
 0x3d9   : > { %v5081_v42 = vpop.f32.mrf.mxu3 }
 0x3da   : > { %v5575_v3 = vadd.f32 %v10263_v7, %v5555_v5  ;;  %v5108_v6 = vadd.f32 %v5081_v42, %v10215_v35 }
 0x3db   : > { %v5529_v24 = vpop.f32.mrf.mxu2  ;;  %v5222_v34 = vpop.f32.mrf.mxu0 }
 0x3dc   : > { %5591 = vst [vmem:[%s10268_s9 + $0x40] sm:$0xff] %v5575_v3  ;;  %v5606_v0 = vadd.f32 %v5605_v51, %v5575_v3  ;;  %v5628_v50 = vmul.f32 %v5575_v3, %v5575_v3  ;;  %v5246_v9 = vadd.f32 %v5219_v43, %v5108_v6 }
 0x3dd   : > { %v5386_v36 = vpop.f32.mrf.mxu1 }
 0x3de   : > { %v5643_v46 = vadd.f32 %v5642_v49, %v5628_v50  ;;  %v5410_v55 = vadd.f32 %v5383_v53, %v5246_v9 }
 0x3e0   : > { %v5556_v11 = vadd.f32 %v5529_v24, %v5410_v55 }
 0x3e1   : > { %v5084_v27 = vpop.f32.mrf.mxu3 }
 0x3e2   : > { %v5576_v30 = vadd.f32 %v10263_v7, %v5556_v11  ;;  %v5109_v39 = vadd.f32 %v5084_v27, %v10219_v28 }
 0x3e3   : > { %v5532_v26 = vpop.f32.mrf.mxu2  ;;  %v5224_v23 = vpop.f32.mrf.mxu0 }
 0x3e4   : > { %5592 = vst [vmem:[%s10268_s9 + $0x48] sm:$0xff] %v5576_v30  ;;  %v5607_v35 = vadd.f32 %v5606_v0, %v5576_v30  ;;  %v5629_v33 = vmul.f32 %v5576_v30, %v5576_v30  ;;  %v5247_v22 = vadd.f32 %v5222_v34, %v5109_v39 }
 0x3e5   : > { %v5388_v1 = vpop.f32.mrf.mxu1 }
 0x3e6   : > { %v5644_v60 = vadd.f32 %v5643_v46, %v5629_v33  ;;  %v5411_v21 = vadd.f32 %v5386_v36, %v5247_v22 }
 0x3e8   : > { %v5557_v29 = vadd.f32 %v5532_v26, %v5411_v21 }
 0x3e9   : > { %v5086_v2 = vpop.f32.mrf.mxu3 }
 0x3ea   : > { %v5577_v32 = vadd.f32 %v10263_v7, %v5557_v29  ;;  %v5110_v54 = vadd.f32 %v5086_v2, %v10232_v17 }
 0x3eb   : > { %v5534_v58 = vpop.f32.mrf.mxu2  ;;  %v5227_v57 = vpop.f32.mrf.mxu0 }
 0x3ec   : > { %5593 = vst [vmem:[%s10268_s9 + $0x50] sm:$0xff] %v5577_v32  ;;  %v5608_v14 = vadd.f32 %v5607_v35, %v5577_v32  ;;  %v5630_v28 = vmul.f32 %v5577_v32, %v5577_v32  ;;  %v5248_v20 = vadd.f32 %v5224_v23, %v5110_v54 }
 0x3ed   : > { %v5391_v10 = vpop.f32.mrf.mxu1 }
 0x3ee   : > { %v5645_v62 = vadd.f32 %v5644_v60, %v5630_v28  ;;  %v5412_v13 = vadd.f32 %v5388_v1, %v5248_v20 }
 0x3f0   : > { %v5558_v61 = vadd.f32 %v5534_v58, %v5412_v13 }
 0x3f1   : > { %v5089_v48 = vpop.f32.mrf.mxu3 }
 0x3f2   : > { %v5578_v52 = vadd.f32 %v10263_v7, %v5558_v61  ;;  %v5111_v18 = vadd.f32 %v5089_v48, %v10241_v4 }
 0x3f3   : > { %v5537_v56 = vpop.f32.mrf.mxu2  ;;  %v5229_v12 = vpop.f32.mrf.mxu0 }
 0x3f4   : > { %5594 = vst [vmem:[%s10268_s9 + $0x58] sm:$0xff] %v5578_v52  ;;  %v5609_v37 = vadd.f32 %v5608_v14, %v5578_v52  ;;  %v5631_v17 = vmul.f32 %v5578_v52, %v5578_v52  ;;  %v5249_v31 = vadd.f32 %v5227_v57, %v5111_v18 }
 0x3f5   : > { %v5393_v38 = vpop.f32.mrf.mxu1 }
 0x3f6   : > { %v5646_v63 = vadd.f32 %v5645_v62, %v5631_v17  ;;  %v5413_v41 = vadd.f32 %v5391_v10, %v5249_v31 }
 0x3f8   : > { %v5559_v47 = vadd.f32 %v5537_v56, %v5413_v41 }
 0x3f9   : > { %v5091_v16 = vpop.f32.mrf.mxu3 }
 0x3fa   : > { %v5579_v45 = vadd.f32 %v10263_v7, %v5559_v47  ;;  %v5112_v25 = vadd.f32 %v5091_v16, %v10249_v19 }
 0x3fb   : > { %v5539_v43 = vpop.f32.mrf.mxu2  ;;  %v5232_v8 = vpop.f32.mrf.mxu0 }
 0x3fc   : > { %5595 = vst [vmem:[%s10268_s9 + $0x60] sm:$0xff] %v5579_v45  ;;  %v5610_v51 = vadd.f32 %v5609_v37, %v5579_v45  ;;  %v5632_v4 = vmul.f32 %v5579_v45, %v5579_v45  ;;  %v5250_v15 = vadd.f32 %v5229_v12, %v5112_v25 }
 0x3fd   : > { %v5396_v6 = vpop.f32.mrf.mxu1 }
 0x3fe   : > { %v5647_v44 = vadd.f32 %v5646_v63, %v5632_v4  ;;  %v5414_v53 = vadd.f32 %v5393_v38, %v5250_v15 }
 0x400   : > { %v5560_v49 = vadd.f32 %v5539_v43, %v5414_v53 }
 0x401   : > { %v5094_v5 = vpop.f32.mrf.mxu3 }
 0x402   : > { %v5580_v42 = vadd.f32 %v10263_v7, %v5560_v49  ;;  %v5113_v3 = vadd.f32 %v5094_v5, %v10253_v40 }
 0x403   : > { %v5542_v0 = vpop.f32.mrf.mxu2  ;;  %v5234_v27 = vpop.f32.mrf.mxu0 }
 0x404   : > { %5596 = vst [vmem:[%s10268_s9 + $0x68] sm:$0xff] %v5580_v42  ;;  %v5611_v24 = vadd.f32 %v5610_v51, %v5580_v42  ;;  %v5633_v34 = vmul.f32 %v5580_v42, %v5580_v42  ;;  %v5251_v19 = vadd.f32 %v5232_v8, %v5113_v3 }
 0x405   : > { %v5398_v26 = vpop.f32.mrf.mxu1 }
 0x406   : > { %v5648_v50 = vadd.f32 %v5647_v44, %v5633_v34  ;;  %v5415_v9 = vadd.f32 %v5396_v6, %v5251_v19 }
 0x408   : > { %v5561_v36 = vadd.f32 %v5542_v0, %v5415_v9 }
 0x409   : > { %v5096_v46 = vpop.f32.mrf.mxu3 }
 0x40a   : > { %v5581_v55 = vadd.f32 %v10263_v7, %v5561_v36  ;;  %v5114_v11 = vadd.f32 %v5096_v46, %v10256_v59 }
 0x40b   : > { %v5544_v33 = vpop.f32.mrf.mxu2 }
 0x40c   : > { %5597 = vst [vmem:[%s10268_s9 + $0x70] sm:$0xff] %v5581_v55  ;;  %v5612_v40 = vadd.f32 %v5611_v24, %v5581_v55  ;;  %v5634_v30 = vmul.f32 %v5581_v55, %v5581_v55  ;;  %v5252_v39 = vadd.f32 %v5234_v27, %v5114_v11 }
 0x40e   : > { %v5649_v23 = vadd.f32 %v5648_v50, %v5634_v30  ;;  %v5416_v35 = vadd.f32 %v5398_v26, %v5252_v39 }
 0x410   : > { %v5562_v22 = vadd.f32 %v5544_v33, %v5416_v35 }
 0x412   : > { %v5582_v1 = vadd.f32 %v10263_v7, %v5562_v22 }
 0x414   : > { %5598 = vst [vmem:[%s10268_s9 + $0x78] sm:$0xff] %v5582_v1  ;;  %v5613_v60 = vadd.f32 %v5612_v40, %v5582_v1  ;;  %v5635_v21 = vmul.f32 %v5582_v1, %v5582_v1 }
 0x416   : > { %v5614_v29 = vrot.slane %v5613_v60, 4  ;;  %v5650_v59 = vadd.f32 %v5649_v23, %v5635_v21 }
 0x418   : > { %v5615_v2 = vadd.f32 %v5614_v29, %v5613_v60  ;;  %v5651_v32 = vrot.slane %v5650_v59, 4 }
 0x41a   : > { %v5616_v54 = vrot.slane %v5615_v2, 2  ;;  %v5652_v58 = vadd.f32 %v5651_v32, %v5650_v59 }
 0x41c   : > { %v5617_v14 = vadd.f32 %v5616_v54, %v5615_v2  ;;  %v5653_v28 = vrot.slane %v5652_v58, 2 }
 0x41e   : > { %v5618_v20 = vrot.slane %v5617_v14, 1  ;;  %v5654_v57 = vadd.f32 %v5653_v28, %v5652_v58 }
 0x420   : > { %v5655_v62 = vrot.slane %v5654_v57, 1  ;;  %v5619_v7 = vadd.f32 %v5618_v20, %v5617_v14 }
 0x422   : > { %v5656_v13 = vadd.f32 %v5655_v62, %v5654_v57 }
 0x424   : > { %v5658_v10 = vsel %vm5657_vm6, %v5619_v7, %v5656_v13 }
 0x425   : > { %5659 = vst [vmem:[%s243_s22] sm:$0x3] %v5658_v10 }
 0x426 PF: > { %s15_s19 = sadd.s32 1, %s7572_s19   ;;  %s10652_s15 = smov %s7564_s17 }
 0x427   : > { %p12_p8 = scmp.ge.s32.totalorder %s15_s19, 10   ;;  %s10653_s16 = smov %s7568_s18 }
 0x428   : > { %s10654_s17 = smov %s10657_s20  ;;  %s10655_s18 = smov %s10661_s21 }
 0x429   :  { %14 = sbr.rel (!%p12_p8) target bundleno = 3 (0x3), region = 103 }

</bundles_post_ra>
